<compile_context>
chip_gen: v7x
topology: tpu7x:2x2x1
jax: 0.10.0
libtpu: 0.0.40
codegen_flags: <defaults>
</compile_context>

<pallas_src>
import functools

import numpy as np
import jax
import jax.numpy as jnp
from jax.experimental import pallas as pl
from jax.experimental.pallas import tpu as pltpu


# ----------------------------------------------------------------------------
# Pallas kernels
# ----------------------------------------------------------------------------
def _bn_relu_matmul_kernel(x_ref, scale_ref, shift_ref, w_ref, o_ref):
    """o = relu(x * scale + shift) @ w   (fused BN+ReLU prologue -> 1x1 conv)."""
    a = jnp.maximum(x_ref[...] * scale_ref[...] + shift_ref[...], 0.0)
    o_ref[...] = jnp.dot(a.astype(w_ref.dtype), w_ref[...],
                         preferred_element_type=jnp.float32)


def _matmul_bn_relu_kernel(x_ref, w_ref, scale_ref, shift_ref, o_ref):
    """o = relu((x @ w) * scale + shift)   (conv -> fused BN+ReLU epilogue)."""
    y = jnp.dot(x_ref[...], w_ref[...], preferred_element_type=jnp.float32)
    o_ref[...] = jnp.maximum(y * scale_ref[...] + shift_ref[...], 0.0)


def _bn_relu_conv3x3_kernel(x_ref, scale_ref, shift_ref, mask_ref, w_ref,
                            o_ref, *, H, W):
    """3x3 stride-1 pad-1 conv of relu(bn(x)), one image per grid step.

    x_ref:    (1, H*W + 2*(W+1), Cin)  raw activation, flattened spatial and
              zero-padded by W+1 rows on both sides (pad reads are masked).
    mask_ref: (9, H*W, 1)  {0,1} validity mask per tap (kills padding and
              row wrap-around contributions).
    w_ref:    (9, Cin, Cout) bf16, tap-major (kh*3+kw).
    o_ref:    (1, H*W, Cout) f32.
    """
    HW = H * W
    P = W + 1
    Cout = o_ref.shape[-1]
    scale = scale_ref[...]
    shift = shift_ref[...]
    acc = jnp.zeros((HW, Cout), jnp.float32)
    for dh in (-1, 0, 1):
        for dw in (-1, 0, 1):
            k = (dh + 1) * 3 + (dw + 1)
            off = P + dh * W + dw
            raw = x_ref[0, pl.ds(off, HW), :]                 # (HW, Cin)
            a = jnp.maximum(raw * scale + shift, 0.0) * mask_ref[k]
            acc = acc + jnp.dot(a.astype(w_ref.dtype), w_ref[k],
                                preferred_element_type=jnp.float32)
    o_ref[0] = acc


def _pool_reduce_kernel(x_ref, o_ref, *, op):
    """Reduce (max / mean) over the leading tap axis of a lane-dense slab."""
    T = x_ref.shape[0]
    acc = x_ref[0]
    for t in range(1, T):
        v = x_ref[t]
        acc = jnp.maximum(acc, v) if op == "max" else acc + v
    if op == "mean":
        acc = acc * (1.0 / T)
    o_ref[...] = acc


def _gap_fc_kernel(x_ref, w_ref, b_ref, o_ref):
    """Fused global-average-pool + Linear head (norm5 pre-folded into w/b)."""
    g = jnp.mean(x_ref[...], axis=1)                          # (N, C)
    o_ref[...] = (jnp.dot(g, w_ref[...], preferred_element_type=jnp.float32)
                  + b_ref[...])


# ----------------------------------------------------------------------------
# Kernel wrappers
# ----------------------------------------------------------------------------
def _choose_tm(M):
    """Largest row tile (<=256, multiple of 8) dividing M with >=2 grid steps
    (keeps both v7x TensorCores busy); otherwise a single full-M block."""
    if M % 8 == 0:
        for tm in (256, 128, 64, 32, 16, 8):
            if M % tm == 0 and M // tm >= 2:
                return tm
    return M


def conv1x1_bn_relu(x, scale, shift, wmat):
    """conv1x1(relu(bn(x))): x NHWC raw f32, wmat (Cin, Cout) bf16."""
    N, H, W, Cin = x.shape
    Cout = wmat.shape[1]
    M = N * H * W
    tm = _choose_tm(M)
    out = pl.pallas_call(
        _bn_relu_matmul_kernel,
        out_shape=jax.ShapeDtypeStruct((M, Cout), jnp.float32),
        grid=(M // tm,),
        in_specs=[pl.BlockSpec((tm, Cin), lambda i: (i, 0)),
                  pl.BlockSpec((1, Cin), lambda i: (0, 0)),
                  pl.BlockSpec((1, Cin), lambda i: (0, 0)),
                  pl.BlockSpec((Cin, Cout), lambda i: (0, 0))],
        out_specs=pl.BlockSpec((tm, Cout), lambda i: (i, 0)),
        compiler_params=pltpu.CompilerParams(
            dimension_semantics=("parallel",)),
    )(x.reshape(M, Cin), scale.reshape(1, Cin), shift.reshape(1, Cin), wmat)
    return out.reshape(N, H, W, Cout)


@functools.lru_cache(maxsize=None)
def _conv3x3_masks(H, W):
    m = np.zeros((9, H * W, 1), np.float32)
    for dh in (-1, 0, 1):
        for dw in (-1, 0, 1):
            k = (dh + 1) * 3 + (dw + 1)
            for h in range(H):
                if not (0 <= h + dh < H):
                    continue
                for w in range(W):
                    if 0 <= w + dw < W:
                        m[k, h * W + w, 0] = 1.0
    return jnp.asarray(m)


def conv3x3_bn_relu(x, scale, shift, wmat):
    """conv3x3_s1_p1(relu(bn(x))): x NHWC raw f32, wmat (9, Cin, Cout) bf16."""
    N, H, W, Cin = x.shape
    Cout = wmat.shape[-1]
    HW, P = H * W, W + 1
    xpad = jnp.pad(x.reshape(N, HW, Cin), ((0, 0), (P, P), (0, 0)))
    mask = _conv3x3_masks(H, W)
    out = pl.pallas_call(
        functools.partial(_bn_relu_conv3x3_kernel, H=H, W=W),
        out_shape=jax.ShapeDtypeStruct((N, HW, Cout), jnp.float32),
        grid=(N,),
        in_specs=[pl.BlockSpec((1, HW + 2 * P, Cin), lambda n: (n, 0, 0)),
                  pl.BlockSpec((1, Cin), lambda n: (0, 0)),
                  pl.BlockSpec((1, Cin), lambda n: (0, 0)),
                  pl.BlockSpec((9, HW, 1), lambda n: (0, 0, 0)),
                  pl.BlockSpec((9, Cin, Cout), lambda n: (0, 0, 0))],
        out_specs=pl.BlockSpec((1, HW, Cout), lambda n: (n, 0, 0)),
        compiler_params=pltpu.CompilerParams(
            dimension_semantics=("parallel",)),
    )(xpad, scale.reshape(1, Cin), shift.reshape(1, Cin), mask, wmat)
    return out.reshape(N, H, W, Cout)


def conv0_bn_relu(x, wmat, scale, shift):
    """Stem 7x7 stride-2 pad-3 conv + fused norm0+relu0 epilogue.

    One-time stem op; im2col patches are built at the JAX level (small at
    these shapes) and consumed by a single fused Pallas matmul+BN+ReLU.
    """
    N, H, W, Cin = x.shape
    KH = KW = 7
    stride, padding = 2, 3
    Cout = wmat.shape[1]
    Ho = (H + 2 * padding - KH) // stride + 1
    Wo = (W + 2 * padding - KW) // stride + 1
    xp = jnp.pad(x, ((0, 0), (padding, padding), (padding, padding), (0, 0)))
    taps = [xp[:, kh:kh + stride * (Ho - 1) + 1:stride,
               kw:kw + stride * (Wo - 1) + 1:stride, :]
            for kh in range(KH) for kw in range(KW)]
    patches = (jnp.stack(taps, axis=3)
               .reshape(N * Ho * Wo, KH * KW * Cin).astype(jnp.bfloat16))
    M, K = patches.shape
    tm = _choose_tm(M)
    out = pl.pallas_call(
        _matmul_bn_relu_kernel,
        out_shape=jax.ShapeDtypeStruct((M, Cout), jnp.float32),
        grid=(M // tm,),
        in_specs=[pl.BlockSpec((tm, K), lambda i: (i, 0)),
                  pl.BlockSpec((K, Cout), lambda i: (0, 0)),
                  pl.BlockSpec((1, Cout), lambda i: (0, 0)),
                  pl.BlockSpec((1, Cout), lambda i: (0, 0))],
        out_specs=pl.BlockSpec((tm, Cout), lambda i: (i, 0)),
        compiler_params=pltpu.CompilerParams(
            dimension_semantics=("parallel",)),
    )(patches, wmat, scale.reshape(1, Cout), shift.reshape(1, Cout))
    return out.reshape(N, Ho, Wo, Cout)


def _pool_reduce(taps, op, out_shape):
    """Elementwise max/mean over the leading tap axis, lane-dense slab."""
    T = taps.shape[0]
    total = int(np.prod(taps.shape[1:]))
    L = next((l for l in (512, 256, 128) if total % l == 0), total)
    flat = taps.reshape(T, total // L, L)
    out = pl.pallas_call(
        functools.partial(_pool_reduce_kernel, op=op),
        out_shape=jax.ShapeDtypeStruct((total // L, L), jnp.float32),
    )(flat)
    return out.reshape(out_shape)


def maxpool_3x3_s2_p1(x):
    N, H, W, C = x.shape
    Ho = (H + 2 - 3) // 2 + 1
    Wo = (W + 2 - 3) // 2 + 1
    xp = jnp.pad(x, ((0, 0), (1, 1), (1, 1), (0, 0)),
                 constant_values=-jnp.inf)
    taps = jnp.stack([xp[:, kh:kh + 2 * (Ho - 1) + 1:2,
                          kw:kw + 2 * (Wo - 1) + 1:2, :]
                      for kh in range(3) for kw in range(3)], axis=0)
    return _pool_reduce(taps, "max", (N, Ho, Wo, C))


def avgpool_2x2_s2(x):
    N, H, W, C = x.shape
    Ho, Wo = H // 2, W // 2
    taps = jnp.stack([x[:, kh::2, kw::2, :]
                      for kh in range(2) for kw in range(2)], axis=0)
    return _pool_reduce(taps, "mean", (N, Ho, Wo, C))


def head_gap_fc(x, w_eff, b_eff):
    """Fused: norm5 (folded into w_eff/b_eff) -> x.mean(3).mean(2) -> Linear."""
    N, H, W, C = x.shape
    return pl.pallas_call(
        _gap_fc_kernel,
        out_shape=jax.ShapeDtypeStruct((N, w_eff.shape[1]), jnp.float32),
    )(x.reshape(N, H * W, C), w_eff, b_eff)


# ----------------------------------------------------------------------------
# DenseNet model (densenet121 topology, scaled-down width/depth)
# ----------------------------------------------------------------------------
CFG = dict(
    growth_rate=8,
    block_config=(2, 2, 2, 2),   # densenet121 uses (6, 12, 24, 16)
    num_init_features=16,        # densenet121 uses 64
    bn_size=4,
    class_number=10,
    dropout=0.5,
)

_KEY = [jax.random.PRNGKey(0)]


def _next_key():
    _KEY[0], sub = jax.random.split(_KEY[0])
    return sub


def _bn_scale_shift(c):
    """Eval-mode BatchNorm2d folded to per-channel (scale, shift), f32."""
    w = 1.0 + 0.1 * jax.random.normal(_next_key(), (c,), jnp.float32)
    b = 0.1 * jax.random.normal(_next_key(), (c,), jnp.float32)
    m = 0.1 * jax.random.normal(_next_key(), (c,), jnp.float32)
    v = jnp.abs(jax.random.normal(_next_key(), (c,), jnp.float32)) + 1.0
    scale = w * jax.lax.rsqrt(v + 1e-5)
    shift = b - m * scale
    return scale, shift


def _conv_w(cout, cin, kh, kw):
    return 0.1 * jax.random.normal(_next_key(), (cout, cin, kh, kw),
                                   jnp.float32)


def build_params(cfg):
    gr, bn_size = cfg["growth_rate"], cfg["bn_size"]
    nf = cfg["num_init_features"]

    params = {}
    # Stem conv0 (7x7 s2 p3); norm0+relu0 fused as the matmul epilogue.
    w0 = _conv_w(nf, 3, 7, 7)
    params["conv0_w"] = (w0.transpose(2, 3, 1, 0)
                         .reshape(7 * 7 * 3, nf).astype(jnp.bfloat16))
    params["norm0"] = _bn_scale_shift(nf)

    num_features = nf
    blocks, transitions = [], []
    for bi, num_layers in enumerate(cfg["block_config"]):
        layers = []
        for li in range(num_layers):
            cin = num_features + li * gr
            s1, b1 = _bn_scale_shift(cin)
            w1 = _conv_w(bn_size * gr, cin, 1, 1)
            s2, b2 = _bn_scale_shift(bn_size * gr)
            w2 = _conv_w(gr, bn_size * gr, 3, 3)
            layers.append(dict(
                s1=s1, b1=b1,
                w1=w1.reshape(bn_size * gr, cin).T.astype(jnp.bfloat16),
                s2=s2, b2=b2,
                w2=(w2.transpose(2, 3, 1, 0)
                    .reshape(9, bn_size * gr, gr).astype(jnp.bfloat16)),
            ))
        blocks.append(layers)
        num_features += num_layers * gr
        if bi != len(cfg["block_config"]) - 1:
            st, bt = _bn_scale_shift(num_features)
            wt = _conv_w(num_features // 2, num_features, 1, 1)
            transitions.append(dict(
                s=st, b=bt,
                w=(wt.reshape(num_features // 2, num_features).T
                   .astype(jnp.bfloat16))))
            num_features //= 2
    params["blocks"] = blocks
    params["transitions"] = transitions

    # Head: backbone = model.features ends at norm5 and this module's forward
    # does x.mean(3).mean(2) with NO extra ReLU, so norm5 (an affine map in
    # eval mode) commutes with the mean and is folded into the FC weights.
    s5, b5 = _bn_scale_shift(num_features)
    fc_w = 0.1 * jax.random.normal(
        _next_key(), (cfg["class_number"], num_features), jnp.float32)
    fc_b = 0.1 * jax.random.normal(
        _next_key(), (cfg["class_number"],), jnp.float32)
    params["head_w"] = (fc_w * s5[None, :]).T                  # (C, classes)
    params["head_b"] = (fc_b + fc_w @ b5).reshape(1, -1)       # (1, classes)
    return params


def densenet_forward(params, x):
    # Backbone (densenet.features), channels-last internally.
    x = jnp.transpose(x, (0, 2, 3, 1))                          # NCHW -> NHWC
    x = conv0_bn_relu(x, params["conv0_w"], *params["norm0"])
    x = maxpool_3x3_s2_p1(x)
    n_blocks = len(params["blocks"])
    for bi, layers in enumerate(params["blocks"]):
        for lp in layers:
            y = conv1x1_bn_relu(x, lp["s1"], lp["b1"], lp["w1"])
            y = conv3x3_bn_relu(y, lp["s2"], lp["b2"], lp["w2"])
            # TODO(synk): at full densenet121 depths write new features into a
            # preallocated block buffer (input_output_aliases) instead of
            # re-concatenating; negligible at 2 layers per block.
            x = jnp.concatenate([x, y], axis=-1)
        if bi < n_blocks - 1:
            tp = params["transitions"][bi]
            x = conv1x1_bn_relu(x, tp["s"], tp["b"], tp["w"])
            x = avgpool_2x2_s2(x)
    # Head: norm5 + x.mean(3).mean(2) + Dropout(eval) + Linear, fused.
    # TODO(synk): train-mode stochastic Dropout not implemented (inference id).
    return head_gap_fc(x, params["head_w"], params["head_b"])


if __name__ == "__main__":
    params = build_params(CFG)
    x = jax.random.normal(jax.random.PRNGKey(0), (2, 3, 32, 32), jnp.float32)
    fwd = jax.jit(densenet_forward)
    out = fwd(params, x)
    jax.block_until_ready(out)
    assert out.shape == (2, CFG["class_number"]), out.shape
    assert bool(jnp.all(jnp.isfinite(out)))
    print("KERNEL_OK")
</pallas_src>

<mosaic_0001>
module attributes {stable_mosaic.version = 11 : i64} {
  func.func @_matmul_bn_relu_kernel(%arg0: i32, %arg1: memref<256x147xbf16, #tpu.memory_space<vmem>>, %arg2: memref<147x16xbf16, #tpu.memory_space<vmem>>, %arg3: memref<1x16xf32, #tpu.memory_space<vmem>>, %arg4: memref<1x16xf32, #tpu.memory_space<vmem>>, %arg5: memref<256x16xf32, #tpu.memory_space<vmem>>) attributes {dimension_semantics = [#tpu.dimension_semantics<parallel>], iteration_bounds = array<i64: 2>, scalar_prefetch = 0 : i64, scratch_operands = 0 : i64, tpu.core_type = #tpu.core_type<tc>, window_params = [{transform_indices = @transform_0, window_bounds = array<i64: 256, 147>}, {pipeline_mode = #tpu.pipeline_mode<synchronous>, transform_indices = @transform_1, window_bounds = array<i64: 147, 16>}, {pipeline_mode = #tpu.pipeline_mode<synchronous>, transform_indices = @transform_2, window_bounds = array<i64: 1, 16>}, {pipeline_mode = #tpu.pipeline_mode<synchronous>, transform_indices = @transform_3, window_bounds = array<i64: 1, 16>}, {transform_indices = @transform_4, window_bounds = array<i64: 256, 16>}]} {
    %c0 = arith.constant 0 : index
    %c0_0 = arith.constant 0 : index
    %0 = vector.load %arg1[%c0, %c0_0] : memref<256x147xbf16, #tpu.memory_space<vmem>>, vector<256x147xbf16>
    %c0_1 = arith.constant 0 : index
    %c0_2 = arith.constant 0 : index
    %1 = vector.load %arg2[%c0_1, %c0_2] : memref<147x16xbf16, #tpu.memory_space<vmem>>, vector<147x16xbf16>
    %cst = arith.constant dense<0.000000e+00> : vector<256x16xf32>
    %2 = tpu.matmul %0, %1, %cst {dimension_numbers = #tpu.dot_dimension_numbers<[1], [0], [0], [1], [0, 0, 1, 1], [], []>} : vector<256x147xbf16>, vector<147x16xbf16>, vector<256x16xf32> -> vector<256x16xf32>
    %c0_3 = arith.constant 0 : index
    %c0_4 = arith.constant 0 : index
    %3 = vector.load %arg3[%c0_3, %c0_4] : memref<1x16xf32, #tpu.memory_space<vmem>>, vector<1x16xf32>
    %4 = vector.broadcast %3 : vector<1x16xf32> to vector<256x16xf32>
    %5 = arith.mulf %2, %4 : vector<256x16xf32>
    %c0_5 = arith.constant 0 : index
    %c0_6 = arith.constant 0 : index
    %6 = vector.load %arg4[%c0_5, %c0_6] : memref<1x16xf32, #tpu.memory_space<vmem>>, vector<1x16xf32>
    %7 = vector.broadcast %6 : vector<1x16xf32> to vector<256x16xf32>
    %8 = arith.addf %5, %7 : vector<256x16xf32>
    %cst_7 = arith.constant 0.000000e+00 : f32
    %9 = vector.broadcast %cst_7 : f32 to vector<256x16xf32>
    %10 = arith.maximumf %8, %9 : vector<256x16xf32>
    %c0_8 = arith.constant 0 : index
    %c0_9 = arith.constant 0 : index
    %11 = vector.load %arg5[%c0_8, %c0_9] : memref<256x16xf32, #tpu.memory_space<vmem>>, vector<256x16xf32>
    tpu.vector_store %arg5[%c0_8, %c0_9], %10 {strides = array<i32>} : memref<256x16xf32, #tpu.memory_space<vmem>>, vector<256x16xf32>,
    return
  }
  func.func @transform_0(%arg0: i32) -> (i32, i32) {
    %c0_i32 = arith.constant 0 : i32
    %c0_i32_0 = arith.constant 0 : i32
    return %arg0, %c0_i32 : i32, i32
  }
  func.func @transform_1(%arg0: i32) -> (i32, i32) {
    %c0_i32 = arith.constant 0 : i32
    %c0_i32_0 = arith.constant 0 : i32
    %c0_i32_1 = arith.constant 0 : i32
    return %c0_i32, %c0_i32_0 : i32, i32
  }
  func.func @transform_2(%arg0: i32) -> (i32, i32) {
    %c0_i32 = arith.constant 0 : i32
    %c0_i32_0 = arith.constant 0 : i32
    %c0_i32_1 = arith.constant 0 : i32
    return %c0_i32, %c0_i32_0 : i32, i32
  }
  func.func @transform_3(%arg0: i32) -> (i32, i32) {
    %c0_i32 = arith.constant 0 : i32
    %c0_i32_0 = arith.constant 0 : i32
    %c0_i32_1 = arith.constant 0 : i32
    return %c0_i32, %c0_i32_0 : i32, i32
  }
  func.func @transform_4(%arg0: i32) -> (i32, i32) {
    %c0_i32 = arith.constant 0 : i32
    %c0_i32_0 = arith.constant 0 : i32
    return %arg0, %c0_i32 : i32, i32
  }
}

module attributes {stable_mosaic.version = 11 : i64} {
  func.func @_pool_reduce_kernel(%arg0: memref<9x4x512xf32, #tpu.memory_space<vmem>>, %arg1: memref<4x512xf32, #tpu.memory_space<vmem>>) attributes {dimension_semantics = [], scalar_prefetch = 0 : i64, scratch_operands = 0 : i64, tpu.core_type = #tpu.core_type<tc>} {
    %c0 = arith.constant 0 : index
    %c0_0 = arith.constant 0 : index
    %c0_1 = arith.constant 0 : index
    %0 = vector.load %arg0[%c0, %c0_0, %c0_1] : memref<9x4x512xf32, #tpu.memory_space<vmem>>, vector<1x4x512xf32>
    %1 = vector.shape_cast %0 : vector<1x4x512xf32> to vector<4x512xf32>
    %c1 = arith.constant 1 : index
    %c0_2 = arith.constant 0 : index
    %c0_3 = arith.constant 0 : index
    %2 = vector.load %arg0[%c1, %c0_2, %c0_3] : memref<9x4x512xf32, #tpu.memory_space<vmem>>, vector<1x4x512xf32>
    %3 = vector.shape_cast %2 : vector<1x4x512xf32> to vector<4x512xf32>
    %4 = arith.maximumf %1, %3 : vector<4x512xf32>
    %c2 = arith.constant 2 : index
    %c0_4 = arith.constant 0 : index
    %c0_5 = arith.constant 0 : index
    %5 = vector.load %arg0[%c2, %c0_4, %c0_5] : memref<9x4x512xf32, #tpu.memory_space<vmem>>, vector<1x4x512xf32>
    %6 = vector.shape_cast %5 : vector<1x4x512xf32> to vector<4x512xf32>
    %7 = arith.maximumf %4, %6 : vector<4x512xf32>
    %c3 = arith.constant 3 : index
    %c0_6 = arith.constant 0 : index
    %c0_7 = arith.constant 0 : index
    %8 = vector.load %arg0[%c3, %c0_6, %c0_7] : memref<9x4x512xf32, #tpu.memory_space<vmem>>, vector<1x4x512xf32>
    %9 = vector.shape_cast %8 : vector<1x4x512xf32> to vector<4x512xf32>
    %10 = arith.maximumf %7, %9 : vector<4x512xf32>
    %c4 = arith.constant 4 : index
    %c0_8 = arith.constant 0 : index
    %c0_9 = arith.constant 0 : index
    %11 = vector.load %arg0[%c4, %c0_8, %c0_9] : memref<9x4x512xf32, #tpu.memory_space<vmem>>, vector<1x4x512xf32>
    %12 = vector.shape_cast %11 : vector<1x4x512xf32> to vector<4x512xf32>
    %13 = arith.maximumf %10, %12 : vector<4x512xf32>
    %c5 = arith.constant 5 : index
    %c0_10 = arith.constant 0 : index
    %c0_11 = arith.constant 0 : index
    %14 = vector.load %arg0[%c5, %c0_10, %c0_11] : memref<9x4x512xf32, #tpu.memory_space<vmem>>, vector<1x4x512xf32>
    %15 = vector.shape_cast %14 : vector<1x4x512xf32> to vector<4x512xf32>
    %16 = arith.maximumf %13, %15 : vector<4x512xf32>
    %c6 = arith.constant 6 : index
    %c0_12 = arith.constant 0 : index
    %c0_13 = arith.constant 0 : index
    %17 = vector.load %arg0[%c6, %c0_12, %c0_13] : memref<9x4x512xf32, #tpu.memory_space<vmem>>, vector<1x4x512xf32>
    %18 = vector.shape_cast %17 : vector<1x4x512xf32> to vector<4x512xf32>
    %19 = arith.maximumf %16, %18 : vector<4x512xf32>
    %c7 = arith.constant 7 : index
    %c0_14 = arith.constant 0 : index
    %c0_15 = arith.constant 0 : index
    %20 = vector.load %arg0[%c7, %c0_14, %c0_15] : memref<9x4x512xf32, #tpu.memory_space<vmem>>, vector<1x4x512xf32>
    %21 = vector.shape_cast %20 : vector<1x4x512xf32> to vector<4x512xf32>
    %22 = arith.maximumf %19, %21 : vector<4x512xf32>
    %c8 = arith.constant 8 : index
    %c0_16 = arith.constant 0 : index
    %c0_17 = arith.constant 0 : index
    %23 = vector.load %arg0[%c8, %c0_16, %c0_17] : memref<9x4x512xf32, #tpu.memory_space<vmem>>, vector<1x4x512xf32>
    %24 = vector.shape_cast %23 : vector<1x4x512xf32> to vector<4x512xf32>
    %25 = arith.maximumf %22, %24 : vector<4x512xf32>
    %c0_18 = arith.constant 0 : index
    %c0_19 = arith.constant 0 : index
    %26 = vector.load %arg1[%c0_18, %c0_19] : memref<4x512xf32, #tpu.memory_space<vmem>>, vector<4x512xf32>
    tpu.vector_store %arg1[%c0_18, %c0_19], %25 {strides = array<i32>} : memref<4x512xf32, #tpu.memory_space<vmem>>, vector<4x512xf32>,
    return
  }
}

module attributes {stable_mosaic.version = 11 : i64} {
  func.func @_bn_relu_matmul_kernel(%arg0: i32, %arg1: memref<64x16xf32, #tpu.memory_space<vmem>>, %arg2: memref<1x16xf32, #tpu.memory_space<vmem>>, %arg3: memref<1x16xf32, #tpu.memory_space<vmem>>, %arg4: memref<16x32xbf16, #tpu.memory_space<vmem>>, %arg5: memref<64x32xf32, #tpu.memory_space<vmem>>) attributes {dimension_semantics = [#tpu.dimension_semantics<parallel>], iteration_bounds = array<i64: 2>, scalar_prefetch = 0 : i64, scratch_operands = 0 : i64, tpu.core_type = #tpu.core_type<tc>, window_params = [{transform_indices = @transform_0, window_bounds = array<i64: 64, 16>}, {pipeline_mode = #tpu.pipeline_mode<synchronous>, transform_indices = @transform_1, window_bounds = array<i64: 1, 16>}, {pipeline_mode = #tpu.pipeline_mode<synchronous>, transform_indices = @transform_2, window_bounds = array<i64: 1, 16>}, {pipeline_mode = #tpu.pipeline_mode<synchronous>, transform_indices = @transform_3, window_bounds = array<i64: 16, 32>}, {transform_indices = @transform_4, window_bounds = array<i64: 64, 32>}]} {
    %c0 = arith.constant 0 : index
    %c0_0 = arith.constant 0 : index
    %0 = vector.load %arg1[%c0, %c0_0] : memref<64x16xf32, #tpu.memory_space<vmem>>, vector<64x16xf32>
    %c0_1 = arith.constant 0 : index
    %c0_2 = arith.constant 0 : index
    %1 = vector.load %arg2[%c0_1, %c0_2] : memref<1x16xf32, #tpu.memory_space<vmem>>, vector<1x16xf32>
    %2 = vector.broadcast %1 : vector<1x16xf32> to vector<64x16xf32>
    %3 = arith.mulf %0, %2 : vector<64x16xf32>
    %c0_3 = arith.constant 0 : index
    %c0_4 = arith.constant 0 : index
    %4 = vector.load %arg3[%c0_3, %c0_4] : memref<1x16xf32, #tpu.memory_space<vmem>>, vector<1x16xf32>
    %5 = vector.broadcast %4 : vector<1x16xf32> to vector<64x16xf32>
    %6 = arith.addf %3, %5 : vector<64x16xf32>
    %cst = arith.constant 0.000000e+00 : f32
    %7 = vector.broadcast %cst : f32 to vector<64x16xf32>
    %8 = arith.maximumf %6, %7 : vector<64x16xf32>
    %9 = arith.truncf %8 : vector<64x16xf32> to vector<64x16xbf16>
    %c0_5 = arith.constant 0 : index
    %c0_6 = arith.constant 0 : index
    %10 = vector.load %arg4[%c0_5, %c0_6] : memref<16x32xbf16, #tpu.memory_space<vmem>>, vector<16x32xbf16>
    %cst_7 = arith.constant dense<0.000000e+00> : vector<64x32xf32>
    %11 = tpu.matmul %9, %10, %cst_7 {dimension_numbers = #tpu.dot_dimension_numbers<[1], [0], [0], [1], [0, 0, 1, 1], [], []>} : vector<64x16xbf16>, vector<16x32xbf16>, vector<64x32xf32> -> vector<64x32xf32>
    %c0_8 = arith.constant 0 : index
    %c0_9 = arith.constant 0 : index
    %12 = vector.load %arg5[%c0_8, %c0_9] : memref<64x32xf32, #tpu.memory_space<vmem>>, vector<64x32xf32>
    tpu.vector_store %arg5[%c0_8, %c0_9], %11 {strides = array<i32>} : memref<64x32xf32, #tpu.memory_space<vmem>>, vector<64x32xf32>,
    return
  }
  func.func @transform_0(%arg0: i32) -> (i32, i32) {
    %c0_i32 = arith.constant 0 : i32
    %c0_i32_0 = arith.constant 0 : i32
    return %arg0, %c0_i32 : i32, i32
  }
  func.func @transform_1(%arg0: i32) -> (i32, i32) {
    %c0_i32 = arith.constant 0 : i32
    %c0_i32_0 = arith.constant 0 : i32
    %c0_i32_1 = arith.constant 0 : i32
    return %c0_i32, %c0_i32_0 : i32, i32
  }
  func.func @transform_2(%arg0: i32) -> (i32, i32) {
    %c0_i32 = arith.constant 0 : i32
    %c0_i32_0 = arith.constant 0 : i32
    %c0_i32_1 = arith.constant 0 : i32
    return %c0_i32, %c0_i32_0 : i32, i32
  }
  func.func @transform_3(%arg0: i32) -> (i32, i32) {
    %c0_i32 = arith.constant 0 : i32
    %c0_i32_0 = arith.constant 0 : i32
    %c0_i32_1 = arith.constant 0 : i32
    return %c0_i32, %c0_i32_0 : i32, i32
  }
  func.func @transform_4(%arg0: i32) -> (i32, i32) {
    %c0_i32 = arith.constant 0 : i32
    %c0_i32_0 = arith.constant 0 : i32
    return %arg0, %c0_i32 : i32, i32
  }
}

module attributes {stable_mosaic.version = 11 : i64} {
  func.func @_bn_relu_conv3x3_kernel(%arg0: i32, %arg1: memref<1x82x32xf32, #tpu.memory_space<vmem>>, %arg2: memref<1x32xf32, #tpu.memory_space<vmem>>, %arg3: memref<1x32xf32, #tpu.memory_space<vmem>>, %arg4: memref<9x64x1xf32, #tpu.memory_space<vmem>>, %arg5: memref<9x32x8xbf16, #tpu.memory_space<vmem>>, %arg6: memref<1x64x8xf32, #tpu.memory_space<vmem>>) attributes {dimension_semantics = [#tpu.dimension_semantics<parallel>], iteration_bounds = array<i64: 2>, scalar_prefetch = 0 : i64, scratch_operands = 0 : i64, tpu.core_type = #tpu.core_type<tc>, window_params = [{transform_indices = @transform_0, window_bounds = array<i64: 1, 82, 32>}, {pipeline_mode = #tpu.pipeline_mode<synchronous>, transform_indices = @transform_1, window_bounds = array<i64: 1, 32>}, {pipeline_mode = #tpu.pipeline_mode<synchronous>, transform_indices = @transform_2, window_bounds = array<i64: 1, 32>}, {pipeline_mode = #tpu.pipeline_mode<synchronous>, transform_indices = @transform_3, window_bounds = array<i64: 9, 64, 1>}, {pipeline_mode = #tpu.pipeline_mode<synchronous>, transform_indices = @transform_4, window_bounds = array<i64: 9, 32, 8>}, {transform_indices = @transform_5, window_bounds = array<i64: 1, 64, 8>}]} {
    %c0 = arith.constant 0 : index
    %c0_0 = arith.constant 0 : index
    %0 = vector.load %arg2[%c0, %c0_0] : memref<1x32xf32, #tpu.memory_space<vmem>>, vector<1x32xf32>
    %c0_1 = arith.constant 0 : index
    %c0_2 = arith.constant 0 : index
    %1 = vector.load %arg3[%c0_1, %c0_2] : memref<1x32xf32, #tpu.memory_space<vmem>>, vector<1x32xf32>
    %cst = arith.constant 0.000000e+00 : f32
    %2 = vector.broadcast %cst : f32 to vector<64x8xf32>
    %c0_3 = arith.constant 0 : index
    %c0_4 = arith.constant 0 : index
    %c0_5 = arith.constant 0 : index
    %3 = vector.load %arg1[%c0_3, %c0_4, %c0_5] : memref<1x82x32xf32, #tpu.memory_space<vmem>>, vector<1x64x32xf32>
    %4 = vector.shape_cast %3 : vector<1x64x32xf32> to vector<64x32xf32>
    %5 = vector.broadcast %0 : vector<1x32xf32> to vector<64x32xf32>
    %6 = arith.mulf %4, %5 : vector<64x32xf32>
    %7 = vector.broadcast %1 : vector<1x32xf32> to vector<64x32xf32>
    %8 = arith.addf %6, %7 : vector<64x32xf32>
    %cst_6 = arith.constant 0.000000e+00 : f32
    %9 = vector.broadcast %cst_6 : f32 to vector<64x32xf32>
    %10 = arith.maximumf %8, %9 : vector<64x32xf32>
    %c0_7 = arith.constant 0 : index
    %c0_8 = arith.constant 0 : index
    %c0_9 = arith.constant 0 : index
    %11 = vector.load %arg4[%c0_7, %c0_8, %c0_9] : memref<9x64x1xf32, #tpu.memory_space<vmem>>, vector<1x64x1xf32>
    %12 = vector.shape_cast %11 : vector<1x64x1xf32> to vector<64x1xf32>
    %13 = vector.broadcast %12 : vector<64x1xf32> to vector<64x32xf32>
    %14 = arith.mulf %10, %13 : vector<64x32xf32>
    %15 = arith.truncf %14 : vector<64x32xf32> to vector<64x32xbf16>
    %c0_10 = arith.constant 0 : index
    %c0_11 = arith.constant 0 : index
    %c0_12 = arith.constant 0 : index
    %16 = vector.load %arg5[%c0_10, %c0_11, %c0_12] : memref<9x32x8xbf16, #tpu.memory_space<vmem>>, vector<1x32x8xbf16>
    %17 = vector.shape_cast %16 : vector<1x32x8xbf16> to vector<32x8xbf16>
    %cst_13 = arith.constant dense<0.000000e+00> : vector<64x8xf32>
    %18 = tpu.matmul %15, %17, %cst_13 {dimension_numbers = #tpu.dot_dimension_numbers<[1], [0], [0], [1], [0, 0, 1, 1], [], []>} : vector<64x32xbf16>, vector<32x8xbf16>, vector<64x8xf32> -> vector<64x8xf32>
    %19 = arith.addf %2, %18 : vector<64x8xf32>
    %c0_14 = arith.constant 0 : index
    %c1 = arith.constant 1 : index
    %c0_15 = arith.constant 0 : index
    %20 = vector.load %arg1[%c0_14, %c1, %c0_15] : memref<1x82x32xf32, #tpu.memory_space<vmem>>, vector<1x64x32xf32>
    %21 = vector.shape_cast %20 : vector<1x64x32xf32> to vector<64x32xf32>
    %22 = vector.broadcast %0 : vector<1x32xf32> to vector<64x32xf32>
    %23 = arith.mulf %21, %22 : vector<64x32xf32>
    %24 = vector.broadcast %1 : vector<1x32xf32> to vector<64x32xf32>
    %25 = arith.addf %23, %24 : vector<64x32xf32>
    %cst_16 = arith.constant 0.000000e+00 : f32
    %26 = vector.broadcast %cst_16 : f32 to vector<64x32xf32>
    %27 = arith.maximumf %25, %26 : vector<64x32xf32>
    %c1_17 = arith.constant 1 : index
    %c0_18 = arith.constant 0 : index
    %c0_19 = arith.constant 0 : index
    %28 = vector.load %arg4[%c1_17, %c0_18, %c0_19] : memref<9x64x1xf32, #tpu.memory_space<vmem>>, vector<1x64x1xf32>
    %29 = vector.shape_cast %28 : vector<1x64x1xf32> to vector<64x1xf32>
    %30 = vector.broadcast %29 : vector<64x1xf32> to vector<64x32xf32>
    %31 = arith.mulf %27, %30 : vector<64x32xf32>
    %32 = arith.truncf %31 : vector<64x32xf32> to vector<64x32xbf16>
    %c1_20 = arith.constant 1 : index
    %c0_21 = arith.constant 0 : index
    %c0_22 = arith.constant 0 : index
    %33 = vector.load %arg5[%c1_20, %c0_21, %c0_22] : memref<9x32x8xbf16, #tpu.memory_space<vmem>>, vector<1x32x8xbf16>
    %34 = vector.shape_cast %33 : vector<1x32x8xbf16> to vector<32x8xbf16>
    %cst_23 = arith.constant dense<0.000000e+00> : vector<64x8xf32>
    %35 = tpu.matmul %32, %34, %cst_23 {dimension_numbers = #tpu.dot_dimension_numbers<[1], [0], [0], [1], [0, 0, 1, 1], [], []>} : vector<64x32xbf16>, vector<32x8xbf16>, vector<64x8xf32> -> vector<64x8xf32>
    %36 = arith.addf %19, %35 : vector<64x8xf32>
    %c0_24 = arith.constant 0 : index
    %c2 = arith.constant 2 : index
    %c0_25 = arith.constant 0 : index
    %37 = vector.load %arg1[%c0_24, %c2, %c0_25] : memref<1x82x32xf32, #tpu.memory_space<vmem>>, vector<1x64x32xf32>
    %38 = vector.shape_cast %37 : vector<1x64x32xf32> to vector<64x32xf32>
    %39 = vector.broadcast %0 : vector<1x32xf32> to vector<64x32xf32>
    %40 = arith.mulf %38, %39 : vector<64x32xf32>
    %41 = vector.broadcast %1 : vector<1x32xf32> to vector<64x32xf32>
    %42 = arith.addf %40, %41 : vector<64x32xf32>
    %cst_26 = arith.constant 0.000000e+00 : f32
    %43 = vector.broadcast %cst_26 : f32 to vector<64x32xf32>
    %44 = arith.maximumf %42, %43 : vector<64x32xf32>
    %c2_27 = arith.constant 2 : index
    %c0_28 = arith.constant 0 : index
    %c0_29 = arith.constant 0 : index
    %45 = vector.load %arg4[%c2_27, %c0_28, %c0_29] : memref<9x64x1xf32, #tpu.memory_space<vmem>>, vector<1x64x1xf32>
    %46 = vector.shape_cast %45 : vector<1x64x1xf32> to vector<64x1xf32>
    %47 = vector.broadcast %46 : vector<64x1xf32> to vector<64x32xf32>
    %48 = arith.mulf %44, %47 : vector<64x32xf32>
    %49 = arith.truncf %48 : vector<64x32xf32> to vector<64x32xbf16>
    %c2_30 = arith.constant 2 : index
    %c0_31 = arith.constant 0 : index
    %c0_32 = arith.constant 0 : index
    %50 = vector.load %arg5[%c2_30, %c0_31, %c0_32] : memref<9x32x8xbf16, #tpu.memory_space<vmem>>, vector<1x32x8xbf16>
    %51 = vector.shape_cast %50 : vector<1x32x8xbf16> to vector<32x8xbf16>
    %cst_33 = arith.constant dense<0.000000e+00> : vector<64x8xf32>
    %52 = tpu.matmul %49, %51, %cst_33 {dimension_numbers = #tpu.dot_dimension_numbers<[1], [0], [0], [1], [0, 0, 1, 1], [], []>} : vector<64x32xbf16>, vector<32x8xbf16>, vector<64x8xf32> -> vector<64x8xf32>
    %53 = arith.addf %36, %52 : vector<64x8xf32>
    %c0_34 = arith.constant 0 : index
    %c8 = arith.constant 8 : index
    %c0_35 = arith.constant 0 : index
    %54 = vector.load %arg1[%c0_34, %c8, %c0_35] : memref<1x82x32xf32, #tpu.memory_space<vmem>>, vector<1x64x32xf32>
    %55 = vector.shape_cast %54 : vector<1x64x32xf32> to vector<64x32xf32>
    %56 = vector.broadcast %0 : vector<1x32xf32> to vector<64x32xf32>
    %57 = arith.mulf %55, %56 : vector<64x32xf32>
    %58 = vector.broadcast %1 : vector<1x32xf32> to vector<64x32xf32>
    %59 = arith.addf %57, %58 : vector<64x32xf32>
    %cst_36 = arith.constant 0.000000e+00 : f32
    %60 = vector.broadcast %cst_36 : f32 to vector<64x32xf32>
    %61 = arith.maximumf %59, %60 : vector<64x32xf32>
    %c3 = arith.constant 3 : index
    %c0_37 = arith.constant 0 : index
    %c0_38 = arith.constant 0 : index
    %62 = vector.load %arg4[%c3, %c0_37, %c0_38] : memref<9x64x1xf32, #tpu.memory_space<vmem>>, vector<1x64x1xf32>
    %63 = vector.shape_cast %62 : vector<1x64x1xf32> to vector<64x1xf32>
    %64 = vector.broadcast %63 : vector<64x1xf32> to vector<64x32xf32>
    %65 = arith.mulf %61, %64 : vector<64x32xf32>
    %66 = arith.truncf %65 : vector<64x32xf32> to vector<64x32xbf16>
    %c3_39 = arith.constant 3 : index
    %c0_40 = arith.constant 0 : index
    %c0_41 = arith.constant 0 : index
    %67 = vector.load %arg5[%c3_39, %c0_40, %c0_41] : memref<9x32x8xbf16, #tpu.memory_space<vmem>>, vector<1x32x8xbf16>
    %68 = vector.shape_cast %67 : vector<1x32x8xbf16> to vector<32x8xbf16>
    %cst_42 = arith.constant dense<0.000000e+00> : vector<64x8xf32>
    %69 = tpu.matmul %66, %68, %cst_42 {dimension_numbers = #tpu.dot_dimension_numbers<[1], [0], [0], [1], [0, 0, 1, 1], [], []>} : vector<64x32xbf16>, vector<32x8xbf16>, vector<64x8xf32> -> vector<64x8xf32>
    %70 = arith.addf %53, %69 : vector<64x8xf32>
    %c0_43 = arith.constant 0 : index
    %c9 = arith.constant 9 : index
    %c0_44 = arith.constant 0 : index
    %71 = vector.load %arg1[%c0_43, %c9, %c0_44] : memref<1x82x32xf32, #tpu.memory_space<vmem>>, vector<1x64x32xf32>
    %72 = vector.shape_cast %71 : vector<1x64x32xf32> to vector<64x32xf32>
    %73 = vector.broadcast %0 : vector<1x32xf32> to vector<64x32xf32>
    %74 = arith.mulf %72, %73 : vector<64x32xf32>
    %75 = vector.broadcast %1 : vector<1x32xf32> to vector<64x32xf32>
    %76 = arith.addf %74, %75 : vector<64x32xf32>
    %cst_45 = arith.constant 0.000000e+00 : f32
    %77 = vector.broadcast %cst_45 : f32 to vector<64x32xf32>
    %78 = arith.maximumf %76, %77 : vector<64x32xf32>
    %c4 = arith.constant 4 : index
    %c0_46 = arith.constant 0 : index
    %c0_47 = arith.constant 0 : index
    %79 = vector.load %arg4[%c4, %c0_46, %c0_47] : memref<9x64x1xf32, #tpu.memory_space<vmem>>, vector<1x64x1xf32>
    %80 = vector.shape_cast %79 : vector<1x64x1xf32> to vector<64x1xf32>
    %81 = vector.broadcast %80 : vector<64x1xf32> to vector<64x32xf32>
    %82 = arith.mulf %78, %81 : vector<64x32xf32>
    %83 = arith.truncf %82 : vector<64x32xf32> to vector<64x32xbf16>
    %c4_48 = arith.constant 4 : index
    %c0_49 = arith.constant 0 : index
    %c0_50 = arith.constant 0 : index
    %84 = vector.load %arg5[%c4_48, %c0_49, %c0_50] : memref<9x32x8xbf16, #tpu.memory_space<vmem>>, vector<1x32x8xbf16>
    %85 = vector.shape_cast %84 : vector<1x32x8xbf16> to vector<32x8xbf16>
    %cst_51 = arith.constant dense<0.000000e+00> : vector<64x8xf32>
    %86 = tpu.matmul %83, %85, %cst_51 {dimension_numbers = #tpu.dot_dimension_numbers<[1], [0], [0], [1], [0, 0, 1, 1], [], []>} : vector<64x32xbf16>, vector<32x8xbf16>, vector<64x8xf32> -> vector<64x8xf32>
    %87 = arith.addf %70, %86 : vector<64x8xf32>
    %c0_52 = arith.constant 0 : index
    %c10 = arith.constant 10 : index
    %c0_53 = arith.constant 0 : index
    %88 = vector.load %arg1[%c0_52, %c10, %c0_53] : memref<1x82x32xf32, #tpu.memory_space<vmem>>, vector<1x64x32xf32>
    %89 = vector.shape_cast %88 : vector<1x64x32xf32> to vector<64x32xf32>
    %90 = vector.broadcast %0 : vector<1x32xf32> to vector<64x32xf32>
    %91 = arith.mulf %89, %90 : vector<64x32xf32>
    %92 = vector.broadcast %1 : vector<1x32xf32> to vector<64x32xf32>
    %93 = arith.addf %91, %92 : vector<64x32xf32>
    %cst_54 = arith.constant 0.000000e+00 : f32
    %94 = vector.broadcast %cst_54 : f32 to vector<64x32xf32>
    %95 = arith.maximumf %93, %94 : vector<64x32xf32>
    %c5 = arith.constant 5 : index
    %c0_55 = arith.constant 0 : index
    %c0_56 = arith.constant 0 : index
    %96 = vector.load %arg4[%c5, %c0_55, %c0_56] : memref<9x64x1xf32, #tpu.memory_space<vmem>>, vector<1x64x1xf32>
    %97 = vector.shape_cast %96 : vector<1x64x1xf32> to vector<64x1xf32>
    %98 = vector.broadcast %97 : vector<64x1xf32> to vector<64x32xf32>
    %99 = arith.mulf %95, %98 : vector<64x32xf32>
    %100 = arith.truncf %99 : vector<64x32xf32> to vector<64x32xbf16>
    %c5_57 = arith.constant 5 : index
    %c0_58 = arith.constant 0 : index
    %c0_59 = arith.constant 0 : index
    %101 = vector.load %arg5[%c5_57, %c0_58, %c0_59] : memref<9x32x8xbf16, #tpu.memory_space<vmem>>, vector<1x32x8xbf16>
    %102 = vector.shape_cast %101 : vector<1x32x8xbf16> to vector<32x8xbf16>
    %cst_60 = arith.constant dense<0.000000e+00> : vector<64x8xf32>
    %103 = tpu.matmul %100, %102, %cst_60 {dimension_numbers = #tpu.dot_dimension_numbers<[1], [0], [0], [1], [0, 0, 1, 1], [], []>} : vector<64x32xbf16>, vector<32x8xbf16>, vector<64x8xf32> -> vector<64x8xf32>
    %104 = arith.addf %87, %103 : vector<64x8xf32>
    %c0_61 = arith.constant 0 : index
    %c16 = arith.constant 16 : index
    %c0_62 = arith.constant 0 : index
    %105 = vector.load %arg1[%c0_61, %c16, %c0_62] : memref<1x82x32xf32, #tpu.memory_space<vmem>>, vector<1x64x32xf32>
    %106 = vector.shape_cast %105 : vector<1x64x32xf32> to vector<64x32xf32>
    %107 = vector.broadcast %0 : vector<1x32xf32> to vector<64x32xf32>
    %108 = arith.mulf %106, %107 : vector<64x32xf32>
    %109 = vector.broadcast %1 : vector<1x32xf32> to vector<64x32xf32>
    %110 = arith.addf %108, %109 : vector<64x32xf32>
    %cst_63 = arith.constant 0.000000e+00 : f32
    %111 = vector.broadcast %cst_63 : f32 to vector<64x32xf32>
    %112 = arith.maximumf %110, %111 : vector<64x32xf32>
    %c6 = arith.constant 6 : index
    %c0_64 = arith.constant 0 : index
    %c0_65 = arith.constant 0 : index
    %113 = vector.load %arg4[%c6, %c0_64, %c0_65] : memref<9x64x1xf32, #tpu.memory_space<vmem>>, vector<1x64x1xf32>
    %114 = vector.shape_cast %113 : vector<1x64x1xf32> to vector<64x1xf32>
    %115 = vector.broadcast %114 : vector<64x1xf32> to vector<64x32xf32>
    %116 = arith.mulf %112, %115 : vector<64x32xf32>
    %117 = arith.truncf %116 : vector<64x32xf32> to vector<64x32xbf16>
    %c6_66 = arith.constant 6 : index
    %c0_67 = arith.constant 0 : index
    %c0_68 = arith.constant 0 : index
    %118 = vector.load %arg5[%c6_66, %c0_67, %c0_68] : memref<9x32x8xbf16, #tpu.memory_space<vmem>>, vector<1x32x8xbf16>
    %119 = vector.shape_cast %118 : vector<1x32x8xbf16> to vector<32x8xbf16>
    %cst_69 = arith.constant dense<0.000000e+00> : vector<64x8xf32>
    %120 = tpu.matmul %117, %119, %cst_69 {dimension_numbers = #tpu.dot_dimension_numbers<[1], [0], [0], [1], [0, 0, 1, 1], [], []>} : vector<64x32xbf16>, vector<32x8xbf16>, vector<64x8xf32> -> vector<64x8xf32>
    %121 = arith.addf %104, %120 : vector<64x8xf32>
    %c0_70 = arith.constant 0 : index
    %c17 = arith.constant 17 : index
    %c0_71 = arith.constant 0 : index
    %122 = vector.load %arg1[%c0_70, %c17, %c0_71] : memref<1x82x32xf32, #tpu.memory_space<vmem>>, vector<1x64x32xf32>
    %123 = vector.shape_cast %122 : vector<1x64x32xf32> to vector<64x32xf32>
    %124 = vector.broadcast %0 : vector<1x32xf32> to vector<64x32xf32>
    %125 = arith.mulf %123, %124 : vector<64x32xf32>
    %126 = vector.broadcast %1 : vector<1x32xf32> to vector<64x32xf32>
    %127 = arith.addf %125, %126 : vector<64x32xf32>
    %cst_72 = arith.constant 0.000000e+00 : f32
    %128 = vector.broadcast %cst_72 : f32 to vector<64x32xf32>
    %129 = arith.maximumf %127, %128 : vector<64x32xf32>
    %c7 = arith.constant 7 : index
    %c0_73 = arith.constant 0 : index
    %c0_74 = arith.constant 0 : index
    %130 = vector.load %arg4[%c7, %c0_73, %c0_74] : memref<9x64x1xf32, #tpu.memory_space<vmem>>, vector<1x64x1xf32>
    %131 = vector.shape_cast %130 : vector<1x64x1xf32> to vector<64x1xf32>
    %132 = vector.broadcast %131 : vector<64x1xf32> to vector<64x32xf32>
    %133 = arith.mulf %129, %132 : vector<64x32xf32>
    %134 = arith.truncf %133 : vector<64x32xf32> to vector<64x32xbf16>
    %c7_75 = arith.constant 7 : index
    %c0_76 = arith.constant 0 : index
    %c0_77 = arith.constant 0 : index
    %135 = vector.load %arg5[%c7_75, %c0_76, %c0_77] : memref<9x32x8xbf16, #tpu.memory_space<vmem>>, vector<1x32x8xbf16>
    %136 = vector.shape_cast %135 : vector<1x32x8xbf16> to vector<32x8xbf16>
    %cst_78 = arith.constant dense<0.000000e+00> : vector<64x8xf32>
    %137 = tpu.matmul %134, %136, %cst_78 {dimension_numbers = #tpu.dot_dimension_numbers<[1], [0], [0], [1], [0, 0, 1, 1], [], []>} : vector<64x32xbf16>, vector<32x8xbf16>, vector<64x8xf32> -> vector<64x8xf32>
    %138 = arith.addf %121, %137 : vector<64x8xf32>
    %c0_79 = arith.constant 0 : index
    %c18 = arith.constant 18 : index
    %c0_80 = arith.constant 0 : index
    %139 = vector.load %arg1[%c0_79, %c18, %c0_80] : memref<1x82x32xf32, #tpu.memory_space<vmem>>, vector<1x64x32xf32>
    %140 = vector.shape_cast %139 : vector<1x64x32xf32> to vector<64x32xf32>
    %141 = vector.broadcast %0 : vector<1x32xf32> to vector<64x32xf32>
    %142 = arith.mulf %140, %141 : vector<64x32xf32>
    %143 = vector.broadcast %1 : vector<1x32xf32> to vector<64x32xf32>
    %144 = arith.addf %142, %143 : vector<64x32xf32>
    %cst_81 = arith.constant 0.000000e+00 : f32
    %145 = vector.broadcast %cst_81 : f32 to vector<64x32xf32>
    %146 = arith.maximumf %144, %145 : vector<64x32xf32>
    %c8_82 = arith.constant 8 : index
    %c0_83 = arith.constant 0 : index
    %c0_84 = arith.constant 0 : index
    %147 = vector.load %arg4[%c8_82, %c0_83, %c0_84] : memref<9x64x1xf32, #tpu.memory_space<vmem>>, vector<1x64x1xf32>
    %148 = vector.shape_cast %147 : vector<1x64x1xf32> to vector<64x1xf32>
    %149 = vector.broadcast %148 : vector<64x1xf32> to vector<64x32xf32>
    %150 = arith.mulf %146, %149 : vector<64x32xf32>
    %151 = arith.truncf %150 : vector<64x32xf32> to vector<64x32xbf16>
    %c8_85 = arith.constant 8 : index
    %c0_86 = arith.constant 0 : index
    %c0_87 = arith.constant 0 : index
    %152 = vector.load %arg5[%c8_85, %c0_86, %c0_87] : memref<9x32x8xbf16, #tpu.memory_space<vmem>>, vector<1x32x8xbf16>
    %153 = vector.shape_cast %152 : vector<1x32x8xbf16> to vector<32x8xbf16>
    %cst_88 = arith.constant dense<0.000000e+00> : vector<64x8xf32>
    %154 = tpu.matmul %151, %153, %cst_88 {dimension_numbers = #tpu.dot_dimension_numbers<[1], [0], [0], [1], [0, 0, 1, 1], [], []>} : vector<64x32xbf16>, vector<32x8xbf16>, vector<64x8xf32> -> vector<64x8xf32>
    %155 = arith.addf %138, %154 : vector<64x8xf32>
    %c0_89 = arith.constant 0 : index
    %c0_90 = arith.constant 0 : index
    %c0_91 = arith.constant 0 : index
    %156 = vector.load %arg6[%c0_89, %c0_90, %c0_91] : memref<1x64x8xf32, #tpu.memory_space<vmem>>, vector<1x64x8xf32>
    %157 = vector.shape_cast %156 : vector<1x64x8xf32> to vector<64x8xf32>
    %158 = vector.shape_cast %155 : vector<64x8xf32> to vector<1x64x8xf32>
    tpu.vector_store %arg6[%c0_89, %c0_90, %c0_91], %158 {strides = array<i32>} : memref<1x64x8xf32, #tpu.memory_space<vmem>>, vector<1x64x8xf32>,
    return
  }
  func.func @transform_0(%arg0: i32) -> (i32, i32, i32) {
    %c0_i32 = arith.constant 0 : i32
    %c0_i32_0 = arith.constant 0 : i32
    %c0_i32_1 = arith.constant 0 : i32
    return %arg0, %c0_i32, %c0_i32_0 : i32, i32, i32
  }
  func.func @transform_1(%arg0: i32) -> (i32, i32) {
    %c0_i32 = arith.constant 0 : i32
    %c0_i32_0 = arith.constant 0 : i32
    %c0_i32_1 = arith.constant 0 : i32
    return %c0_i32, %c0_i32_0 : i32, i32
  }
  func.func @transform_2(%arg0: i32) -> (i32, i32) {
    %c0_i32 = arith.constant 0 : i32
    %c0_i32_0 = arith.constant 0 : i32
    %c0_i32_1 = arith.constant 0 : i32
    return %c0_i32, %c0_i32_0 : i32, i32
  }
  func.func @transform_3(%arg0: i32) -> (i32, i32, i32) {
    %c0_i32 = arith.constant 0 : i32
    %c0_i32_0 = arith.constant 0 : i32
    %c0_i32_1 = arith.constant 0 : i32
    %c0_i32_2 = arith.constant 0 : i32
    return %c0_i32, %c0_i32_0, %c0_i32_1 : i32, i32, i32
  }
  func.func @transform_4(%arg0: i32) -> (i32, i32, i32) {
    %c0_i32 = arith.constant 0 : i32
    %c0_i32_0 = arith.constant 0 : i32
    %c0_i32_1 = arith.constant 0 : i32
    %c0_i32_2 = arith.constant 0 : i32
    return %c0_i32, %c0_i32_0, %c0_i32_1 : i32, i32, i32
  }
  func.func @transform_5(%arg0: i32) -> (i32, i32, i32) {
    %c0_i32 = arith.constant 0 : i32
    %c0_i32_0 = arith.constant 0 : i32
    %c0_i32_1 = arith.constant 0 : i32
    return %arg0, %c0_i32, %c0_i32_0 : i32, i32, i32
  }
}

module attributes {stable_mosaic.version = 11 : i64} {
  func.func @_bn_relu_matmul_kernel(%arg0: i32, %arg1: memref<64x24xf32, #tpu.memory_space<vmem>>, %arg2: memref<1x24xf32, #tpu.memory_space<vmem>>, %arg3: memref<1x24xf32, #tpu.memory_space<vmem>>, %arg4: memref<24x32xbf16, #tpu.memory_space<vmem>>, %arg5: memref<64x32xf32, #tpu.memory_space<vmem>>) attributes {dimension_semantics = [#tpu.dimension_semantics<parallel>], iteration_bounds = array<i64: 2>, scalar_prefetch = 0 : i64, scratch_operands = 0 : i64, tpu.core_type = #tpu.core_type<tc>, window_params = [{transform_indices = @transform_0, window_bounds = array<i64: 64, 24>}, {pipeline_mode = #tpu.pipeline_mode<synchronous>, transform_indices = @transform_1, window_bounds = array<i64: 1, 24>}, {pipeline_mode = #tpu.pipeline_mode<synchronous>, transform_indices = @transform_2, window_bounds = array<i64: 1, 24>}, {pipeline_mode = #tpu.pipeline_mode<synchronous>, transform_indices = @transform_3, window_bounds = array<i64: 24, 32>}, {transform_indices = @transform_4, window_bounds = array<i64: 64, 32>}]} {
    %c0 = arith.constant 0 : index
    %c0_0 = arith.constant 0 : index
    %0 = vector.load %arg1[%c0, %c0_0] : memref<64x24xf32, #tpu.memory_space<vmem>>, vector<64x24xf32>
    %c0_1 = arith.constant 0 : index
    %c0_2 = arith.constant 0 : index
    %1 = vector.load %arg2[%c0_1, %c0_2] : memref<1x24xf32, #tpu.memory_space<vmem>>, vector<1x24xf32>
    %2 = vector.broadcast %1 : vector<1x24xf32> to vector<64x24xf32>
    %3 = arith.mulf %0, %2 : vector<64x24xf32>
    %c0_3 = arith.constant 0 : index
    %c0_4 = arith.constant 0 : index
    %4 = vector.load %arg3[%c0_3, %c0_4] : memref<1x24xf32, #tpu.memory_space<vmem>>, vector<1x24xf32>
    %5 = vector.broadcast %4 : vector<1x24xf32> to vector<64x24xf32>
    %6 = arith.addf %3, %5 : vector<64x24xf32>
    %cst = arith.constant 0.000000e+00 : f32
    %7 = vector.broadcast %cst : f32 to vector<64x24xf32>
    %8 = arith.maximumf %6, %7 : vector<64x24xf32>
    %9 = arith.truncf %8 : vector<64x24xf32> to vector<64x24xbf16>
    %c0_5 = arith.constant 0 : index
    %c0_6 = arith.constant 0 : index
    %10 = vector.load %arg4[%c0_5, %c0_6] : memref<24x32xbf16, #tpu.memory_space<vmem>>, vector<24x32xbf16>
    %cst_7 = arith.constant dense<0.000000e+00> : vector<64x32xf32>
    %11 = tpu.matmul %9, %10, %cst_7 {dimension_numbers = #tpu.dot_dimension_numbers<[1], [0], [0], [1], [0, 0, 1, 1], [], []>} : vector<64x24xbf16>, vector<24x32xbf16>, vector<64x32xf32> -> vector<64x32xf32>
    %c0_8 = arith.constant 0 : index
    %c0_9 = arith.constant 0 : index
    %12 = vector.load %arg5[%c0_8, %c0_9] : memref<64x32xf32, #tpu.memory_space<vmem>>, vector<64x32xf32>
    tpu.vector_store %arg5[%c0_8, %c0_9], %11 {strides = array<i32>} : memref<64x32xf32, #tpu.memory_space<vmem>>, vector<64x32xf32>,
    return
  }
  func.func @transform_0(%arg0: i32) -> (i32, i32) {
    %c0_i32 = arith.constant 0 : i32
    %c0_i32_0 = arith.constant 0 : i32
    return %arg0, %c0_i32 : i32, i32
  }
  func.func @transform_1(%arg0: i32) -> (i32, i32) {
    %c0_i32 = arith.constant 0 : i32
    %c0_i32_0 = arith.constant 0 : i32
    %c0_i32_1 = arith.constant 0 : i32
    return %c0_i32, %c0_i32_0 : i32, i32
  }
  func.func @transform_2(%arg0: i32) -> (i32, i32) {
    %c0_i32 = arith.constant 0 : i32
    %c0_i32_0 = arith.constant 0 : i32
    %c0_i32_1 = arith.constant 0 : i32
    return %c0_i32, %c0_i32_0 : i32, i32
  }
  func.func @transform_3(%arg0: i32) -> (i32, i32) {
    %c0_i32 = arith.constant 0 : i32
    %c0_i32_0 = arith.constant 0 : i32
    %c0_i32_1 = arith.constant 0 : i32
    return %c0_i32, %c0_i32_0 : i32, i32
  }
  func.func @transform_4(%arg0: i32) -> (i32, i32) {
    %c0_i32 = arith.constant 0 : i32
    %c0_i32_0 = arith.constant 0 : i32
    return %arg0, %c0_i32 : i32, i32
  }
}

module attributes {stable_mosaic.version = 11 : i64} {
  func.func @_bn_relu_matmul_kernel(%arg0: i32, %arg1: memref<64x32xf32, #tpu.memory_space<vmem>>, %arg2: memref<1x32xf32, #tpu.memory_space<vmem>>, %arg3: memref<1x32xf32, #tpu.memory_space<vmem>>, %arg4: memref<32x16xbf16, #tpu.memory_space<vmem>>, %arg5: memref<64x16xf32, #tpu.memory_space<vmem>>) attributes {dimension_semantics = [#tpu.dimension_semantics<parallel>], iteration_bounds = array<i64: 2>, scalar_prefetch = 0 : i64, scratch_operands = 0 : i64, tpu.core_type = #tpu.core_type<tc>, window_params = [{transform_indices = @transform_0, window_bounds = array<i64: 64, 32>}, {pipeline_mode = #tpu.pipeline_mode<synchronous>, transform_indices = @transform_1, window_bounds = array<i64: 1, 32>}, {pipeline_mode = #tpu.pipeline_mode<synchronous>, transform_indices = @transform_2, window_bounds = array<i64: 1, 32>}, {pipeline_mode = #tpu.pipeline_mode<synchronous>, transform_indices = @transform_3, window_bounds = array<i64: 32, 16>}, {transform_indices = @transform_4, window_bounds = array<i64: 64, 16>}]} {
    %c0 = arith.constant 0 : index
    %c0_0 = arith.constant 0 : index
    %0 = vector.load %arg1[%c0, %c0_0] : memref<64x32xf32, #tpu.memory_space<vmem>>, vector<64x32xf32>
    %c0_1 = arith.constant 0 : index
    %c0_2 = arith.constant 0 : index
    %1 = vector.load %arg2[%c0_1, %c0_2] : memref<1x32xf32, #tpu.memory_space<vmem>>, vector<1x32xf32>
    %2 = vector.broadcast %1 : vector<1x32xf32> to vector<64x32xf32>
    %3 = arith.mulf %0, %2 : vector<64x32xf32>
    %c0_3 = arith.constant 0 : index
    %c0_4 = arith.constant 0 : index
    %4 = vector.load %arg3[%c0_3, %c0_4] : memref<1x32xf32, #tpu.memory_space<vmem>>, vector<1x32xf32>
    %5 = vector.broadcast %4 : vector<1x32xf32> to vector<64x32xf32>
    %6 = arith.addf %3, %5 : vector<64x32xf32>
    %cst = arith.constant 0.000000e+00 : f32
    %7 = vector.broadcast %cst : f32 to vector<64x32xf32>
    %8 = arith.maximumf %6, %7 : vector<64x32xf32>
    %9 = arith.truncf %8 : vector<64x32xf32> to vector<64x32xbf16>
    %c0_5 = arith.constant 0 : index
    %c0_6 = arith.constant 0 : index
    %10 = vector.load %arg4[%c0_5, %c0_6] : memref<32x16xbf16, #tpu.memory_space<vmem>>, vector<32x16xbf16>
    %cst_7 = arith.constant dense<0.000000e+00> : vector<64x16xf32>
    %11 = tpu.matmul %9, %10, %cst_7 {dimension_numbers = #tpu.dot_dimension_numbers<[1], [0], [0], [1], [0, 0, 1, 1], [], []>} : vector<64x32xbf16>, vector<32x16xbf16>, vector<64x16xf32> -> vector<64x16xf32>
    %c0_8 = arith.constant 0 : index
    %c0_9 = arith.constant 0 : index
    %12 = vector.load %arg5[%c0_8, %c0_9] : memref<64x16xf32, #tpu.memory_space<vmem>>, vector<64x16xf32>
    tpu.vector_store %arg5[%c0_8, %c0_9], %11 {strides = array<i32>} : memref<64x16xf32, #tpu.memory_space<vmem>>, vector<64x16xf32>,
    return
  }
  func.func @transform_0(%arg0: i32) -> (i32, i32) {
    %c0_i32 = arith.constant 0 : i32
    %c0_i32_0 = arith.constant 0 : i32
    return %arg0, %c0_i32 : i32, i32
  }
  func.func @transform_1(%arg0: i32) -> (i32, i32) {
    %c0_i32 = arith.constant 0 : i32
    %c0_i32_0 = arith.constant 0 : i32
    %c0_i32_1 = arith.constant 0 : i32
    return %c0_i32, %c0_i32_0 : i32, i32
  }
  func.func @transform_2(%arg0: i32) -> (i32, i32) {
    %c0_i32 = arith.constant 0 : i32
    %c0_i32_0 = arith.constant 0 : i32
    %c0_i32_1 = arith.constant 0 : i32
    return %c0_i32, %c0_i32_0 : i32, i32
  }
  func.func @transform_3(%arg0: i32) -> (i32, i32) {
    %c0_i32 = arith.constant 0 : i32
    %c0_i32_0 = arith.constant 0 : i32
    %c0_i32_1 = arith.constant 0 : i32
    return %c0_i32, %c0_i32_0 : i32, i32
  }
  func.func @transform_4(%arg0: i32) -> (i32, i32) {
    %c0_i32 = arith.constant 0 : i32
    %c0_i32_0 = arith.constant 0 : i32
    return %arg0, %c0_i32 : i32, i32
  }
}

module attributes {stable_mosaic.version = 11 : i64} {
  func.func @_pool_reduce_kernel(%arg0: memref<4x1x512xf32, #tpu.memory_space<vmem>>, %arg1: memref<1x512xf32, #tpu.memory_space<vmem>>) attributes {dimension_semantics = [], scalar_prefetch = 0 : i64, scratch_operands = 0 : i64, tpu.core_type = #tpu.core_type<tc>} {
    %c0 = arith.constant 0 : index
    %c0_0 = arith.constant 0 : index
    %c0_1 = arith.constant 0 : index
    %0 = vector.load %arg0[%c0, %c0_0, %c0_1] : memref<4x1x512xf32, #tpu.memory_space<vmem>>, vector<1x1x512xf32>
    %1 = vector.shape_cast %0 : vector<1x1x512xf32> to vector<1x512xf32>
    %c1 = arith.constant 1 : index
    %c0_2 = arith.constant 0 : index
    %c0_3 = arith.constant 0 : index
    %2 = vector.load %arg0[%c1, %c0_2, %c0_3] : memref<4x1x512xf32, #tpu.memory_space<vmem>>, vector<1x1x512xf32>
    %3 = vector.shape_cast %2 : vector<1x1x512xf32> to vector<1x512xf32>
    %4 = arith.addf %1, %3 : vector<1x512xf32>
    %c2 = arith.constant 2 : index
    %c0_4 = arith.constant 0 : index
    %c0_5 = arith.constant 0 : index
    %5 = vector.load %arg0[%c2, %c0_4, %c0_5] : memref<4x1x512xf32, #tpu.memory_space<vmem>>, vector<1x1x512xf32>
    %6 = vector.shape_cast %5 : vector<1x1x512xf32> to vector<1x512xf32>
    %7 = arith.addf %4, %6 : vector<1x512xf32>
    %c3 = arith.constant 3 : index
    %c0_6 = arith.constant 0 : index
    %c0_7 = arith.constant 0 : index
    %8 = vector.load %arg0[%c3, %c0_6, %c0_7] : memref<4x1x512xf32, #tpu.memory_space<vmem>>, vector<1x1x512xf32>
    %9 = vector.shape_cast %8 : vector<1x1x512xf32> to vector<1x512xf32>
    %10 = arith.addf %7, %9 : vector<1x512xf32>
    %cst = arith.constant 2.500000e-01 : f32
    %11 = vector.broadcast %cst : f32 to vector<1x512xf32>
    %12 = arith.mulf %10, %11 : vector<1x512xf32>
    %c0_8 = arith.constant 0 : index
    %c0_9 = arith.constant 0 : index
    %13 = vector.load %arg1[%c0_8, %c0_9] : memref<1x512xf32, #tpu.memory_space<vmem>>, vector<1x512xf32>
    tpu.vector_store %arg1[%c0_8, %c0_9], %12 {strides = array<i32>} : memref<1x512xf32, #tpu.memory_space<vmem>>, vector<1x512xf32>,
    return
  }
}

module attributes {stable_mosaic.version = 11 : i64} {
  func.func @_bn_relu_matmul_kernel(%arg0: i32, %arg1: memref<16x16xf32, #tpu.memory_space<vmem>>, %arg2: memref<1x16xf32, #tpu.memory_space<vmem>>, %arg3: memref<1x16xf32, #tpu.memory_space<vmem>>, %arg4: memref<16x32xbf16, #tpu.memory_space<vmem>>, %arg5: memref<16x32xf32, #tpu.memory_space<vmem>>) attributes {dimension_semantics = [#tpu.dimension_semantics<parallel>], iteration_bounds = array<i64: 2>, scalar_prefetch = 0 : i64, scratch_operands = 0 : i64, tpu.core_type = #tpu.core_type<tc>, window_params = [{transform_indices = @transform_0, window_bounds = array<i64: 16, 16>}, {pipeline_mode = #tpu.pipeline_mode<synchronous>, transform_indices = @transform_1, window_bounds = array<i64: 1, 16>}, {pipeline_mode = #tpu.pipeline_mode<synchronous>, transform_indices = @transform_2, window_bounds = array<i64: 1, 16>}, {pipeline_mode = #tpu.pipeline_mode<synchronous>, transform_indices = @transform_3, window_bounds = array<i64: 16, 32>}, {transform_indices = @transform_4, window_bounds = array<i64: 16, 32>}]} {
    %c0 = arith.constant 0 : index
    %c0_0 = arith.constant 0 : index
    %0 = vector.load %arg1[%c0, %c0_0] : memref<16x16xf32, #tpu.memory_space<vmem>>, vector<16x16xf32>
    %c0_1 = arith.constant 0 : index
    %c0_2 = arith.constant 0 : index
    %1 = vector.load %arg2[%c0_1, %c0_2] : memref<1x16xf32, #tpu.memory_space<vmem>>, vector<1x16xf32>
    %2 = vector.broadcast %1 : vector<1x16xf32> to vector<16x16xf32>
    %3 = arith.mulf %0, %2 : vector<16x16xf32>
    %c0_3 = arith.constant 0 : index
    %c0_4 = arith.constant 0 : index
    %4 = vector.load %arg3[%c0_3, %c0_4] : memref<1x16xf32, #tpu.memory_space<vmem>>, vector<1x16xf32>
    %5 = vector.broadcast %4 : vector<1x16xf32> to vector<16x16xf32>
    %6 = arith.addf %3, %5 : vector<16x16xf32>
    %cst = arith.constant 0.000000e+00 : f32
    %7 = vector.broadcast %cst : f32 to vector<16x16xf32>
    %8 = arith.maximumf %6, %7 : vector<16x16xf32>
    %9 = arith.truncf %8 : vector<16x16xf32> to vector<16x16xbf16>
    %c0_5 = arith.constant 0 : index
    %c0_6 = arith.constant 0 : index
    %10 = vector.load %arg4[%c0_5, %c0_6] : memref<16x32xbf16, #tpu.memory_space<vmem>>, vector<16x32xbf16>
    %cst_7 = arith.constant dense<0.000000e+00> : vector<16x32xf32>
    %11 = tpu.matmul %9, %10, %cst_7 {dimension_numbers = #tpu.dot_dimension_numbers<[1], [0], [0], [1], [0, 0, 1, 1], [], []>} : vector<16x16xbf16>, vector<16x32xbf16>, vector<16x32xf32> -> vector<16x32xf32>
    %c0_8 = arith.constant 0 : index
    %c0_9 = arith.constant 0 : index
    %12 = vector.load %arg5[%c0_8, %c0_9] : memref<16x32xf32, #tpu.memory_space<vmem>>, vector<16x32xf32>
    tpu.vector_store %arg5[%c0_8, %c0_9], %11 {strides = array<i32>} : memref<16x32xf32, #tpu.memory_space<vmem>>, vector<16x32xf32>,
    return
  }
  func.func @transform_0(%arg0: i32) -> (i32, i32) {
    %c0_i32 = arith.constant 0 : i32
    %c0_i32_0 = arith.constant 0 : i32
    return %arg0, %c0_i32 : i32, i32
  }
  func.func @transform_1(%arg0: i32) -> (i32, i32) {
    %c0_i32 = arith.constant 0 : i32
    %c0_i32_0 = arith.constant 0 : i32
    %c0_i32_1 = arith.constant 0 : i32
    return %c0_i32, %c0_i32_0 : i32, i32
  }
  func.func @transform_2(%arg0: i32) -> (i32, i32) {
    %c0_i32 = arith.constant 0 : i32
    %c0_i32_0 = arith.constant 0 : i32
    %c0_i32_1 = arith.constant 0 : i32
    return %c0_i32, %c0_i32_0 : i32, i32
  }
  func.func @transform_3(%arg0: i32) -> (i32, i32) {
    %c0_i32 = arith.constant 0 : i32
    %c0_i32_0 = arith.constant 0 : i32
    %c0_i32_1 = arith.constant 0 : i32
    return %c0_i32, %c0_i32_0 : i32, i32
  }
  func.func @transform_4(%arg0: i32) -> (i32, i32) {
    %c0_i32 = arith.constant 0 : i32
    %c0_i32_0 = arith.constant 0 : i32
    return %arg0, %c0_i32 : i32, i32
  }
}

module attributes {stable_mosaic.version = 11 : i64} {
  func.func @_bn_relu_conv3x3_kernel(%arg0: i32, %arg1: memref<1x26x32xf32, #tpu.memory_space<vmem>>, %arg2: memref<1x32xf32, #tpu.memory_space<vmem>>, %arg3: memref<1x32xf32, #tpu.memory_space<vmem>>, %arg4: memref<9x16x1xf32, #tpu.memory_space<vmem>>, %arg5: memref<9x32x8xbf16, #tpu.memory_space<vmem>>, %arg6: memref<1x16x8xf32, #tpu.memory_space<vmem>>) attributes {dimension_semantics = [#tpu.dimension_semantics<parallel>], iteration_bounds = array<i64: 2>, scalar_prefetch = 0 : i64, scratch_operands = 0 : i64, tpu.core_type = #tpu.core_type<tc>, window_params = [{transform_indices = @transform_0, window_bounds = array<i64: 1, 26, 32>}, {pipeline_mode = #tpu.pipeline_mode<synchronous>, transform_indices = @transform_1, window_bounds = array<i64: 1, 32>}, {pipeline_mode = #tpu.pipeline_mode<synchronous>, transform_indices = @transform_2, window_bounds = array<i64: 1, 32>}, {pipeline_mode = #tpu.pipeline_mode<synchronous>, transform_indices = @transform_3, window_bounds = array<i64: 9, 16, 1>}, {pipeline_mode = #tpu.pipeline_mode<synchronous>, transform_indices = @transform_4, window_bounds = array<i64: 9, 32, 8>}, {transform_indices = @transform_5, window_bounds = array<i64: 1, 16, 8>}]} {
    %c0 = arith.constant 0 : index
    %c0_0 = arith.constant 0 : index
    %0 = vector.load %arg2[%c0, %c0_0] : memref<1x32xf32, #tpu.memory_space<vmem>>, vector<1x32xf32>
    %c0_1 = arith.constant 0 : index
    %c0_2 = arith.constant 0 : index
    %1 = vector.load %arg3[%c0_1, %c0_2] : memref<1x32xf32, #tpu.memory_space<vmem>>, vector<1x32xf32>
    %cst = arith.constant 0.000000e+00 : f32
    %2 = vector.broadcast %cst : f32 to vector<16x8xf32>
    %c0_3 = arith.constant 0 : index
    %c0_4 = arith.constant 0 : index
    %c0_5 = arith.constant 0 : index
    %3 = vector.load %arg1[%c0_3, %c0_4, %c0_5] : memref<1x26x32xf32, #tpu.memory_space<vmem>>, vector<1x16x32xf32>
    %4 = vector.shape_cast %3 : vector<1x16x32xf32> to vector<16x32xf32>
    %5 = vector.broadcast %0 : vector<1x32xf32> to vector<16x32xf32>
    %6 = arith.mulf %4, %5 : vector<16x32xf32>
    %7 = vector.broadcast %1 : vector<1x32xf32> to vector<16x32xf32>
    %8 = arith.addf %6, %7 : vector<16x32xf32>
    %cst_6 = arith.constant 0.000000e+00 : f32
    %9 = vector.broadcast %cst_6 : f32 to vector<16x32xf32>
    %10 = arith.maximumf %8, %9 : vector<16x32xf32>
    %c0_7 = arith.constant 0 : index
    %c0_8 = arith.constant 0 : index
    %c0_9 = arith.constant 0 : index
    %11 = vector.load %arg4[%c0_7, %c0_8, %c0_9] : memref<9x16x1xf32, #tpu.memory_space<vmem>>, vector<1x16x1xf32>
    %12 = vector.shape_cast %11 : vector<1x16x1xf32> to vector<16x1xf32>
    %13 = vector.broadcast %12 : vector<16x1xf32> to vector<16x32xf32>
    %14 = arith.mulf %10, %13 : vector<16x32xf32>
    %15 = arith.truncf %14 : vector<16x32xf32> to vector<16x32xbf16>
    %c0_10 = arith.constant 0 : index
    %c0_11 = arith.constant 0 : index
    %c0_12 = arith.constant 0 : index
    %16 = vector.load %arg5[%c0_10, %c0_11, %c0_12] : memref<9x32x8xbf16, #tpu.memory_space<vmem>>, vector<1x32x8xbf16>
    %17 = vector.shape_cast %16 : vector<1x32x8xbf16> to vector<32x8xbf16>
    %cst_13 = arith.constant dense<0.000000e+00> : vector<16x8xf32>
    %18 = tpu.matmul %15, %17, %cst_13 {dimension_numbers = #tpu.dot_dimension_numbers<[1], [0], [0], [1], [0, 0, 1, 1], [], []>} : vector<16x32xbf16>, vector<32x8xbf16>, vector<16x8xf32> -> vector<16x8xf32>
    %19 = arith.addf %2, %18 : vector<16x8xf32>
    %c0_14 = arith.constant 0 : index
    %c1 = arith.constant 1 : index
    %c0_15 = arith.constant 0 : index
    %20 = vector.load %arg1[%c0_14, %c1, %c0_15] : memref<1x26x32xf32, #tpu.memory_space<vmem>>, vector<1x16x32xf32>
    %21 = vector.shape_cast %20 : vector<1x16x32xf32> to vector<16x32xf32>
    %22 = vector.broadcast %0 : vector<1x32xf32> to vector<16x32xf32>
    %23 = arith.mulf %21, %22 : vector<16x32xf32>
    %24 = vector.broadcast %1 : vector<1x32xf32> to vector<16x32xf32>
    %25 = arith.addf %23, %24 : vector<16x32xf32>
    %cst_16 = arith.constant 0.000000e+00 : f32
    %26 = vector.broadcast %cst_16 : f32 to vector<16x32xf32>
    %27 = arith.maximumf %25, %26 : vector<16x32xf32>
    %c1_17 = arith.constant 1 : index
    %c0_18 = arith.constant 0 : index
    %c0_19 = arith.constant 0 : index
    %28 = vector.load %arg4[%c1_17, %c0_18, %c0_19] : memref<9x16x1xf32, #tpu.memory_space<vmem>>, vector<1x16x1xf32>
    %29 = vector.shape_cast %28 : vector<1x16x1xf32> to vector<16x1xf32>
    %30 = vector.broadcast %29 : vector<16x1xf32> to vector<16x32xf32>
    %31 = arith.mulf %27, %30 : vector<16x32xf32>
    %32 = arith.truncf %31 : vector<16x32xf32> to vector<16x32xbf16>
    %c1_20 = arith.constant 1 : index
    %c0_21 = arith.constant 0 : index
    %c0_22 = arith.constant 0 : index
    %33 = vector.load %arg5[%c1_20, %c0_21, %c0_22] : memref<9x32x8xbf16, #tpu.memory_space<vmem>>, vector<1x32x8xbf16>
    %34 = vector.shape_cast %33 : vector<1x32x8xbf16> to vector<32x8xbf16>
    %cst_23 = arith.constant dense<0.000000e+00> : vector<16x8xf32>
    %35 = tpu.matmul %32, %34, %cst_23 {dimension_numbers = #tpu.dot_dimension_numbers<[1], [0], [0], [1], [0, 0, 1, 1], [], []>} : vector<16x32xbf16>, vector<32x8xbf16>, vector<16x8xf32> -> vector<16x8xf32>
    %36 = arith.addf %19, %35 : vector<16x8xf32>
    %c0_24 = arith.constant 0 : index
    %c2 = arith.constant 2 : index
    %c0_25 = arith.constant 0 : index
    %37 = vector.load %arg1[%c0_24, %c2, %c0_25] : memref<1x26x32xf32, #tpu.memory_space<vmem>>, vector<1x16x32xf32>
    %38 = vector.shape_cast %37 : vector<1x16x32xf32> to vector<16x32xf32>
    %39 = vector.broadcast %0 : vector<1x32xf32> to vector<16x32xf32>
    %40 = arith.mulf %38, %39 : vector<16x32xf32>
    %41 = vector.broadcast %1 : vector<1x32xf32> to vector<16x32xf32>
    %42 = arith.addf %40, %41 : vector<16x32xf32>
    %cst_26 = arith.constant 0.000000e+00 : f32
    %43 = vector.broadcast %cst_26 : f32 to vector<16x32xf32>
    %44 = arith.maximumf %42, %43 : vector<16x32xf32>
    %c2_27 = arith.constant 2 : index
    %c0_28 = arith.constant 0 : index
    %c0_29 = arith.constant 0 : index
    %45 = vector.load %arg4[%c2_27, %c0_28, %c0_29] : memref<9x16x1xf32, #tpu.memory_space<vmem>>, vector<1x16x1xf32>
    %46 = vector.shape_cast %45 : vector<1x16x1xf32> to vector<16x1xf32>
    %47 = vector.broadcast %46 : vector<16x1xf32> to vector<16x32xf32>
    %48 = arith.mulf %44, %47 : vector<16x32xf32>
    %49 = arith.truncf %48 : vector<16x32xf32> to vector<16x32xbf16>
    %c2_30 = arith.constant 2 : index
    %c0_31 = arith.constant 0 : index
    %c0_32 = arith.constant 0 : index
    %50 = vector.load %arg5[%c2_30, %c0_31, %c0_32] : memref<9x32x8xbf16, #tpu.memory_space<vmem>>, vector<1x32x8xbf16>
    %51 = vector.shape_cast %50 : vector<1x32x8xbf16> to vector<32x8xbf16>
    %cst_33 = arith.constant dense<0.000000e+00> : vector<16x8xf32>
    %52 = tpu.matmul %49, %51, %cst_33 {dimension_numbers = #tpu.dot_dimension_numbers<[1], [0], [0], [1], [0, 0, 1, 1], [], []>} : vector<16x32xbf16>, vector<32x8xbf16>, vector<16x8xf32> -> vector<16x8xf32>
    %53 = arith.addf %36, %52 : vector<16x8xf32>
    %c0_34 = arith.constant 0 : index
    %c4 = arith.constant 4 : index
    %c0_35 = arith.constant 0 : index
    %54 = vector.load %arg1[%c0_34, %c4, %c0_35] : memref<1x26x32xf32, #tpu.memory_space<vmem>>, vector<1x16x32xf32>
    %55 = vector.shape_cast %54 : vector<1x16x32xf32> to vector<16x32xf32>
    %56 = vector.broadcast %0 : vector<1x32xf32> to vector<16x32xf32>
    %57 = arith.mulf %55, %56 : vector<16x32xf32>
    %58 = vector.broadcast %1 : vector<1x32xf32> to vector<16x32xf32>
    %59 = arith.addf %57, %58 : vector<16x32xf32>
    %cst_36 = arith.constant 0.000000e+00 : f32
    %60 = vector.broadcast %cst_36 : f32 to vector<16x32xf32>
    %61 = arith.maximumf %59, %60 : vector<16x32xf32>
    %c3 = arith.constant 3 : index
    %c0_37 = arith.constant 0 : index
    %c0_38 = arith.constant 0 : index
    %62 = vector.load %arg4[%c3, %c0_37, %c0_38] : memref<9x16x1xf32, #tpu.memory_space<vmem>>, vector<1x16x1xf32>
    %63 = vector.shape_cast %62 : vector<1x16x1xf32> to vector<16x1xf32>
    %64 = vector.broadcast %63 : vector<16x1xf32> to vector<16x32xf32>
    %65 = arith.mulf %61, %64 : vector<16x32xf32>
    %66 = arith.truncf %65 : vector<16x32xf32> to vector<16x32xbf16>
    %c3_39 = arith.constant 3 : index
    %c0_40 = arith.constant 0 : index
    %c0_41 = arith.constant 0 : index
    %67 = vector.load %arg5[%c3_39, %c0_40, %c0_41] : memref<9x32x8xbf16, #tpu.memory_space<vmem>>, vector<1x32x8xbf16>
    %68 = vector.shape_cast %67 : vector<1x32x8xbf16> to vector<32x8xbf16>
    %cst_42 = arith.constant dense<0.000000e+00> : vector<16x8xf32>
    %69 = tpu.matmul %66, %68, %cst_42 {dimension_numbers = #tpu.dot_dimension_numbers<[1], [0], [0], [1], [0, 0, 1, 1], [], []>} : vector<16x32xbf16>, vector<32x8xbf16>, vector<16x8xf32> -> vector<16x8xf32>
    %70 = arith.addf %53, %69 : vector<16x8xf32>
    %c0_43 = arith.constant 0 : index
    %c5 = arith.constant 5 : index
    %c0_44 = arith.constant 0 : index
    %71 = vector.load %arg1[%c0_43, %c5, %c0_44] : memref<1x26x32xf32, #tpu.memory_space<vmem>>, vector<1x16x32xf32>
    %72 = vector.shape_cast %71 : vector<1x16x32xf32> to vector<16x32xf32>
    %73 = vector.broadcast %0 : vector<1x32xf32> to vector<16x32xf32>
    %74 = arith.mulf %72, %73 : vector<16x32xf32>
    %75 = vector.broadcast %1 : vector<1x32xf32> to vector<16x32xf32>
    %76 = arith.addf %74, %75 : vector<16x32xf32>
    %cst_45 = arith.constant 0.000000e+00 : f32
    %77 = vector.broadcast %cst_45 : f32 to vector<16x32xf32>
    %78 = arith.maximumf %76, %77 : vector<16x32xf32>
    %c4_46 = arith.constant 4 : index
    %c0_47 = arith.constant 0 : index
    %c0_48 = arith.constant 0 : index
    %79 = vector.load %arg4[%c4_46, %c0_47, %c0_48] : memref<9x16x1xf32, #tpu.memory_space<vmem>>, vector<1x16x1xf32>
    %80 = vector.shape_cast %79 : vector<1x16x1xf32> to vector<16x1xf32>
    %81 = vector.broadcast %80 : vector<16x1xf32> to vector<16x32xf32>
    %82 = arith.mulf %78, %81 : vector<16x32xf32>
    %83 = arith.truncf %82 : vector<16x32xf32> to vector<16x32xbf16>
    %c4_49 = arith.constant 4 : index
    %c0_50 = arith.constant 0 : index
    %c0_51 = arith.constant 0 : index
    %84 = vector.load %arg5[%c4_49, %c0_50, %c0_51] : memref<9x32x8xbf16, #tpu.memory_space<vmem>>, vector<1x32x8xbf16>
    %85 = vector.shape_cast %84 : vector<1x32x8xbf16> to vector<32x8xbf16>
    %cst_52 = arith.constant dense<0.000000e+00> : vector<16x8xf32>
    %86 = tpu.matmul %83, %85, %cst_52 {dimension_numbers = #tpu.dot_dimension_numbers<[1], [0], [0], [1], [0, 0, 1, 1], [], []>} : vector<16x32xbf16>, vector<32x8xbf16>, vector<16x8xf32> -> vector<16x8xf32>
    %87 = arith.addf %70, %86 : vector<16x8xf32>
    %c0_53 = arith.constant 0 : index
    %c6 = arith.constant 6 : index
    %c0_54 = arith.constant 0 : index
    %88 = vector.load %arg1[%c0_53, %c6, %c0_54] : memref<1x26x32xf32, #tpu.memory_space<vmem>>, vector<1x16x32xf32>
    %89 = vector.shape_cast %88 : vector<1x16x32xf32> to vector<16x32xf32>
    %90 = vector.broadcast %0 : vector<1x32xf32> to vector<16x32xf32>
    %91 = arith.mulf %89, %90 : vector<16x32xf32>
    %92 = vector.broadcast %1 : vector<1x32xf32> to vector<16x32xf32>
    %93 = arith.addf %91, %92 : vector<16x32xf32>
    %cst_55 = arith.constant 0.000000e+00 : f32
    %94 = vector.broadcast %cst_55 : f32 to vector<16x32xf32>
    %95 = arith.maximumf %93, %94 : vector<16x32xf32>
    %c5_56 = arith.constant 5 : index
    %c0_57 = arith.constant 0 : index
    %c0_58 = arith.constant 0 : index
    %96 = vector.load %arg4[%c5_56, %c0_57, %c0_58] : memref<9x16x1xf32, #tpu.memory_space<vmem>>, vector<1x16x1xf32>
    %97 = vector.shape_cast %96 : vector<1x16x1xf32> to vector<16x1xf32>
    %98 = vector.broadcast %97 : vector<16x1xf32> to vector<16x32xf32>
    %99 = arith.mulf %95, %98 : vector<16x32xf32>
    %100 = arith.truncf %99 : vector<16x32xf32> to vector<16x32xbf16>
    %c5_59 = arith.constant 5 : index
    %c0_60 = arith.constant 0 : index
    %c0_61 = arith.constant 0 : index
    %101 = vector.load %arg5[%c5_59, %c0_60, %c0_61] : memref<9x32x8xbf16, #tpu.memory_space<vmem>>, vector<1x32x8xbf16>
    %102 = vector.shape_cast %101 : vector<1x32x8xbf16> to vector<32x8xbf16>
    %cst_62 = arith.constant dense<0.000000e+00> : vector<16x8xf32>
    %103 = tpu.matmul %100, %102, %cst_62 {dimension_numbers = #tpu.dot_dimension_numbers<[1], [0], [0], [1], [0, 0, 1, 1], [], []>} : vector<16x32xbf16>, vector<32x8xbf16>, vector<16x8xf32> -> vector<16x8xf32>
    %104 = arith.addf %87, %103 : vector<16x8xf32>
    %c0_63 = arith.constant 0 : index
    %c8 = arith.constant 8 : index
    %c0_64 = arith.constant 0 : index
    %105 = vector.load %arg1[%c0_63, %c8, %c0_64] : memref<1x26x32xf32, #tpu.memory_space<vmem>>, vector<1x16x32xf32>
    %106 = vector.shape_cast %105 : vector<1x16x32xf32> to vector<16x32xf32>
    %107 = vector.broadcast %0 : vector<1x32xf32> to vector<16x32xf32>
    %108 = arith.mulf %106, %107 : vector<16x32xf32>
    %109 = vector.broadcast %1 : vector<1x32xf32> to vector<16x32xf32>
    %110 = arith.addf %108, %109 : vector<16x32xf32>
    %cst_65 = arith.constant 0.000000e+00 : f32
    %111 = vector.broadcast %cst_65 : f32 to vector<16x32xf32>
    %112 = arith.maximumf %110, %111 : vector<16x32xf32>
    %c6_66 = arith.constant 6 : index
    %c0_67 = arith.constant 0 : index
    %c0_68 = arith.constant 0 : index
    %113 = vector.load %arg4[%c6_66, %c0_67, %c0_68] : memref<9x16x1xf32, #tpu.memory_space<vmem>>, vector<1x16x1xf32>
    %114 = vector.shape_cast %113 : vector<1x16x1xf32> to vector<16x1xf32>
    %115 = vector.broadcast %114 : vector<16x1xf32> to vector<16x32xf32>
    %116 = arith.mulf %112, %115 : vector<16x32xf32>
    %117 = arith.truncf %116 : vector<16x32xf32> to vector<16x32xbf16>
    %c6_69 = arith.constant 6 : index
    %c0_70 = arith.constant 0 : index
    %c0_71 = arith.constant 0 : index
    %118 = vector.load %arg5[%c6_69, %c0_70, %c0_71] : memref<9x32x8xbf16, #tpu.memory_space<vmem>>, vector<1x32x8xbf16>
    %119 = vector.shape_cast %118 : vector<1x32x8xbf16> to vector<32x8xbf16>
    %cst_72 = arith.constant dense<0.000000e+00> : vector<16x8xf32>
    %120 = tpu.matmul %117, %119, %cst_72 {dimension_numbers = #tpu.dot_dimension_numbers<[1], [0], [0], [1], [0, 0, 1, 1], [], []>} : vector<16x32xbf16>, vector<32x8xbf16>, vector<16x8xf32> -> vector<16x8xf32>
    %121 = arith.addf %104, %120 : vector<16x8xf32>
    %c0_73 = arith.constant 0 : index
    %c9 = arith.constant 9 : index
    %c0_74 = arith.constant 0 : index
    %122 = vector.load %arg1[%c0_73, %c9, %c0_74] : memref<1x26x32xf32, #tpu.memory_space<vmem>>, vector<1x16x32xf32>
    %123 = vector.shape_cast %122 : vector<1x16x32xf32> to vector<16x32xf32>
    %124 = vector.broadcast %0 : vector<1x32xf32> to vector<16x32xf32>
    %125 = arith.mulf %123, %124 : vector<16x32xf32>
    %126 = vector.broadcast %1 : vector<1x32xf32> to vector<16x32xf32>
    %127 = arith.addf %125, %126 : vector<16x32xf32>
    %cst_75 = arith.constant 0.000000e+00 : f32
    %128 = vector.broadcast %cst_75 : f32 to vector<16x32xf32>
    %129 = arith.maximumf %127, %128 : vector<16x32xf32>
    %c7 = arith.constant 7 : index
    %c0_76 = arith.constant 0 : index
    %c0_77 = arith.constant 0 : index
    %130 = vector.load %arg4[%c7, %c0_76, %c0_77] : memref<9x16x1xf32, #tpu.memory_space<vmem>>, vector<1x16x1xf32>
    %131 = vector.shape_cast %130 : vector<1x16x1xf32> to vector<16x1xf32>
    %132 = vector.broadcast %131 : vector<16x1xf32> to vector<16x32xf32>
    %133 = arith.mulf %129, %132 : vector<16x32xf32>
    %134 = arith.truncf %133 : vector<16x32xf32> to vector<16x32xbf16>
    %c7_78 = arith.constant 7 : index
    %c0_79 = arith.constant 0 : index
    %c0_80 = arith.constant 0 : index
    %135 = vector.load %arg5[%c7_78, %c0_79, %c0_80] : memref<9x32x8xbf16, #tpu.memory_space<vmem>>, vector<1x32x8xbf16>
    %136 = vector.shape_cast %135 : vector<1x32x8xbf16> to vector<32x8xbf16>
    %cst_81 = arith.constant dense<0.000000e+00> : vector<16x8xf32>
    %137 = tpu.matmul %134, %136, %cst_81 {dimension_numbers = #tpu.dot_dimension_numbers<[1], [0], [0], [1], [0, 0, 1, 1], [], []>} : vector<16x32xbf16>, vector<32x8xbf16>, vector<16x8xf32> -> vector<16x8xf32>
    %138 = arith.addf %121, %137 : vector<16x8xf32>
    %c0_82 = arith.constant 0 : index
    %c10 = arith.constant 10 : index
    %c0_83 = arith.constant 0 : index
    %139 = vector.load %arg1[%c0_82, %c10, %c0_83] : memref<1x26x32xf32, #tpu.memory_space<vmem>>, vector<1x16x32xf32>
    %140 = vector.shape_cast %139 : vector<1x16x32xf32> to vector<16x32xf32>
    %141 = vector.broadcast %0 : vector<1x32xf32> to vector<16x32xf32>
    %142 = arith.mulf %140, %141 : vector<16x32xf32>
    %143 = vector.broadcast %1 : vector<1x32xf32> to vector<16x32xf32>
    %144 = arith.addf %142, %143 : vector<16x32xf32>
    %cst_84 = arith.constant 0.000000e+00 : f32
    %145 = vector.broadcast %cst_84 : f32 to vector<16x32xf32>
    %146 = arith.maximumf %144, %145 : vector<16x32xf32>
    %c8_85 = arith.constant 8 : index
    %c0_86 = arith.constant 0 : index
    %c0_87 = arith.constant 0 : index
    %147 = vector.load %arg4[%c8_85, %c0_86, %c0_87] : memref<9x16x1xf32, #tpu.memory_space<vmem>>, vector<1x16x1xf32>
    %148 = vector.shape_cast %147 : vector<1x16x1xf32> to vector<16x1xf32>
    %149 = vector.broadcast %148 : vector<16x1xf32> to vector<16x32xf32>
    %150 = arith.mulf %146, %149 : vector<16x32xf32>
    %151 = arith.truncf %150 : vector<16x32xf32> to vector<16x32xbf16>
    %c8_88 = arith.constant 8 : index
    %c0_89 = arith.constant 0 : index
    %c0_90 = arith.constant 0 : index
    %152 = vector.load %arg5[%c8_88, %c0_89, %c0_90] : memref<9x32x8xbf16, #tpu.memory_space<vmem>>, vector<1x32x8xbf16>
    %153 = vector.shape_cast %152 : vector<1x32x8xbf16> to vector<32x8xbf16>
    %cst_91 = arith.constant dense<0.000000e+00> : vector<16x8xf32>
    %154 = tpu.matmul %151, %153, %cst_91 {dimension_numbers = #tpu.dot_dimension_numbers<[1], [0], [0], [1], [0, 0, 1, 1], [], []>} : vector<16x32xbf16>, vector<32x8xbf16>, vector<16x8xf32> -> vector<16x8xf32>
    %155 = arith.addf %138, %154 : vector<16x8xf32>
    %c0_92 = arith.constant 0 : index
    %c0_93 = arith.constant 0 : index
    %c0_94 = arith.constant 0 : index
    %156 = vector.load %arg6[%c0_92, %c0_93, %c0_94] : memref<1x16x8xf32, #tpu.memory_space<vmem>>, vector<1x16x8xf32>
    %157 = vector.shape_cast %156 : vector<1x16x8xf32> to vector<16x8xf32>
    %158 = vector.shape_cast %155 : vector<16x8xf32> to vector<1x16x8xf32>
    tpu.vector_store %arg6[%c0_92, %c0_93, %c0_94], %158 {strides = array<i32>} : memref<1x16x8xf32, #tpu.memory_space<vmem>>, vector<1x16x8xf32>,
    return
  }
  func.func @transform_0(%arg0: i32) -> (i32, i32, i32) {
    %c0_i32 = arith.constant 0 : i32
    %c0_i32_0 = arith.constant 0 : i32
    %c0_i32_1 = arith.constant 0 : i32
    return %arg0, %c0_i32, %c0_i32_0 : i32, i32, i32
  }
  func.func @transform_1(%arg0: i32) -> (i32, i32) {
    %c0_i32 = arith.constant 0 : i32
    %c0_i32_0 = arith.constant 0 : i32
    %c0_i32_1 = arith.constant 0 : i32
    return %c0_i32, %c0_i32_0 : i32, i32
  }
  func.func @transform_2(%arg0: i32) -> (i32, i32) {
    %c0_i32 = arith.constant 0 : i32
    %c0_i32_0 = arith.constant 0 : i32
    %c0_i32_1 = arith.constant 0 : i32
    return %c0_i32, %c0_i32_0 : i32, i32
  }
  func.func @transform_3(%arg0: i32) -> (i32, i32, i32) {
    %c0_i32 = arith.constant 0 : i32
    %c0_i32_0 = arith.constant 0 : i32
    %c0_i32_1 = arith.constant 0 : i32
    %c0_i32_2 = arith.constant 0 : i32
    return %c0_i32, %c0_i32_0, %c0_i32_1 : i32, i32, i32
  }
  func.func @transform_4(%arg0: i32) -> (i32, i32, i32) {
    %c0_i32 = arith.constant 0 : i32
    %c0_i32_0 = arith.constant 0 : i32
    %c0_i32_1 = arith.constant 0 : i32
    %c0_i32_2 = arith.constant 0 : i32
    return %c0_i32, %c0_i32_0, %c0_i32_1 : i32, i32, i32
  }
  func.func @transform_5(%arg0: i32) -> (i32, i32, i32) {
    %c0_i32 = arith.constant 0 : i32
    %c0_i32_0 = arith.constant 0 : i32
    %c0_i32_1 = arith.constant 0 : i32
    return %arg0, %c0_i32, %c0_i32_0 : i32, i32, i32
  }
}

module attributes {stable_mosaic.version = 11 : i64} {
  func.func @_bn_relu_matmul_kernel(%arg0: i32, %arg1: memref<16x24xf32, #tpu.memory_space<vmem>>, %arg2: memref<1x24xf32, #tpu.memory_space<vmem>>, %arg3: memref<1x24xf32, #tpu.memory_space<vmem>>, %arg4: memref<24x32xbf16, #tpu.memory_space<vmem>>, %arg5: memref<16x32xf32, #tpu.memory_space<vmem>>) attributes {dimension_semantics = [#tpu.dimension_semantics<parallel>], iteration_bounds = array<i64: 2>, scalar_prefetch = 0 : i64, scratch_operands = 0 : i64, tpu.core_type = #tpu.core_type<tc>, window_params = [{transform_indices = @transform_0, window_bounds = array<i64: 16, 24>}, {pipeline_mode = #tpu.pipeline_mode<synchronous>, transform_indices = @transform_1, window_bounds = array<i64: 1, 24>}, {pipeline_mode = #tpu.pipeline_mode<synchronous>, transform_indices = @transform_2, window_bounds = array<i64: 1, 24>}, {pipeline_mode = #tpu.pipeline_mode<synchronous>, transform_indices = @transform_3, window_bounds = array<i64: 24, 32>}, {transform_indices = @transform_4, window_bounds = array<i64: 16, 32>}]} {
    %c0 = arith.constant 0 : index
    %c0_0 = arith.constant 0 : index
    %0 = vector.load %arg1[%c0, %c0_0] : memref<16x24xf32, #tpu.memory_space<vmem>>, vector<16x24xf32>
    %c0_1 = arith.constant 0 : index
    %c0_2 = arith.constant 0 : index
    %1 = vector.load %arg2[%c0_1, %c0_2] : memref<1x24xf32, #tpu.memory_space<vmem>>, vector<1x24xf32>
    %2 = vector.broadcast %1 : vector<1x24xf32> to vector<16x24xf32>
    %3 = arith.mulf %0, %2 : vector<16x24xf32>
    %c0_3 = arith.constant 0 : index
    %c0_4 = arith.constant 0 : index
    %4 = vector.load %arg3[%c0_3, %c0_4] : memref<1x24xf32, #tpu.memory_space<vmem>>, vector<1x24xf32>
    %5 = vector.broadcast %4 : vector<1x24xf32> to vector<16x24xf32>
    %6 = arith.addf %3, %5 : vector<16x24xf32>
    %cst = arith.constant 0.000000e+00 : f32
    %7 = vector.broadcast %cst : f32 to vector<16x24xf32>
    %8 = arith.maximumf %6, %7 : vector<16x24xf32>
    %9 = arith.truncf %8 : vector<16x24xf32> to vector<16x24xbf16>
    %c0_5 = arith.constant 0 : index
    %c0_6 = arith.constant 0 : index
    %10 = vector.load %arg4[%c0_5, %c0_6] : memref<24x32xbf16, #tpu.memory_space<vmem>>, vector<24x32xbf16>
    %cst_7 = arith.constant dense<0.000000e+00> : vector<16x32xf32>
    %11 = tpu.matmul %9, %10, %cst_7 {dimension_numbers = #tpu.dot_dimension_numbers<[1], [0], [0], [1], [0, 0, 1, 1], [], []>} : vector<16x24xbf16>, vector<24x32xbf16>, vector<16x32xf32> -> vector<16x32xf32>
    %c0_8 = arith.constant 0 : index
    %c0_9 = arith.constant 0 : index
    %12 = vector.load %arg5[%c0_8, %c0_9] : memref<16x32xf32, #tpu.memory_space<vmem>>, vector<16x32xf32>
    tpu.vector_store %arg5[%c0_8, %c0_9], %11 {strides = array<i32>} : memref<16x32xf32, #tpu.memory_space<vmem>>, vector<16x32xf32>,
    return
  }
  func.func @transform_0(%arg0: i32) -> (i32, i32) {
    %c0_i32 = arith.constant 0 : i32
    %c0_i32_0 = arith.constant 0 : i32
    return %arg0, %c0_i32 : i32, i32
  }
  func.func @transform_1(%arg0: i32) -> (i32, i32) {
    %c0_i32 = arith.constant 0 : i32
    %c0_i32_0 = arith.constant 0 : i32
    %c0_i32_1 = arith.constant 0 : i32
    return %c0_i32, %c0_i32_0 : i32, i32
  }
  func.func @transform_2(%arg0: i32) -> (i32, i32) {
    %c0_i32 = arith.constant 0 : i32
    %c0_i32_0 = arith.constant 0 : i32
    %c0_i32_1 = arith.constant 0 : i32
    return %c0_i32, %c0_i32_0 : i32, i32
  }
  func.func @transform_3(%arg0: i32) -> (i32, i32) {
    %c0_i32 = arith.constant 0 : i32
    %c0_i32_0 = arith.constant 0 : i32
    %c0_i32_1 = arith.constant 0 : i32
    return %c0_i32, %c0_i32_0 : i32, i32
  }
  func.func @transform_4(%arg0: i32) -> (i32, i32) {
    %c0_i32 = arith.constant 0 : i32
    %c0_i32_0 = arith.constant 0 : i32
    return %arg0, %c0_i32 : i32, i32
  }
}

module attributes {stable_mosaic.version = 11 : i64} {
  func.func @_bn_relu_matmul_kernel(%arg0: i32, %arg1: memref<16x32xf32, #tpu.memory_space<vmem>>, %arg2: memref<1x32xf32, #tpu.memory_space<vmem>>, %arg3: memref<1x32xf32, #tpu.memory_space<vmem>>, %arg4: memref<32x16xbf16, #tpu.memory_space<vmem>>, %arg5: memref<16x16xf32, #tpu.memory_space<vmem>>) attributes {dimension_semantics = [#tpu.dimension_semantics<parallel>], iteration_bounds = array<i64: 2>, scalar_prefetch = 0 : i64, scratch_operands = 0 : i64, tpu.core_type = #tpu.core_type<tc>, window_params = [{transform_indices = @transform_0, window_bounds = array<i64: 16, 32>}, {pipeline_mode = #tpu.pipeline_mode<synchronous>, transform_indices = @transform_1, window_bounds = array<i64: 1, 32>}, {pipeline_mode = #tpu.pipeline_mode<synchronous>, transform_indices = @transform_2, window_bounds = array<i64: 1, 32>}, {pipeline_mode = #tpu.pipeline_mode<synchronous>, transform_indices = @transform_3, window_bounds = array<i64: 32, 16>}, {transform_indices = @transform_4, window_bounds = array<i64: 16, 16>}]} {
    %c0 = arith.constant 0 : index
    %c0_0 = arith.constant 0 : index
    %0 = vector.load %arg1[%c0, %c0_0] : memref<16x32xf32, #tpu.memory_space<vmem>>, vector<16x32xf32>
    %c0_1 = arith.constant 0 : index
    %c0_2 = arith.constant 0 : index
    %1 = vector.load %arg2[%c0_1, %c0_2] : memref<1x32xf32, #tpu.memory_space<vmem>>, vector<1x32xf32>
    %2 = vector.broadcast %1 : vector<1x32xf32> to vector<16x32xf32>
    %3 = arith.mulf %0, %2 : vector<16x32xf32>
    %c0_3 = arith.constant 0 : index
    %c0_4 = arith.constant 0 : index
    %4 = vector.load %arg3[%c0_3, %c0_4] : memref<1x32xf32, #tpu.memory_space<vmem>>, vector<1x32xf32>
    %5 = vector.broadcast %4 : vector<1x32xf32> to vector<16x32xf32>
    %6 = arith.addf %3, %5 : vector<16x32xf32>
    %cst = arith.constant 0.000000e+00 : f32
    %7 = vector.broadcast %cst : f32 to vector<16x32xf32>
    %8 = arith.maximumf %6, %7 : vector<16x32xf32>
    %9 = arith.truncf %8 : vector<16x32xf32> to vector<16x32xbf16>
    %c0_5 = arith.constant 0 : index
    %c0_6 = arith.constant 0 : index
    %10 = vector.load %arg4[%c0_5, %c0_6] : memref<32x16xbf16, #tpu.memory_space<vmem>>, vector<32x16xbf16>
    %cst_7 = arith.constant dense<0.000000e+00> : vector<16x16xf32>
    %11 = tpu.matmul %9, %10, %cst_7 {dimension_numbers = #tpu.dot_dimension_numbers<[1], [0], [0], [1], [0, 0, 1, 1], [], []>} : vector<16x32xbf16>, vector<32x16xbf16>, vector<16x16xf32> -> vector<16x16xf32>
    %c0_8 = arith.constant 0 : index
    %c0_9 = arith.constant 0 : index
    %12 = vector.load %arg5[%c0_8, %c0_9] : memref<16x16xf32, #tpu.memory_space<vmem>>, vector<16x16xf32>
    tpu.vector_store %arg5[%c0_8, %c0_9], %11 {strides = array<i32>} : memref<16x16xf32, #tpu.memory_space<vmem>>, vector<16x16xf32>,
    return
  }
  func.func @transform_0(%arg0: i32) -> (i32, i32) {
    %c0_i32 = arith.constant 0 : i32
    %c0_i32_0 = arith.constant 0 : i32
    return %arg0, %c0_i32 : i32, i32
  }
  func.func @transform_1(%arg0: i32) -> (i32, i32) {
    %c0_i32 = arith.constant 0 : i32
    %c0_i32_0 = arith.constant 0 : i32
    %c0_i32_1 = arith.constant 0 : i32
    return %c0_i32, %c0_i32_0 : i32, i32
  }
  func.func @transform_2(%arg0: i32) -> (i32, i32) {
    %c0_i32 = arith.constant 0 : i32
    %c0_i32_0 = arith.constant 0 : i32
    %c0_i32_1 = arith.constant 0 : i32
    return %c0_i32, %c0_i32_0 : i32, i32
  }
  func.func @transform_3(%arg0: i32) -> (i32, i32) {
    %c0_i32 = arith.constant 0 : i32
    %c0_i32_0 = arith.constant 0 : i32
    %c0_i32_1 = arith.constant 0 : i32
    return %c0_i32, %c0_i32_0 : i32, i32
  }
  func.func @transform_4(%arg0: i32) -> (i32, i32) {
    %c0_i32 = arith.constant 0 : i32
    %c0_i32_0 = arith.constant 0 : i32
    return %arg0, %c0_i32 : i32, i32
  }
}

module attributes {stable_mosaic.version = 11 : i64} {
  func.func @_bn_relu_matmul_kernel(%arg0: i32, %arg1: memref<8x16xf32, #tpu.memory_space<vmem>>, %arg2: memref<1x16xf32, #tpu.memory_space<vmem>>, %arg3: memref<1x16xf32, #tpu.memory_space<vmem>>, %arg4: memref<16x32xbf16, #tpu.memory_space<vmem>>, %arg5: memref<8x32xf32, #tpu.memory_space<vmem>>) attributes {dimension_semantics = [#tpu.dimension_semantics<parallel>], iteration_bounds = array<i64: 1>, scalar_prefetch = 0 : i64, scratch_operands = 0 : i64, tpu.core_type = #tpu.core_type<tc>, window_params = [{transform_indices = @transform_0, window_bounds = array<i64: 8, 16>}, {pipeline_mode = #tpu.pipeline_mode<synchronous>, transform_indices = @transform_1, window_bounds = array<i64: 1, 16>}, {pipeline_mode = #tpu.pipeline_mode<synchronous>, transform_indices = @transform_2, window_bounds = array<i64: 1, 16>}, {pipeline_mode = #tpu.pipeline_mode<synchronous>, transform_indices = @transform_3, window_bounds = array<i64: 16, 32>}, {transform_indices = @transform_4, window_bounds = array<i64: 8, 32>}]} {
    %c0 = arith.constant 0 : index
    %c0_0 = arith.constant 0 : index
    %0 = vector.load %arg1[%c0, %c0_0] : memref<8x16xf32, #tpu.memory_space<vmem>>, vector<8x16xf32>
    %c0_1 = arith.constant 0 : index
    %c0_2 = arith.constant 0 : index
    %1 = vector.load %arg2[%c0_1, %c0_2] : memref<1x16xf32, #tpu.memory_space<vmem>>, vector<1x16xf32>
    %2 = vector.broadcast %1 : vector<1x16xf32> to vector<8x16xf32>
    %3 = arith.mulf %0, %2 : vector<8x16xf32>
    %c0_3 = arith.constant 0 : index
    %c0_4 = arith.constant 0 : index
    %4 = vector.load %arg3[%c0_3, %c0_4] : memref<1x16xf32, #tpu.memory_space<vmem>>, vector<1x16xf32>
    %5 = vector.broadcast %4 : vector<1x16xf32> to vector<8x16xf32>
    %6 = arith.addf %3, %5 : vector<8x16xf32>
    %cst = arith.constant 0.000000e+00 : f32
    %7 = vector.broadcast %cst : f32 to vector<8x16xf32>
    %8 = arith.maximumf %6, %7 : vector<8x16xf32>
    %9 = arith.truncf %8 : vector<8x16xf32> to vector<8x16xbf16>
    %c0_5 = arith.constant 0 : index
    %c0_6 = arith.constant 0 : index
    %10 = vector.load %arg4[%c0_5, %c0_6] : memref<16x32xbf16, #tpu.memory_space<vmem>>, vector<16x32xbf16>
    %cst_7 = arith.constant dense<0.000000e+00> : vector<8x32xf32>
    %11 = tpu.matmul %9, %10, %cst_7 {dimension_numbers = #tpu.dot_dimension_numbers<[1], [0], [0], [1], [0, 0, 1, 1], [], []>} : vector<8x16xbf16>, vector<16x32xbf16>, vector<8x32xf32> -> vector<8x32xf32>
    %c0_8 = arith.constant 0 : index
    %c0_9 = arith.constant 0 : index
    %12 = vector.load %arg5[%c0_8, %c0_9] : memref<8x32xf32, #tpu.memory_space<vmem>>, vector<8x32xf32>
    tpu.vector_store %arg5[%c0_8, %c0_9], %11 {strides = array<i32>} : memref<8x32xf32, #tpu.memory_space<vmem>>, vector<8x32xf32>,
    return
  }
  func.func @transform_0(%arg0: i32) -> (i32, i32) {
    %c0_i32 = arith.constant 0 : i32
    %c0_i32_0 = arith.constant 0 : i32
    return %arg0, %c0_i32 : i32, i32
  }
  func.func @transform_1(%arg0: i32) -> (i32, i32) {
    %c0_i32 = arith.constant 0 : i32
    %c0_i32_0 = arith.constant 0 : i32
    %c0_i32_1 = arith.constant 0 : i32
    return %c0_i32, %c0_i32_0 : i32, i32
  }
  func.func @transform_2(%arg0: i32) -> (i32, i32) {
    %c0_i32 = arith.constant 0 : i32
    %c0_i32_0 = arith.constant 0 : i32
    %c0_i32_1 = arith.constant 0 : i32
    return %c0_i32, %c0_i32_0 : i32, i32
  }
  func.func @transform_3(%arg0: i32) -> (i32, i32) {
    %c0_i32 = arith.constant 0 : i32
    %c0_i32_0 = arith.constant 0 : i32
    %c0_i32_1 = arith.constant 0 : i32
    return %c0_i32, %c0_i32_0 : i32, i32
  }
  func.func @transform_4(%arg0: i32) -> (i32, i32) {
    %c0_i32 = arith.constant 0 : i32
    %c0_i32_0 = arith.constant 0 : i32
    return %arg0, %c0_i32 : i32, i32
  }
}

module attributes {stable_mosaic.version = 11 : i64} {
  func.func @_pool_reduce_kernel(%arg0: memref<4x1x128xf32, #tpu.memory_space<vmem>>, %arg1: memref<1x128xf32, #tpu.memory_space<vmem>>) attributes {dimension_semantics = [], scalar_prefetch = 0 : i64, scratch_operands = 0 : i64, tpu.core_type = #tpu.core_type<tc>} {
    %c0 = arith.constant 0 : index
    %c0_0 = arith.constant 0 : index
    %c0_1 = arith.constant 0 : index
    %0 = vector.load %arg0[%c0, %c0_0, %c0_1] : memref<4x1x128xf32, #tpu.memory_space<vmem>>, vector<1x1x128xf32>
    %1 = vector.shape_cast %0 : vector<1x1x128xf32> to vector<1x128xf32>
    %c1 = arith.constant 1 : index
    %c0_2 = arith.constant 0 : index
    %c0_3 = arith.constant 0 : index
    %2 = vector.load %arg0[%c1, %c0_2, %c0_3] : memref<4x1x128xf32, #tpu.memory_space<vmem>>, vector<1x1x128xf32>
    %3 = vector.shape_cast %2 : vector<1x1x128xf32> to vector<1x128xf32>
    %4 = arith.addf %1, %3 : vector<1x128xf32>
    %c2 = arith.constant 2 : index
    %c0_4 = arith.constant 0 : index
    %c0_5 = arith.constant 0 : index
    %5 = vector.load %arg0[%c2, %c0_4, %c0_5] : memref<4x1x128xf32, #tpu.memory_space<vmem>>, vector<1x1x128xf32>
    %6 = vector.shape_cast %5 : vector<1x1x128xf32> to vector<1x128xf32>
    %7 = arith.addf %4, %6 : vector<1x128xf32>
    %c3 = arith.constant 3 : index
    %c0_6 = arith.constant 0 : index
    %c0_7 = arith.constant 0 : index
    %8 = vector.load %arg0[%c3, %c0_6, %c0_7] : memref<4x1x128xf32, #tpu.memory_space<vmem>>, vector<1x1x128xf32>
    %9 = vector.shape_cast %8 : vector<1x1x128xf32> to vector<1x128xf32>
    %10 = arith.addf %7, %9 : vector<1x128xf32>
    %cst = arith.constant 2.500000e-01 : f32
    %11 = vector.broadcast %cst : f32 to vector<1x128xf32>
    %12 = arith.mulf %10, %11 : vector<1x128xf32>
    %c0_8 = arith.constant 0 : index
    %c0_9 = arith.constant 0 : index
    %13 = vector.load %arg1[%c0_8, %c0_9] : memref<1x128xf32, #tpu.memory_space<vmem>>, vector<1x128xf32>
    tpu.vector_store %arg1[%c0_8, %c0_9], %12 {strides = array<i32>} : memref<1x128xf32, #tpu.memory_space<vmem>>, vector<1x128xf32>,
    return
  }
}

module attributes {stable_mosaic.version = 11 : i64} {
  func.func @_bn_relu_conv3x3_kernel(%arg0: i32, %arg1: memref<1x10x32xf32, #tpu.memory_space<vmem>>, %arg2: memref<1x32xf32, #tpu.memory_space<vmem>>, %arg3: memref<1x32xf32, #tpu.memory_space<vmem>>, %arg4: memref<9x4x1xf32, #tpu.memory_space<vmem>>, %arg5: memref<9x32x8xbf16, #tpu.memory_space<vmem>>, %arg6: memref<1x4x8xf32, #tpu.memory_space<vmem>>) attributes {dimension_semantics = [#tpu.dimension_semantics<parallel>], iteration_bounds = array<i64: 2>, scalar_prefetch = 0 : i64, scratch_operands = 0 : i64, tpu.core_type = #tpu.core_type<tc>, window_params = [{transform_indices = @transform_0, window_bounds = array<i64: 1, 10, 32>}, {pipeline_mode = #tpu.pipeline_mode<synchronous>, transform_indices = @transform_1, window_bounds = array<i64: 1, 32>}, {pipeline_mode = #tpu.pipeline_mode<synchronous>, transform_indices = @transform_2, window_bounds = array<i64: 1, 32>}, {pipeline_mode = #tpu.pipeline_mode<synchronous>, transform_indices = @transform_3, window_bounds = array<i64: 9, 4, 1>}, {pipeline_mode = #tpu.pipeline_mode<synchronous>, transform_indices = @transform_4, window_bounds = array<i64: 9, 32, 8>}, {transform_indices = @transform_5, window_bounds = array<i64: 1, 4, 8>}]} {
    %c0 = arith.constant 0 : index
    %c0_0 = arith.constant 0 : index
    %0 = vector.load %arg2[%c0, %c0_0] : memref<1x32xf32, #tpu.memory_space<vmem>>, vector<1x32xf32>
    %c0_1 = arith.constant 0 : index
    %c0_2 = arith.constant 0 : index
    %1 = vector.load %arg3[%c0_1, %c0_2] : memref<1x32xf32, #tpu.memory_space<vmem>>, vector<1x32xf32>
    %cst = arith.constant 0.000000e+00 : f32
    %2 = vector.broadcast %cst : f32 to vector<4x8xf32>
    %c0_3 = arith.constant 0 : index
    %c0_4 = arith.constant 0 : index
    %c0_5 = arith.constant 0 : index
    %3 = vector.load %arg1[%c0_3, %c0_4, %c0_5] : memref<1x10x32xf32, #tpu.memory_space<vmem>>, vector<1x4x32xf32>
    %4 = vector.shape_cast %3 : vector<1x4x32xf32> to vector<4x32xf32>
    %5 = vector.broadcast %0 : vector<1x32xf32> to vector<4x32xf32>
    %6 = arith.mulf %4, %5 : vector<4x32xf32>
    %7 = vector.broadcast %1 : vector<1x32xf32> to vector<4x32xf32>
    %8 = arith.addf %6, %7 : vector<4x32xf32>
    %cst_6 = arith.constant 0.000000e+00 : f32
    %9 = vector.broadcast %cst_6 : f32 to vector<4x32xf32>
    %10 = arith.maximumf %8, %9 : vector<4x32xf32>
    %c0_7 = arith.constant 0 : index
    %c0_8 = arith.constant 0 : index
    %c0_9 = arith.constant 0 : index
    %11 = vector.load %arg4[%c0_7, %c0_8, %c0_9] : memref<9x4x1xf32, #tpu.memory_space<vmem>>, vector<1x4x1xf32>
    %12 = vector.shape_cast %11 : vector<1x4x1xf32> to vector<4x1xf32>
    %13 = vector.broadcast %12 : vector<4x1xf32> to vector<4x32xf32>
    %14 = arith.mulf %10, %13 : vector<4x32xf32>
    %15 = arith.truncf %14 : vector<4x32xf32> to vector<4x32xbf16>
    %c0_10 = arith.constant 0 : index
    %c0_11 = arith.constant 0 : index
    %c0_12 = arith.constant 0 : index
    %16 = vector.load %arg5[%c0_10, %c0_11, %c0_12] : memref<9x32x8xbf16, #tpu.memory_space<vmem>>, vector<1x32x8xbf16>
    %17 = vector.shape_cast %16 : vector<1x32x8xbf16> to vector<32x8xbf16>
    %cst_13 = arith.constant dense<0.000000e+00> : vector<4x8xf32>
    %18 = tpu.matmul %15, %17, %cst_13 {dimension_numbers = #tpu.dot_dimension_numbers<[1], [0], [0], [1], [0, 0, 1, 1], [], []>} : vector<4x32xbf16>, vector<32x8xbf16>, vector<4x8xf32> -> vector<4x8xf32>
    %19 = arith.addf %2, %18 : vector<4x8xf32>
    %c0_14 = arith.constant 0 : index
    %c1 = arith.constant 1 : index
    %c0_15 = arith.constant 0 : index
    %20 = vector.load %arg1[%c0_14, %c1, %c0_15] : memref<1x10x32xf32, #tpu.memory_space<vmem>>, vector<1x4x32xf32>
    %21 = vector.shape_cast %20 : vector<1x4x32xf32> to vector<4x32xf32>
    %22 = vector.broadcast %0 : vector<1x32xf32> to vector<4x32xf32>
    %23 = arith.mulf %21, %22 : vector<4x32xf32>
    %24 = vector.broadcast %1 : vector<1x32xf32> to vector<4x32xf32>
    %25 = arith.addf %23, %24 : vector<4x32xf32>
    %cst_16 = arith.constant 0.000000e+00 : f32
    %26 = vector.broadcast %cst_16 : f32 to vector<4x32xf32>
    %27 = arith.maximumf %25, %26 : vector<4x32xf32>
    %c1_17 = arith.constant 1 : index
    %c0_18 = arith.constant 0 : index
    %c0_19 = arith.constant 0 : index
    %28 = vector.load %arg4[%c1_17, %c0_18, %c0_19] : memref<9x4x1xf32, #tpu.memory_space<vmem>>, vector<1x4x1xf32>
    %29 = vector.shape_cast %28 : vector<1x4x1xf32> to vector<4x1xf32>
    %30 = vector.broadcast %29 : vector<4x1xf32> to vector<4x32xf32>
    %31 = arith.mulf %27, %30 : vector<4x32xf32>
    %32 = arith.truncf %31 : vector<4x32xf32> to vector<4x32xbf16>
    %c1_20 = arith.constant 1 : index
    %c0_21 = arith.constant 0 : index
    %c0_22 = arith.constant 0 : index
    %33 = vector.load %arg5[%c1_20, %c0_21, %c0_22] : memref<9x32x8xbf16, #tpu.memory_space<vmem>>, vector<1x32x8xbf16>
    %34 = vector.shape_cast %33 : vector<1x32x8xbf16> to vector<32x8xbf16>
    %cst_23 = arith.constant dense<0.000000e+00> : vector<4x8xf32>
    %35 = tpu.matmul %32, %34, %cst_23 {dimension_numbers = #tpu.dot_dimension_numbers<[1], [0], [0], [1], [0, 0, 1, 1], [], []>} : vector<4x32xbf16>, vector<32x8xbf16>, vector<4x8xf32> -> vector<4x8xf32>
    %36 = arith.addf %19, %35 : vector<4x8xf32>
    %c0_24 = arith.constant 0 : index
    %c2 = arith.constant 2 : index
    %c0_25 = arith.constant 0 : index
    %37 = vector.load %arg1[%c0_24, %c2, %c0_25] : memref<1x10x32xf32, #tpu.memory_space<vmem>>, vector<1x4x32xf32>
    %38 = vector.shape_cast %37 : vector<1x4x32xf32> to vector<4x32xf32>
    %39 = vector.broadcast %0 : vector<1x32xf32> to vector<4x32xf32>
    %40 = arith.mulf %38, %39 : vector<4x32xf32>
    %41 = vector.broadcast %1 : vector<1x32xf32> to vector<4x32xf32>
    %42 = arith.addf %40, %41 : vector<4x32xf32>
    %cst_26 = arith.constant 0.000000e+00 : f32
    %43 = vector.broadcast %cst_26 : f32 to vector<4x32xf32>
    %44 = arith.maximumf %42, %43 : vector<4x32xf32>
    %c2_27 = arith.constant 2 : index
    %c0_28 = arith.constant 0 : index
    %c0_29 = arith.constant 0 : index
    %45 = vector.load %arg4[%c2_27, %c0_28, %c0_29] : memref<9x4x1xf32, #tpu.memory_space<vmem>>, vector<1x4x1xf32>
    %46 = vector.shape_cast %45 : vector<1x4x1xf32> to vector<4x1xf32>
    %47 = vector.broadcast %46 : vector<4x1xf32> to vector<4x32xf32>
    %48 = arith.mulf %44, %47 : vector<4x32xf32>
    %49 = arith.truncf %48 : vector<4x32xf32> to vector<4x32xbf16>
    %c2_30 = arith.constant 2 : index
    %c0_31 = arith.constant 0 : index
    %c0_32 = arith.constant 0 : index
    %50 = vector.load %arg5[%c2_30, %c0_31, %c0_32] : memref<9x32x8xbf16, #tpu.memory_space<vmem>>, vector<1x32x8xbf16>
    %51 = vector.shape_cast %50 : vector<1x32x8xbf16> to vector<32x8xbf16>
    %cst_33 = arith.constant dense<0.000000e+00> : vector<4x8xf32>
    %52 = tpu.matmul %49, %51, %cst_33 {dimension_numbers = #tpu.dot_dimension_numbers<[1], [0], [0], [1], [0, 0, 1, 1], [], []>} : vector<4x32xbf16>, vector<32x8xbf16>, vector<4x8xf32> -> vector<4x8xf32>
    %53 = arith.addf %36, %52 : vector<4x8xf32>
    %c0_34 = arith.constant 0 : index
    %c2_35 = arith.constant 2 : index
    %c0_36 = arith.constant 0 : index
    %54 = vector.load %arg1[%c0_34, %c2_35, %c0_36] : memref<1x10x32xf32, #tpu.memory_space<vmem>>, vector<1x4x32xf32>
    %55 = vector.shape_cast %54 : vector<1x4x32xf32> to vector<4x32xf32>
    %56 = vector.broadcast %0 : vector<1x32xf32> to vector<4x32xf32>
    %57 = arith.mulf %55, %56 : vector<4x32xf32>
    %58 = vector.broadcast %1 : vector<1x32xf32> to vector<4x32xf32>
    %59 = arith.addf %57, %58 : vector<4x32xf32>
    %cst_37 = arith.constant 0.000000e+00 : f32
    %60 = vector.broadcast %cst_37 : f32 to vector<4x32xf32>
    %61 = arith.maximumf %59, %60 : vector<4x32xf32>
    %c3 = arith.constant 3 : index
    %c0_38 = arith.constant 0 : index
    %c0_39 = arith.constant 0 : index
    %62 = vector.load %arg4[%c3, %c0_38, %c0_39] : memref<9x4x1xf32, #tpu.memory_space<vmem>>, vector<1x4x1xf32>
    %63 = vector.shape_cast %62 : vector<1x4x1xf32> to vector<4x1xf32>
    %64 = vector.broadcast %63 : vector<4x1xf32> to vector<4x32xf32>
    %65 = arith.mulf %61, %64 : vector<4x32xf32>
    %66 = arith.truncf %65 : vector<4x32xf32> to vector<4x32xbf16>
    %c3_40 = arith.constant 3 : index
    %c0_41 = arith.constant 0 : index
    %c0_42 = arith.constant 0 : index
    %67 = vector.load %arg5[%c3_40, %c0_41, %c0_42] : memref<9x32x8xbf16, #tpu.memory_space<vmem>>, vector<1x32x8xbf16>
    %68 = vector.shape_cast %67 : vector<1x32x8xbf16> to vector<32x8xbf16>
    %cst_43 = arith.constant dense<0.000000e+00> : vector<4x8xf32>
    %69 = tpu.matmul %66, %68, %cst_43 {dimension_numbers = #tpu.dot_dimension_numbers<[1], [0], [0], [1], [0, 0, 1, 1], [], []>} : vector<4x32xbf16>, vector<32x8xbf16>, vector<4x8xf32> -> vector<4x8xf32>
    %70 = arith.addf %53, %69 : vector<4x8xf32>
    %c0_44 = arith.constant 0 : index
    %c3_45 = arith.constant 3 : index
    %c0_46 = arith.constant 0 : index
    %71 = vector.load %arg1[%c0_44, %c3_45, %c0_46] : memref<1x10x32xf32, #tpu.memory_space<vmem>>, vector<1x4x32xf32>
    %72 = vector.shape_cast %71 : vector<1x4x32xf32> to vector<4x32xf32>
    %73 = vector.broadcast %0 : vector<1x32xf32> to vector<4x32xf32>
    %74 = arith.mulf %72, %73 : vector<4x32xf32>
    %75 = vector.broadcast %1 : vector<1x32xf32> to vector<4x32xf32>
    %76 = arith.addf %74, %75 : vector<4x32xf32>
    %cst_47 = arith.constant 0.000000e+00 : f32
    %77 = vector.broadcast %cst_47 : f32 to vector<4x32xf32>
    %78 = arith.maximumf %76, %77 : vector<4x32xf32>
    %c4 = arith.constant 4 : index
    %c0_48 = arith.constant 0 : index
    %c0_49 = arith.constant 0 : index
    %79 = vector.load %arg4[%c4, %c0_48, %c0_49] : memref<9x4x1xf32, #tpu.memory_space<vmem>>, vector<1x4x1xf32>
    %80 = vector.shape_cast %79 : vector<1x4x1xf32> to vector<4x1xf32>
    %81 = vector.broadcast %80 : vector<4x1xf32> to vector<4x32xf32>
    %82 = arith.mulf %78, %81 : vector<4x32xf32>
    %83 = arith.truncf %82 : vector<4x32xf32> to vector<4x32xbf16>
    %c4_50 = arith.constant 4 : index
    %c0_51 = arith.constant 0 : index
    %c0_52 = arith.constant 0 : index
    %84 = vector.load %arg5[%c4_50, %c0_51, %c0_52] : memref<9x32x8xbf16, #tpu.memory_space<vmem>>, vector<1x32x8xbf16>
    %85 = vector.shape_cast %84 : vector<1x32x8xbf16> to vector<32x8xbf16>
    %cst_53 = arith.constant dense<0.000000e+00> : vector<4x8xf32>
    %86 = tpu.matmul %83, %85, %cst_53 {dimension_numbers = #tpu.dot_dimension_numbers<[1], [0], [0], [1], [0, 0, 1, 1], [], []>} : vector<4x32xbf16>, vector<32x8xbf16>, vector<4x8xf32> -> vector<4x8xf32>
    %87 = arith.addf %70, %86 : vector<4x8xf32>
    %c0_54 = arith.constant 0 : index
    %c4_55 = arith.constant 4 : index
    %c0_56 = arith.constant 0 : index
    %88 = vector.load %arg1[%c0_54, %c4_55, %c0_56] : memref<1x10x32xf32, #tpu.memory_space<vmem>>, vector<1x4x32xf32>
    %89 = vector.shape_cast %88 : vector<1x4x32xf32> to vector<4x32xf32>
    %90 = vector.broadcast %0 : vector<1x32xf32> to vector<4x32xf32>
    %91 = arith.mulf %89, %90 : vector<4x32xf32>
    %92 = vector.broadcast %1 : vector<1x32xf32> to vector<4x32xf32>
    %93 = arith.addf %91, %92 : vector<4x32xf32>
    %cst_57 = arith.constant 0.000000e+00 : f32
    %94 = vector.broadcast %cst_57 : f32 to vector<4x32xf32>
    %95 = arith.maximumf %93, %94 : vector<4x32xf32>
    %c5 = arith.constant 5 : index
    %c0_58 = arith.constant 0 : index
    %c0_59 = arith.constant 0 : index
    %96 = vector.load %arg4[%c5, %c0_58, %c0_59] : memref<9x4x1xf32, #tpu.memory_space<vmem>>, vector<1x4x1xf32>
    %97 = vector.shape_cast %96 : vector<1x4x1xf32> to vector<4x1xf32>
    %98 = vector.broadcast %97 : vector<4x1xf32> to vector<4x32xf32>
    %99 = arith.mulf %95, %98 : vector<4x32xf32>
    %100 = arith.truncf %99 : vector<4x32xf32> to vector<4x32xbf16>
    %c5_60 = arith.constant 5 : index
    %c0_61 = arith.constant 0 : index
    %c0_62 = arith.constant 0 : index
    %101 = vector.load %arg5[%c5_60, %c0_61, %c0_62] : memref<9x32x8xbf16, #tpu.memory_space<vmem>>, vector<1x32x8xbf16>
    %102 = vector.shape_cast %101 : vector<1x32x8xbf16> to vector<32x8xbf16>
    %cst_63 = arith.constant dense<0.000000e+00> : vector<4x8xf32>
    %103 = tpu.matmul %100, %102, %cst_63 {dimension_numbers = #tpu.dot_dimension_numbers<[1], [0], [0], [1], [0, 0, 1, 1], [], []>} : vector<4x32xbf16>, vector<32x8xbf16>, vector<4x8xf32> -> vector<4x8xf32>
    %104 = arith.addf %87, %103 : vector<4x8xf32>
    %c0_64 = arith.constant 0 : index
    %c4_65 = arith.constant 4 : index
    %c0_66 = arith.constant 0 : index
    %105 = vector.load %arg1[%c0_64, %c4_65, %c0_66] : memref<1x10x32xf32, #tpu.memory_space<vmem>>, vector<1x4x32xf32>
    %106 = vector.shape_cast %105 : vector<1x4x32xf32> to vector<4x32xf32>
    %107 = vector.broadcast %0 : vector<1x32xf32> to vector<4x32xf32>
    %108 = arith.mulf %106, %107 : vector<4x32xf32>
    %109 = vector.broadcast %1 : vector<1x32xf32> to vector<4x32xf32>
    %110 = arith.addf %108, %109 : vector<4x32xf32>
    %cst_67 = arith.constant 0.000000e+00 : f32
    %111 = vector.broadcast %cst_67 : f32 to vector<4x32xf32>
    %112 = arith.maximumf %110, %111 : vector<4x32xf32>
    %c6 = arith.constant 6 : index
    %c0_68 = arith.constant 0 : index
    %c0_69 = arith.constant 0 : index
    %113 = vector.load %arg4[%c6, %c0_68, %c0_69] : memref<9x4x1xf32, #tpu.memory_space<vmem>>, vector<1x4x1xf32>
    %114 = vector.shape_cast %113 : vector<1x4x1xf32> to vector<4x1xf32>
    %115 = vector.broadcast %114 : vector<4x1xf32> to vector<4x32xf32>
    %116 = arith.mulf %112, %115 : vector<4x32xf32>
    %117 = arith.truncf %116 : vector<4x32xf32> to vector<4x32xbf16>
    %c6_70 = arith.constant 6 : index
    %c0_71 = arith.constant 0 : index
    %c0_72 = arith.constant 0 : index
    %118 = vector.load %arg5[%c6_70, %c0_71, %c0_72] : memref<9x32x8xbf16, #tpu.memory_space<vmem>>, vector<1x32x8xbf16>
    %119 = vector.shape_cast %118 : vector<1x32x8xbf16> to vector<32x8xbf16>
    %cst_73 = arith.constant dense<0.000000e+00> : vector<4x8xf32>
    %120 = tpu.matmul %117, %119, %cst_73 {dimension_numbers = #tpu.dot_dimension_numbers<[1], [0], [0], [1], [0, 0, 1, 1], [], []>} : vector<4x32xbf16>, vector<32x8xbf16>, vector<4x8xf32> -> vector<4x8xf32>
    %121 = arith.addf %104, %120 : vector<4x8xf32>
    %c0_74 = arith.constant 0 : index
    %c5_75 = arith.constant 5 : index
    %c0_76 = arith.constant 0 : index
    %122 = vector.load %arg1[%c0_74, %c5_75, %c0_76] : memref<1x10x32xf32, #tpu.memory_space<vmem>>, vector<1x4x32xf32>
    %123 = vector.shape_cast %122 : vector<1x4x32xf32> to vector<4x32xf32>
    %124 = vector.broadcast %0 : vector<1x32xf32> to vector<4x32xf32>
    %125 = arith.mulf %123, %124 : vector<4x32xf32>
    %126 = vector.broadcast %1 : vector<1x32xf32> to vector<4x32xf32>
    %127 = arith.addf %125, %126 : vector<4x32xf32>
    %cst_77 = arith.constant 0.000000e+00 : f32
    %128 = vector.broadcast %cst_77 : f32 to vector<4x32xf32>
    %129 = arith.maximumf %127, %128 : vector<4x32xf32>
    %c7 = arith.constant 7 : index
    %c0_78 = arith.constant 0 : index
    %c0_79 = arith.constant 0 : index
    %130 = vector.load %arg4[%c7, %c0_78, %c0_79] : memref<9x4x1xf32, #tpu.memory_space<vmem>>, vector<1x4x1xf32>
    %131 = vector.shape_cast %130 : vector<1x4x1xf32> to vector<4x1xf32>
    %132 = vector.broadcast %131 : vector<4x1xf32> to vector<4x32xf32>
    %133 = arith.mulf %129, %132 : vector<4x32xf32>
    %134 = arith.truncf %133 : vector<4x32xf32> to vector<4x32xbf16>
    %c7_80 = arith.constant 7 : index
    %c0_81 = arith.constant 0 : index
    %c0_82 = arith.constant 0 : index
    %135 = vector.load %arg5[%c7_80, %c0_81, %c0_82] : memref<9x32x8xbf16, #tpu.memory_space<vmem>>, vector<1x32x8xbf16>
    %136 = vector.shape_cast %135 : vector<1x32x8xbf16> to vector<32x8xbf16>
    %cst_83 = arith.constant dense<0.000000e+00> : vector<4x8xf32>
    %137 = tpu.matmul %134, %136, %cst_83 {dimension_numbers = #tpu.dot_dimension_numbers<[1], [0], [0], [1], [0, 0, 1, 1], [], []>} : vector<4x32xbf16>, vector<32x8xbf16>, vector<4x8xf32> -> vector<4x8xf32>
    %138 = arith.addf %121, %137 : vector<4x8xf32>
    %c0_84 = arith.constant 0 : index
    %c6_85 = arith.constant 6 : index
    %c0_86 = arith.constant 0 : index
    %139 = vector.load %arg1[%c0_84, %c6_85, %c0_86] : memref<1x10x32xf32, #tpu.memory_space<vmem>>, vector<1x4x32xf32>
    %140 = vector.shape_cast %139 : vector<1x4x32xf32> to vector<4x32xf32>
    %141 = vector.broadcast %0 : vector<1x32xf32> to vector<4x32xf32>
    %142 = arith.mulf %140, %141 : vector<4x32xf32>
    %143 = vector.broadcast %1 : vector<1x32xf32> to vector<4x32xf32>
    %144 = arith.addf %142, %143 : vector<4x32xf32>
    %cst_87 = arith.constant 0.000000e+00 : f32
    %145 = vector.broadcast %cst_87 : f32 to vector<4x32xf32>
    %146 = arith.maximumf %144, %145 : vector<4x32xf32>
    %c8 = arith.constant 8 : index
    %c0_88 = arith.constant 0 : index
    %c0_89 = arith.constant 0 : index
    %147 = vector.load %arg4[%c8, %c0_88, %c0_89] : memref<9x4x1xf32, #tpu.memory_space<vmem>>, vector<1x4x1xf32>
    %148 = vector.shape_cast %147 : vector<1x4x1xf32> to vector<4x1xf32>
    %149 = vector.broadcast %148 : vector<4x1xf32> to vector<4x32xf32>
    %150 = arith.mulf %146, %149 : vector<4x32xf32>
    %151 = arith.truncf %150 : vector<4x32xf32> to vector<4x32xbf16>
    %c8_90 = arith.constant 8 : index
    %c0_91 = arith.constant 0 : index
    %c0_92 = arith.constant 0 : index
    %152 = vector.load %arg5[%c8_90, %c0_91, %c0_92] : memref<9x32x8xbf16, #tpu.memory_space<vmem>>, vector<1x32x8xbf16>
    %153 = vector.shape_cast %152 : vector<1x32x8xbf16> to vector<32x8xbf16>
    %cst_93 = arith.constant dense<0.000000e+00> : vector<4x8xf32>
    %154 = tpu.matmul %151, %153, %cst_93 {dimension_numbers = #tpu.dot_dimension_numbers<[1], [0], [0], [1], [0, 0, 1, 1], [], []>} : vector<4x32xbf16>, vector<32x8xbf16>, vector<4x8xf32> -> vector<4x8xf32>
    %155 = arith.addf %138, %154 : vector<4x8xf32>
    %c0_94 = arith.constant 0 : index
    %c0_95 = arith.constant 0 : index
    %c0_96 = arith.constant 0 : index
    %156 = vector.load %arg6[%c0_94, %c0_95, %c0_96] : memref<1x4x8xf32, #tpu.memory_space<vmem>>, vector<1x4x8xf32>
    %157 = vector.shape_cast %156 : vector<1x4x8xf32> to vector<4x8xf32>
    %158 = vector.shape_cast %155 : vector<4x8xf32> to vector<1x4x8xf32>
    tpu.vector_store %arg6[%c0_94, %c0_95, %c0_96], %158 {strides = array<i32>} : memref<1x4x8xf32, #tpu.memory_space<vmem>>, vector<1x4x8xf32>,
    return
  }
  func.func @transform_0(%arg0: i32) -> (i32, i32, i32) {
    %c0_i32 = arith.constant 0 : i32
    %c0_i32_0 = arith.constant 0 : i32
    %c0_i32_1 = arith.constant 0 : i32
    return %arg0, %c0_i32, %c0_i32_0 : i32, i32, i32
  }
  func.func @transform_1(%arg0: i32) -> (i32, i32) {
    %c0_i32 = arith.constant 0 : i32
    %c0_i32_0 = arith.constant 0 : i32
    %c0_i32_1 = arith.constant 0 : i32
    return %c0_i32, %c0_i32_0 : i32, i32
  }
  func.func @transform_2(%arg0: i32) -> (i32, i32) {
    %c0_i32 = arith.constant 0 : i32
    %c0_i32_0 = arith.constant 0 : i32
    %c0_i32_1 = arith.constant 0 : i32
    return %c0_i32, %c0_i32_0 : i32, i32
  }
  func.func @transform_3(%arg0: i32) -> (i32, i32, i32) {
    %c0_i32 = arith.constant 0 : i32
    %c0_i32_0 = arith.constant 0 : i32
    %c0_i32_1 = arith.constant 0 : i32
    %c0_i32_2 = arith.constant 0 : i32
    return %c0_i32, %c0_i32_0, %c0_i32_1 : i32, i32, i32
  }
  func.func @transform_4(%arg0: i32) -> (i32, i32, i32) {
    %c0_i32 = arith.constant 0 : i32
    %c0_i32_0 = arith.constant 0 : i32
    %c0_i32_1 = arith.constant 0 : i32
    %c0_i32_2 = arith.constant 0 : i32
    return %c0_i32, %c0_i32_0, %c0_i32_1 : i32, i32, i32
  }
  func.func @transform_5(%arg0: i32) -> (i32, i32, i32) {
    %c0_i32 = arith.constant 0 : i32
    %c0_i32_0 = arith.constant 0 : i32
    %c0_i32_1 = arith.constant 0 : i32
    return %arg0, %c0_i32, %c0_i32_0 : i32, i32, i32
  }
}

module attributes {stable_mosaic.version = 11 : i64} {
  func.func @_bn_relu_matmul_kernel(%arg0: i32, %arg1: memref<8x24xf32, #tpu.memory_space<vmem>>, %arg2: memref<1x24xf32, #tpu.memory_space<vmem>>, %arg3: memref<1x24xf32, #tpu.memory_space<vmem>>, %arg4: memref<24x32xbf16, #tpu.memory_space<vmem>>, %arg5: memref<8x32xf32, #tpu.memory_space<vmem>>) attributes {dimension_semantics = [#tpu.dimension_semantics<parallel>], iteration_bounds = array<i64: 1>, scalar_prefetch = 0 : i64, scratch_operands = 0 : i64, tpu.core_type = #tpu.core_type<tc>, window_params = [{transform_indices = @transform_0, window_bounds = array<i64: 8, 24>}, {pipeline_mode = #tpu.pipeline_mode<synchronous>, transform_indices = @transform_1, window_bounds = array<i64: 1, 24>}, {pipeline_mode = #tpu.pipeline_mode<synchronous>, transform_indices = @transform_2, window_bounds = array<i64: 1, 24>}, {pipeline_mode = #tpu.pipeline_mode<synchronous>, transform_indices = @transform_3, window_bounds = array<i64: 24, 32>}, {transform_indices = @transform_4, window_bounds = array<i64: 8, 32>}]} {
    %c0 = arith.constant 0 : index
    %c0_0 = arith.constant 0 : index
    %0 = vector.load %arg1[%c0, %c0_0] : memref<8x24xf32, #tpu.memory_space<vmem>>, vector<8x24xf32>
    %c0_1 = arith.constant 0 : index
    %c0_2 = arith.constant 0 : index
    %1 = vector.load %arg2[%c0_1, %c0_2] : memref<1x24xf32, #tpu.memory_space<vmem>>, vector<1x24xf32>
    %2 = vector.broadcast %1 : vector<1x24xf32> to vector<8x24xf32>
    %3 = arith.mulf %0, %2 : vector<8x24xf32>
    %c0_3 = arith.constant 0 : index
    %c0_4 = arith.constant 0 : index
    %4 = vector.load %arg3[%c0_3, %c0_4] : memref<1x24xf32, #tpu.memory_space<vmem>>, vector<1x24xf32>
    %5 = vector.broadcast %4 : vector<1x24xf32> to vector<8x24xf32>
    %6 = arith.addf %3, %5 : vector<8x24xf32>
    %cst = arith.constant 0.000000e+00 : f32
    %7 = vector.broadcast %cst : f32 to vector<8x24xf32>
    %8 = arith.maximumf %6, %7 : vector<8x24xf32>
    %9 = arith.truncf %8 : vector<8x24xf32> to vector<8x24xbf16>
    %c0_5 = arith.constant 0 : index
    %c0_6 = arith.constant 0 : index
    %10 = vector.load %arg4[%c0_5, %c0_6] : memref<24x32xbf16, #tpu.memory_space<vmem>>, vector<24x32xbf16>
    %cst_7 = arith.constant dense<0.000000e+00> : vector<8x32xf32>
    %11 = tpu.matmul %9, %10, %cst_7 {dimension_numbers = #tpu.dot_dimension_numbers<[1], [0], [0], [1], [0, 0, 1, 1], [], []>} : vector<8x24xbf16>, vector<24x32xbf16>, vector<8x32xf32> -> vector<8x32xf32>
    %c0_8 = arith.constant 0 : index
    %c0_9 = arith.constant 0 : index
    %12 = vector.load %arg5[%c0_8, %c0_9] : memref<8x32xf32, #tpu.memory_space<vmem>>, vector<8x32xf32>
    tpu.vector_store %arg5[%c0_8, %c0_9], %11 {strides = array<i32>} : memref<8x32xf32, #tpu.memory_space<vmem>>, vector<8x32xf32>,
    return
  }
  func.func @transform_0(%arg0: i32) -> (i32, i32) {
    %c0_i32 = arith.constant 0 : i32
    %c0_i32_0 = arith.constant 0 : i32
    return %arg0, %c0_i32 : i32, i32
  }
  func.func @transform_1(%arg0: i32) -> (i32, i32) {
    %c0_i32 = arith.constant 0 : i32
    %c0_i32_0 = arith.constant 0 : i32
    %c0_i32_1 = arith.constant 0 : i32
    return %c0_i32, %c0_i32_0 : i32, i32
  }
  func.func @transform_2(%arg0: i32) -> (i32, i32) {
    %c0_i32 = arith.constant 0 : i32
    %c0_i32_0 = arith.constant 0 : i32
    %c0_i32_1 = arith.constant 0 : i32
    return %c0_i32, %c0_i32_0 : i32, i32
  }
  func.func @transform_3(%arg0: i32) -> (i32, i32) {
    %c0_i32 = arith.constant 0 : i32
    %c0_i32_0 = arith.constant 0 : i32
    %c0_i32_1 = arith.constant 0 : i32
    return %c0_i32, %c0_i32_0 : i32, i32
  }
  func.func @transform_4(%arg0: i32) -> (i32, i32) {
    %c0_i32 = arith.constant 0 : i32
    %c0_i32_0 = arith.constant 0 : i32
    return %arg0, %c0_i32 : i32, i32
  }
}

module attributes {stable_mosaic.version = 11 : i64} {
  func.func @_bn_relu_matmul_kernel(%arg0: i32, %arg1: memref<8x32xf32, #tpu.memory_space<vmem>>, %arg2: memref<1x32xf32, #tpu.memory_space<vmem>>, %arg3: memref<1x32xf32, #tpu.memory_space<vmem>>, %arg4: memref<32x16xbf16, #tpu.memory_space<vmem>>, %arg5: memref<8x16xf32, #tpu.memory_space<vmem>>) attributes {dimension_semantics = [#tpu.dimension_semantics<parallel>], iteration_bounds = array<i64: 1>, scalar_prefetch = 0 : i64, scratch_operands = 0 : i64, tpu.core_type = #tpu.core_type<tc>, window_params = [{transform_indices = @transform_0, window_bounds = array<i64: 8, 32>}, {pipeline_mode = #tpu.pipeline_mode<synchronous>, transform_indices = @transform_1, window_bounds = array<i64: 1, 32>}, {pipeline_mode = #tpu.pipeline_mode<synchronous>, transform_indices = @transform_2, window_bounds = array<i64: 1, 32>}, {pipeline_mode = #tpu.pipeline_mode<synchronous>, transform_indices = @transform_3, window_bounds = array<i64: 32, 16>}, {transform_indices = @transform_4, window_bounds = array<i64: 8, 16>}]} {
    %c0 = arith.constant 0 : index
    %c0_0 = arith.constant 0 : index
    %0 = vector.load %arg1[%c0, %c0_0] : memref<8x32xf32, #tpu.memory_space<vmem>>, vector<8x32xf32>
    %c0_1 = arith.constant 0 : index
    %c0_2 = arith.constant 0 : index
    %1 = vector.load %arg2[%c0_1, %c0_2] : memref<1x32xf32, #tpu.memory_space<vmem>>, vector<1x32xf32>
    %2 = vector.broadcast %1 : vector<1x32xf32> to vector<8x32xf32>
    %3 = arith.mulf %0, %2 : vector<8x32xf32>
    %c0_3 = arith.constant 0 : index
    %c0_4 = arith.constant 0 : index
    %4 = vector.load %arg3[%c0_3, %c0_4] : memref<1x32xf32, #tpu.memory_space<vmem>>, vector<1x32xf32>
    %5 = vector.broadcast %4 : vector<1x32xf32> to vector<8x32xf32>
    %6 = arith.addf %3, %5 : vector<8x32xf32>
    %cst = arith.constant 0.000000e+00 : f32
    %7 = vector.broadcast %cst : f32 to vector<8x32xf32>
    %8 = arith.maximumf %6, %7 : vector<8x32xf32>
    %9 = arith.truncf %8 : vector<8x32xf32> to vector<8x32xbf16>
    %c0_5 = arith.constant 0 : index
    %c0_6 = arith.constant 0 : index
    %10 = vector.load %arg4[%c0_5, %c0_6] : memref<32x16xbf16, #tpu.memory_space<vmem>>, vector<32x16xbf16>
    %cst_7 = arith.constant dense<0.000000e+00> : vector<8x16xf32>
    %11 = tpu.matmul %9, %10, %cst_7 {dimension_numbers = #tpu.dot_dimension_numbers<[1], [0], [0], [1], [0, 0, 1, 1], [], []>} : vector<8x32xbf16>, vector<32x16xbf16>, vector<8x16xf32> -> vector<8x16xf32>
    %c0_8 = arith.constant 0 : index
    %c0_9 = arith.constant 0 : index
    %12 = vector.load %arg5[%c0_8, %c0_9] : memref<8x16xf32, #tpu.memory_space<vmem>>, vector<8x16xf32>
    tpu.vector_store %arg5[%c0_8, %c0_9], %11 {strides = array<i32>} : memref<8x16xf32, #tpu.memory_space<vmem>>, vector<8x16xf32>,
    return
  }
  func.func @transform_0(%arg0: i32) -> (i32, i32) {
    %c0_i32 = arith.constant 0 : i32
    %c0_i32_0 = arith.constant 0 : i32
    return %arg0, %c0_i32 : i32, i32
  }
  func.func @transform_1(%arg0: i32) -> (i32, i32) {
    %c0_i32 = arith.constant 0 : i32
    %c0_i32_0 = arith.constant 0 : i32
    %c0_i32_1 = arith.constant 0 : i32
    return %c0_i32, %c0_i32_0 : i32, i32
  }
  func.func @transform_2(%arg0: i32) -> (i32, i32) {
    %c0_i32 = arith.constant 0 : i32
    %c0_i32_0 = arith.constant 0 : i32
    %c0_i32_1 = arith.constant 0 : i32
    return %c0_i32, %c0_i32_0 : i32, i32
  }
  func.func @transform_3(%arg0: i32) -> (i32, i32) {
    %c0_i32 = arith.constant 0 : i32
    %c0_i32_0 = arith.constant 0 : i32
    %c0_i32_1 = arith.constant 0 : i32
    return %c0_i32, %c0_i32_0 : i32, i32
  }
  func.func @transform_4(%arg0: i32) -> (i32, i32) {
    %c0_i32 = arith.constant 0 : i32
    %c0_i32_0 = arith.constant 0 : i32
    return %arg0, %c0_i32 : i32, i32
  }
}

module attributes {stable_mosaic.version = 11 : i64} {
  func.func @_bn_relu_matmul_kernel(%arg0: i32, %arg1: memref<2x16xf32, #tpu.memory_space<vmem>>, %arg2: memref<1x16xf32, #tpu.memory_space<vmem>>, %arg3: memref<1x16xf32, #tpu.memory_space<vmem>>, %arg4: memref<16x32xbf16, #tpu.memory_space<vmem>>, %arg5: memref<2x32xf32, #tpu.memory_space<vmem>>) attributes {dimension_semantics = [#tpu.dimension_semantics<parallel>], iteration_bounds = array<i64: 1>, scalar_prefetch = 0 : i64, scratch_operands = 0 : i64, tpu.core_type = #tpu.core_type<tc>, window_params = [{transform_indices = @transform_0, window_bounds = array<i64: 2, 16>}, {pipeline_mode = #tpu.pipeline_mode<synchronous>, transform_indices = @transform_1, window_bounds = array<i64: 1, 16>}, {pipeline_mode = #tpu.pipeline_mode<synchronous>, transform_indices = @transform_2, window_bounds = array<i64: 1, 16>}, {pipeline_mode = #tpu.pipeline_mode<synchronous>, transform_indices = @transform_3, window_bounds = array<i64: 16, 32>}, {transform_indices = @transform_4, window_bounds = array<i64: 2, 32>}]} {
    %c0 = arith.constant 0 : index
    %c0_0 = arith.constant 0 : index
    %0 = vector.load %arg1[%c0, %c0_0] : memref<2x16xf32, #tpu.memory_space<vmem>>, vector<2x16xf32>
    %c0_1 = arith.constant 0 : index
    %c0_2 = arith.constant 0 : index
    %1 = vector.load %arg2[%c0_1, %c0_2] : memref<1x16xf32, #tpu.memory_space<vmem>>, vector<1x16xf32>
    %2 = vector.broadcast %1 : vector<1x16xf32> to vector<2x16xf32>
    %3 = arith.mulf %0, %2 : vector<2x16xf32>
    %c0_3 = arith.constant 0 : index
    %c0_4 = arith.constant 0 : index
    %4 = vector.load %arg3[%c0_3, %c0_4] : memref<1x16xf32, #tpu.memory_space<vmem>>, vector<1x16xf32>
    %5 = vector.broadcast %4 : vector<1x16xf32> to vector<2x16xf32>
    %6 = arith.addf %3, %5 : vector<2x16xf32>
    %cst = arith.constant 0.000000e+00 : f32
    %7 = vector.broadcast %cst : f32 to vector<2x16xf32>
    %8 = arith.maximumf %6, %7 : vector<2x16xf32>
    %9 = arith.truncf %8 : vector<2x16xf32> to vector<2x16xbf16>
    %c0_5 = arith.constant 0 : index
    %c0_6 = arith.constant 0 : index
    %10 = vector.load %arg4[%c0_5, %c0_6] : memref<16x32xbf16, #tpu.memory_space<vmem>>, vector<16x32xbf16>
    %cst_7 = arith.constant dense<0.000000e+00> : vector<2x32xf32>
    %11 = tpu.matmul %9, %10, %cst_7 {dimension_numbers = #tpu.dot_dimension_numbers<[1], [0], [0], [1], [0, 0, 1, 1], [], []>} : vector<2x16xbf16>, vector<16x32xbf16>, vector<2x32xf32> -> vector<2x32xf32>
    %c0_8 = arith.constant 0 : index
    %c0_9 = arith.constant 0 : index
    %12 = vector.load %arg5[%c0_8, %c0_9] : memref<2x32xf32, #tpu.memory_space<vmem>>, vector<2x32xf32>
    tpu.vector_store %arg5[%c0_8, %c0_9], %11 {strides = array<i32>} : memref<2x32xf32, #tpu.memory_space<vmem>>, vector<2x32xf32>,
    return
  }
  func.func @transform_0(%arg0: i32) -> (i32, i32) {
    %c0_i32 = arith.constant 0 : i32
    %c0_i32_0 = arith.constant 0 : i32
    return %arg0, %c0_i32 : i32, i32
  }
  func.func @transform_1(%arg0: i32) -> (i32, i32) {
    %c0_i32 = arith.constant 0 : i32
    %c0_i32_0 = arith.constant 0 : i32
    %c0_i32_1 = arith.constant 0 : i32
    return %c0_i32, %c0_i32_0 : i32, i32
  }
  func.func @transform_2(%arg0: i32) -> (i32, i32) {
    %c0_i32 = arith.constant 0 : i32
    %c0_i32_0 = arith.constant 0 : i32
    %c0_i32_1 = arith.constant 0 : i32
    return %c0_i32, %c0_i32_0 : i32, i32
  }
  func.func @transform_3(%arg0: i32) -> (i32, i32) {
    %c0_i32 = arith.constant 0 : i32
    %c0_i32_0 = arith.constant 0 : i32
    %c0_i32_1 = arith.constant 0 : i32
    return %c0_i32, %c0_i32_0 : i32, i32
  }
  func.func @transform_4(%arg0: i32) -> (i32, i32) {
    %c0_i32 = arith.constant 0 : i32
    %c0_i32_0 = arith.constant 0 : i32
    return %arg0, %c0_i32 : i32, i32
  }
}

module attributes {stable_mosaic.version = 11 : i64} {
  func.func @_bn_relu_conv3x3_kernel(%arg0: i32, %arg1: memref<1x5x32xf32, #tpu.memory_space<vmem>>, %arg2: memref<1x32xf32, #tpu.memory_space<vmem>>, %arg3: memref<1x32xf32, #tpu.memory_space<vmem>>, %arg4: memref<9x1x1xf32, #tpu.memory_space<vmem>>, %arg5: memref<9x32x8xbf16, #tpu.memory_space<vmem>>, %arg6: memref<1x1x8xf32, #tpu.memory_space<vmem>>) attributes {dimension_semantics = [#tpu.dimension_semantics<parallel>], iteration_bounds = array<i64: 2>, scalar_prefetch = 0 : i64, scratch_operands = 0 : i64, tpu.core_type = #tpu.core_type<tc>, window_params = [{transform_indices = @transform_0, window_bounds = array<i64: 1, 5, 32>}, {pipeline_mode = #tpu.pipeline_mode<synchronous>, transform_indices = @transform_1, window_bounds = array<i64: 1, 32>}, {pipeline_mode = #tpu.pipeline_mode<synchronous>, transform_indices = @transform_2, window_bounds = array<i64: 1, 32>}, {pipeline_mode = #tpu.pipeline_mode<synchronous>, transform_indices = @transform_3, window_bounds = array<i64: 9, 1, 1>}, {pipeline_mode = #tpu.pipeline_mode<synchronous>, transform_indices = @transform_4, window_bounds = array<i64: 9, 32, 8>}, {transform_indices = @transform_5, window_bounds = array<i64: 1, 1, 8>}]} {
    %c0 = arith.constant 0 : index
    %c0_0 = arith.constant 0 : index
    %0 = vector.load %arg2[%c0, %c0_0] : memref<1x32xf32, #tpu.memory_space<vmem>>, vector<1x32xf32>
    %c0_1 = arith.constant 0 : index
    %c0_2 = arith.constant 0 : index
    %1 = vector.load %arg3[%c0_1, %c0_2] : memref<1x32xf32, #tpu.memory_space<vmem>>, vector<1x32xf32>
    %cst = arith.constant 0.000000e+00 : f32
    %2 = vector.broadcast %cst : f32 to vector<1x8xf32>
    %c0_3 = arith.constant 0 : index
    %c0_4 = arith.constant 0 : index
    %c0_5 = arith.constant 0 : index
    %3 = vector.load %arg1[%c0_3, %c0_4, %c0_5] : memref<1x5x32xf32, #tpu.memory_space<vmem>>, vector<1x1x32xf32>
    %4 = vector.shape_cast %3 : vector<1x1x32xf32> to vector<1x32xf32>
    %5 = arith.mulf %4, %0 : vector<1x32xf32>
    %6 = arith.addf %5, %1 : vector<1x32xf32>
    %cst_6 = arith.constant 0.000000e+00 : f32
    %7 = vector.broadcast %cst_6 : f32 to vector<1x32xf32>
    %8 = arith.maximumf %6, %7 : vector<1x32xf32>
    %c0_7 = arith.constant 0 : index
    %c0_8 = arith.constant 0 : index
    %c0_9 = arith.constant 0 : index
    %9 = vector.load %arg4[%c0_7, %c0_8, %c0_9] : memref<9x1x1xf32, #tpu.memory_space<vmem>>, vector<1x1x1xf32>
    %10 = vector.shape_cast %9 : vector<1x1x1xf32> to vector<1x1xf32>
    %11 = vector.broadcast %10 : vector<1x1xf32> to vector<1x32xf32>
    %12 = arith.mulf %8, %11 : vector<1x32xf32>
    %13 = arith.truncf %12 : vector<1x32xf32> to vector<1x32xbf16>
    %c0_10 = arith.constant 0 : index
    %c0_11 = arith.constant 0 : index
    %c0_12 = arith.constant 0 : index
    %14 = vector.load %arg5[%c0_10, %c0_11, %c0_12] : memref<9x32x8xbf16, #tpu.memory_space<vmem>>, vector<1x32x8xbf16>
    %15 = vector.shape_cast %14 : vector<1x32x8xbf16> to vector<32x8xbf16>
    %cst_13 = arith.constant dense<0.000000e+00> : vector<1x8xf32>
    %16 = tpu.matmul %13, %15, %cst_13 {dimension_numbers = #tpu.dot_dimension_numbers<[1], [0], [0], [1], [0, 0, 1, 1], [], []>} : vector<1x32xbf16>, vector<32x8xbf16>, vector<1x8xf32> -> vector<1x8xf32>
    %17 = arith.addf %2, %16 : vector<1x8xf32>
    %c0_14 = arith.constant 0 : index
    %c1 = arith.constant 1 : index
    %c0_15 = arith.constant 0 : index
    %18 = vector.load %arg1[%c0_14, %c1, %c0_15] : memref<1x5x32xf32, #tpu.memory_space<vmem>>, vector<1x1x32xf32>
    %19 = vector.shape_cast %18 : vector<1x1x32xf32> to vector<1x32xf32>
    %20 = arith.mulf %19, %0 : vector<1x32xf32>
    %21 = arith.addf %20, %1 : vector<1x32xf32>
    %cst_16 = arith.constant 0.000000e+00 : f32
    %22 = vector.broadcast %cst_16 : f32 to vector<1x32xf32>
    %23 = arith.maximumf %21, %22 : vector<1x32xf32>
    %c1_17 = arith.constant 1 : index
    %c0_18 = arith.constant 0 : index
    %c0_19 = arith.constant 0 : index
    %24 = vector.load %arg4[%c1_17, %c0_18, %c0_19] : memref<9x1x1xf32, #tpu.memory_space<vmem>>, vector<1x1x1xf32>
    %25 = vector.shape_cast %24 : vector<1x1x1xf32> to vector<1x1xf32>
    %26 = vector.broadcast %25 : vector<1x1xf32> to vector<1x32xf32>
    %27 = arith.mulf %23, %26 : vector<1x32xf32>
    %28 = arith.truncf %27 : vector<1x32xf32> to vector<1x32xbf16>
    %c1_20 = arith.constant 1 : index
    %c0_21 = arith.constant 0 : index
    %c0_22 = arith.constant 0 : index
    %29 = vector.load %arg5[%c1_20, %c0_21, %c0_22] : memref<9x32x8xbf16, #tpu.memory_space<vmem>>, vector<1x32x8xbf16>
    %30 = vector.shape_cast %29 : vector<1x32x8xbf16> to vector<32x8xbf16>
    %cst_23 = arith.constant dense<0.000000e+00> : vector<1x8xf32>
    %31 = tpu.matmul %28, %30, %cst_23 {dimension_numbers = #tpu.dot_dimension_numbers<[1], [0], [0], [1], [0, 0, 1, 1], [], []>} : vector<1x32xbf16>, vector<32x8xbf16>, vector<1x8xf32> -> vector<1x8xf32>
    %32 = arith.addf %17, %31 : vector<1x8xf32>
    %c0_24 = arith.constant 0 : index
    %c2 = arith.constant 2 : index
    %c0_25 = arith.constant 0 : index
    %33 = vector.load %arg1[%c0_24, %c2, %c0_25] : memref<1x5x32xf32, #tpu.memory_space<vmem>>, vector<1x1x32xf32>
    %34 = vector.shape_cast %33 : vector<1x1x32xf32> to vector<1x32xf32>
    %35 = arith.mulf %34, %0 : vector<1x32xf32>
    %36 = arith.addf %35, %1 : vector<1x32xf32>
    %cst_26 = arith.constant 0.000000e+00 : f32
    %37 = vector.broadcast %cst_26 : f32 to vector<1x32xf32>
    %38 = arith.maximumf %36, %37 : vector<1x32xf32>
    %c2_27 = arith.constant 2 : index
    %c0_28 = arith.constant 0 : index
    %c0_29 = arith.constant 0 : index
    %39 = vector.load %arg4[%c2_27, %c0_28, %c0_29] : memref<9x1x1xf32, #tpu.memory_space<vmem>>, vector<1x1x1xf32>
    %40 = vector.shape_cast %39 : vector<1x1x1xf32> to vector<1x1xf32>
    %41 = vector.broadcast %40 : vector<1x1xf32> to vector<1x32xf32>
    %42 = arith.mulf %38, %41 : vector<1x32xf32>
    %43 = arith.truncf %42 : vector<1x32xf32> to vector<1x32xbf16>
    %c2_30 = arith.constant 2 : index
    %c0_31 = arith.constant 0 : index
    %c0_32 = arith.constant 0 : index
    %44 = vector.load %arg5[%c2_30, %c0_31, %c0_32] : memref<9x32x8xbf16, #tpu.memory_space<vmem>>, vector<1x32x8xbf16>
    %45 = vector.shape_cast %44 : vector<1x32x8xbf16> to vector<32x8xbf16>
    %cst_33 = arith.constant dense<0.000000e+00> : vector<1x8xf32>
    %46 = tpu.matmul %43, %45, %cst_33 {dimension_numbers = #tpu.dot_dimension_numbers<[1], [0], [0], [1], [0, 0, 1, 1], [], []>} : vector<1x32xbf16>, vector<32x8xbf16>, vector<1x8xf32> -> vector<1x8xf32>
    %47 = arith.addf %32, %46 : vector<1x8xf32>
    %c0_34 = arith.constant 0 : index
    %c1_35 = arith.constant 1 : index
    %c0_36 = arith.constant 0 : index
    %48 = vector.load %arg1[%c0_34, %c1_35, %c0_36] : memref<1x5x32xf32, #tpu.memory_space<vmem>>, vector<1x1x32xf32>
    %49 = vector.shape_cast %48 : vector<1x1x32xf32> to vector<1x32xf32>
    %50 = arith.mulf %49, %0 : vector<1x32xf32>
    %51 = arith.addf %50, %1 : vector<1x32xf32>
    %cst_37 = arith.constant 0.000000e+00 : f32
    %52 = vector.broadcast %cst_37 : f32 to vector<1x32xf32>
    %53 = arith.maximumf %51, %52 : vector<1x32xf32>
    %c3 = arith.constant 3 : index
    %c0_38 = arith.constant 0 : index
    %c0_39 = arith.constant 0 : index
    %54 = vector.load %arg4[%c3, %c0_38, %c0_39] : memref<9x1x1xf32, #tpu.memory_space<vmem>>, vector<1x1x1xf32>
    %55 = vector.shape_cast %54 : vector<1x1x1xf32> to vector<1x1xf32>
    %56 = vector.broadcast %55 : vector<1x1xf32> to vector<1x32xf32>
    %57 = arith.mulf %53, %56 : vector<1x32xf32>
    %58 = arith.truncf %57 : vector<1x32xf32> to vector<1x32xbf16>
    %c3_40 = arith.constant 3 : index
    %c0_41 = arith.constant 0 : index
    %c0_42 = arith.constant 0 : index
    %59 = vector.load %arg5[%c3_40, %c0_41, %c0_42] : memref<9x32x8xbf16, #tpu.memory_space<vmem>>, vector<1x32x8xbf16>
    %60 = vector.shape_cast %59 : vector<1x32x8xbf16> to vector<32x8xbf16>
    %cst_43 = arith.constant dense<0.000000e+00> : vector<1x8xf32>
    %61 = tpu.matmul %58, %60, %cst_43 {dimension_numbers = #tpu.dot_dimension_numbers<[1], [0], [0], [1], [0, 0, 1, 1], [], []>} : vector<1x32xbf16>, vector<32x8xbf16>, vector<1x8xf32> -> vector<1x8xf32>
    %62 = arith.addf %47, %61 : vector<1x8xf32>
    %c0_44 = arith.constant 0 : index
    %c2_45 = arith.constant 2 : index
    %c0_46 = arith.constant 0 : index
    %63 = vector.load %arg1[%c0_44, %c2_45, %c0_46] : memref<1x5x32xf32, #tpu.memory_space<vmem>>, vector<1x1x32xf32>
    %64 = vector.shape_cast %63 : vector<1x1x32xf32> to vector<1x32xf32>
    %65 = arith.mulf %64, %0 : vector<1x32xf32>
    %66 = arith.addf %65, %1 : vector<1x32xf32>
    %cst_47 = arith.constant 0.000000e+00 : f32
    %67 = vector.broadcast %cst_47 : f32 to vector<1x32xf32>
    %68 = arith.maximumf %66, %67 : vector<1x32xf32>
    %c4 = arith.constant 4 : index
    %c0_48 = arith.constant 0 : index
    %c0_49 = arith.constant 0 : index
    %69 = vector.load %arg4[%c4, %c0_48, %c0_49] : memref<9x1x1xf32, #tpu.memory_space<vmem>>, vector<1x1x1xf32>
    %70 = vector.shape_cast %69 : vector<1x1x1xf32> to vector<1x1xf32>
    %71 = vector.broadcast %70 : vector<1x1xf32> to vector<1x32xf32>
    %72 = arith.mulf %68, %71 : vector<1x32xf32>
    %73 = arith.truncf %72 : vector<1x32xf32> to vector<1x32xbf16>
    %c4_50 = arith.constant 4 : index
    %c0_51 = arith.constant 0 : index
    %c0_52 = arith.constant 0 : index
    %74 = vector.load %arg5[%c4_50, %c0_51, %c0_52] : memref<9x32x8xbf16, #tpu.memory_space<vmem>>, vector<1x32x8xbf16>
    %75 = vector.shape_cast %74 : vector<1x32x8xbf16> to vector<32x8xbf16>
    %cst_53 = arith.constant dense<0.000000e+00> : vector<1x8xf32>
    %76 = tpu.matmul %73, %75, %cst_53 {dimension_numbers = #tpu.dot_dimension_numbers<[1], [0], [0], [1], [0, 0, 1, 1], [], []>} : vector<1x32xbf16>, vector<32x8xbf16>, vector<1x8xf32> -> vector<1x8xf32>
    %77 = arith.addf %62, %76 : vector<1x8xf32>
    %c0_54 = arith.constant 0 : index
    %c3_55 = arith.constant 3 : index
    %c0_56 = arith.constant 0 : index
    %78 = vector.load %arg1[%c0_54, %c3_55, %c0_56] : memref<1x5x32xf32, #tpu.memory_space<vmem>>, vector<1x1x32xf32>
    %79 = vector.shape_cast %78 : vector<1x1x32xf32> to vector<1x32xf32>
    %80 = arith.mulf %79, %0 : vector<1x32xf32>
    %81 = arith.addf %80, %1 : vector<1x32xf32>
    %cst_57 = arith.constant 0.000000e+00 : f32
    %82 = vector.broadcast %cst_57 : f32 to vector<1x32xf32>
    %83 = arith.maximumf %81, %82 : vector<1x32xf32>
    %c5 = arith.constant 5 : index
    %c0_58 = arith.constant 0 : index
    %c0_59 = arith.constant 0 : index
    %84 = vector.load %arg4[%c5, %c0_58, %c0_59] : memref<9x1x1xf32, #tpu.memory_space<vmem>>, vector<1x1x1xf32>
    %85 = vector.shape_cast %84 : vector<1x1x1xf32> to vector<1x1xf32>
    %86 = vector.broadcast %85 : vector<1x1xf32> to vector<1x32xf32>
    %87 = arith.mulf %83, %86 : vector<1x32xf32>
    %88 = arith.truncf %87 : vector<1x32xf32> to vector<1x32xbf16>
    %c5_60 = arith.constant 5 : index
    %c0_61 = arith.constant 0 : index
    %c0_62 = arith.constant 0 : index
    %89 = vector.load %arg5[%c5_60, %c0_61, %c0_62] : memref<9x32x8xbf16, #tpu.memory_space<vmem>>, vector<1x32x8xbf16>
    %90 = vector.shape_cast %89 : vector<1x32x8xbf16> to vector<32x8xbf16>
    %cst_63 = arith.constant dense<0.000000e+00> : vector<1x8xf32>
    %91 = tpu.matmul %88, %90, %cst_63 {dimension_numbers = #tpu.dot_dimension_numbers<[1], [0], [0], [1], [0, 0, 1, 1], [], []>} : vector<1x32xbf16>, vector<32x8xbf16>, vector<1x8xf32> -> vector<1x8xf32>
    %92 = arith.addf %77, %91 : vector<1x8xf32>
    %c0_64 = arith.constant 0 : index
    %c2_65 = arith.constant 2 : index
    %c0_66 = arith.constant 0 : index
    %93 = vector.load %arg1[%c0_64, %c2_65, %c0_66] : memref<1x5x32xf32, #tpu.memory_space<vmem>>, vector<1x1x32xf32>
    %94 = vector.shape_cast %93 : vector<1x1x32xf32> to vector<1x32xf32>
    %95 = arith.mulf %94, %0 : vector<1x32xf32>
    %96 = arith.addf %95, %1 : vector<1x32xf32>
    %cst_67 = arith.constant 0.000000e+00 : f32
    %97 = vector.broadcast %cst_67 : f32 to vector<1x32xf32>
    %98 = arith.maximumf %96, %97 : vector<1x32xf32>
    %c6 = arith.constant 6 : index
    %c0_68 = arith.constant 0 : index
    %c0_69 = arith.constant 0 : index
    %99 = vector.load %arg4[%c6, %c0_68, %c0_69] : memref<9x1x1xf32, #tpu.memory_space<vmem>>, vector<1x1x1xf32>
    %100 = vector.shape_cast %99 : vector<1x1x1xf32> to vector<1x1xf32>
    %101 = vector.broadcast %100 : vector<1x1xf32> to vector<1x32xf32>
    %102 = arith.mulf %98, %101 : vector<1x32xf32>
    %103 = arith.truncf %102 : vector<1x32xf32> to vector<1x32xbf16>
    %c6_70 = arith.constant 6 : index
    %c0_71 = arith.constant 0 : index
    %c0_72 = arith.constant 0 : index
    %104 = vector.load %arg5[%c6_70, %c0_71, %c0_72] : memref<9x32x8xbf16, #tpu.memory_space<vmem>>, vector<1x32x8xbf16>
    %105 = vector.shape_cast %104 : vector<1x32x8xbf16> to vector<32x8xbf16>
    %cst_73 = arith.constant dense<0.000000e+00> : vector<1x8xf32>
    %106 = tpu.matmul %103, %105, %cst_73 {dimension_numbers = #tpu.dot_dimension_numbers<[1], [0], [0], [1], [0, 0, 1, 1], [], []>} : vector<1x32xbf16>, vector<32x8xbf16>, vector<1x8xf32> -> vector<1x8xf32>
    %107 = arith.addf %92, %106 : vector<1x8xf32>
    %c0_74 = arith.constant 0 : index
    %c3_75 = arith.constant 3 : index
    %c0_76 = arith.constant 0 : index
    %108 = vector.load %arg1[%c0_74, %c3_75, %c0_76] : memref<1x5x32xf32, #tpu.memory_space<vmem>>, vector<1x1x32xf32>
    %109 = vector.shape_cast %108 : vector<1x1x32xf32> to vector<1x32xf32>
    %110 = arith.mulf %109, %0 : vector<1x32xf32>
    %111 = arith.addf %110, %1 : vector<1x32xf32>
    %cst_77 = arith.constant 0.000000e+00 : f32
    %112 = vector.broadcast %cst_77 : f32 to vector<1x32xf32>
    %113 = arith.maximumf %111, %112 : vector<1x32xf32>
    %c7 = arith.constant 7 : index
    %c0_78 = arith.constant 0 : index
    %c0_79 = arith.constant 0 : index
    %114 = vector.load %arg4[%c7, %c0_78, %c0_79] : memref<9x1x1xf32, #tpu.memory_space<vmem>>, vector<1x1x1xf32>
    %115 = vector.shape_cast %114 : vector<1x1x1xf32> to vector<1x1xf32>
    %116 = vector.broadcast %115 : vector<1x1xf32> to vector<1x32xf32>
    %117 = arith.mulf %113, %116 : vector<1x32xf32>
    %118 = arith.truncf %117 : vector<1x32xf32> to vector<1x32xbf16>
    %c7_80 = arith.constant 7 : index
    %c0_81 = arith.constant 0 : index
    %c0_82 = arith.constant 0 : index
    %119 = vector.load %arg5[%c7_80, %c0_81, %c0_82] : memref<9x32x8xbf16, #tpu.memory_space<vmem>>, vector<1x32x8xbf16>
    %120 = vector.shape_cast %119 : vector<1x32x8xbf16> to vector<32x8xbf16>
    %cst_83 = arith.constant dense<0.000000e+00> : vector<1x8xf32>
    %121 = tpu.matmul %118, %120, %cst_83 {dimension_numbers = #tpu.dot_dimension_numbers<[1], [0], [0], [1], [0, 0, 1, 1], [], []>} : vector<1x32xbf16>, vector<32x8xbf16>, vector<1x8xf32> -> vector<1x8xf32>
    %122 = arith.addf %107, %121 : vector<1x8xf32>
    %c0_84 = arith.constant 0 : index
    %c4_85 = arith.constant 4 : index
    %c0_86 = arith.constant 0 : index
    %123 = vector.load %arg1[%c0_84, %c4_85, %c0_86] : memref<1x5x32xf32, #tpu.memory_space<vmem>>, vector<1x1x32xf32>
    %124 = vector.shape_cast %123 : vector<1x1x32xf32> to vector<1x32xf32>
    %125 = arith.mulf %124, %0 : vector<1x32xf32>
    %126 = arith.addf %125, %1 : vector<1x32xf32>
    %cst_87 = arith.constant 0.000000e+00 : f32
    %127 = vector.broadcast %cst_87 : f32 to vector<1x32xf32>
    %128 = arith.maximumf %126, %127 : vector<1x32xf32>
    %c8 = arith.constant 8 : index
    %c0_88 = arith.constant 0 : index
    %c0_89 = arith.constant 0 : index
    %129 = vector.load %arg4[%c8, %c0_88, %c0_89] : memref<9x1x1xf32, #tpu.memory_space<vmem>>, vector<1x1x1xf32>
    %130 = vector.shape_cast %129 : vector<1x1x1xf32> to vector<1x1xf32>
    %131 = vector.broadcast %130 : vector<1x1xf32> to vector<1x32xf32>
    %132 = arith.mulf %128, %131 : vector<1x32xf32>
    %133 = arith.truncf %132 : vector<1x32xf32> to vector<1x32xbf16>
    %c8_90 = arith.constant 8 : index
    %c0_91 = arith.constant 0 : index
    %c0_92 = arith.constant 0 : index
    %134 = vector.load %arg5[%c8_90, %c0_91, %c0_92] : memref<9x32x8xbf16, #tpu.memory_space<vmem>>, vector<1x32x8xbf16>
    %135 = vector.shape_cast %134 : vector<1x32x8xbf16> to vector<32x8xbf16>
    %cst_93 = arith.constant dense<0.000000e+00> : vector<1x8xf32>
    %136 = tpu.matmul %133, %135, %cst_93 {dimension_numbers = #tpu.dot_dimension_numbers<[1], [0], [0], [1], [0, 0, 1, 1], [], []>} : vector<1x32xbf16>, vector<32x8xbf16>, vector<1x8xf32> -> vector<1x8xf32>
    %137 = arith.addf %122, %136 : vector<1x8xf32>
    %c0_94 = arith.constant 0 : index
    %c0_95 = arith.constant 0 : index
    %c0_96 = arith.constant 0 : index
    %138 = vector.load %arg6[%c0_94, %c0_95, %c0_96] : memref<1x1x8xf32, #tpu.memory_space<vmem>>, vector<1x1x8xf32>
    %139 = vector.shape_cast %138 : vector<1x1x8xf32> to vector<1x8xf32>
    %140 = vector.shape_cast %137 : vector<1x8xf32> to vector<1x1x8xf32>
    tpu.vector_store %arg6[%c0_94, %c0_95, %c0_96], %140 {strides = array<i32>} : memref<1x1x8xf32, #tpu.memory_space<vmem>>, vector<1x1x8xf32>,
    return
  }
  func.func @transform_0(%arg0: i32) -> (i32, i32, i32) {
    %c0_i32 = arith.constant 0 : i32
    %c0_i32_0 = arith.constant 0 : i32
    %c0_i32_1 = arith.constant 0 : i32
    return %arg0, %c0_i32, %c0_i32_0 : i32, i32, i32
  }
  func.func @transform_1(%arg0: i32) -> (i32, i32) {
    %c0_i32 = arith.constant 0 : i32
    %c0_i32_0 = arith.constant 0 : i32
    %c0_i32_1 = arith.constant 0 : i32
    return %c0_i32, %c0_i32_0 : i32, i32
  }
  func.func @transform_2(%arg0: i32) -> (i32, i32) {
    %c0_i32 = arith.constant 0 : i32
    %c0_i32_0 = arith.constant 0 : i32
    %c0_i32_1 = arith.constant 0 : i32
    return %c0_i32, %c0_i32_0 : i32, i32
  }
  func.func @transform_3(%arg0: i32) -> (i32, i32, i32) {
    %c0_i32 = arith.constant 0 : i32
    %c0_i32_0 = arith.constant 0 : i32
    %c0_i32_1 = arith.constant 0 : i32
    %c0_i32_2 = arith.constant 0 : i32
    return %c0_i32, %c0_i32_0, %c0_i32_1 : i32, i32, i32
  }
  func.func @transform_4(%arg0: i32) -> (i32, i32, i32) {
    %c0_i32 = arith.constant 0 : i32
    %c0_i32_0 = arith.constant 0 : i32
    %c0_i32_1 = arith.constant 0 : i32
    %c0_i32_2 = arith.constant 0 : i32
    return %c0_i32, %c0_i32_0, %c0_i32_1 : i32, i32, i32
  }
  func.func @transform_5(%arg0: i32) -> (i32, i32, i32) {
    %c0_i32 = arith.constant 0 : i32
    %c0_i32_0 = arith.constant 0 : i32
    %c0_i32_1 = arith.constant 0 : i32
    return %arg0, %c0_i32, %c0_i32_0 : i32, i32, i32
  }
}

module attributes {stable_mosaic.version = 11 : i64} {
  func.func @_pool_reduce_kernel(%arg0: memref<4x1x32xf32, #tpu.memory_space<vmem>>, %arg1: memref<1x32xf32, #tpu.memory_space<vmem>>) attributes {dimension_semantics = [], scalar_prefetch = 0 : i64, scratch_operands = 0 : i64, tpu.core_type = #tpu.core_type<tc>} {
    %c0 = arith.constant 0 : index
    %c0_0 = arith.constant 0 : index
    %c0_1 = arith.constant 0 : index
    %0 = vector.load %arg0[%c0, %c0_0, %c0_1] : memref<4x1x32xf32, #tpu.memory_space<vmem>>, vector<1x1x32xf32>
    %1 = vector.shape_cast %0 : vector<1x1x32xf32> to vector<1x32xf32>
    %c1 = arith.constant 1 : index
    %c0_2 = arith.constant 0 : index
    %c0_3 = arith.constant 0 : index
    %2 = vector.load %arg0[%c1, %c0_2, %c0_3] : memref<4x1x32xf32, #tpu.memory_space<vmem>>, vector<1x1x32xf32>
    %3 = vector.shape_cast %2 : vector<1x1x32xf32> to vector<1x32xf32>
    %4 = arith.addf %1, %3 : vector<1x32xf32>
    %c2 = arith.constant 2 : index
    %c0_4 = arith.constant 0 : index
    %c0_5 = arith.constant 0 : index
    %5 = vector.load %arg0[%c2, %c0_4, %c0_5] : memref<4x1x32xf32, #tpu.memory_space<vmem>>, vector<1x1x32xf32>
    %6 = vector.shape_cast %5 : vector<1x1x32xf32> to vector<1x32xf32>
    %7 = arith.addf %4, %6 : vector<1x32xf32>
    %c3 = arith.constant 3 : index
    %c0_6 = arith.constant 0 : index
    %c0_7 = arith.constant 0 : index
    %8 = vector.load %arg0[%c3, %c0_6, %c0_7] : memref<4x1x32xf32, #tpu.memory_space<vmem>>, vector<1x1x32xf32>
    %9 = vector.shape_cast %8 : vector<1x1x32xf32> to vector<1x32xf32>
    %10 = arith.addf %7, %9 : vector<1x32xf32>
    %cst = arith.constant 2.500000e-01 : f32
    %11 = vector.broadcast %cst : f32 to vector<1x32xf32>
    %12 = arith.mulf %10, %11 : vector<1x32xf32>
    %c0_8 = arith.constant 0 : index
    %c0_9 = arith.constant 0 : index
    %13 = vector.load %arg1[%c0_8, %c0_9] : memref<1x32xf32, #tpu.memory_space<vmem>>, vector<1x32xf32>
    tpu.vector_store %arg1[%c0_8, %c0_9], %12 {strides = array<i32>} : memref<1x32xf32, #tpu.memory_space<vmem>>, vector<1x32xf32>,
    return
  }
}

module attributes {stable_mosaic.version = 11 : i64} {
  func.func @_bn_relu_matmul_kernel(%arg0: i32, %arg1: memref<2x24xf32, #tpu.memory_space<vmem>>, %arg2: memref<1x24xf32, #tpu.memory_space<vmem>>, %arg3: memref<1x24xf32, #tpu.memory_space<vmem>>, %arg4: memref<24x32xbf16, #tpu.memory_space<vmem>>, %arg5: memref<2x32xf32, #tpu.memory_space<vmem>>) attributes {dimension_semantics = [#tpu.dimension_semantics<parallel>], iteration_bounds = array<i64: 1>, scalar_prefetch = 0 : i64, scratch_operands = 0 : i64, tpu.core_type = #tpu.core_type<tc>, window_params = [{transform_indices = @transform_0, window_bounds = array<i64: 2, 24>}, {pipeline_mode = #tpu.pipeline_mode<synchronous>, transform_indices = @transform_1, window_bounds = array<i64: 1, 24>}, {pipeline_mode = #tpu.pipeline_mode<synchronous>, transform_indices = @transform_2, window_bounds = array<i64: 1, 24>}, {pipeline_mode = #tpu.pipeline_mode<synchronous>, transform_indices = @transform_3, window_bounds = array<i64: 24, 32>}, {transform_indices = @transform_4, window_bounds = array<i64: 2, 32>}]} {
    %c0 = arith.constant 0 : index
    %c0_0 = arith.constant 0 : index
    %0 = vector.load %arg1[%c0, %c0_0] : memref<2x24xf32, #tpu.memory_space<vmem>>, vector<2x24xf32>
    %c0_1 = arith.constant 0 : index
    %c0_2 = arith.constant 0 : index
    %1 = vector.load %arg2[%c0_1, %c0_2] : memref<1x24xf32, #tpu.memory_space<vmem>>, vector<1x24xf32>
    %2 = vector.broadcast %1 : vector<1x24xf32> to vector<2x24xf32>
    %3 = arith.mulf %0, %2 : vector<2x24xf32>
    %c0_3 = arith.constant 0 : index
    %c0_4 = arith.constant 0 : index
    %4 = vector.load %arg3[%c0_3, %c0_4] : memref<1x24xf32, #tpu.memory_space<vmem>>, vector<1x24xf32>
    %5 = vector.broadcast %4 : vector<1x24xf32> to vector<2x24xf32>
    %6 = arith.addf %3, %5 : vector<2x24xf32>
    %cst = arith.constant 0.000000e+00 : f32
    %7 = vector.broadcast %cst : f32 to vector<2x24xf32>
    %8 = arith.maximumf %6, %7 : vector<2x24xf32>
    %9 = arith.truncf %8 : vector<2x24xf32> to vector<2x24xbf16>
    %c0_5 = arith.constant 0 : index
    %c0_6 = arith.constant 0 : index
    %10 = vector.load %arg4[%c0_5, %c0_6] : memref<24x32xbf16, #tpu.memory_space<vmem>>, vector<24x32xbf16>
    %cst_7 = arith.constant dense<0.000000e+00> : vector<2x32xf32>
    %11 = tpu.matmul %9, %10, %cst_7 {dimension_numbers = #tpu.dot_dimension_numbers<[1], [0], [0], [1], [0, 0, 1, 1], [], []>} : vector<2x24xbf16>, vector<24x32xbf16>, vector<2x32xf32> -> vector<2x32xf32>
    %c0_8 = arith.constant 0 : index
    %c0_9 = arith.constant 0 : index
    %12 = vector.load %arg5[%c0_8, %c0_9] : memref<2x32xf32, #tpu.memory_space<vmem>>, vector<2x32xf32>
    tpu.vector_store %arg5[%c0_8, %c0_9], %11 {strides = array<i32>} : memref<2x32xf32, #tpu.memory_space<vmem>>, vector<2x32xf32>,
    return
  }
  func.func @transform_0(%arg0: i32) -> (i32, i32) {
    %c0_i32 = arith.constant 0 : i32
    %c0_i32_0 = arith.constant 0 : i32
    return %arg0, %c0_i32 : i32, i32
  }
  func.func @transform_1(%arg0: i32) -> (i32, i32) {
    %c0_i32 = arith.constant 0 : i32
    %c0_i32_0 = arith.constant 0 : i32
    %c0_i32_1 = arith.constant 0 : i32
    return %c0_i32, %c0_i32_0 : i32, i32
  }
  func.func @transform_2(%arg0: i32) -> (i32, i32) {
    %c0_i32 = arith.constant 0 : i32
    %c0_i32_0 = arith.constant 0 : i32
    %c0_i32_1 = arith.constant 0 : i32
    return %c0_i32, %c0_i32_0 : i32, i32
  }
  func.func @transform_3(%arg0: i32) -> (i32, i32) {
    %c0_i32 = arith.constant 0 : i32
    %c0_i32_0 = arith.constant 0 : i32
    %c0_i32_1 = arith.constant 0 : i32
    return %c0_i32, %c0_i32_0 : i32, i32
  }
  func.func @transform_4(%arg0: i32) -> (i32, i32) {
    %c0_i32 = arith.constant 0 : i32
    %c0_i32_0 = arith.constant 0 : i32
    return %arg0, %c0_i32 : i32, i32
  }
}

module attributes {stable_mosaic.version = 11 : i64} {
  func.func @_gap_fc_kernel(%arg0: memref<2x1x32xf32, #tpu.memory_space<vmem>>, %arg1: memref<32x10xf32, #tpu.memory_space<vmem>>, %arg2: memref<1x10xf32, #tpu.memory_space<vmem>>, %arg3: memref<2x10xf32, #tpu.memory_space<vmem>>) attributes {dimension_semantics = [], scalar_prefetch = 0 : i64, scratch_operands = 0 : i64, tpu.core_type = #tpu.core_type<tc>} {
    %c0 = arith.constant 0 : index
    %c0_0 = arith.constant 0 : index
    %c0_1 = arith.constant 0 : index
    %0 = vector.load %arg0[%c0, %c0_0, %c0_1] : memref<2x1x32xf32, #tpu.memory_space<vmem>>, vector<2x1x32xf32>
    %cst = arith.constant dense<0.000000e+00> : vector<2x32xf32>
    %1 = vector.multi_reduction <add>, %0, %cst [1] : vector<2x1x32xf32> to vector<2x32xf32>
    %cst_2 = arith.constant 1.000000e+00 : f32
    %2 = vector.broadcast %cst_2 : f32 to vector<2x32xf32>
    %3 = arith.divf %1, %2 : vector<2x32xf32>
    %c0_3 = arith.constant 0 : index
    %c0_4 = arith.constant 0 : index
    %4 = vector.load %arg1[%c0_3, %c0_4] : memref<32x10xf32, #tpu.memory_space<vmem>>, vector<32x10xf32>
    %cst_5 = arith.constant dense<0.000000e+00> : vector<2x10xf32>
    %5 = tpu.matmul %3, %4, %cst_5 {dimension_numbers = #tpu.dot_dimension_numbers<[1], [0], [0], [1], [0, 0, 1, 1], [], []>} : vector<2x32xf32>, vector<32x10xf32>, vector<2x10xf32> -> vector<2x10xf32>
    %c0_6 = arith.constant 0 : index
    %c0_7 = arith.constant 0 : index
    %6 = vector.load %arg2[%c0_6, %c0_7] : memref<1x10xf32, #tpu.memory_space<vmem>>, vector<1x10xf32>
    %7 = vector.broadcast %6 : vector<1x10xf32> to vector<2x10xf32>
    %8 = arith.addf %5, %7 : vector<2x10xf32>
    %c0_8 = arith.constant 0 : index
    %c0_9 = arith.constant 0 : index
    %9 = vector.load %arg3[%c0_8, %c0_9] : memref<2x10xf32, #tpu.memory_space<vmem>>, vector<2x10xf32>
    tpu.vector_store %arg3[%c0_8, %c0_9], %8 {strides = array<i32>} : memref<2x10xf32, #tpu.memory_space<vmem>>, vector<2x10xf32>,
    return
  }
}

</mosaic_0001>

<bundles_post_ra>
// kernel: densenet_forward.25
= control target key start
LH: loop header
LB: loop body
LE: loop exit
PB: predicated region body
PF: predicated region fallthrough
CT: control target
= control target key end

     0   :  { %s1069_s15 = smov 0   ;;  %s1313_s0 = inlined_call_operand.vmem [shape: bf16[512,147], index: 0, kind: input, shape index: {}]   ;;  %s1314_s1 = inlined_call_operand.vmem [shape: bf16[147,16], index: 1, kind: input, shape index: {}]   ;;  %s1315_s2 = inlined_call_operand.vmem [shape: f32[1,16], index: 2, kind: input, shape index: {}]   ;;  %s1316_s3 = inlined_call_operand.vmem [shape: f32[1,16], index: 3, kind: input, shape index: {}]   ;;  %s1317_s4 = inlined_call_operand.vmem [shape: f32[512,16], index: 4, kind: output, shape index: {}]  }
   0x1 LB: > { %s873_s16 = sadd.s32 4294967295, %s1040_s15   ;;  %p877_p0 = scmp.ge.s32.totalorder %s1040_s15, 1  ;;  %s1040_s15 = sphi %s1069_s15, %s14_s15  }
   0x2   : > { %p164_p1 = scmp.lt.s32.totalorder %s1040_s15, 3 }
   0x4   : > { %p165_p2 = pnand %p877_p0, %p164_p1 }
   0x5   : > { %v976_v0 = vld [vmem:[%s1314_s1] sm:$0xff] (!%p165_p2)   ;;  %v1042_v1 = vmov (!%p165_p2), 0   ;;  %v977_v2 = vld [vmem:[%s1314_s1 + $0x8] sm:$0xff] (!%p165_p2)   ;;  %v978_v3 = vld [vmem:[%s1314_s1 + $0x10] sm:$0xff] (!%p165_p2)   ;;  %s878_s23 = sshll.u32 (!%p165_p2), %s873_s16, 5  ;;  %vm457_vm0 = vcmask (!%p165_p2), 154624  }
   0x6   : > { %168 = sbr.rel (%p165_p2) target bundleno = 323 (0x143), region = 36  ;;  %513 = vmatprep.subr.bf16.mxu0 (!%p165_p2), %v1042_v1  ;;  %946 = vmatprep.subr.bf16.mxu1 (!%p165_p2), %v1042_v1  ;;  %p192_p3 = scmp.lt.s32.totalorder (!%p165_p2), %s878_s23, 63  ;;  %v979_v4 = vld [vmem:[%s1314_s1 + $0x18] sm:$0xff] (!%p165_p2)   ;;  %v980_v5 = vld [vmem:[%s1314_s1 + $0x20] sm:$0xff] (!%p165_p2)   ;;  %v981_v8 = vld [vmem:[%s1314_s1 + $0x28] sm:$0xff] (!%p165_p2)   ;;  %vm506_vm1 = vcmask (!%p165_p2), 1040384  }
   0x7   : > { %514 = vmatpush1.bf16.msra.mxu0 (!%p165_p2), %v976_v0  ;;  %956 = vmatpush1.bf16.msra.mxu1 (!%p165_p2), %v976_v0  ;;  %v982_v9 = vld [vmem:[%s1314_s1 + $0x30] sm:$0xff] (!%p165_p2)   ;;  %v983_v10 = vld [vmem:[%s1314_s1 + $0x38] sm:$0xff] (!%p165_p2)   ;;  %vm507_vm2 = vcmask (!%p165_p2), 1041408   ;;  %v1043_v11 = vmov (!%p165_p2), 65535   ;;  %v984_v13 = vld [vmem:[%s1314_s1 + $0x40] sm:$0xff] (!%p165_p2)   ;;  %vm784_vm3 = vcmask (!%p165_p2), 130048  }
   0x8   : > { %515 = vmatprep.subr.bf16.mxu0 (!%p165_p2), %v1042_v1  ;;  %947 = vmatprep.subr.bf16.mxu1 (!%p165_p2), %v1042_v1  ;;  %v508_v12 = vsel (!%p165_p2), %vm506_vm1, 4294967295, %v1043_v11  ;;  %v985_v14 = vld [vmem:[%s1314_s1 + $0x48] ss:$0 sps:$4 sm:$0x33] (!%p165_p2)   ;;  %v1168_v47 = vld [vmem:[%s1315_s2] ss:$0 sm:$0xff] (!%p165_p2) }
   0x9   : > { %v509_v15 = vsel (!%p165_p2), %vm507_vm2, %v508_v12, 0  ;;  %v1173_v49 = vld [vmem:[%s1316_s3] ss:$0 sm:$0xff] (!%p165_p2) }
   0xa   : > { %v511_v16 = vand.u32 (!%p165_p2), %v985_v14, %v509_v15 }
   0xb   : > { %516 = vmatpush1.bf16.msra.mxu0 (!%p165_p2), %v977_v2  ;;  %957 = vmatpush1.bf16.msra.mxu1 (!%p165_p2), %v977_v2 }
   0xc   : > { %517 = vmatprep.subr.bf16.mxu0 (!%p165_p2), %v1042_v1  ;;  %948 = vmatprep.subr.bf16.mxu1 (!%p165_p2), %v1042_v1 }
   0xd   : > { %s1319_s23 = smov (!%p192_p3, %s878_s23), 63 }
   0xe   : > { %s945_s26 = sshll.u32 %s1319_s23, 3 }
   0xf   : > { %518 = vmatpush1.bf16.msra.mxu0 %v978_v3  ;;  %958 = vmatpush1.bf16.msra.mxu1 %v978_v3  ;;  %s1097_s29 = scalar_lea.vmem %s1313_s0, %s945_s26  ;;  %s1186_s24 = scalar_lea.vmem %s1317_s4, %s945_s26 }
  0x10   : > { %519 = vmatprep.subr.bf16.mxu0 %v1042_v1  ;;  %949 = vmatprep.subr.bf16.mxu1 %v1042_v1  ;;  %v988_v6 = vld [vmem:[%s1097_s29 + $0x4] ss:$8 sps:$4 sm:$0xff]   ;;  %v986_v17 = vld [vmem:[%s1097_s29] ss:$8 sps:$4 sm:$0xff]   ;;  %v992_v19 = vld [vmem:[%s1097_s29 + $0x14] ss:$8 sps:$4 sm:$0xff]  }
  0x11   : > { %v991_v7 = vld [vmem:[%s1097_s29 + $0x84] ss:$8 sps:$4 sm:$0xff]   ;;  %925 = vmatprep.mubr.msk.bf16.mxu0 %vm457_vm0, %v988_v6  ;;  %v989_v18 = vld [vmem:[%s1097_s29 + $0x80] ss:$8 sps:$4 sm:$0xff]   ;;  %v994_v20 = vld [vmem:[%s1097_s29 + $0x94] ss:$8 sps:$4 sm:$0xff]  }
  0x12   : > { %933 = vmatprep.mubr.msk.bf16.mxu1 %vm457_vm0, %v991_v7  ;;  %v996_v21 = vld [vmem:[%s1097_s29 + $0x10] ss:$8 sps:$4 sm:$0xff]   ;;  %v998_v23 = vld [vmem:[%s1097_s29 + $0x24] ss:$8 sps:$4 sm:$0xff]   ;;  %v1002_v25 = vld [vmem:[%s1097_s29 + $0x20] ss:$8 sps:$4 sm:$0xff]  }
  0x13   : > { %520 = vmatpush1.bf16.msra.mxu0 %v979_v4  ;;  %959 = vmatpush1.bf16.msra.mxu1 %v979_v4  ;;  %v997_v22 = vld [vmem:[%s1097_s29 + $0x90] ss:$8 sps:$4 sm:$0xff]   ;;  %v1000_v24 = vld [vmem:[%s1097_s29 + $0xa4] ss:$8 sps:$4 sm:$0xff]   ;;  %v1003_v26 = vld [vmem:[%s1097_s29 + $0xa0] ss:$8 sps:$4 sm:$0xff]  }
  0x14   : > { %521 = vmatprep.subr.bf16.mxu0 %v1042_v1  ;;  %950 = vmatprep.subr.bf16.mxu1 %v1042_v1  ;;  %v1004_v27 = vld [vmem:[%s1097_s29 + $0x34] ss:$8 sps:$4 sm:$0xff]   ;;  %v1008_v29 = vld [vmem:[%s1097_s29 + $0x30] ss:$8 sps:$4 sm:$0xff]   ;;  %v1010_v31 = vld [vmem:[%s1097_s29 + $0x44] ss:$8 sps:$4 sm:$0xff]  }
  0x15   : > { %v1006_v28 = vld [vmem:[%s1097_s29 + $0xb4] ss:$8 sps:$4 sm:$0xff]   ;;  %v1009_v30 = vld [vmem:[%s1097_s29 + $0xb0] ss:$8 sps:$4 sm:$0xff]   ;;  %v1012_v32 = vld [vmem:[%s1097_s29 + $0xc4] ss:$8 sps:$4 sm:$0xff]  }
  0x16   : > { %v1014_v33 = vld [vmem:[%s1097_s29 + $0x40] ss:$8 sps:$4 sm:$0xff]   ;;  %v1016_v35 = vld [vmem:[%s1097_s29 + $0x54] ss:$8 sps:$4 sm:$0xff]   ;;  %v1020_v37 = vld [vmem:[%s1097_s29 + $0x50] ss:$8 sps:$4 sm:$0xff]  }
  0x17   : > { %522 = vmatpush1.bf16.msra.mxu0 %v980_v5  ;;  %960 = vmatpush1.bf16.msra.mxu1 %v980_v5  ;;  %v1015_v34 = vld [vmem:[%s1097_s29 + $0xc0] ss:$8 sps:$4 sm:$0xff]   ;;  %v1018_v36 = vld [vmem:[%s1097_s29 + $0xd4] ss:$8 sps:$4 sm:$0xff]   ;;  %v1021_v38 = vld [vmem:[%s1097_s29 + $0xd0] ss:$8 sps:$4 sm:$0xff]  }
  0x18   : > { %523 = vmatprep.subr.bf16.mxu0 %v1042_v1  ;;  %951 = vmatprep.subr.bf16.mxu1 %v1042_v1  ;;  %v1022_v39 = vld [vmem:[%s1097_s29 + $0x64] ss:$8 sps:$4 sm:$0xff]   ;;  %v1026_v41 = vld [vmem:[%s1097_s29 + $0x60] ss:$8 sps:$4 sm:$0xff]   ;;  %v1028_v43 = vld [vmem:[%s1097_s29 + $0x74] ss:$8 sps:$4 sm:$0xff]  }
  0x19   : > { %v1024_v40 = vld [vmem:[%s1097_s29 + $0xe4] ss:$8 sps:$4 sm:$0xff]   ;;  %v1027_v42 = vld [vmem:[%s1097_s29 + $0xe0] ss:$8 sps:$4 sm:$0xff]   ;;  %v1030_v44 = vld [vmem:[%s1097_s29 + $0xf4] ss:$8 sps:$4 sm:$0xff]  }
  0x1a   : > { %v1032_v45 = vld [vmem:[%s1097_s29 + $0x70] ss:$8 sps:$4 sm:$0xff]  }
  0x1b   : > { %524 = vmatpush1.bf16.msra.mxu0 %v981_v8  ;;  %961 = vmatpush1.bf16.msra.mxu1 %v981_v8  ;;  %v1033_v46 = vld [vmem:[%s1097_s29 + $0xf0] ss:$8 sps:$4 sm:$0xff]  }
  0x1c   : > { %525 = vmatprep.subr.bf16.mxu0 %v1042_v1  ;;  %952 = vmatprep.subr.bf16.mxu1 %v1042_v1 }
  0x1f   : > { %526 = vmatpush1.bf16.msra.mxu0 %v982_v9  ;;  %962 = vmatpush1.bf16.msra.mxu1 %v982_v9 }
  0x20   : > { %527 = vmatprep.subr.bf16.mxu0 %v1042_v1  ;;  %953 = vmatprep.subr.bf16.mxu1 %v1042_v1 }
  0x23   : > { %528 = vmatpush1.bf16.msra.mxu0 %v983_v10  ;;  %963 = vmatpush1.bf16.msra.mxu1 %v983_v10 }
  0x24   : > { %529 = vmatprep.subr.bf16.mxu0 %v1042_v1  ;;  %954 = vmatprep.subr.bf16.mxu1 %v1042_v1 }
  0x27   : > { %530 = vmatpush1.bf16.msra.mxu0 %v984_v13  ;;  %964 = vmatpush1.bf16.msra.mxu1 %v984_v13 }
  0x28   : > { %531 = vmatprep.subr.bf16.mxu0 %v1042_v1  ;;  %955 = vmatprep.subr.bf16.mxu1 %v1042_v1 }
  0x2b   : > { %532 = vmatpush1.bf16.msra.mxu0 %v511_v16  ;;  %965 = vmatpush1.bf16.msra.mxu1 %v511_v16 }
  0x2e   : > { %546 = vmatmul.mubr.bf16.vlgmr.msra.gmra.mrb[0].mxu0 %v986_v17  ;;  %610 = vmatmul.mubr.bf16.vlgmr.msra.gmra.mrb[0].mxu1 %v989_v18 }
  0x2f   : > { %926 = vmatprep.mubr.msk.bf16.mxu0 %vm457_vm0, %v992_v19  ;;  %934 = vmatprep.mubr.msk.bf16.mxu1 %vm457_vm0, %v994_v20 }
  0x36   : > { %554 = vmatmul.mubr.bf16.gmra.mrb[4].mxu0 %v996_v21  ;;  %618 = vmatmul.mubr.bf16.gmra.mrb[4].mxu1 %v997_v22 }
  0x37   : > { %927 = vmatprep.mubr.msk.bf16.mxu0 %vm457_vm0, %v998_v23  ;;  %935 = vmatprep.mubr.msk.bf16.mxu1 %vm457_vm0, %v1000_v24 }
  0x3e   : > { %562 = vmatmul.mubr.bf16.gmra.mrb[8].mxu0 %v1002_v25  ;;  %626 = vmatmul.mubr.bf16.gmra.mrb[8].mxu1 %v1003_v26 }
  0x3f   : > { %928 = vmatprep.mubr.msk.bf16.mxu0 %vm457_vm0, %v1004_v27  ;;  %936 = vmatprep.mubr.msk.bf16.mxu1 %vm457_vm0, %v1006_v28 }
  0x46   : > { %570 = vmatmul.mubr.bf16.gmra.mrb[12].mxu0 %v1008_v29  ;;  %634 = vmatmul.mubr.bf16.gmra.mrb[12].mxu1 %v1009_v30 }
  0x47   : > { %929 = vmatprep.mubr.msk.bf16.mxu0 %vm457_vm0, %v1010_v31  ;;  %937 = vmatprep.mubr.msk.bf16.mxu1 %vm457_vm0, %v1012_v32 }
  0x4e   : > { %578 = vmatmul.mubr.bf16.gmra.mrb[16].mxu0 %v1014_v33  ;;  %642 = vmatmul.mubr.bf16.gmra.mrb[16].mxu1 %v1015_v34 }
  0x4f   : > { %930 = vmatprep.mubr.msk.bf16.mxu0 %vm457_vm0, %v1016_v35  ;;  %938 = vmatprep.mubr.msk.bf16.mxu1 %vm457_vm0, %v1018_v36 }
  0x56   : > { %586 = vmatmul.mubr.bf16.gmra.mrb[20].mxu0 %v1020_v37  ;;  %650 = vmatmul.mubr.bf16.gmra.mrb[20].mxu1 %v1021_v38 }
  0x57   : > { %931 = vmatprep.mubr.msk.bf16.mxu0 %vm457_vm0, %v1022_v39  ;;  %939 = vmatprep.mubr.msk.bf16.mxu1 %vm457_vm0, %v1024_v40 }
  0x5e   : > { %594 = vmatmul.mubr.bf16.gmra.mrb[24].mxu0 %v1026_v41  ;;  %658 = vmatmul.mubr.bf16.gmra.mrb[24].mxu1 %v1027_v42 }
  0x5f   : > { %932 = vmatprep.mubr.msk.bf16.mxu0 %vm457_vm0, %v1028_v43  ;;  %940 = vmatprep.mubr.msk.bf16.mxu1 %vm457_vm0, %v1030_v44 }
  0x66   : > { %602 = vmatmul.mubr.bf16.gmra.mrb[28].mxu0 %v1032_v45  ;;  %666 = vmatmul.mubr.bf16.gmra.mrb[28].mxu1 %v1033_v46 }
 0x101   : > { %v547_v48 = vpop.f32.mrb[0].mxu0  ;;  %v611_v50 = vpop.f32.mrb[0].mxu1 }
 0x102   : > { %v681_v51 = vmul.f32 %v1168_v47, %v547_v48  ;;  %v697_v52 = vmul.f32 %v1168_v47, %v611_v50  ;;  %v549_v53 = vpop.f32.mrb[1].mxu0  ;;  %v613_v54 = vpop.f32.mrb[1].mxu1 }
 0x103   : > { %v550_v55 = vpop.f32.mrb[2].mxu0  ;;  %v614_v56 = vpop.f32.mrb[2].mxu1 }
 0x104   : > { %v720_v57 = vadd.f32 %v1173_v49, %v681_v51  ;;  %v736_v58 = vadd.f32 %v1173_v49, %v697_v52  ;;  %v682_v59 = vmul.f32 %v1168_v47, %v550_v55  ;;  %v698_v60 = vmul.f32 %v1168_v47, %v614_v56  ;;  %v552_v61 = vpop.f32.mrb[3].mxu0  ;;  %v616_v62 = vpop.f32.mrb[3].mxu1 }
 0x106   : > { %v752_v63 = vmax.f32 %v720_v57, 0.0  ;;  %v768_v0 = vmax.f32 %v736_v58, 0.0  ;;  %v721_v1 = vadd.f32 %v1173_v49, %v682_v59  ;;  %v737_v2 = vadd.f32 %v1173_v49, %v698_v60 }
 0x108   : > { %785 = vst.msk [vmem:[%s1186_s24] sm:$0xff] %vm784_vm3, %v752_v63  ;;  %801 = vst.msk [vmem:[%s1186_s24 + $0x80] sm:$0xff] %vm784_vm3, %v768_v0  ;;  %v753_v3 = vmax.f32 %v721_v1, 0.0  ;;  %v769_v4 = vmax.f32 %v737_v2, 0.0 }
 0x109   : > { %v555_v5 = vpop.f32.mrb[4].mxu0  ;;  %v619_v6 = vpop.f32.mrb[4].mxu1 }
 0x10a   : > { %786 = vst.msk [vmem:[%s1186_s24 + $0x8] sm:$0xff] %vm784_vm3, %v753_v3  ;;  %802 = vst.msk [vmem:[%s1186_s24 + $0x88] sm:$0xff] %vm784_vm3, %v769_v4  ;;  %v683_v7 = vmul.f32 %v1168_v47, %v555_v5  ;;  %v699_v8 = vmul.f32 %v1168_v47, %v619_v6  ;;  %v557_v9 = vpop.f32.mrb[5].mxu0  ;;  %v621_v10 = vpop.f32.mrb[5].mxu1 }
 0x10b   : > { %v558_v11 = vpop.f32.mrb[6].mxu0  ;;  %v622_v12 = vpop.f32.mrb[6].mxu1 }
 0x10c   : > { %v722_v13 = vadd.f32 %v1173_v49, %v683_v7  ;;  %v738_v14 = vadd.f32 %v1173_v49, %v699_v8  ;;  %v684_v15 = vmul.f32 %v1168_v47, %v558_v11  ;;  %v700_v16 = vmul.f32 %v1168_v47, %v622_v12  ;;  %v560_v17 = vpop.f32.mrb[7].mxu0  ;;  %v624_v18 = vpop.f32.mrb[7].mxu1 }
 0x10e   : > { %v754_v19 = vmax.f32 %v722_v13, 0.0  ;;  %v770_v20 = vmax.f32 %v738_v14, 0.0  ;;  %v723_v21 = vadd.f32 %v1173_v49, %v684_v15  ;;  %v739_v22 = vadd.f32 %v1173_v49, %v700_v16 }
 0x110   : > { %787 = vst.msk [vmem:[%s1186_s24 + $0x10] sm:$0xff] %vm784_vm3, %v754_v19  ;;  %803 = vst.msk [vmem:[%s1186_s24 + $0x90] sm:$0xff] %vm784_vm3, %v770_v20  ;;  %v755_v23 = vmax.f32 %v723_v21, 0.0  ;;  %v771_v24 = vmax.f32 %v739_v22, 0.0 }
 0x111   : > { %v563_v25 = vpop.f32.mrb[8].mxu0  ;;  %v627_v26 = vpop.f32.mrb[8].mxu1 }
 0x112   : > { %788 = vst.msk [vmem:[%s1186_s24 + $0x18] sm:$0xff] %vm784_vm3, %v755_v23  ;;  %804 = vst.msk [vmem:[%s1186_s24 + $0x98] sm:$0xff] %vm784_vm3, %v771_v24  ;;  %v685_v27 = vmul.f32 %v1168_v47, %v563_v25  ;;  %v701_v28 = vmul.f32 %v1168_v47, %v627_v26  ;;  %v565_v29 = vpop.f32.mrb[9].mxu0  ;;  %v629_v30 = vpop.f32.mrb[9].mxu1 }
 0x113   : > { %v566_v31 = vpop.f32.mrb[10].mxu0  ;;  %v630_v32 = vpop.f32.mrb[10].mxu1 }
 0x114   : > { %v724_v33 = vadd.f32 %v1173_v49, %v685_v27  ;;  %v740_v34 = vadd.f32 %v1173_v49, %v701_v28  ;;  %v686_v35 = vmul.f32 %v1168_v47, %v566_v31  ;;  %v702_v36 = vmul.f32 %v1168_v47, %v630_v32  ;;  %v568_v37 = vpop.f32.mrb[11].mxu0  ;;  %v632_v38 = vpop.f32.mrb[11].mxu1 }
 0x116   : > { %v756_v39 = vmax.f32 %v724_v33, 0.0  ;;  %v772_v40 = vmax.f32 %v740_v34, 0.0  ;;  %v725_v41 = vadd.f32 %v1173_v49, %v686_v35  ;;  %v741_v42 = vadd.f32 %v1173_v49, %v702_v36 }
 0x118   : > { %789 = vst.msk [vmem:[%s1186_s24 + $0x20] sm:$0xff] %vm784_vm3, %v756_v39  ;;  %805 = vst.msk [vmem:[%s1186_s24 + $0xa0] sm:$0xff] %vm784_vm3, %v772_v40  ;;  %v757_v43 = vmax.f32 %v725_v41, 0.0  ;;  %v773_v44 = vmax.f32 %v741_v42, 0.0 }
 0x119   : > { %v571_v45 = vpop.f32.mrb[12].mxu0  ;;  %v635_v46 = vpop.f32.mrb[12].mxu1 }
 0x11a   : > { %790 = vst.msk [vmem:[%s1186_s24 + $0x28] sm:$0xff] %vm784_vm3, %v757_v43  ;;  %806 = vst.msk [vmem:[%s1186_s24 + $0xa8] sm:$0xff] %vm784_vm3, %v773_v44  ;;  %v687_v48 = vmul.f32 %v1168_v47, %v571_v45  ;;  %v703_v50 = vmul.f32 %v1168_v47, %v635_v46  ;;  %v573_v51 = vpop.f32.mrb[13].mxu0  ;;  %v637_v52 = vpop.f32.mrb[13].mxu1 }
 0x11b   : > { %v574_v53 = vpop.f32.mrb[14].mxu0  ;;  %v638_v54 = vpop.f32.mrb[14].mxu1 }
 0x11c   : > { %v726_v55 = vadd.f32 %v1173_v49, %v687_v48  ;;  %v742_v56 = vadd.f32 %v1173_v49, %v703_v50  ;;  %v688_v57 = vmul.f32 %v1168_v47, %v574_v53  ;;  %v704_v58 = vmul.f32 %v1168_v47, %v638_v54  ;;  %v576_v59 = vpop.f32.mrb[15].mxu0  ;;  %v640_v60 = vpop.f32.mrb[15].mxu1 }
 0x11e   : > { %v758_v61 = vmax.f32 %v726_v55, 0.0  ;;  %v774_v62 = vmax.f32 %v742_v56, 0.0  ;;  %v727_v63 = vadd.f32 %v1173_v49, %v688_v57  ;;  %v743_v0 = vadd.f32 %v1173_v49, %v704_v58 }
 0x120   : > { %791 = vst.msk [vmem:[%s1186_s24 + $0x30] sm:$0xff] %vm784_vm3, %v758_v61  ;;  %807 = vst.msk [vmem:[%s1186_s24 + $0xb0] sm:$0xff] %vm784_vm3, %v774_v62  ;;  %v759_v1 = vmax.f32 %v727_v63, 0.0  ;;  %v775_v2 = vmax.f32 %v743_v0, 0.0 }
 0x121   : > { %v579_v3 = vpop.f32.mrb[16].mxu0  ;;  %v643_v4 = vpop.f32.mrb[16].mxu1 }
 0x122   : > { %792 = vst.msk [vmem:[%s1186_s24 + $0x38] sm:$0xff] %vm784_vm3, %v759_v1  ;;  %808 = vst.msk [vmem:[%s1186_s24 + $0xb8] sm:$0xff] %vm784_vm3, %v775_v2  ;;  %v689_v5 = vmul.f32 %v1168_v47, %v579_v3  ;;  %v705_v6 = vmul.f32 %v1168_v47, %v643_v4  ;;  %v581_v7 = vpop.f32.mrb[17].mxu0  ;;  %v645_v8 = vpop.f32.mrb[17].mxu1 }
 0x123   : > { %v582_v9 = vpop.f32.mrb[18].mxu0  ;;  %v646_v10 = vpop.f32.mrb[18].mxu1 }
 0x124   : > { %v728_v11 = vadd.f32 %v1173_v49, %v689_v5  ;;  %v744_v12 = vadd.f32 %v1173_v49, %v705_v6  ;;  %v690_v13 = vmul.f32 %v1168_v47, %v582_v9  ;;  %v706_v14 = vmul.f32 %v1168_v47, %v646_v10  ;;  %v584_v15 = vpop.f32.mrb[19].mxu0  ;;  %v648_v16 = vpop.f32.mrb[19].mxu1 }
 0x126   : > { %v760_v17 = vmax.f32 %v728_v11, 0.0  ;;  %v776_v18 = vmax.f32 %v744_v12, 0.0  ;;  %v729_v19 = vadd.f32 %v1173_v49, %v690_v13  ;;  %v745_v20 = vadd.f32 %v1173_v49, %v706_v14 }
 0x128   : > { %793 = vst.msk [vmem:[%s1186_s24 + $0x40] sm:$0xff] %vm784_vm3, %v760_v17  ;;  %809 = vst.msk [vmem:[%s1186_s24 + $0xc0] sm:$0xff] %vm784_vm3, %v776_v18  ;;  %v761_v21 = vmax.f32 %v729_v19, 0.0  ;;  %v777_v22 = vmax.f32 %v745_v20, 0.0 }
 0x129   : > { %v587_v23 = vpop.f32.mrb[20].mxu0  ;;  %v651_v24 = vpop.f32.mrb[20].mxu1 }
 0x12a   : > { %794 = vst.msk [vmem:[%s1186_s24 + $0x48] sm:$0xff] %vm784_vm3, %v761_v21  ;;  %810 = vst.msk [vmem:[%s1186_s24 + $0xc8] sm:$0xff] %vm784_vm3, %v777_v22  ;;  %v691_v25 = vmul.f32 %v1168_v47, %v587_v23  ;;  %v707_v26 = vmul.f32 %v1168_v47, %v651_v24  ;;  %v589_v27 = vpop.f32.mrb[21].mxu0  ;;  %v653_v28 = vpop.f32.mrb[21].mxu1 }
 0x12b   : > { %v590_v29 = vpop.f32.mrb[22].mxu0  ;;  %v654_v30 = vpop.f32.mrb[22].mxu1 }
 0x12c   : > { %v730_v31 = vadd.f32 %v1173_v49, %v691_v25  ;;  %v746_v32 = vadd.f32 %v1173_v49, %v707_v26  ;;  %v692_v33 = vmul.f32 %v1168_v47, %v590_v29  ;;  %v708_v34 = vmul.f32 %v1168_v47, %v654_v30  ;;  %v592_v35 = vpop.f32.mrb[23].mxu0  ;;  %v656_v36 = vpop.f32.mrb[23].mxu1 }
 0x12e   : > { %v762_v37 = vmax.f32 %v730_v31, 0.0  ;;  %v778_v38 = vmax.f32 %v746_v32, 0.0  ;;  %v731_v39 = vadd.f32 %v1173_v49, %v692_v33  ;;  %v747_v40 = vadd.f32 %v1173_v49, %v708_v34 }
 0x130   : > { %795 = vst.msk [vmem:[%s1186_s24 + $0x50] sm:$0xff] %vm784_vm3, %v762_v37  ;;  %811 = vst.msk [vmem:[%s1186_s24 + $0xd0] sm:$0xff] %vm784_vm3, %v778_v38  ;;  %v763_v41 = vmax.f32 %v731_v39, 0.0  ;;  %v779_v42 = vmax.f32 %v747_v40, 0.0 }
 0x131   : > { %v595_v43 = vpop.f32.mrb[24].mxu0  ;;  %v659_v44 = vpop.f32.mrb[24].mxu1 }
 0x132   : > { %796 = vst.msk [vmem:[%s1186_s24 + $0x58] sm:$0xff] %vm784_vm3, %v763_v41  ;;  %812 = vst.msk [vmem:[%s1186_s24 + $0xd8] sm:$0xff] %vm784_vm3, %v779_v42  ;;  %v693_v45 = vmul.f32 %v1168_v47, %v595_v43  ;;  %v709_v46 = vmul.f32 %v1168_v47, %v659_v44  ;;  %v597_v48 = vpop.f32.mrb[25].mxu0  ;;  %v661_v50 = vpop.f32.mrb[25].mxu1 }
 0x133   : > { %v598_v51 = vpop.f32.mrb[26].mxu0  ;;  %v662_v52 = vpop.f32.mrb[26].mxu1 }
 0x134   : > { %v732_v53 = vadd.f32 %v1173_v49, %v693_v45  ;;  %v748_v54 = vadd.f32 %v1173_v49, %v709_v46  ;;  %v694_v55 = vmul.f32 %v1168_v47, %v598_v51  ;;  %v710_v56 = vmul.f32 %v1168_v47, %v662_v52  ;;  %v600_v57 = vpop.f32.mrb[27].mxu0  ;;  %v664_v58 = vpop.f32.mrb[27].mxu1 }
 0x136   : > { %v764_v59 = vmax.f32 %v732_v53, 0.0  ;;  %v780_v60 = vmax.f32 %v748_v54, 0.0  ;;  %v733_v61 = vadd.f32 %v1173_v49, %v694_v55  ;;  %v749_v62 = vadd.f32 %v1173_v49, %v710_v56 }
 0x138   : > { %797 = vst.msk [vmem:[%s1186_s24 + $0x60] sm:$0xff] %vm784_vm3, %v764_v59  ;;  %813 = vst.msk [vmem:[%s1186_s24 + $0xe0] sm:$0xff] %vm784_vm3, %v780_v60  ;;  %v765_v63 = vmax.f32 %v733_v61, 0.0  ;;  %v781_v0 = vmax.f32 %v749_v62, 0.0 }
 0x139   : > { %v603_v1 = vpop.f32.mrb[28].mxu0  ;;  %v667_v2 = vpop.f32.mrb[28].mxu1 }
 0x13a   : > { %798 = vst.msk [vmem:[%s1186_s24 + $0x68] sm:$0xff] %vm784_vm3, %v765_v63  ;;  %814 = vst.msk [vmem:[%s1186_s24 + $0xe8] sm:$0xff] %vm784_vm3, %v781_v0  ;;  %v695_v3 = vmul.f32 %v1168_v47, %v603_v1  ;;  %v711_v4 = vmul.f32 %v1168_v47, %v667_v2  ;;  %v605_v5 = vpop.f32.mrb[29].mxu0  ;;  %v669_v6 = vpop.f32.mrb[29].mxu1 }
 0x13b   : > { %v606_v7 = vpop.f32.mrb[30].mxu0  ;;  %v670_v8 = vpop.f32.mrb[30].mxu1 }
 0x13c   : > { %v734_v9 = vadd.f32 %v1173_v49, %v695_v3  ;;  %v750_v10 = vadd.f32 %v1173_v49, %v711_v4  ;;  %v696_v11 = vmul.f32 %v1168_v47, %v606_v7  ;;  %v712_v12 = vmul.f32 %v1168_v47, %v670_v8  ;;  %v608_v13 = vpop.f32.mrb[31].mxu0  ;;  %v672_v14 = vpop.f32.mrb[31].mxu1 }
 0x13e   : > { %v766_v15 = vmax.f32 %v734_v9, 0.0  ;;  %v782_v16 = vmax.f32 %v750_v10, 0.0  ;;  %v735_v17 = vadd.f32 %v1173_v49, %v696_v11  ;;  %v751_v18 = vadd.f32 %v1173_v49, %v712_v12 }
 0x140   : > { %799 = vst.msk [vmem:[%s1186_s24 + $0x70] sm:$0xff] %vm784_vm3, %v766_v15  ;;  %815 = vst.msk [vmem:[%s1186_s24 + $0xf0] sm:$0xff] %vm784_vm3, %v782_v16  ;;  %v767_v19 = vmax.f32 %v735_v17, 0.0  ;;  %v783_v20 = vmax.f32 %v751_v18, 0.0 }
 0x142   : > { %800 = vst.msk [vmem:[%s1186_s24 + $0x78] sm:$0xff] %vm784_vm3, %v767_v19  ;;  %816 = vst.msk [vmem:[%s1186_s24 + $0xf8] sm:$0xff] %vm784_vm3, %v783_v20 }
 0x143 PF: > { %s14_s15 = sadd.s32 1, %s1040_s15  }
 0x144   : > { %p11_p4 = scmp.ge.s32.totalorder %s14_s15, 4  }
 0x146   :  { %13 = sbr.rel (!%p11_p4) target bundleno = 1 (0x1), region = 66 }

// kernel: densenet_forward.26
= control target key start
LH: loop header
LB: loop body
LE: loop exit
PB: predicated region body
PF: predicated region fallthrough
CT: control target
= control target key end

     0   :  { %s142_s0 = inlined_call_operand.vmem [shape: f32[9,4,512], index: 0, kind: input, shape index: {}]   ;;  %s143_s1 = inlined_call_operand.vmem [shape: f32[4,512], index: 1, kind: output, shape index: {}]  }
   0x1   :  { %v8_v0 = vld [vmem:[%s142_s0] sm:$0xff]  ;;  %v56_v1 = vld [vmem:[%s142_s0 + $0x10] sm:$0xff]  ;;  %v9_v6 = vld [vmem:[%s142_s0 + $0x8] sm:$0xff] }
   0x2   :  { %v58_v2 = vld [vmem:[%s142_s0 + $0x20] sm:$0xff]  ;;  %v13_v3 = vmax.f32 %v8_v0, %v56_v1  ;;  %v60_v4 = vld [vmem:[%s142_s0 + $0x30] sm:$0xff]  ;;  %v57_v7 = vld [vmem:[%s142_s0 + $0x18] sm:$0xff] }
   0x3   :  { %v59_v8 = vld [vmem:[%s142_s0 + $0x28] sm:$0xff]  ;;  %v62_v9 = vld [vmem:[%s142_s0 + $0x40] sm:$0xff]  ;;  %v14_v10 = vmax.f32 %v9_v6, %v57_v7  ;;  %v61_v12 = vld [vmem:[%s142_s0 + $0x38] sm:$0xff] }
   0x4   :  { %v18_v5 = vmax.f32 %v13_v3, %v58_v2  ;;  %v64_v13 = vld [vmem:[%s142_s0 + $0x50] sm:$0xff]  ;;  %v63_v16 = vld [vmem:[%s142_s0 + $0x48] sm:$0xff]  ;;  %v66_v17 = vld [vmem:[%s142_s0 + $0x60] sm:$0xff] }
   0x5   :  { %v19_v14 = vmax.f32 %v14_v10, %v59_v8  ;;  %v65_v20 = vld [vmem:[%s142_s0 + $0x58] sm:$0xff]  ;;  %v68_v21 = vld [vmem:[%s142_s0 + $0x70] sm:$0xff]  ;;  %v67_v24 = vld [vmem:[%s142_s0 + $0x68] sm:$0xff] }
   0x6   :  { %v23_v11 = vmax.f32 %v18_v5, %v60_v4  ;;  %v70_v25 = vld [vmem:[%s142_s0 + $0x80] sm:$0xff]  ;;  %v69_v28 = vld [vmem:[%s142_s0 + $0x78] sm:$0xff]  ;;  %v71_v31 = vld [vmem:[%s142_s0 + $0x88] sm:$0xff] }
   0x7   :  { %v24_v18 = vmax.f32 %v19_v14, %v61_v12 }
   0x8   :  { %v28_v15 = vmax.f32 %v23_v11, %v62_v9 }
   0x9   :  { %v29_v22 = vmax.f32 %v24_v18, %v63_v16 }
   0xa   :  { %v33_v19 = vmax.f32 %v28_v15, %v64_v13 }
   0xb   :  { %v34_v26 = vmax.f32 %v29_v22, %v65_v20 }
   0xc   :  { %v38_v23 = vmax.f32 %v33_v19, %v66_v17 }
   0xd   :  { %v39_v29 = vmax.f32 %v34_v26, %v67_v24 }
   0xe   :  { %v43_v27 = vmax.f32 %v38_v23, %v68_v21 }
   0xf   :  { %v44_v32 = vmax.f32 %v39_v29, %v69_v28 }
  0x10   :  { %v48_v30 = vmax.f32 %v43_v27, %v70_v25 }
  0x11   :  { %v49_v33 = vmax.f32 %v44_v32, %v71_v31 }
  0x12   :  { %50 = vst [vmem:[%s143_s1] sm:$0xff] %v48_v30 }
  0x13   :  { %51 = vst [vmem:[%s143_s1 + $0x8] sm:$0xff] %v49_v33 }

// kernel: densenet_forward.27
= control target key start
LH: loop header
LB: loop body
LE: loop exit
PB: predicated region body
PF: predicated region fallthrough
CT: control target
= control target key end

     0   :  { %s480_s15 = smov 0   ;;  %s525_s0 = inlined_call_operand.vmem [shape: f32[128,16], index: 0, kind: input, shape index: {}]   ;;  %s526_s1 = inlined_call_operand.vmem [shape: f32[1,16], index: 1, kind: input, shape index: {}]   ;;  %s527_s2 = inlined_call_operand.vmem [shape: f32[1,16], index: 2, kind: input, shape index: {}]   ;;  %s528_s3 = inlined_call_operand.vmem [shape: bf16[16,32], index: 3, kind: input, shape index: {}]   ;;  %s529_s4 = inlined_call_operand.vmem [shape: f32[128,32], index: 4, kind: output, shape index: {}]  }
   0x1 LB: > { %s403_s16 = sadd.s32 4294967295, %s453_s15   ;;  %p407_p0 = scmp.ge.s32.totalorder %s453_s15, 1  ;;  %s453_s15 = sphi %s480_s15, %s14_s15  }
   0x2   : > { %p163_p1 = scmp.lt.s32.totalorder %s453_s15, 3 }
   0x4   : > { %p164_p2 = pnand %p407_p0, %p163_p1 }
   0x5   : > { %v446_v0 = vld [vmem:[%s528_s3] sm:$0xff] (!%p164_p2)   ;;  %s408_s19 = sshll.u32 (!%p164_p2), %s403_s16, 3  ;;  %vm260_vm0 = vcmask (!%p164_p2), 130048   ;;  %vm338_vm1 = vcmask (!%p164_p2), 261120  }
   0x6   : > { %167 = sbr.rel (%p164_p2) target bundleno = 244 (0xf4), region = 36  ;;  %p190_p3 = scmp.lt.s32.totalorder (!%p164_p2), %s408_s19, 15  ;;  %426 = vmatprep.subr.bf16.mxu0 (!%p164_p2), %v446_v0  ;;  %436 = vmatprep.subr.bf16.mxu1 (!%p164_p2), %v446_v0  ;;  %v412_v1 = vld [vmem:[%s526_s1] ss:$0 sm:$0xff] (!%p164_p2) }
   0x7   : > { %427 = vmatpush3.bf16.msra.mxu0 (!%p164_p2), %v446_v0  ;;  %437 = vmatpush3.bf16.msra.mxu1 (!%p164_p2), %v446_v0  ;;  %v413_v2 = vld [vmem:[%s527_s2] ss:$0 sm:$0xff] (!%p164_p2) }
   0xd   : > { %s531_s19 = smov (!%p190_p3, %s408_s19), 15 }
   0xe   : > { %s409_s20 = sshll.u32 %s531_s19, 3 }
   0xf   : > { %s193_s25 = scalar_lea.vmem %s525_s0, %s409_s20  ;;  %s199_s30 = scalar_lea.vmem %s529_s4, %s409_s20 }
  0x10   : > { %v202_v3 = vld [vmem:[%s193_s25] sm:$0xff]  ;;  %v203_v4 = vld [vmem:[%s193_s25 + $0x8] sm:$0xff]  ;;  %v204_v10 = vld [vmem:[%s193_s25 + $0x10] sm:$0xff] }
  0x11   : > { %v206_v5 = vld [vmem:[%s193_s25 + $0x20] sm:$0xff]  ;;  %v217_v6 = vmul.f32 %v412_v1, %v202_v3  ;;  %v218_v7 = vmul.f32 %v412_v1, %v203_v4  ;;  %v207_v8 = vld [vmem:[%s193_s25 + $0x28] sm:$0xff]  ;;  %v205_v11 = vld [vmem:[%s193_s25 + $0x18] sm:$0xff]  ;;  %v219_v13 = vmul.f32 %v412_v1, %v204_v10 }
  0x12   : > { %v221_v9 = vmul.f32 %v412_v1, %v206_v5  ;;  %v222_v12 = vmul.f32 %v412_v1, %v207_v8  ;;  %v220_v14 = vmul.f32 %v412_v1, %v205_v11  ;;  %v208_v15 = vld [vmem:[%s193_s25 + $0x30] sm:$0xff]  ;;  %v209_v16 = vld [vmem:[%s193_s25 + $0x38] sm:$0xff] }
  0x13   : > { %v232_v17 = vadd.f32 %v413_v2, %v217_v6  ;;  %v233_v18 = vadd.f32 %v413_v2, %v218_v7  ;;  %v223_v20 = vmul.f32 %v412_v1, %v208_v15  ;;  %v234_v22 = vadd.f32 %v413_v2, %v219_v13 }
  0x14   : > { %v236_v19 = vadd.f32 %v413_v2, %v221_v9  ;;  %v237_v21 = vadd.f32 %v413_v2, %v222_v12  ;;  %v235_v23 = vadd.f32 %v413_v2, %v220_v14  ;;  %v224_v24 = vmul.f32 %v412_v1, %v209_v16 }
  0x15   : > { %v240_v25 = vmax.f32 %v232_v17, 0.0  ;;  %v241_v26 = vmax.f32 %v233_v18, 0.0  ;;  %v238_v28 = vadd.f32 %v413_v2, %v223_v20  ;;  %v242_v30 = vmax.f32 %v234_v22, 0.0 }
  0x16   : > { %v244_v27 = vmax.f32 %v236_v19, 0.0  ;;  %v245_v29 = vmax.f32 %v237_v21, 0.0  ;;  %v243_v31 = vmax.f32 %v235_v23, 0.0  ;;  %v239_v32 = vadd.f32 %v413_v2, %v224_v24 }
  0x17   : > { %v248_v33 = vpack.c.bf16 %v241_v26, %v240_v25  ;;  %v246_v34 = vmax.f32 %v238_v28, 0.0 }
  0x18   : > { %v250_v35 = vpack.c.bf16 %v245_v29, %v244_v27  ;;  %v249_v36 = vpack.c.bf16 %v243_v31, %v242_v30  ;;  %v247_v37 = vmax.f32 %v239_v32, 0.0 }
  0x19   : > { %428 = vmatprep.mubr.msk.bf16.mxu0 %vm260_vm0, %v248_v33 }
  0x1a   : > { %432 = vmatprep.mubr.msk.bf16.mxu1 %vm260_vm0, %v250_v35  ;;  %429 = vmatmul.mubr.msk.bf16.vlgmr.msra.gmra.mrb[0].mxu0 %vm260_vm0, %v249_v36  ;;  %v251_v38 = vpack.c.bf16 %v247_v37, %v246_v34 }
  0x1c   : > { %433 = vmatmul.mubr.msk.bf16.vlgmr.msra.gmra.mrb[0].mxu1 %vm260_vm0, %v251_v38 }
  0xed   : > { %v430_v39 = vpop.f32.mrb[0].mxu0 }
  0xee   : > { %341 = vst.msk [vmem:[%s199_s30 + $0x10] sm:$0xff] %vm338_vm1, %v430_v39  ;;  %v307_v40 = vpop.f32.mrb[1].mxu0 }
  0xef   : > { %v434_v41 = vpop.f32.mrb[0].mxu1  ;;  %339 = vst.msk [vmem:[%s199_s30] sm:$0xff] %vm338_vm1, %v307_v40  ;;  %v431_v42 = vpop.f32.mrb[2].mxu0 }
  0xf0   : > { %345 = vst.msk [vmem:[%s199_s30 + $0x30] sm:$0xff] %vm338_vm1, %v434_v41  ;;  %v323_v43 = vpop.f32.mrb[1].mxu1  ;;  %342 = vst.msk [vmem:[%s199_s30 + $0x18] sm:$0xff] %vm338_vm1, %v431_v42  ;;  %v310_v44 = vpop.f32.mrb[3].mxu0 }
  0xf1   : > { %343 = vst.msk [vmem:[%s199_s30 + $0x20] sm:$0xff] %vm338_vm1, %v323_v43  ;;  %v435_v45 = vpop.f32.mrb[2].mxu1  ;;  %340 = vst.msk [vmem:[%s199_s30 + $0x8] sm:$0xff] %vm338_vm1, %v310_v44 }
  0xf2   : > { %346 = vst.msk [vmem:[%s199_s30 + $0x38] sm:$0xff] %vm338_vm1, %v435_v45  ;;  %v326_v46 = vpop.f32.mrb[3].mxu1 }
  0xf3   : > { %344 = vst.msk [vmem:[%s199_s30 + $0x28] sm:$0xff] %vm338_vm1, %v326_v46 }
  0xf4 PF: > { %s14_s15 = sadd.s32 1, %s453_s15  }
  0xf5   : > { %p11_p4 = scmp.ge.s32.totalorder %s14_s15, 4  }
  0xf7   :  { %13 = sbr.rel (!%p11_p4) target bundleno = 1 (0x1), region = 66 }

// kernel: densenet_forward.29
= control target key start
LH: loop header
LB: loop body
LE: loop exit
PB: predicated region body
PF: predicated region fallthrough
CT: control target
= control target key end

     0   :  { %s497_s15 = smov 0   ;;  %s545_s0 = inlined_call_operand.vmem [shape: f32[128,24], index: 0, kind: input, shape index: {}]   ;;  %s546_s1 = inlined_call_operand.vmem [shape: f32[1,24], index: 1, kind: input, shape index: {}]   ;;  %s547_s2 = inlined_call_operand.vmem [shape: f32[1,24], index: 2, kind: input, shape index: {}]   ;;  %s548_s3 = inlined_call_operand.vmem [shape: bf16[24,32], index: 3, kind: input, shape index: {}]   ;;  %s549_s4 = inlined_call_operand.vmem [shape: f32[128,32], index: 4, kind: output, shape index: {}]  }
   0x1 LB: > { %s411_s16 = sadd.s32 4294967295, %s470_s15   ;;  %p415_p0 = scmp.ge.s32.totalorder %s470_s15, 1  ;;  %s470_s15 = sphi %s497_s15, %s14_s15  }
   0x2   : > { %p163_p1 = scmp.lt.s32.totalorder %s470_s15, 3 }
   0x4   : > { %p164_p2 = pnand %p415_p0, %p163_p1 }
   0x5   : > { %v462_v0 = vld [vmem:[%s548_s3] sm:$0xff] (!%p164_p2)   ;;  %v463_v1 = vld [vmem:[%s548_s3 + $0x8] ss:$0 sps:$4 sm:$0xff] (!%p164_p2)   ;;  %vm277_vm0 = vcmask (!%p164_p2), 1043456   ;;  %s416_s21 = sshll.u32 (!%p164_p2), %s411_s16, 3  ;;  %vm264_vm1 = vcmask (!%p164_p2), 195584  }
   0x6   : > { %167 = sbr.rel (%p164_p2) target bundleno = 244 (0xf4), region = 36  ;;  %436 = vmatprep.subr.bf16.mxu0 (!%p164_p2), %v462_v0  ;;  %448 = vmatprep.subr.bf16.mxu1 (!%p164_p2), %v462_v0  ;;  %p190_p3 = scmp.lt.s32.totalorder (!%p164_p2), %s416_s21, 15  ;;  %v279_v2 = vsel (!%p164_p2), %vm277_vm0, %v463_v1, 0  ;;  %v420_v3 = vld [vmem:[%s546_s1] ss:$0 sm:$0xff] (!%p164_p2)  ;;  %vm346_vm2 = vcmask (!%p164_p2), 261120  }
   0x7   : > { %437 = vmatpush3.bf16.msra.mxu0 (!%p164_p2), %v462_v0  ;;  %450 = vmatpush3.bf16.msra.mxu1 (!%p164_p2), %v462_v0  ;;  %v421_v4 = vld [vmem:[%s547_s2] ss:$0 sm:$0xff] (!%p164_p2) }
   0x8   : > { %452 = vmatprep.subr.msk.bf16.mxu0 (!%p164_p2), %vm277_vm0, %v463_v1  ;;  %453 = vmatprep.subr.msk.bf16.mxu1 (!%p164_p2), %vm277_vm0, %v463_v1 }
   0xb   : > { %439 = vmatpush3.bf16.msra.mxu0 (!%p164_p2), %v279_v2  ;;  %451 = vmatpush3.bf16.msra.mxu1 (!%p164_p2), %v279_v2 }
   0xd   : > { %s551_s21 = smov (!%p190_p3, %s416_s21), 15 }
   0xe   : > { %s417_s22 = sshll.u32 %s551_s21, 3 }
   0xf   : > { %s193_s27 = scalar_lea.vmem %s545_s0, %s417_s22  ;;  %s199_s6 = scalar_lea.vmem %s549_s4, %s417_s22 }
  0x10   : > { %v202_v5 = vld [vmem:[%s193_s27] sm:$0xff]  ;;  %v203_v6 = vld [vmem:[%s193_s27 + $0x8] sm:$0xff]  ;;  %v204_v12 = vld [vmem:[%s193_s27 + $0x10] sm:$0xff] }
  0x11   : > { %v206_v7 = vld [vmem:[%s193_s27 + $0x20] sm:$0xff]  ;;  %v217_v8 = vmul.f32 %v420_v3, %v202_v5  ;;  %v218_v9 = vmul.f32 %v420_v3, %v203_v6  ;;  %v207_v10 = vld [vmem:[%s193_s27 + $0x28] sm:$0xff]  ;;  %v205_v13 = vld [vmem:[%s193_s27 + $0x18] sm:$0xff]  ;;  %v219_v15 = vmul.f32 %v420_v3, %v204_v12 }
  0x12   : > { %v221_v11 = vmul.f32 %v420_v3, %v206_v7  ;;  %v222_v14 = vmul.f32 %v420_v3, %v207_v10  ;;  %v220_v16 = vmul.f32 %v420_v3, %v205_v13  ;;  %v208_v17 = vld [vmem:[%s193_s27 + $0x30] sm:$0xff]  ;;  %v209_v18 = vld [vmem:[%s193_s27 + $0x38] sm:$0xff] }
  0x13   : > { %v232_v19 = vadd.f32 %v421_v4, %v217_v8  ;;  %v233_v20 = vadd.f32 %v421_v4, %v218_v9  ;;  %v223_v22 = vmul.f32 %v420_v3, %v208_v17  ;;  %v234_v24 = vadd.f32 %v421_v4, %v219_v15 }
  0x14   : > { %v236_v21 = vadd.f32 %v421_v4, %v221_v11  ;;  %v237_v23 = vadd.f32 %v421_v4, %v222_v14  ;;  %v235_v25 = vadd.f32 %v421_v4, %v220_v16  ;;  %v224_v26 = vmul.f32 %v420_v3, %v209_v18 }
  0x15   : > { %v240_v27 = vmax.f32 %v232_v19, 0.0  ;;  %v241_v28 = vmax.f32 %v233_v20, 0.0  ;;  %v238_v30 = vadd.f32 %v421_v4, %v223_v22  ;;  %v242_v32 = vmax.f32 %v234_v24, 0.0 }
  0x16   : > { %v244_v29 = vmax.f32 %v236_v21, 0.0  ;;  %v245_v31 = vmax.f32 %v237_v23, 0.0  ;;  %v243_v33 = vmax.f32 %v235_v25, 0.0  ;;  %v239_v34 = vadd.f32 %v421_v4, %v224_v26 }
  0x17   : > { %v248_v35 = vpack.c.bf16 %v241_v28, %v240_v27  ;;  %v246_v36 = vmax.f32 %v238_v30, 0.0 }
  0x18   : > { %v250_v37 = vpack.c.bf16 %v245_v31, %v244_v29  ;;  %v249_v38 = vpack.c.bf16 %v243_v33, %v242_v32  ;;  %v247_v39 = vmax.f32 %v239_v34, 0.0 }
  0x19   : > { %440 = vmatprep.mubr.msk.bf16.mxu0 %vm264_vm1, %v248_v35 }
  0x1a   : > { %444 = vmatprep.mubr.msk.bf16.mxu1 %vm264_vm1, %v250_v37  ;;  %441 = vmatmul.mubr.msk.bf16.vlgmr.msra.gmra.mrb[0].mxu0 %vm264_vm1, %v249_v38  ;;  %v251_v40 = vpack.c.bf16 %v247_v39, %v246_v36 }
  0x1c   : > { %445 = vmatmul.mubr.msk.bf16.vlgmr.msra.gmra.mrb[0].mxu1 %vm264_vm1, %v251_v40 }
  0xed   : > { %v442_v41 = vpop.f32.mrb[0].mxu0 }
  0xee   : > { %349 = vst.msk [vmem:[%s199_s6 + $0x10] sm:$0xff] %vm346_vm2, %v442_v41  ;;  %v315_v42 = vpop.f32.mrb[1].mxu0 }
  0xef   : > { %v446_v43 = vpop.f32.mrb[0].mxu1  ;;  %347 = vst.msk [vmem:[%s199_s6] sm:$0xff] %vm346_vm2, %v315_v42  ;;  %v443_v44 = vpop.f32.mrb[2].mxu0 }
  0xf0   : > { %353 = vst.msk [vmem:[%s199_s6 + $0x30] sm:$0xff] %vm346_vm2, %v446_v43  ;;  %v331_v45 = vpop.f32.mrb[1].mxu1  ;;  %350 = vst.msk [vmem:[%s199_s6 + $0x18] sm:$0xff] %vm346_vm2, %v443_v44  ;;  %v318_v46 = vpop.f32.mrb[3].mxu0 }
  0xf1   : > { %351 = vst.msk [vmem:[%s199_s6 + $0x20] sm:$0xff] %vm346_vm2, %v331_v45  ;;  %v447_v47 = vpop.f32.mrb[2].mxu1  ;;  %348 = vst.msk [vmem:[%s199_s6 + $0x8] sm:$0xff] %vm346_vm2, %v318_v46 }
  0xf2   : > { %354 = vst.msk [vmem:[%s199_s6 + $0x38] sm:$0xff] %vm346_vm2, %v447_v47  ;;  %v334_v48 = vpop.f32.mrb[3].mxu1 }
  0xf3   : > { %352 = vst.msk [vmem:[%s199_s6 + $0x28] sm:$0xff] %vm346_vm2, %v334_v48 }
  0xf4 PF: > { %s14_s15 = sadd.s32 1, %s470_s15  }
  0xf5   : > { %p11_p4 = scmp.ge.s32.totalorder %s14_s15, 4  }
  0xf7   :  { %13 = sbr.rel (!%p11_p4) target bundleno = 1 (0x1), region = 66 }

// kernel: densenet_forward.31
= control target key start
LH: loop header
LB: loop body
LE: loop exit
PB: predicated region body
PF: predicated region fallthrough
CT: control target
= control target key end

     0   :  { %s495_s15 = smov 0   ;;  %s543_s0 = inlined_call_operand.vmem [shape: f32[128,32], index: 0, kind: input, shape index: {}]   ;;  %s544_s1 = inlined_call_operand.vmem [shape: f32[1,32], index: 1, kind: input, shape index: {}]   ;;  %s545_s2 = inlined_call_operand.vmem [shape: f32[1,32], index: 2, kind: input, shape index: {}]   ;;  %s546_s3 = inlined_call_operand.vmem [shape: bf16[32,16], index: 3, kind: input, shape index: {}]   ;;  %s547_s4 = inlined_call_operand.vmem [shape: f32[128,16], index: 4, kind: output, shape index: {}]  }
   0x1 LB: > { %s411_s16 = sadd.s32 4294967295, %s468_s15   ;;  %p415_p0 = scmp.ge.s32.totalorder %s468_s15, 1  ;;  %s468_s15 = sphi %s495_s15, %s14_s15  }
   0x2   : > { %p163_p1 = scmp.lt.s32.totalorder %s468_s15, 3 }
   0x4   : > { %p164_p2 = pnand %p415_p0, %p163_p1 }
   0x5   : > { %v460_v0 = vld [vmem:[%s546_s3] sm:$0xff] (!%p164_p2)   ;;  %s416_s19 = sshll.u32 (!%p164_p2), %s411_s16, 3  ;;  %v461_v1 = vld [vmem:[%s546_s3 + $0x8] sm:$0xff] (!%p164_p2)   ;;  %vm268_vm0 = vcmask (!%p164_p2), 261120   ;;  %vm346_vm1 = vcmask (!%p164_p2), 130048  }
   0x6   : > { %167 = sbr.rel (%p164_p2) target bundleno = 244 (0xf4), region = 36  ;;  %p190_p3 = scmp.lt.s32.totalorder (!%p164_p2), %s416_s19, 15  ;;  %436 = vmatprep.subr.bf16.mxu0 (!%p164_p2), %v460_v0  ;;  %448 = vmatprep.subr.bf16.mxu1 (!%p164_p2), %v460_v0  ;;  %v420_v2 = vld [vmem:[%s544_s1] ss:$0 sm:$0xff] (!%p164_p2) }
   0x7   : > { %437 = vmatpush3.bf16.msra.mxu0 (!%p164_p2), %v460_v0  ;;  %450 = vmatpush3.bf16.msra.mxu1 (!%p164_p2), %v460_v0  ;;  %v421_v3 = vld [vmem:[%s545_s2] ss:$0 sm:$0xff] (!%p164_p2) }
   0x8   : > { %438 = vmatprep.subr.bf16.mxu0 (!%p164_p2), %v461_v1  ;;  %449 = vmatprep.subr.bf16.mxu1 (!%p164_p2), %v461_v1 }
   0xb   : > { %439 = vmatpush3.bf16.msra.mxu0 (!%p164_p2), %v461_v1  ;;  %451 = vmatpush3.bf16.msra.mxu1 (!%p164_p2), %v461_v1 }
   0xd   : > { %s549_s19 = smov (!%p190_p3, %s416_s19), 15 }
   0xe   : > { %s417_s22 = sshll.u32 %s549_s19, 3 }
   0xf   : > { %s193_s27 = scalar_lea.vmem %s543_s0, %s417_s22  ;;  %s199_s6 = scalar_lea.vmem %s547_s4, %s417_s22 }
  0x10   : > { %v202_v4 = vld [vmem:[%s193_s27] sm:$0xff]  ;;  %v203_v5 = vld [vmem:[%s193_s27 + $0x8] sm:$0xff]  ;;  %v204_v11 = vld [vmem:[%s193_s27 + $0x10] sm:$0xff] }
  0x11   : > { %v206_v6 = vld [vmem:[%s193_s27 + $0x20] sm:$0xff]  ;;  %v217_v7 = vmul.f32 %v420_v2, %v202_v4  ;;  %v218_v8 = vmul.f32 %v420_v2, %v203_v5  ;;  %v207_v9 = vld [vmem:[%s193_s27 + $0x28] sm:$0xff]  ;;  %v205_v12 = vld [vmem:[%s193_s27 + $0x18] sm:$0xff]  ;;  %v219_v14 = vmul.f32 %v420_v2, %v204_v11 }
  0x12   : > { %v221_v10 = vmul.f32 %v420_v2, %v206_v6  ;;  %v222_v13 = vmul.f32 %v420_v2, %v207_v9  ;;  %v220_v15 = vmul.f32 %v420_v2, %v205_v12  ;;  %v208_v16 = vld [vmem:[%s193_s27 + $0x30] sm:$0xff]  ;;  %v209_v17 = vld [vmem:[%s193_s27 + $0x38] sm:$0xff] }
  0x13   : > { %v232_v18 = vadd.f32 %v421_v3, %v217_v7  ;;  %v233_v19 = vadd.f32 %v421_v3, %v218_v8  ;;  %v223_v21 = vmul.f32 %v420_v2, %v208_v16  ;;  %v234_v23 = vadd.f32 %v421_v3, %v219_v14 }
  0x14   : > { %v236_v20 = vadd.f32 %v421_v3, %v221_v10  ;;  %v237_v22 = vadd.f32 %v421_v3, %v222_v13  ;;  %v235_v24 = vadd.f32 %v421_v3, %v220_v15  ;;  %v224_v25 = vmul.f32 %v420_v2, %v209_v17 }
  0x15   : > { %v240_v26 = vmax.f32 %v232_v18, 0.0  ;;  %v241_v27 = vmax.f32 %v233_v19, 0.0  ;;  %v238_v29 = vadd.f32 %v421_v3, %v223_v21  ;;  %v242_v31 = vmax.f32 %v234_v23, 0.0 }
  0x16   : > { %v244_v28 = vmax.f32 %v236_v20, 0.0  ;;  %v245_v30 = vmax.f32 %v237_v22, 0.0  ;;  %v243_v32 = vmax.f32 %v235_v24, 0.0  ;;  %v239_v33 = vadd.f32 %v421_v3, %v224_v25 }
  0x17   : > { %v248_v34 = vpack.c.bf16 %v241_v27, %v240_v26  ;;  %v246_v35 = vmax.f32 %v238_v29, 0.0 }
  0x18   : > { %v250_v36 = vpack.c.bf16 %v245_v30, %v244_v28  ;;  %v249_v37 = vpack.c.bf16 %v243_v32, %v242_v31  ;;  %v247_v38 = vmax.f32 %v239_v33, 0.0 }
  0x19   : > { %440 = vmatprep.mubr.msk.bf16.mxu0 %vm268_vm0, %v248_v34 }
  0x1a   : > { %444 = vmatprep.mubr.msk.bf16.mxu1 %vm268_vm0, %v250_v36  ;;  %441 = vmatmul.mubr.msk.bf16.vlgmr.msra.gmra.mrb[0].mxu0 %vm268_vm0, %v249_v37  ;;  %v251_v39 = vpack.c.bf16 %v247_v38, %v246_v35 }
  0x1c   : > { %445 = vmatmul.mubr.msk.bf16.vlgmr.msra.gmra.mrb[0].mxu1 %vm268_vm0, %v251_v39 }
  0xed   : > { %v442_v40 = vpop.f32.mrb[0].mxu0 }
  0xee   : > { %349 = vst.msk [vmem:[%s199_s6 + $0x10] sm:$0xff] %vm346_vm1, %v442_v40  ;;  %v315_v41 = vpop.f32.mrb[1].mxu0 }
  0xef   : > { %v446_v42 = vpop.f32.mrb[0].mxu1  ;;  %347 = vst.msk [vmem:[%s199_s6] sm:$0xff] %vm346_vm1, %v315_v41  ;;  %v443_v43 = vpop.f32.mrb[2].mxu0 }
  0xf0   : > { %353 = vst.msk [vmem:[%s199_s6 + $0x30] sm:$0xff] %vm346_vm1, %v446_v42  ;;  %v331_v44 = vpop.f32.mrb[1].mxu1  ;;  %350 = vst.msk [vmem:[%s199_s6 + $0x18] sm:$0xff] %vm346_vm1, %v443_v43  ;;  %v318_v45 = vpop.f32.mrb[3].mxu0 }
  0xf1   : > { %351 = vst.msk [vmem:[%s199_s6 + $0x20] sm:$0xff] %vm346_vm1, %v331_v44  ;;  %v447_v46 = vpop.f32.mrb[2].mxu1  ;;  %348 = vst.msk [vmem:[%s199_s6 + $0x8] sm:$0xff] %vm346_vm1, %v318_v45 }
  0xf2   : > { %354 = vst.msk [vmem:[%s199_s6 + $0x38] sm:$0xff] %vm346_vm1, %v447_v46  ;;  %v334_v47 = vpop.f32.mrb[3].mxu1 }
  0xf3   : > { %352 = vst.msk [vmem:[%s199_s6 + $0x28] sm:$0xff] %vm346_vm1, %v334_v47 }
  0xf4 PF: > { %s14_s15 = sadd.s32 1, %s468_s15  }
  0xf5   : > { %p11_p4 = scmp.ge.s32.totalorder %s14_s15, 4  }
  0xf7   :  { %13 = sbr.rel (!%p11_p4) target bundleno = 1 (0x1), region = 66 }

// kernel: densenet_forward.28
= control target key start
LH: loop header
LB: loop body
LE: loop exit
PB: predicated region body
PF: predicated region fallthrough
CT: control target
= control target key end

     0   :  { %s2504_s18 = smov 0   ;;  %s3099_s0 = inlined_call_operand.vmem [shape: f32[2,82,32], index: 0, kind: input, shape index: {}]   ;;  %s3100_s1 = inlined_call_operand.vmem [shape: f32[1,32], index: 1, kind: input, shape index: {}]   ;;  %s3101_s2 = inlined_call_operand.vmem [shape: f32[1,32], index: 2, kind: input, shape index: {}]   ;;  %s3102_s3 = inlined_call_operand.vmem [shape: f32[9,64,1], index: 3, kind: input, shape index: {}]   ;;  %s3103_s4 = inlined_call_operand.vmem [shape: bf16[9,32,8], index: 4, kind: input, shape index: {}]   ;;  %s3104_s5 = inlined_call_operand.vmem [shape: f32[2,64,8], index: 5, kind: output, shape index: {}]  }
   0x1 LB: > { %s2042_s19 = sadd.s32 4294967295, %s2471_s18   ;;  %p2046_p0 = scmp.ge.s32.totalorder %s2471_s18, 1  ;;  %s2471_s18 = sphi %s2504_s18, %s15_s18  }
   0x2   : > { %p187_p1 = scmp.lt.s32.totalorder %s2471_s18, 3 }
   0x4   : > { %p188_p2 = pnand %p2046_p0, %p187_p1 }
   0x5   : > { %v2112_v0 = vld [vmem:[%s3102_s3 + $0x100] sm:$0xff] (!%p188_p2)  ;;  %v2473_v2 = vmov (!%p188_p2), 0   ;;  %v2113_v3 = vld [vmem:[%s3102_s3 + $0x108] sm:$0xff] (!%p188_p2)  ;;  %v2055_v5 = vld [vmem:[%s3102_s3 + $0x58] sm:$0xff] (!%p188_p2)  ;;  %p215_p3 = scmp.lt.s32.totalorder (!%p188_p2), %s2042_s19, 1  ;;  %vm446_vm0 = vcmask (!%p188_p2), 261120  }
   0x6   : > { %191 = sbr.rel (%p188_p2) target bundleno = 497 (0x1f1), region = 40  ;;  %v2052_v1 = vld [vmem:[%s3102_s3 + $0x40] sm:$0xff] (!%p188_p2)  ;;  %2446 = vset.pattern.permute.xlu1 (!%p188_p2), %v2473_v2  ;;  %2445 = vset.pattern.permute.xlu0 (!%p188_p2), %v2473_v2  ;;  %v2053_v4 = vld [vmem:[%s3102_s3 + $0x48] sm:$0xff] (!%p188_p2)  ;;  %v2054_v6 = vld [vmem:[%s3102_s3 + $0x50] sm:$0xff] (!%p188_p2)  ;;  %vm1978_vm1 = vcmask (!%p188_p2), 64512  }
   0x7   : > { %1046 = vperm.xlu1 (!%p188_p2), %2446, %v2112_v0   ;;  %379 = vperm.xlu0 (!%p188_p2), %2445, %v2052_v1   ;;  %v2115_v7 = vld [vmem:[%s3102_s3 + $0x118] sm:$0xff] (!%p188_p2)  ;;  %v2114_v8 = vld [vmem:[%s3102_s3 + $0x110] sm:$0xff] (!%p188_p2)  ;;  %v2057_v9 = vld [vmem:[%s3102_s3 + $0x68] sm:$0xff] (!%p188_p2) }
   0x8   : > { %v2056_v10 = vld [vmem:[%s3102_s3 + $0x60] sm:$0xff] (!%p188_p2)  ;;  %v2059_v11 = vld [vmem:[%s3102_s3 + $0x78] sm:$0xff] (!%p188_p2)  ;;  %v2058_v12 = vld [vmem:[%s3102_s3 + $0x70] sm:$0xff] (!%p188_p2) }
   0x9   : > { %v2131_v13 = vld [vmem:[%s3102_s3 + $0x148] sm:$0xff] (!%p188_p2)  ;;  %v2130_v14 = vld [vmem:[%s3102_s3 + $0x140] sm:$0xff] (!%p188_p2)  ;;  %v2447_v15 = vld [vmem:[%s3103_s4 + $0x10] sm:$0xff] (!%p188_p2)  }
   0xa   : > { %v2133_v16 = vld [vmem:[%s3102_s3 + $0x158] sm:$0xff] (!%p188_p2)  ;;  %v2132_v18 = vld [vmem:[%s3102_s3 + $0x150] sm:$0xff] (!%p188_p2)  ;;  %2259 = vmatprep.subr.bf16.mxu1 (!%p188_p2), %v2447_v15  ;;  %v2569_v19 = vld [vmem:[%s3103_s4 + $0x40] sm:$0xff] (!%p188_p2)  }
   0xb   : > { %1051 = vperm.xlu1 (!%p188_p2), %2446, %v2113_v3   ;;  %384 = vperm.xlu0 (!%p188_p2), %2445, %v2053_v4   ;;  %v2448_v17 = vld [vmem:[%s3103_s4 + $0x18] sm:$0xff] (!%p188_p2)   ;;  %v2575_v20 = vld [vmem:[%s3103_s4 + $0x48] sm:$0xff] (!%p188_p2)   ;;  %v272_v22 = vld [vmem:[%s3102_s3] sm:$0xff] (!%p188_p2) }
   0xc   : > { %2260 = vmatpush3.bf16.msra.mxu1 (!%p188_p2), %v2447_v15  ;;  %2307 = vmatprep.subr.bf16.mxu0 (!%p188_p2), %v2569_v19  ;;  %v273_v21 = vld [vmem:[%s3102_s3 + $0x8] sm:$0xff] (!%p188_p2)  ;;  %v2588_v23 = vld [vmem:[%s3103_s4 + $0x50] sm:$0xff] (!%p188_p2)   ;;  %v275_v24 = vld [vmem:[%s3102_s3 + $0x18] sm:$0xff] (!%p188_p2) }
   0xd   : > { %2261 = vmatprep.subr.bf16.mxu1 %v2448_v17  ;;  %2308 = vmatpush3.bf16.msra.mxu0 %v2569_v19  ;;  %v274_v25 = vld [vmem:[%s3102_s3 + $0x10] sm:$0xff]  ;;  %v2600_v26 = vld [vmem:[%s3103_s4] sm:$0xff]   ;;  %v2135_v27 = vld [vmem:[%s3102_s3 + $0x168] sm:$0xff]  ;;  %s3106_s19 = smov (!%p215_p3, %s2042_s19), 1 }
   0xe   : > { %2309 = vmatprep.subr.bf16.mxu0 %v2575_v20  ;;  %v2134_v28 = vld [vmem:[%s3102_s3 + $0x160] sm:$0xff]  ;;  %v2137_v29 = vld [vmem:[%s3102_s3 + $0x178] sm:$0xff]  ;;  %v2136_v30 = vld [vmem:[%s3102_s3 + $0x170] sm:$0xff]  ;;  %s2435_s8 = smul.u32 88, %s3106_s19 }
   0xf   : > { %394 = vperm.xlu1 %2446, %v2055_v5   ;;  %389 = vperm.xlu0 %2445, %v2054_v6   ;;  %v277_v31 = vld [vmem:[%s3102_s3 + $0x28] sm:$0xff]  ;;  %v276_v32 = vld [vmem:[%s3102_s3 + $0x20] sm:$0xff]  ;;  %v279_v33 = vld [vmem:[%s3102_s3 + $0x38] sm:$0xff] }
  0x10   : > { %2262 = vmatpush3.bf16.msra.mxu1 %v2448_v17  ;;  %v278_v34 = vld [vmem:[%s3102_s3 + $0x30] sm:$0xff]  ;;  %v2149_v35 = vld [vmem:[%s3102_s3 + $0x188] sm:$0xff]  ;;  %v2148_v36 = vld [vmem:[%s3102_s3 + $0x180] sm:$0xff]  ;;  %s2734_s15 = scalar_lea.vmem %s3099_s0, %s2435_s8 }
  0x11   : > { %2310 = vmatpush3.bf16.msra.mxu0 %v2575_v20  ;;  %2271 = vmatprep.subr.bf16.mxu1 %v2600_v26  ;;  %v2151_v37 = vld [vmem:[%s3102_s3 + $0x198] sm:$0xff]  ;;  %v2150_v38 = vld [vmem:[%s3102_s3 + $0x190] sm:$0xff]  ;;  %v2077_v39 = vld [vmem:[%s3102_s3 + $0x88] sm:$0xff] }
  0x12   : > { %2319 = vmatprep.subr.bf16.mxu0 %v2588_v23  ;;  %v2076_v40 = vld [vmem:[%s3102_s3 + $0x80] sm:$0xff]  ;;  %v2079_v41 = vld [vmem:[%s3102_s3 + $0x98] sm:$0xff]  ;;  %v2078_v42 = vld [vmem:[%s3102_s3 + $0x90] sm:$0xff] }
  0x13   : > { %1061 = vperm.xlu1 %2446, %v2115_v7   ;;  %1056 = vperm.xlu0 %2445, %v2114_v8   ;;  %v2153_v43 = vld [vmem:[%s3102_s3 + $0x1a8] sm:$0xff]  ;;  %v2152_v44 = vld [vmem:[%s3102_s3 + $0x1a0] sm:$0xff]  ;;  %v2155_v45 = vld [vmem:[%s3102_s3 + $0x1b8] sm:$0xff] }
  0x14   : > { %v2154_v46 = vld [vmem:[%s3102_s3 + $0x1b0] sm:$0xff]  ;;  %v2081_v47 = vld [vmem:[%s3102_s3 + $0xa8] sm:$0xff]  ;;  %v2080_v48 = vld [vmem:[%s3102_s3 + $0xa0] sm:$0xff] }
  0x15   : > { %v2083_v49 = vld [vmem:[%s3102_s3 + $0xb8] sm:$0xff]  ;;  %v2082_v50 = vld [vmem:[%s3102_s3 + $0xb0] sm:$0xff]  ;;  %v2167_v51 = vld [vmem:[%s3102_s3 + $0x1c8] sm:$0xff] }
  0x16   : > { %v2166_v52 = vld [vmem:[%s3102_s3 + $0x1c0] sm:$0xff]  ;;  %v2169_v53 = vld [vmem:[%s3102_s3 + $0x1d8] sm:$0xff]  ;;  %v2168_v54 = vld [vmem:[%s3102_s3 + $0x1d0] sm:$0xff] }
  0x17   : > { %404 = vperm.xlu1 %2446, %v2057_v9   ;;  %399 = vperm.xlu0 %2445, %v2056_v10   ;;  %v2095_v55 = vld [vmem:[%s3102_s3 + $0xc8] sm:$0xff]  ;;  %v2094_v56 = vld [vmem:[%s3102_s3 + $0xc0] sm:$0xff]  ;;  %v2097_v57 = vld [vmem:[%s3102_s3 + $0xd8] sm:$0xff] }
  0x18   : > { %v2096_v58 = vld [vmem:[%s3102_s3 + $0xd0] sm:$0xff]  ;;  %v2171_v59 = vld [vmem:[%s3102_s3 + $0x1e8] sm:$0xff]  ;;  %v2170_v60 = vld [vmem:[%s3102_s3 + $0x1e0] sm:$0xff] }
  0x19   : > { %v2173_v61 = vld [vmem:[%s3102_s3 + $0x1f8] sm:$0xff]  ;;  %v2172_v62 = vld [vmem:[%s3102_s3 + $0x1f0] sm:$0xff]  ;;  %v2099_v63 = vld [vmem:[%s3102_s3 + $0xe8] sm:$0xff] }
  0x1a   : > { %v2098_v0 = vld [vmem:[%s3102_s3 + $0xe0] sm:$0xff]  ;;  %v2101_v1 = vld [vmem:[%s3102_s3 + $0xf8] sm:$0xff]  ;;  %v2100_v2 = vld [vmem:[%s3102_s3 + $0xf0] sm:$0xff] }
  0x1b   : > { %414 = vperm.xlu1 %2446, %v2059_v11   ;;  %409 = vperm.xlu0 %2445, %v2058_v12   ;;  %v2185_v3 = vld [vmem:[%s3102_s3 + $0x208] sm:$0xff]  ;;  %v2742_v4 = vld [vmem:[%s3100_s1] ss:$0 sm:$0xff]  ;;  %v1004_v8 = vld [vmem:[%s2734_s15 + $0x11] sm:$0xff] }
  0x1c   : > { %v1003_v5 = vld [vmem:[%s2734_s15 + $0x9] sm:$0xff]  ;;  %v2184_v6 = vld [vmem:[%s3102_s3 + $0x200] sm:$0xff]  ;;  %v1012_v12 = vmul.f32 %v2742_v4, %v1004_v8 }
  0x1d   : > { %v336_v7 = vld [vmem:[%s2734_s15 + $0x1] sm:$0xff]  ;;  %v1011_v9 = vmul.f32 %v2742_v4, %v1003_v5  ;;  %v2754_v10 = vld [vmem:[%s3101_s2] ss:$0 sm:$0xff] }
  0x1e   : > { %v344_v11 = vmul.f32 %v2742_v4, %v336_v7  ;;  %v339_v15 = vld [vmem:[%s2734_s15 + $0x19] sm:$0xff]  ;;  %v2454_v7 = vld [vmem:[%s3103_s4 + $0x8] sm:$0xff]  }
  0x1f   : > { %1246 = vperm.xlu1 %2446, %v2131_v13   ;;  %1241 = vperm.xlu0 %2445, %v2130_v14   ;;  %v2187_v13 = vld [vmem:[%s3102_s3 + $0x218] sm:$0xff]  ;;  %v2186_v14 = vld [vmem:[%s3102_s3 + $0x210] sm:$0xff] }
  0x20   : > { %v352_v17 = vadd.f32 %v2754_v10, %v344_v11 }
  0x23   : > { %1256 = vperm.xlu1 %2446, %v2133_v16   ;;  %1251 = vperm.xlu0 %2445, %v2132_v18   ;;  %v1019_v16 = vadd.f32 %v2754_v10, %v1011_v9  ;;  %v1020_v18 = vadd.f32 %v2754_v10, %v1012_v12 }
  0x27   : > { %287 = vperm.xlu1 %2446, %v273_v21   ;;  %282 = vperm.xlu0 %2445, %v272_v22   ;;  %v347_v21 = vmul.f32 %v2742_v4, %v339_v15  ;;  %v1006_v22 = vld [vmem:[%s2734_s15 + $0x21] sm:$0xff] }
  0x2b   : > { %297 = vperm.xlu1 %2446, %v275_v24   ;;  %292 = vperm.xlu0 %2445, %v274_v25   ;;  %v2117_v24 = vld [vmem:[%s3102_s3 + $0x128] sm:$0xff]  ;;  %v2116_v25 = vld [vmem:[%s3102_s3 + $0x120] sm:$0xff] }
  0x2f   : > { %1266 = vperm.xlu1 %2446, %v2135_v27   ;;  %1261 = vperm.xlu0 %2445, %v2134_v28   ;;  %v1027_v28 = vmax.f32 %v1019_v16, 0.0  ;;  %v2452_v16 = vld [vmem:[%s3103_s4 + $0x58] sm:$0xff]  }
  0x33   : > { %1276 = vperm.xlu1 %2446, %v2137_v29   ;;  %1271 = vperm.xlu0 %2445, %v2136_v30   ;;  %v1014_v30 = vmul.f32 %v2742_v4, %v1006_v22 }
  0x37   : > { %307 = vperm.xlu1 %2446, %v277_v31   ;;  %302 = vperm.xlu0 %2445, %v276_v32   ;;  %v360_v31 = vmax.f32 %v352_v17, 0.0  ;;  %v2777_v32 = vmax.f32 %v1020_v18, 0.0 }
  0x3b   : > { %317 = vperm.xlu1 %2446, %v279_v33   ;;  %312 = vperm.xlu0 %2445, %v278_v34   ;;  %v355_v33 = vadd.f32 %v2754_v10, %v347_v21  ;;  %v341_v34 = vld [vmem:[%s2734_s15 + $0x29] sm:$0xff] }
  0x3f   : > { %1441 = vperm.xlu1 %2446, %v2149_v35   ;;  %1436 = vperm.xlu0 %2445, %v2148_v36   ;;  %v2189_v35 = vld [vmem:[%s3102_s3 + $0x228] sm:$0xff]  ;;  %v2188_v36 = vld [vmem:[%s3102_s3 + $0x220] sm:$0xff] }
  0x43   : > { %1451 = vperm.xlu1 %2446, %v2151_v37   ;;  %1446 = vperm.xlu0 %2445, %v2150_v38  }
  0x47   : > { %661 = vperm.xlu1 %2446, %v2077_v39   ;;  %656 = vperm.xlu0 %2445, %v2076_v40   ;;  %v1022_v40 = vadd.f32 %v2754_v10, %v1014_v30 }
  0x4b   : > { %671 = vperm.xlu1 %2446, %v2079_v41   ;;  %666 = vperm.xlu0 %2445, %v2078_v42   ;;  %v349_v41 = vmul.f32 %v2742_v4, %v341_v34 }
  0x4f   : > { %1461 = vperm.xlu1 %2446, %v2153_v43   ;;  %1456 = vperm.xlu0 %2445, %v2152_v44  }
  0x53   : > { %1471 = vperm.xlu1 %2446, %v2155_v45   ;;  %1466 = vperm.xlu0 %2445, %v2154_v46   ;;  %v2790_v45 = vmax.f32 %v355_v33, 0.0  ;;  %v343_v46 = vld [vmem:[%s2734_s15 + $0x39] sm:$0xff] }
  0x54   : > { %v228_v33 = vld [vmem:[%s2734_s15] sm:$0xff] }
  0x57   : > { %681 = vperm.xlu1 %2446, %v2081_v47   ;;  %676 = vperm.xlu0 %2445, %v2080_v48   ;;  %v342_v47 = vld [vmem:[%s2734_s15 + $0x31] sm:$0xff] }
  0x58   : > { %v2119_v48 = vld [vmem:[%s3102_s3 + $0x138] sm:$0xff] }
  0x5b   : > { %691 = vperm.xlu1 %2446, %v2083_v49   ;;  %686 = vperm.xlu0 %2445, %v2082_v50   ;;  %v2118_v49 = vld [vmem:[%s3102_s3 + $0x130] sm:$0xff] }
  0x5f   : > { %1636 = vperm.xlu1 %2446, %v2167_v51   ;;  %1631 = vperm.xlu0 %2445, %v2166_v52  }
  0x63   : > { %1646 = vperm.xlu1 %2446, %v2169_v53   ;;  %1641 = vperm.xlu0 %2445, %v2168_v54   ;;  %v351_v54 = vmul.f32 %v2742_v4, %v343_v46  ;;  %v231_v46 = vld [vmem:[%s2734_s15 + $0x18] sm:$0xff] }
  0x67   : > { %856 = vperm.xlu1 %2446, %v2095_v55   ;;  %851 = vperm.xlu0 %2445, %v2094_v56   ;;  %v350_v55 = vmul.f32 %v2742_v4, %v342_v47  ;;  %v230_v47 = vld [vmem:[%s2734_s15 + $0x10] sm:$0xff] }
  0x69   : > { %v358_v12 = vadd.f32 %v2754_v10, %v350_v55 }
  0x6b   : > { %866 = vperm.xlu1 %2446, %v2097_v57   ;;  %861 = vperm.xlu0 %2445, %v2096_v58   ;;  %v2804_v58 = vmax.f32 %v1022_v40, 0.0 }
  0x6f   : > { %1656 = vperm.xlu1 %2446, %v2171_v59   ;;  %1651 = vperm.xlu0 %2445, %v2170_v60   ;;  %v357_v59 = vadd.f32 %v2754_v10, %v349_v41  ;;  %v1199_v60 = vld [vmem:[%s2734_s15 + $0x12] sm:$0xff] }
  0x70   : > { %v1207_v5 = vmul.f32 %v2742_v4, %v1199_v60  ;;  %v1203_v60 = vld [vmem:[%s2734_s15 + $0x32] sm:$0xff] }
  0x71   : > { %v2825_v11 = vmax.f32 %v357_v59, 0.0 }
  0x72   : > { %v1215_v22 = vadd.f32 %v2754_v10, %v1207_v5  ;;  %v1211_v5 = vmul.f32 %v2742_v4, %v1203_v60 }
  0x73   : > { %1666 = vperm.xlu1 %2446, %v2173_v61   ;;  %1661 = vperm.xlu0 %2445, %v2172_v62   ;;  %v1198_v61 = vld [vmem:[%s2734_s15 + $0xa] sm:$0xff]  ;;  %v2191_v62 = vld [vmem:[%s3102_s3 + $0x238] sm:$0xff] }
  0x77   : > { %876 = vperm.xlu1 %2446, %v2099_v63   ;;  %871 = vperm.xlu0 %2445, %v2098_v0   ;;  %v2190_v63 = vld [vmem:[%s3102_s3 + $0x230] sm:$0xff] }
  0x7b   : > { %886 = vperm.xlu1 %2446, %v2101_v1   ;;  %881 = vperm.xlu0 %2445, %v2100_v2  }
  0x7f   : > { %1831 = vperm.xlu1 %2446, %v2185_v3   ;;  %1826 = vperm.xlu0 %2445, %v2184_v6   ;;  %v359_v3 = vadd.f32 %v2754_v10, %v351_v54  ;;  %v1206_v6 = vmul.f32 %v2742_v4, %v1198_v61  ;;  %v244_v54 = vmul.f32 %v2742_v4, %v230_v47  ;;  %v1202_v61 = vld [vmem:[%s2734_s15 + $0x2a] sm:$0xff] }
  0x81   : > { %v2835_v21 = vmax.f32 %v359_v3, 0.0  ;;  %v258_v3 = vadd.f32 %v2754_v10, %v244_v54 }
  0x83   : > { %1841 = vperm.xlu1 %2446, %v2187_v13   ;;  %1836 = vperm.xlu0 %2445, %v2186_v14   ;;  %v1201_v13 = vld [vmem:[%s2734_s15 + $0x22] sm:$0xff]  ;;  %v1200_v14 = vld [vmem:[%s2734_s15 + $0x1a] sm:$0xff] }
  0x84   : > { %v1208_v30 = vmul.f32 %v2742_v4, %v1200_v14 }
  0x86   : > { %v1047_v27 = vpop.permute.xlu1 %1046  ;;  %v380_v29 = vpop.permute.xlu0 %379 }
  0x87   : > { %1071 = vperm.xlu1 %2446, %v2117_v24   ;;  %1066 = vperm.xlu0 %2445, %v2116_v25   ;;  %v1084_v37 = vmul.f32 %v1047_v27, %v1027_v28  ;;  %v417_v42 = vmul.f32 %v380_v29, %v360_v31  ;;  %v2839_v24 = vadd.f32 %v2754_v10, %v1206_v6  ;;  %v2845_v27 = vld [vmem:[%s3103_s4 + $0x20] sm:$0xff]   ;;  %v2850_v29 = vmax.f32 %v358_v12, 0.0  ;;  %v229_v31 = vld [vmem:[%s2734_s15 + $0x8] sm:$0xff] }
  0x88   : > { %v1209_v25 = vmul.f32 %v2742_v4, %v1201_v13  ;;  %v1205_v12 = vld [vmem:[%s2734_s15 + $0x42] sm:$0xff]  ;;  %v1204_v13 = vld [vmem:[%s2734_s15 + $0x3a] sm:$0xff] }
  0x8a   : > { %v1052_v38 = vpop.permute.xlu1 %1051  ;;  %v385_v39 = vpop.permute.xlu0 %384  ;;  %v1217_v40 = vadd.f32 %v2754_v10, %v1209_v25  ;;  %v1213_v25 = vmul.f32 %v2742_v4, %v1205_v12 }
  0x8b   : > { %v1085_v43 = vmul.f32 %v1052_v38, %v2777_v32  ;;  %v418_v44 = vmul.f32 %v1027_v28, %v385_v39  ;;  %1851 = vperm.xlu1 %2446, %v2189_v35   ;;  %1846 = vperm.xlu0 %2445, %v2188_v36   ;;  %v2455_v35 = vld [vmem:[%s3103_s4 + $0x60] sm:$0xff]   ;;  %v2859_v38 = vmax.f32 %v1215_v22, 0.0  ;;  %v1222_v39 = vmax.f32 %v2839_v24, 0.0 }
  0x8c   : > { %v2903_v22 = vmax.f32 %v258_v3, 0.0 }
  0x8d   : > { %v425_v50 = vpack.c.bf16 %v418_v44, %v417_v42  ;;  %v1092_v51 = vpack.c.bf16 %v1085_v43, %v1084_v37  ;;  %v1216_v43 = vadd.f32 %v2754_v10, %v1208_v30  ;;  %v242_v44 = vmul.f32 %v2742_v4, %v228_v33 }
  0x8e   : > { %v395_v52 = vpop.permute.xlu1 %394  ;;  %v390_v53 = vpop.permute.xlu0 %389 }
  0x8f   : > { %v420_v56 = vmul.f32 %v395_v52, %v2790_v45  ;;  %v419_v57 = vmul.f32 %v2777_v32, %v390_v53  ;;  %1081 = vperm.xlu1 %2446, %v2119_v48   ;;  %1076 = vperm.xlu0 %2445, %v2118_v49   ;;  %v245_v53 = vmul.f32 %v2742_v4, %v231_v46 }
  0x90   : > { %2263 = vmatprep.mubr.msk.bf16.mxu1 %vm446_vm0, %v425_v50  ;;  %2311 = vmatprep.mubr.msk.bf16.mxu0 %vm446_vm0, %v1092_v51  ;;  %v2872_v51 = vmax.f32 %v1217_v40, 0.0  ;;  %v256_v59 = vadd.f32 %v2754_v10, %v242_v44  ;;  %v2917_v40 = vld [vmem:[%s3103_s4 + $0x70] sm:$0xff]  }
  0x91   : > { %v426_v0 = vpack.c.bf16 %v420_v56, %v419_v57  ;;  %v2883_v57 = vmax.f32 %v1216_v43, 0.0 }
  0x92   : > { %v1062_v1 = vpop.permute.xlu1 %1061  ;;  %v1057_v2 = vpop.permute.xlu0 %1056 }
  0x93   : > { %v1087_v8 = vmul.f32 %v1062_v1, %v2804_v58  ;;  %v1086_v9 = vmul.f32 %v1057_v2, %v2790_v45  ;;  %1861 = vperm.xlu1 %2446, %v2191_v62   ;;  %1856 = vperm.xlu0 %2445, %v2190_v63   ;;  %v259_v2 = vadd.f32 %v2754_v10, %v245_v53  ;;  %v234_v53 = vld [vmem:[%s2734_s15 + $0x30] sm:$0xff] }
  0x94   : > { %2264 = vmatmul.mubr.msk.bf16.vlgmr.msra.gmra.mrb[0].mxu1 %vm446_vm0, %v426_v0 }
  0x95   : > { %v1093_v15 = vpack.c.bf16 %v1087_v8, %v1086_v9  ;;  %2272 = vmatpush3.bf16.msra.mxu1 %v2600_v26  ;;  %v264_v8 = vmax.f32 %v256_v59, 0.0  ;;  %v1210_v9 = vmul.f32 %v2742_v4, %v1202_v61 }
  0x96   : > { %v405_v17 = vpop.permute.xlu1 %404  ;;  %v400_v18 = vpop.permute.xlu0 %399  ;;  %2273 = vmatprep.subr.bf16.mxu1 %v2454_v7 }
  0x97   : > { %v422_v26 = vmul.f32 %v405_v17, %v2825_v11  ;;  %v421_v28 = vmul.f32 %v2804_v58, %v400_v18  ;;  %2312 = vmatmul.mubr.msk.bf16.vlgmr.msra.gmra.mrb[0].mxu0 %vm446_vm0, %v1093_v15  ;;  %v2456_v15 = vld [vmem:[%s3103_s4 + $0x68] sm:$0xff]   ;;  %v2901_v18 = vmax.f32 %v259_v2, 0.0  ;;  %v1218_v33 = vadd.f32 %v2754_v10, %v1210_v9 }
  0x98   : > { %2320 = vmatpush3.bf16.msra.mxu0 %v2588_v23  ;;  %v243_v23 = vmul.f32 %v2742_v4, %v229_v31  ;;  %v1219_v31 = vadd.f32 %v2754_v10, %v1211_v5  ;;  %v248_v5 = vmul.f32 %v2742_v4, %v234_v53 }
  0x99   : > { %v427_v34 = vpack.c.bf16 %v422_v26, %v421_v28  ;;  %2321 = vmatprep.subr.bf16.mxu0 %v2452_v16  ;;  %2274 = vmatpush3.bf16.msra.mxu1 %v2454_v7  ;;  %v1212_v26 = vmul.f32 %v2742_v4, %v1204_v13 }
  0x9a   : > { %v415_v36 = vpop.permute.xlu1 %414  ;;  %v410_v37 = vpop.permute.xlu0 %409  ;;  %2283 = vmatprep.subr.bf16.mxu1 %v2845_v27  ;;  %v2875_v52 = vadd.f32 %v2754_v10, %v243_v23 }
  0x9b   : > { %v424_v41 = vmul.f32 %v415_v36, %v2835_v21  ;;  %v423_v42 = vmul.f32 %v410_v37, %v2850_v29  ;;  %2267 = vmatprep.mubr.msk.bf16.mxu1 %vm446_vm0, %v427_v34  ;;  %v233_v34 = vld [vmem:[%s2734_s15 + $0x28] sm:$0xff]  ;;  %v232_v36 = vld [vmem:[%s2734_s15 + $0x20] sm:$0xff]  ;;  %v1220_v43 = vadd.f32 %v2754_v10, %v1212_v26 }
  0x9c   : > { %2322 = vmatpush3.bf16.msra.mxu0 %v2452_v16  ;;  %v265_v1 = vmax.f32 %v2875_v52, 0.0  ;;  %v247_v44 = vmul.f32 %v2742_v4, %v233_v34  ;;  %v246_v46 = vmul.f32 %v2742_v4, %v232_v36  ;;  %v613_v34 = vld [vmem:[%s2734_s15 + $0x2] sm:$0xff] }
  0x9d   : > { %v428_v48 = vpack.c.bf16 %v424_v41, %v423_v42  ;;  %2331 = vmatprep.subr.bf16.mxu0 %v2455_v35  ;;  %v2920_v42 = vadd.f32 %v2754_v10, %v1213_v25  ;;  %v2939_v61 = vmax.f32 %v1220_v43, 0.0 }
  0x9e   : > { %v1247_v49 = vpop.permute.xlu1 %1246  ;;  %v1242_v50 = vpop.permute.xlu0 %1241 }
  0x9f   : > { %v1280_v55 = vmul.f32 %v1247_v49, %v2859_v38  ;;  %v1279_v56 = vmul.f32 %v1242_v50, %v1222_v39  ;;  %2268 = vmatmul.mubr.msk.bf16.gmra.mrb[4].mxu1 %vm446_vm0, %v428_v48  ;;  %v2928_v48 = vmax.f32 %v1219_v31, 0.0  ;;  %v2930_v49 = vmax.f32 %v1218_v33, 0.0  ;;  %v235_v50 = vld [vmem:[%s2734_s15 + $0x38] sm:$0xff] }
  0xa0   : > { %v1229_v60 = vmax.f32 %v2920_v42, 0.0  ;;  %v249_v3 = vmul.f32 %v2742_v4, %v235_v50 }
  0xa1   : > { %v1287_v62 = vpack.c.bf16 %v1280_v55, %v1279_v56  ;;  %v2458_v55 = vld [vmem:[%s3103_s4 + $0x28] sm:$0xff]  }
  0xa2   : > { %v1257_v63 = vpop.permute.xlu1 %1256  ;;  %v1252_v0 = vpop.permute.xlu0 %1251 }
  0xa3   : > { %v1282_v6 = vmul.f32 %v1257_v63, %v2872_v51  ;;  %v1281_v7 = vmul.f32 %v1252_v0, %v2883_v57  ;;  %2323 = vmatprep.mubr.msk.bf16.mxu0 %vm446_vm0, %v1287_v62  ;;  %v261_v62 = vadd.f32 %v2754_v10, %v247_v44  ;;  %v260_v63 = vadd.f32 %v2754_v10, %v246_v46 }
  0xa4   : > { %v621_v44 = vmul.f32 %v2742_v4, %v613_v34 }
  0xa5   : > { %v1288_v14 = vpack.c.bf16 %v1282_v6, %v1281_v7  ;;  %v2952_v7 = vld [vmem:[%s3103_s4 + $0x30] sm:$0xff]   ;;  %v2954_v12 = vmax.f32 %v261_v62, 0.0  ;;  %v2956_v13 = vmax.f32 %v260_v63, 0.0 }
  0xa6   : > { %v288_v16 = vpop.permute.xlu1 %287  ;;  %v283_v17 = vpop.permute.xlu0 %282 }
  0xa7   : > { %v321_v28 = vmul.f32 %v288_v16, %v265_v1  ;;  %v320_v30 = vmul.f32 %v283_v17, %v264_v8  ;;  %2324 = vmatmul.mubr.msk.bf16.vlgmr.msra.gmra.mrb[0].mxu0 %vm446_vm0, %v1288_v14  ;;  %v262_v16 = vadd.f32 %v2754_v10, %v248_v5 }
  0xa8   : > { %2332 = vmatpush3.bf16.msra.mxu0 %v2455_v35 }
  0xa9   : > { %v328_v37 = vpack.c.bf16 %v321_v28, %v320_v30  ;;  %2333 = vmatprep.subr.bf16.mxu0 %v2456_v15  ;;  %v2970_v33 = vmax.f32 %v262_v16, 0.0 }
  0xaa   : > { %v298_v23 = vpop.permute.xlu1 %297  ;;  %v293_v41 = vpop.permute.xlu0 %292 }
  0xab   : > { %v323_v35 = vmul.f32 %v298_v23, %v2901_v18  ;;  %v322_v47 = vmul.f32 %v293_v41, %v2903_v22  ;;  %2275 = vmatprep.mubr.msk.bf16.mxu1 %vm446_vm0, %v328_v37 }
  0xac   : > { %2334 = vmatpush3.bf16.msra.mxu0 %v2456_v15 }
  0xad   : > { %v329_v54 = vpack.c.bf16 %v323_v35, %v322_v47  ;;  %2343 = vmatprep.subr.bf16.mxu0 %v2917_v40 }
  0xae   : > { %v1267_v56 = vpop.permute.xlu1 %1266  ;;  %v1262_v59 = vpop.permute.xlu0 %1261 }
  0xaf   : > { %v1284_v0 = vmul.f32 %v1267_v56, %v2928_v48  ;;  %v1283_v2 = vmul.f32 %v1262_v59, %v2930_v49  ;;  %2276 = vmatmul.mubr.msk.bf16.vlgmr.msra.gmra.mrb[0].mxu1 %vm446_vm0, %v329_v54  ;;  %v629_v54 = vadd.f32 %v2754_v10, %v621_v44 }
  0xb0   : > { %2284 = vmatpush3.bf16.msra.mxu1 %v2845_v27  ;;  %v263_v27 = vadd.f32 %v2754_v10, %v249_v3  ;;  %v1399_v3 = vld [vmem:[%s2734_s15 + $0x40] sm:$0xff] }
  0xb1   : > { %v1289_v6 = vpack.c.bf16 %v1284_v0, %v1283_v2  ;;  %2285 = vmatprep.subr.bf16.mxu1 %v2458_v55  ;;  %v637_v0 = vmax.f32 %v629_v54, 0.0  ;;  %v1400_v2 = vld [vmem:[%s2734_s15 + $0x48] sm:$0xff]  ;;  %v1407_v16 = vmul.f32 %v2742_v4, %v1399_v3 }
  0xb2   : > { %v1277_v8 = vpop.permute.xlu1 %1276  ;;  %v1272_v9 = vpop.permute.xlu0 %1271  ;;  %v2968_v31 = vmax.f32 %v263_v27, 0.0  ;;  %v1408_v27 = vmul.f32 %v2742_v4, %v1400_v2 }
  0xb3   : > { %v1286_v14 = vmul.f32 %v1277_v8, %v1229_v60  ;;  %v1285_v15 = vmul.f32 %v1272_v9, %v2939_v61  ;;  %2327 = vmatprep.mubr.msk.bf16.mxu0 %vm446_vm0, %v1289_v6  ;;  %v2460_v6 = vld [vmem:[%s3103_s4 + $0x78] sm:$0xff]   ;;  %v3005_v34 = vadd.f32 %v2754_v10, %v1407_v16 }
  0xb4   : > { %2286 = vmatpush3.bf16.msra.mxu1 %v2458_v55 }
  0xb5   : > { %v1290_v17 = vpack.c.bf16 %v1286_v14, %v1285_v15  ;;  %2295 = vmatprep.subr.bf16.mxu1 %v2952_v7 }
  0xb6   : > { %v308_v25 = vpop.permute.xlu1 %307  ;;  %v303_v26 = vpop.permute.xlu0 %302 }
  0xb7   : > { %v325_v28 = vmul.f32 %v308_v25, %v2954_v12  ;;  %v324_v30 = vmul.f32 %v303_v26, %v2956_v13  ;;  %2328 = vmatmul.mubr.msk.bf16.gmra.mrb[4].mxu0 %vm446_vm0, %v1290_v17  ;;  %v2998_v25 = vld [vmem:[%s3103_s4 + $0x80] sm:$0xff]  }
  0xb9   : > { %v330_v36 = vpack.c.bf16 %v325_v28, %v324_v30  ;;  %v1416_v30 = vadd.f32 %v2754_v10, %v1408_v27 }
  0xba   : > { %v318_v37 = vpop.permute.xlu1 %317  ;;  %v313_v23 = vpop.permute.xlu0 %312 }
  0xbb   : > { %v327_v41 = vmul.f32 %v318_v37, %v2968_v31  ;;  %v326_v43 = vmul.f32 %v313_v23, %v2970_v33  ;;  %2279 = vmatprep.mubr.msk.bf16.mxu1 %vm446_vm0, %v330_v36  ;;  %v2462_v36 = vld [vmem:[%s3103_s4 + $0x38] sm:$0xff]   ;;  %v1424_v44 = vmax.f32 %v1416_v30, 0.0 }
  0xbd   : > { %v331_v46 = vpack.c.bf16 %v327_v41, %v326_v43 }
  0xbe   : > { %v1442_v35 = vpop.permute.xlu1 %1441  ;;  %v1437_v47 = vpop.permute.xlu0 %1436 }
  0xbf   : > { %v1475_v50 = vmul.f32 %v1442_v35, %v2901_v18  ;;  %v1474_v53 = vmul.f32 %v1437_v47, %v2903_v22  ;;  %2280 = vmatmul.mubr.msk.bf16.gmra.mrb[4].mxu1 %vm446_vm0, %v331_v46  ;;  %v1423_v46 = vmax.f32 %v3005_v34, 0.0 }
  0xc1   : > { %v1482_v55 = vpack.c.bf16 %v1475_v50, %v1474_v53 }
  0xc2   : > { %v1452_v56 = vpop.permute.xlu1 %1451  ;;  %v1447_v59 = vpop.permute.xlu0 %1446 }
  0xc3   : > { %v1477_v62 = vmul.f32 %v1452_v56, %v2954_v12  ;;  %v1476_v63 = vmul.f32 %v1447_v59, %v2956_v13  ;;  %2335 = vmatprep.mubr.msk.bf16.mxu0 %vm446_vm0, %v1482_v55 }
  0xc5   : > { %v1483_v5 = vpack.c.bf16 %v1477_v62, %v1476_v63 }
  0xc6   : > { %v662_v8 = vpop.permute.xlu1 %661  ;;  %v657_v9 = vpop.permute.xlu0 %656 }
  0xc7   : > { %v695_v14 = vmul.f32 %v1222_v39, %v662_v8  ;;  %v694_v15 = vmul.f32 %v657_v9, %v637_v0  ;;  %2336 = vmatmul.mubr.msk.bf16.vlgmr.msra.gmra.mrb[0].mxu0 %vm446_vm0, %v1483_v5 }
  0xc8   : > { %2344 = vmatpush3.bf16.msra.mxu0 %v2917_v40 }
  0xc9   : > { %v702_v17 = vpack.c.bf16 %v695_v14, %v694_v15  ;;  %2345 = vmatprep.subr.bf16.mxu0 %v2460_v6 }
  0xca   : > { %v672_v26 = vpop.permute.xlu1 %671  ;;  %v667_v28 = vpop.permute.xlu0 %666 }
  0xcb   : > { %v697_v24 = vmul.f32 %v2883_v57, %v672_v26  ;;  %v696_v39 = vmul.f32 %v2859_v38, %v667_v28  ;;  %2287 = vmatprep.mubr.msk.bf16.mxu1 %vm446_vm0, %v702_v17 }
  0xcc   : > { %2346 = vmatpush3.bf16.msra.mxu0 %v2460_v6 }
  0xcd   : > { %v703_v40 = vpack.c.bf16 %v697_v24, %v696_v39  ;;  %2355 = vmatprep.subr.bf16.mxu0 %v2998_v25  ;;  %v1595_v24 = vld [vmem:[%s2734_s15 + $0x49] sm:$0xff]  ;;  %v1594_v39 = vld [vmem:[%s2734_s15 + $0x41] sm:$0xff] }
  0xce   : > { %v1462_v37 = vpop.permute.xlu1 %1461  ;;  %v1457_v23 = vpop.permute.xlu0 %1456 }
  0xcf   : > { %v1479_v41 = vmul.f32 %v1462_v37, %v2968_v31  ;;  %v1478_v43 = vmul.f32 %v1457_v23, %v2970_v33  ;;  %2288 = vmatmul.mubr.msk.bf16.vlgmr.msra.gmra.mrb[0].mxu1 %vm446_vm0, %v703_v40  ;;  %v1602_v23 = vmul.f32 %v2742_v4, %v1594_v39 }
  0xd0   : > { %2296 = vmatpush3.bf16.msra.mxu1 %v2952_v7 }
  0xd1   : > { %v1484_v35 = vpack.c.bf16 %v1479_v41, %v1478_v43  ;;  %2297 = vmatprep.subr.bf16.mxu1 %v2462_v36 }
  0xd2   : > { %v1472_v47 = vpop.permute.xlu1 %1471  ;;  %v1467_v50 = vpop.permute.xlu0 %1466 }
  0xd3   : > { %v1481_v53 = vmul.f32 %v1472_v47, %v1424_v44  ;;  %v1480_v54 = vmul.f32 %v1467_v50, %v1423_v46  ;;  %2339 = vmatprep.mubr.msk.bf16.mxu0 %vm446_vm0, %v1484_v35 }
  0xd4   : > { %2298 = vmatpush3.bf16.msra.mxu1 %v2462_v36 }
  0xd5   : > { %v1485_v55 = vpack.c.bf16 %v1481_v53, %v1480_v54  ;;  %2367 = vmatprep.subr.bf16.mxu1 %v2569_v19 }
  0xd6   : > { %v682_v56 = vpop.permute.xlu1 %681  ;;  %v677_v59 = vpop.permute.xlu0 %676 }
  0xd7   : > { %v699_v62 = vmul.f32 %v2930_v49, %v682_v56  ;;  %v698_v7 = vmul.f32 %v2872_v51, %v677_v59  ;;  %2340 = vmatmul.mubr.msk.bf16.gmra.mrb[4].mxu0 %vm446_vm0, %v1485_v55 }
  0xd9   : > { %v704_v63 = vpack.c.bf16 %v699_v62, %v698_v7 }
  0xda   : > { %v692_v0 = vpop.permute.xlu1 %691  ;;  %v687_v2 = vpop.permute.xlu0 %686 }
  0xdb   : > { %v701_v3 = vmul.f32 %v2939_v61, %v692_v0  ;;  %v700_v5 = vmul.f32 %v2928_v48, %v687_v2  ;;  %2291 = vmatprep.mubr.msk.bf16.mxu1 %vm446_vm0, %v704_v63 }
  0xdd   : > { %v705_v6 = vpack.c.bf16 %v701_v3, %v700_v5 }
  0xde   : > { %v1637_v8 = vpop.permute.xlu1 %1636  ;;  %v1632_v9 = vpop.permute.xlu0 %1631 }
  0xdf   : > { %v1670_v14 = vmul.f32 %v1637_v8, %v2790_v45  ;;  %v1669_v15 = vmul.f32 %v1632_v9, %v2777_v32  ;;  %2292 = vmatmul.mubr.msk.bf16.gmra.mrb[4].mxu1 %vm446_vm0, %v705_v6  ;;  %v2464_v45 = vld [vmem:[%s3103_s4 + $0x88] sm:$0xff]  }
  0xe1   : > { %v1677_v27 = vpack.c.bf16 %v1670_v14, %v1669_v15 }
  0xe2   : > { %v1647_v16 = vpop.permute.xlu1 %1646  ;;  %v1642_v17 = vpop.permute.xlu0 %1641 }
  0xe3   : > { %v1672_v26 = vmul.f32 %v1647_v16, %v2825_v11  ;;  %v1671_v28 = vmul.f32 %v1642_v17, %v2804_v58  ;;  %2347 = vmatprep.mubr.msk.bf16.mxu0 %vm446_vm0, %v1677_v27  ;;  %v1603_v58 = vmul.f32 %v2742_v4, %v1595_v24 }
  0xe5   : > { %v1678_v30 = vpack.c.bf16 %v1672_v26, %v1671_v28  ;;  %v1611_v52 = vadd.f32 %v2754_v10, %v1603_v58 }
  0xe6   : > { %v857_v40 = vpop.permute.xlu1 %856  ;;  %v852_v32 = vpop.permute.xlu0 %851 }
  0xe7   : > { %v890_v36 = vmul.f32 %v857_v40, %v2903_v22  ;;  %v889_v37 = vmul.f32 %v852_v32, %v265_v1  ;;  %2348 = vmatmul.mubr.msk.bf16.vlgmr.msra.gmra.mrb[0].mxu0 %vm446_vm0, %v1678_v30  ;;  %v1610_v1 = vadd.f32 %v2754_v10, %v1602_v23  ;;  %v1619_v55 = vmax.f32 %v1611_v52, 0.0 }
  0xe8   : > { %2356 = vmatpush3.bf16.msra.mxu0 %v2998_v25 }
  0xe9   : > { %v897_v41 = vpack.c.bf16 %v890_v36, %v889_v37  ;;  %2357 = vmatprep.subr.bf16.mxu0 %v2464_v45 }
  0xea   : > { %v867_v43 = vpop.permute.xlu1 %866  ;;  %v862_v44 = vpop.permute.xlu0 %861 }
  0xeb   : > { %v892_v35 = vmul.f32 %v867_v43, %v2956_v13  ;;  %v891_v47 = vmul.f32 %v862_v44, %v2901_v18  ;;  %2299 = vmatprep.mubr.msk.bf16.mxu1 %vm446_vm0, %v897_v41  ;;  %v1618_v13 = vmax.f32 %v1610_v1, 0.0 }
  0xec   : > { %2358 = vmatpush3.bf16.msra.mxu0 %v2464_v45 }
  0xed   : > { %v898_v22 = vpack.c.bf16 %v892_v35, %v891_v47 }
  0xee   : > { %v1657_v50 = vpop.permute.xlu1 %1656  ;;  %v1652_v53 = vpop.permute.xlu0 %1651 }
  0xef   : > { %v1674_v25 = vmul.f32 %v1657_v50, %v2835_v21  ;;  %v1673_v54 = vmul.f32 %v1652_v53, %v2850_v29  ;;  %2300 = vmatmul.mubr.msk.bf16.vlgmr.msra.gmra.mrb[0].mxu1 %vm446_vm0, %v898_v22 }
  0xf0   : > { %2369 = vmatpush3.bf16.msra.mxu1 %v2569_v19 }
  0xf1   : > { %v1679_v18 = vpack.c.bf16 %v1674_v25, %v1673_v54  ;;  %2368 = vmatprep.subr.bf16.mxu1 %v2575_v20 }
  0xf2   : > { %v1667_v56 = vpop.permute.xlu1 %1666  ;;  %v1662_v59 = vpop.permute.xlu0 %1661 }
  0xf3   : > { %v1676_v62 = vmul.f32 %v1667_v56, %v1619_v55  ;;  %v1675_v7 = vmul.f32 %v1662_v59, %v1618_v13  ;;  %2351 = vmatprep.mubr.msk.bf16.mxu0 %vm446_vm0, %v1679_v18 }
  0xf4   : > { %2370 = vmatpush3.bf16.msra.mxu1 %v2575_v20 }
  0xf5   : > { %v1680_v63 = vpack.c.bf16 %v1676_v62, %v1675_v7 }
  0xf6   : > { %v877_v0 = vpop.permute.xlu1 %876  ;;  %v872_v2 = vpop.permute.xlu0 %871 }
  0xf7   : > { %v894_v3 = vmul.f32 %v877_v0, %v2970_v33  ;;  %v893_v5 = vmul.f32 %v872_v2, %v2954_v12  ;;  %2352 = vmatmul.mubr.msk.bf16.gmra.mrb[4].mxu0 %vm446_vm0, %v1680_v63 }
  0xf9   : > { %v899_v19 = vpack.c.bf16 %v894_v3, %v893_v5 }
  0xfa   : > { %v887_v6 = vpop.permute.xlu1 %886  ;;  %v882_v8 = vpop.permute.xlu0 %881 }
  0xfb   : > { %v896_v9 = vmul.f32 %v1423_v46, %v887_v6  ;;  %v895_v14 = vmul.f32 %v882_v8, %v2968_v31  ;;  %2303 = vmatprep.mubr.msk.bf16.mxu1 %vm446_vm0, %v899_v19  ;;  %v1790_v31 = vld [vmem:[%s2734_s15 + $0x4a] sm:$0xff]  ;;  %s2204_s15 = sshll.u32 %s3106_s19, 6 }
  0xfc   : > { %s224_s28 = scalar_lea.vmem %s3104_s5, %s2204_s15 }
  0xfd   : > { %v900_v20 = vpack.c.bf16 %v896_v9, %v895_v14 }
  0xfe   : > { %v1832_v15 = vpop.permute.xlu1 %1831  ;;  %v1827_v27 = vpop.permute.xlu0 %1826 }
  0xff   : > { %v1865_v33 = vmul.f32 %v1832_v15, %v2883_v57  ;;  %v1864_v12 = vmul.f32 %v1827_v27, %v2859_v38  ;;  %2304 = vmatmul.mubr.msk.bf16.gmra.mrb[4].mxu1 %vm446_vm0, %v900_v20  ;;  %v1798_v38 = vmul.f32 %v2742_v4, %v1790_v31 }
 0x101   : > { %v1872_v16 = vpack.c.bf16 %v1865_v33, %v1864_v12  ;;  %v1806_v36 = vadd.f32 %v2754_v10, %v1798_v38 }
 0x102   : > { %v1842_v17 = vpop.permute.xlu1 %1841  ;;  %v1837_v26 = vpop.permute.xlu0 %1836 }
 0x103   : > { %v1867_v34 = vmul.f32 %v1842_v17, %v2930_v49  ;;  %v1866_v46 = vmul.f32 %v1837_v26, %v2872_v51  ;;  %2359 = vmatprep.mubr.msk.bf16.mxu0 %vm446_vm0, %v1872_v16  ;;  %v1814_v4 = vmax.f32 %v1806_v36, 0.0 }
 0x105   : > { %v1873_v28 = vpack.c.bf16 %v1867_v34, %v1866_v46 }
 0x106   : > { %v1072_v24 = vpop.permute.xlu1 %1071  ;;  %v1067_v39 = vpop.permute.xlu0 %1066 }
 0x107   : > { %v1089_v30 = vmul.f32 %v1072_v24, %v2850_v29  ;;  %v1088_v57 = vmul.f32 %v1067_v39, %v2825_v11  ;;  %2360 = vmatmul.mubr.msk.bf16.vlgmr.msra.gmra.mrb[0].mxu0 %vm446_vm0, %v1873_v28 }
 0x109   : > { %v1094_v45 = vpack.c.bf16 %v1089_v30, %v1088_v57 }
 0x10a   : > { %v1852_v40 = vpop.permute.xlu1 %1851  ;;  %v1847_v32 = vpop.permute.xlu0 %1846 }
 0x10b   : > { %v1869_v49 = vmul.f32 %v1852_v40, %v2939_v61  ;;  %v1868_v51 = vmul.f32 %v1847_v32, %v2928_v48  ;;  %2315 = vmatprep.mubr.msk.bf16.mxu1 %vm446_vm0, %v1094_v45 }
 0x10d   : > { %v1874_v37 = vpack.c.bf16 %v1869_v49, %v1868_v51 }
 0x10e   : > { %v1082_v58 = vpop.permute.xlu1 %1081  ;;  %v1077_v29 = vpop.permute.xlu0 %1076 }
 0x10f   : > { %v1091_v23 = vmul.f32 %v1618_v13, %v1082_v58  ;;  %v1090_v11 = vmul.f32 %v1077_v29, %v2835_v21  ;;  %2363 = vmatprep.mubr.msk.bf16.mxu0 %vm446_vm0, %v1874_v37 }
 0x111   : > { %v1095_v41 = vpack.c.bf16 %v1091_v23, %v1090_v11 }
 0x112   : > { %v1862_v43 = vpop.permute.xlu1 %1861  ;;  %v1857_v44 = vpop.permute.xlu0 %1856 }
 0x113   : > { %v1871_v61 = vmul.f32 %v1862_v43, %v1814_v4  ;;  %v1870_v48 = vmul.f32 %v1857_v44, %v1229_v60  ;;  %2316 = vmatmul.mubr.msk.bf16.vlgmr.msra.gmra.mrb[4].mxu1 %vm446_vm0, %v1095_v41 }
 0x115   : > { %v1875_v10 = vpack.c.bf16 %v1871_v61, %v1870_v48 }
 0x117   : > { %2364 = vmatmul.mubr.msk.bf16.gmra.mrb[4].mxu0 %vm446_vm0, %v1875_v10 }
 0x1c2   : > { %v2301_v35 = vpop.f32.mrb[0].mxu1 }
 0x1c3   : > { %v964_v47 = vpop.f32.mrb[1].mxu1 }
 0x1c4   : > { %v2302_v52 = vpop.f32.mrb[2].mxu1 }
 0x1c5   : > { %v967_v1 = vpop.f32.mrb[3].mxu1 }
 0x1da   : > { %v2361_v21 = vpop.f32.mrb[0].mxu0 }
 0x1db   : > { %v2371_v22 = vadd.f32 %v2361_v21, %v2301_v35  ;;  %v1939_v50 = vpop.f32.mrb[1].mxu0 }
 0x1dc   : > { %v2372_v42 = vadd.f32 %v1939_v50, %v964_v47  ;;  %v2362_v60 = vpop.f32.mrb[2].mxu0 }
 0x1dd   : > { %1981 = vst.msk [vmem:[%s224_s28 + $0x10] sm:$0xff] %vm1978_vm1, %v2371_v22  ;;  %v2373_v53 = vadd.f32 %v2362_v60, %v2302_v52  ;;  %v1942_v25 = vpop.f32.mrb[3].mxu0 }
 0x1de   : > { %1979 = vst.msk [vmem:[%s224_s28] sm:$0xff] %vm1978_vm1, %v2372_v42  ;;  %v2374_v54 = vadd.f32 %v1942_v25, %v967_v1 }
 0x1df   : > { %1982 = vst.msk [vmem:[%s224_s28 + $0x18] sm:$0xff] %vm1978_vm1, %v2373_v53 }
 0x1e0   : > { %1980 = vst.msk [vmem:[%s224_s28 + $0x8] sm:$0xff] %vm1978_vm1, %v2374_v54 }
 0x1e6   : > { %v2317_v55 = vpop.f32.mrb[4].mxu1 }
 0x1e7   : > { %v1175_v13 = vpop.f32.mrb[5].mxu1 }
 0x1e8   : > { %v2318_v18 = vpop.f32.mrb[6].mxu1 }
 0x1e9   : > { %v1178_v56 = vpop.f32.mrb[7].mxu1 }
 0x1ea   : > { %v2365_v59 = vpop.f32.mrb[4].mxu0 }
 0x1eb   : > { %v2375_v62 = vadd.f32 %v2365_v59, %v2317_v55  ;;  %v1955_v7 = vpop.f32.mrb[5].mxu0 }
 0x1ec   : > { %v2376_v63 = vadd.f32 %v1955_v7, %v1175_v13  ;;  %v2366_v0 = vpop.f32.mrb[6].mxu0 }
 0x1ed   : > { %1985 = vst.msk [vmem:[%s224_s28 + $0x30] sm:$0xff] %vm1978_vm1, %v2375_v62  ;;  %v2377_v2 = vadd.f32 %v2366_v0, %v2318_v18  ;;  %v1958_v3 = vpop.f32.mrb[7].mxu0 }
 0x1ee   : > { %1983 = vst.msk [vmem:[%s224_s28 + $0x20] sm:$0xff] %vm1978_vm1, %v2376_v63  ;;  %v2378_v5 = vadd.f32 %v1958_v3, %v1178_v56 }
 0x1ef   : > { %1986 = vst.msk [vmem:[%s224_s28 + $0x38] sm:$0xff] %vm1978_vm1, %v2377_v2 }
 0x1f0   : > { %1984 = vst.msk [vmem:[%s224_s28 + $0x28] sm:$0xff] %vm1978_vm1, %v2378_v5 }
 0x1f1 PF: > { %s15_s18 = sadd.s32 1, %s2471_s18  }
 0x1f2   : > { %p12_p4 = scmp.ge.s32.totalorder %s15_s18, 4  }
 0x1f4   :  { %14 = sbr.rel (!%p12_p4) target bundleno = 1 (0x1), region = 86 }

// kernel: densenet_forward.32
= control target key start
LH: loop header
LB: loop body
LE: loop exit
PB: predicated region body
PF: predicated region fallthrough
CT: control target
= control target key end

     0   :  { %v19_v5 = vlaneseq  ;;  %s56_s0 = inlined_call_operand.vmem [shape: f32[4,1,512], index: 0, kind: input, shape index: {}]   ;;  %s57_s1 = inlined_call_operand.vmem [shape: f32[1,512], index: 1, kind: output, shape index: {}]  }
   0x1   :  { %v8_v0 = vld [vmem:[%s56_s0] sm:$0xf]  ;;  %v28_v1 = vld [vmem:[%s56_s0 + $0x4] sm:$0xf]  ;;  %v29_v2 = vld [vmem:[%s56_s0 + $0x8] sm:$0xf] }
   0x2   :  { %v11_v3 = vadd.f32 %v28_v1, %v8_v0  ;;  %v30_v4 = vld [vmem:[%s56_s0 + $0xc] sm:$0xf]  ;;  %vm21_vm0 = vcmp.lt.s32.totalorder %v19_v5, 512 }
   0x4   :  { %v14_v6 = vadd.f32 %v29_v2, %v11_v3 }
   0x6   :  { %v17_v7 = vadd.f32 %v30_v4, %v14_v6 }
   0x8   :  { %v18_v8 = vmul.f32 0.25, %v17_v7 }
   0xa   :  { %23 = vst.msk [vmem:[%s57_s1] sm:$0xf] %vm21_vm0, %v18_v8 }

// kernel: densenet_forward.33
= control target key start
LH: loop header
LB: loop body
LE: loop exit
PB: predicated region body
PF: predicated region fallthrough
CT: control target
= control target key end

     0   :  { %s406_s15 = smov 0   ;;  %s432_s0 = inlined_call_operand.vmem [shape: f32[32,16], index: 0, kind: input, shape index: {}]   ;;  %s433_s1 = inlined_call_operand.vmem [shape: f32[1,16], index: 1, kind: input, shape index: {}]   ;;  %s434_s2 = inlined_call_operand.vmem [shape: f32[1,16], index: 2, kind: input, shape index: {}]   ;;  %s435_s3 = inlined_call_operand.vmem [shape: bf16[16,32], index: 3, kind: input, shape index: {}]   ;;  %s436_s4 = inlined_call_operand.vmem [shape: f32[32,32], index: 4, kind: output, shape index: {}]  }
   0x1 LB: > { %s337_s16 = sadd.s32 4294967295, %s377_s15   ;;  %p341_p0 = scmp.ge.s32.totalorder %s377_s15, 1  ;;  %s377_s15 = sphi %s406_s15, %s14_s15  }
   0x2   : > { %p163_p1 = scmp.lt.s32.totalorder %s377_s15, 3 }
   0x4   : > { %p164_p2 = pnand %p341_p0, %p163_p1 }
   0x5   : > { %v370_v0 = vld [vmem:[%s435_s3] sm:$0xff] (!%p164_p2)   ;;  %v379_v1 = vmov (!%p164_p2), 0.0   ;;  %s342_s19 = sshll.u32 (!%p164_p2), %s337_s16, 1  ;;  %vm380_vm0 = vmmov (!%p164_p2), 0   ;;  %vm233_vm1 = vcmask (!%p164_p2), 130048   ;;  %vm278_vm2 = vcmask (!%p164_p2), 261120  }
   0x6   : > { %167 = sbr.rel (%p164_p2) target bundleno = 240 (0xf0), region = 36  ;;  %354 = vmatprep.subr.bf16.mxu0 (!%p164_p2), %v379_v1  ;;  %356 = vmatprep.mubr.msk.bf16.mxu0 (!%p164_p2), %vm380_vm0, %v379_v1  ;;  %p190_p3 = scmp.lt.s32.totalorder (!%p164_p2), %s342_s19, 3  ;;  %v346_v2 = vld [vmem:[%s433_s1] ss:$0 sm:$0xff] (!%p164_p2) }
   0x7   : > { %355 = vmatpush3.bf16.msra.mxu0 (!%p164_p2), %v370_v0  ;;  %v347_v5 = vld [vmem:[%s434_s2] ss:$0 sm:$0xff] (!%p164_p2) }
   0xd   : > { %s438_s19 = smov (!%p190_p3, %s342_s19), 3 }
   0xe   : > { %s343_s20 = sshll.u32 %s438_s19, 3 }
   0xf   : > { %s193_s25 = scalar_lea.vmem %s432_s0, %s343_s20  ;;  %s199_s30 = scalar_lea.vmem %s436_s4, %s343_s20 }
  0x10   : > { %v202_v3 = vld [vmem:[%s193_s25] sm:$0xff]  ;;  %v203_v4 = vld [vmem:[%s193_s25 + $0x8] sm:$0xff] }
  0x11   : > { %v211_v6 = vmul.f32 %v346_v2, %v202_v3  ;;  %v212_v7 = vmul.f32 %v346_v2, %v203_v4 }
  0x13   : > { %v220_v8 = vadd.f32 %v347_v5, %v211_v6  ;;  %v221_v9 = vadd.f32 %v347_v5, %v212_v7 }
  0x15   : > { %v222_v10 = vmax.f32 %v220_v8, 0.0  ;;  %v223_v11 = vmax.f32 %v221_v9, 0.0 }
  0x17   : > { %v224_v12 = vpack.c.bf16 %v223_v11, %v222_v10 }
  0x19   : > { %357 = vmatmul.mubr.msk.bf16.vlgmr.msra.gmra.mrb[0].mxu0 %vm233_vm1, %v224_v12 }
  0xec   : > { %v271_v13 = vpop.f32.mrb[0].mxu0 }
  0xed   : > { %279 = vst.msk [vmem:[%s199_s30] sm:$0xff] %vm278_vm2, %v271_v13  ;;  %v358_v14 = vpop.f32.mrb[1].mxu0 }
  0xee   : > { %v274_v15 = vpop.f32.mrb[2].mxu0 }
  0xef   : > { %280 = vst.msk [vmem:[%s199_s30 + $0x8] sm:$0xff] %vm278_vm2, %v274_v15  ;;  %v359_v16 = vpop.f32.mrb[3].mxu0 }
  0xf0 PF: > { %s14_s15 = sadd.s32 1, %s377_s15  }
  0xf1   : > { %p11_p4 = scmp.ge.s32.totalorder %s14_s15, 4  }
  0xf3   :  { %13 = sbr.rel (!%p11_p4) target bundleno = 1 (0x1), region = 66 }

// kernel: densenet_forward.35
= control target key start
LH: loop header
LB: loop body
LE: loop exit
PB: predicated region body
PF: predicated region fallthrough
CT: control target
= control target key end

     0   :  { %s419_s15 = smov 0   ;;  %s448_s0 = inlined_call_operand.vmem [shape: f32[32,24], index: 0, kind: input, shape index: {}]   ;;  %s449_s1 = inlined_call_operand.vmem [shape: f32[1,24], index: 1, kind: input, shape index: {}]   ;;  %s450_s2 = inlined_call_operand.vmem [shape: f32[1,24], index: 2, kind: input, shape index: {}]   ;;  %s451_s3 = inlined_call_operand.vmem [shape: bf16[24,32], index: 3, kind: input, shape index: {}]   ;;  %s452_s4 = inlined_call_operand.vmem [shape: f32[32,32], index: 4, kind: output, shape index: {}]  }
   0x1 LB: > { %s345_s16 = sadd.s32 4294967295, %s390_s15   ;;  %p349_p0 = scmp.ge.s32.totalorder %s390_s15, 1  ;;  %s390_s15 = sphi %s419_s15, %s14_s15  }
   0x2   : > { %p163_p1 = scmp.lt.s32.totalorder %s390_s15, 3 }
   0x4   : > { %p164_p2 = pnand %p349_p0, %p163_p1 }
   0x5   : > { %v382_v0 = vld [vmem:[%s451_s3] sm:$0xff] (!%p164_p2)   ;;  %v392_v1 = vmov (!%p164_p2), 0.0   ;;  %v383_v2 = vld [vmem:[%s451_s3 + $0x8] ss:$0 sps:$4 sm:$0xff] (!%p164_p2)   ;;  %vm241_vm0 = vcmask (!%p164_p2), 1043456   ;;  %vm393_vm1 = vmmov (!%p164_p2), 0  }
   0x6   : > { %167 = sbr.rel (%p164_p2) target bundleno = 240 (0xf0), region = 36  ;;  %364 = vmatprep.subr.bf16.mxu0 (!%p164_p2), %v392_v1  ;;  %368 = vmatprep.mubr.msk.bf16.mxu0 (!%p164_p2), %vm393_vm1, %v392_v1  ;;  %s350_s21 = sshll.u32 (!%p164_p2), %s345_s16, 1  ;;  %v243_v3 = vsel (!%p164_p2), %vm241_vm0, %v383_v2, 0  ;;  %v354_v4 = vld [vmem:[%s449_s1] ss:$0 sm:$0xff] (!%p164_p2)  ;;  %vm237_vm2 = vcmask (!%p164_p2), 195584  }
   0x7   : > { %365 = vmatpush3.bf16.msra.mxu0 (!%p164_p2), %v382_v0  ;;  %p190_p3 = scmp.lt.s32.totalorder (!%p164_p2), %s350_s21, 3  ;;  %v355_v7 = vld [vmem:[%s450_s2] ss:$0 sm:$0xff] (!%p164_p2)  ;;  %vm286_vm3 = vcmask (!%p164_p2), 261120  }
   0x8   : > { %366 = vmatprep.subr.bf16.mxu0 (!%p164_p2), %v392_v1 }
   0xb   : > { %367 = vmatpush3.bf16.msra.mxu0 (!%p164_p2), %v243_v3 }
   0xd   : > { %s454_s21 = smov (!%p190_p3, %s350_s21), 3 }
   0xe   : > { %s351_s22 = sshll.u32 %s454_s21, 3 }
   0xf   : > { %s193_s27 = scalar_lea.vmem %s448_s0, %s351_s22  ;;  %s199_s6 = scalar_lea.vmem %s452_s4, %s351_s22 }
  0x10   : > { %v202_v5 = vld [vmem:[%s193_s27] sm:$0xff]  ;;  %v203_v6 = vld [vmem:[%s193_s27 + $0x8] sm:$0xff] }
  0x11   : > { %v211_v8 = vmul.f32 %v354_v4, %v202_v5  ;;  %v212_v9 = vmul.f32 %v354_v4, %v203_v6 }
  0x13   : > { %v220_v10 = vadd.f32 %v355_v7, %v211_v8  ;;  %v221_v11 = vadd.f32 %v355_v7, %v212_v9 }
  0x15   : > { %v222_v12 = vmax.f32 %v220_v10, 0.0  ;;  %v223_v13 = vmax.f32 %v221_v11, 0.0 }
  0x17   : > { %v224_v14 = vpack.c.bf16 %v223_v13, %v222_v12 }
  0x19   : > { %369 = vmatmul.mubr.msk.bf16.vlgmr.msra.gmra.mrb[0].mxu0 %vm237_vm2, %v224_v14 }
  0xec   : > { %v279_v15 = vpop.f32.mrb[0].mxu0 }
  0xed   : > { %287 = vst.msk [vmem:[%s199_s6] sm:$0xff] %vm286_vm3, %v279_v15  ;;  %v370_v16 = vpop.f32.mrb[1].mxu0 }
  0xee   : > { %v282_v17 = vpop.f32.mrb[2].mxu0 }
  0xef   : > { %288 = vst.msk [vmem:[%s199_s6 + $0x8] sm:$0xff] %vm286_vm3, %v282_v17  ;;  %v371_v18 = vpop.f32.mrb[3].mxu0 }
  0xf0 PF: > { %s14_s15 = sadd.s32 1, %s390_s15  }
  0xf1   : > { %p11_p4 = scmp.ge.s32.totalorder %s14_s15, 4  }
  0xf3   :  { %13 = sbr.rel (!%p11_p4) target bundleno = 1 (0x1), region = 66 }

// kernel: densenet_forward.37
= control target key start
LH: loop header
LB: loop body
LE: loop exit
PB: predicated region body
PF: predicated region fallthrough
CT: control target
= control target key end

     0   :  { %s419_s15 = smov 0   ;;  %s448_s0 = inlined_call_operand.vmem [shape: f32[32,32], index: 0, kind: input, shape index: {}]   ;;  %s449_s1 = inlined_call_operand.vmem [shape: f32[1,32], index: 1, kind: input, shape index: {}]   ;;  %s450_s2 = inlined_call_operand.vmem [shape: f32[1,32], index: 2, kind: input, shape index: {}]   ;;  %s451_s3 = inlined_call_operand.vmem [shape: bf16[32,16], index: 3, kind: input, shape index: {}]   ;;  %s452_s4 = inlined_call_operand.vmem [shape: f32[32,16], index: 4, kind: output, shape index: {}]  }
   0x1 LB: > { %s345_s16 = sadd.s32 4294967295, %s390_s15   ;;  %p349_p0 = scmp.ge.s32.totalorder %s390_s15, 1  ;;  %s390_s15 = sphi %s419_s15, %s14_s15  }
   0x2   : > { %p163_p1 = scmp.lt.s32.totalorder %s390_s15, 3 }
   0x4   : > { %p164_p2 = pnand %p349_p0, %p163_p1 }
   0x5   : > { %v382_v0 = vld [vmem:[%s451_s3] sm:$0xff] (!%p164_p2)   ;;  %v392_v1 = vmov (!%p164_p2), 0.0   ;;  %v383_v2 = vld [vmem:[%s451_s3 + $0x8] sm:$0xff] (!%p164_p2)   ;;  %vm393_vm0 = vmmov (!%p164_p2), 0   ;;  %s350_s21 = sshll.u32 (!%p164_p2), %s345_s16, 1  ;;  %vm241_vm1 = vcmask (!%p164_p2), 261120  }
   0x6   : > { %167 = sbr.rel (%p164_p2) target bundleno = 240 (0xf0), region = 36  ;;  %364 = vmatprep.subr.bf16.mxu0 (!%p164_p2), %v392_v1  ;;  %368 = vmatprep.mubr.msk.bf16.mxu0 (!%p164_p2), %vm393_vm0, %v392_v1  ;;  %p190_p3 = scmp.lt.s32.totalorder (!%p164_p2), %s350_s21, 3  ;;  %v354_v3 = vld [vmem:[%s449_s1] ss:$0 sm:$0xff] (!%p164_p2)  ;;  %vm286_vm2 = vcmask (!%p164_p2), 130048  }
   0x7   : > { %365 = vmatpush3.bf16.msra.mxu0 (!%p164_p2), %v382_v0  ;;  %v355_v6 = vld [vmem:[%s450_s2] ss:$0 sm:$0xff] (!%p164_p2) }
   0x8   : > { %366 = vmatprep.subr.bf16.mxu0 (!%p164_p2), %v392_v1 }
   0xb   : > { %367 = vmatpush3.bf16.msra.mxu0 (!%p164_p2), %v383_v2 }
   0xd   : > { %s454_s21 = smov (!%p190_p3, %s350_s21), 3 }
   0xe   : > { %s351_s22 = sshll.u32 %s454_s21, 3 }
   0xf   : > { %s193_s27 = scalar_lea.vmem %s448_s0, %s351_s22  ;;  %s199_s6 = scalar_lea.vmem %s452_s4, %s351_s22 }
  0x10   : > { %v202_v4 = vld [vmem:[%s193_s27] sm:$0xff]  ;;  %v203_v5 = vld [vmem:[%s193_s27 + $0x8] sm:$0xff] }
  0x11   : > { %v211_v7 = vmul.f32 %v354_v3, %v202_v4  ;;  %v212_v8 = vmul.f32 %v354_v3, %v203_v5 }
  0x13   : > { %v220_v9 = vadd.f32 %v355_v6, %v211_v7  ;;  %v221_v10 = vadd.f32 %v355_v6, %v212_v8 }
  0x15   : > { %v222_v11 = vmax.f32 %v220_v9, 0.0  ;;  %v223_v12 = vmax.f32 %v221_v10, 0.0 }
  0x17   : > { %v224_v13 = vpack.c.bf16 %v223_v12, %v222_v11 }
  0x19   : > { %369 = vmatmul.mubr.msk.bf16.vlgmr.msra.gmra.mrb[0].mxu0 %vm241_vm1, %v224_v13 }
  0xec   : > { %v279_v14 = vpop.f32.mrb[0].mxu0 }
  0xed   : > { %287 = vst.msk [vmem:[%s199_s6] sm:$0xff] %vm286_vm2, %v279_v14  ;;  %v370_v15 = vpop.f32.mrb[1].mxu0 }
  0xee   : > { %v282_v16 = vpop.f32.mrb[2].mxu0 }
  0xef   : > { %288 = vst.msk [vmem:[%s199_s6 + $0x8] sm:$0xff] %vm286_vm2, %v282_v16  ;;  %v371_v17 = vpop.f32.mrb[3].mxu0 }
  0xf0 PF: > { %s14_s15 = sadd.s32 1, %s390_s15  }
  0xf1   : > { %p11_p4 = scmp.ge.s32.totalorder %s14_s15, 4  }
  0xf3   :  { %13 = sbr.rel (!%p11_p4) target bundleno = 1 (0x1), region = 66 }

// kernel: densenet_forward.34
= control target key start
LH: loop header
LB: loop body
LE: loop exit
PB: predicated region body
PF: predicated region fallthrough
CT: control target
= control target key end

     0   :  { %s1367_s18 = smov 0   ;;  %s1619_s0 = inlined_call_operand.vmem [shape: f32[2,26,32], index: 0, kind: input, shape index: {}]   ;;  %s1620_s1 = inlined_call_operand.vmem [shape: f32[1,32], index: 1, kind: input, shape index: {}]   ;;  %s1621_s2 = inlined_call_operand.vmem [shape: f32[1,32], index: 2, kind: input, shape index: {}]   ;;  %s1622_s3 = inlined_call_operand.vmem [shape: f32[9,16,1], index: 3, kind: input, shape index: {}]   ;;  %s1623_s4 = inlined_call_operand.vmem [shape: bf16[9,32,8], index: 4, kind: input, shape index: {}]   ;;  %s1624_s5 = inlined_call_operand.vmem [shape: f32[2,16,8], index: 5, kind: output, shape index: {}]  }
   0x1 LB: > { %s1076_s19 = sadd.s32 4294967295, %s1332_s18   ;;  %p1080_p0 = scmp.ge.s32.totalorder %s1332_s18, 1  ;;  %s1332_s18 = sphi %s1367_s18, %s15_s18  }
   0x2   : > { %p187_p1 = scmp.lt.s32.totalorder %s1332_s18, 3 }
   0x4   : > { %p188_p2 = pnand %p1080_p0, %p187_p1 }
   0x5   : > { %v1087_v0 = vld [vmem:[%s1622_s3 + $0x10] sm:$0xff] (!%p188_p2)  ;;  %v1117_v1 = vld [vmem:[%s1622_s3 + $0x40] sm:$0xff] (!%p188_p2)  ;;  %v1334_v2 = vmov (!%p188_p2), 0   ;;  %v1088_v3 = vld [vmem:[%s1622_s3 + $0x18] sm:$0xff] (!%p188_p2)  ;;  %v1335_v5 = vmov (!%p188_p2), 0.0   ;;  %vm1336_vm0 = vmmov (!%p188_p2), 0  }
   0x6   : > { %191 = sbr.rel (%p188_p2) target bundleno = 408 (0x198), region = 40  ;;  %1307 = vset.pattern.permute.xlu1 (!%p188_p2), %v1334_v2  ;;  %1306 = vset.pattern.permute.xlu0 (!%p188_p2), %v1334_v2  ;;  %v1118_v4 = vld [vmem:[%s1622_s3 + $0x48] sm:$0xff] (!%p188_p2)  ;;  %v1127_v6 = vld [vmem:[%s1622_s3 + $0x58] sm:$0xff] (!%p188_p2)  ;;  %v1126_v7 = vld [vmem:[%s1622_s3 + $0x50] sm:$0xff] (!%p188_p2)  ;;  %p215_p3 = scmp.lt.s32.totalorder (!%p188_p2), %s1076_s19, 1  ;;  %vm308_vm1 = vcmask (!%p188_p2), 261120  }
   0x7   : > { %280 = vperm.xlu1 (!%p188_p2), %1307, %v1087_v0   ;;  %596 = vperm.xlu0 (!%p188_p2), %1306, %v1117_v1   ;;  %v1308_v8 = vld [vmem:[%s1623_s4 + $0x40] sm:$0xff] (!%p188_p2)   ;;  %v249_v9 = vld [vmem:[%s1622_s3 + $0x8] sm:$0xff] (!%p188_p2)  ;;  %v1309_v11 = vld [vmem:[%s1623_s4 + $0x10] sm:$0xff] (!%p188_p2)   ;;  %vm1018_vm2 = vcmask (!%p188_p2), 64512  }
   0x8   : > { %1225 = vmatprep.subr.bf16.mxu0 (!%p188_p2), %v1335_v5  ;;  %1193 = vmatprep.subr.bf16.mxu1 (!%p188_p2), %v1335_v5  ;;  %v248_v10 = vld [vmem:[%s1622_s3] sm:$0xff] (!%p188_p2)  ;;  %v1310_v12 = vld [vmem:[%s1623_s4 + $0x48] sm:$0xff] (!%p188_p2)   ;;  %v1311_v13 = vld [vmem:[%s1623_s4 + $0x18] sm:$0xff] (!%p188_p2)  }
   0x9   : > { %1197 = vmatprep.mubr.msk.bf16.mxu1 (!%p188_p2), %vm1336_vm0, %v1335_v5  ;;  %1229 = vmatprep.mubr.msk.bf16.mxu0 (!%p188_p2), %vm1336_vm0, %v1335_v5  ;;  %v1136_v14 = vld [vmem:[%s1622_s3 + $0x68] sm:$0xff] (!%p188_p2)  ;;  %v1135_v15 = vld [vmem:[%s1622_s3 + $0x60] sm:$0xff] (!%p188_p2)  ;;  %v1145_v18 = vld [vmem:[%s1622_s3 + $0x78] sm:$0xff] (!%p188_p2) }
   0xa   : > { %1226 = vmatpush3.bf16.msra.mxu0 (!%p188_p2), %v1308_v8  ;;  %1194 = vmatpush3.bf16.msra.mxu1 (!%p188_p2), %v1309_v11  ;;  %v1100_v16 = vld [vmem:[%s1622_s3 + $0x28] sm:$0xff] (!%p188_p2)  ;;  %v1099_v17 = vld [vmem:[%s1622_s3 + $0x20] sm:$0xff] (!%p188_p2)  ;;  %v1144_v19 = vld [vmem:[%s1622_s3 + $0x70] sm:$0xff] (!%p188_p2) }
   0xb   : > { %285 = vperm.xlu1 (!%p188_p2), %1307, %v1088_v3   ;;  %601 = vperm.xlu0 (!%p188_p2), %1306, %v1118_v4   ;;  %v1109_v20 = vld [vmem:[%s1622_s3 + $0x38] sm:$0xff] (!%p188_p2)  ;;  %v1108_v21 = vld [vmem:[%s1622_s3 + $0x30] sm:$0xff] (!%p188_p2)  ;;  %v1154_v22 = vld [vmem:[%s1622_s3 + $0x88] sm:$0xff] (!%p188_p2) }
   0xc   : > { %1227 = vmatprep.subr.bf16.mxu0 (!%p188_p2), %v1335_v5  ;;  %1195 = vmatprep.subr.bf16.mxu1 (!%p188_p2), %v1335_v5  ;;  %v1153_v23 = vld [vmem:[%s1622_s3 + $0x80] sm:$0xff] (!%p188_p2)  ;;  %v1312_v60 = vld [vmem:[%s1623_s4 + $0x50] sm:$0xff] (!%p188_p2)   ;;  %v1315_v8 = vld [vmem:[%s1623_s4 + $0x8] sm:$0xff] (!%p188_p2)  }
   0xd   : > { %s1626_s19 = smov (!%p215_p3, %s1076_s19), 1  ;;  %v1467_v25 = vld [vmem:[%s1620_s1] ss:$0 sm:$0xff] }
   0xe   : > { %1228 = vmatpush3.bf16.msra.mxu0 %v1310_v12  ;;  %1196 = vmatpush3.bf16.msra.mxu1 %v1311_v13  ;;  %s1164_s16 = sshll.u32 %s1626_s19, 5  ;;  %v1479_v33 = vld [vmem:[%s1621_s2] ss:$0 sm:$0xff]  ;;  %s1165_s6 = sshll.u32 %s1626_s19, 4 }
   0xf   : > { %688 = vperm.xlu1 %1307, %v1127_v6   ;;  %683 = vperm.xlu0 %1306, %v1126_v7   ;;  %s1461_s21 = scalar_lea.vmem %s1619_s0, %s1164_s16  ;;  %v1313_v61 = vld [vmem:[%s1623_s4] sm:$0xff]   ;;  %v1314_v6 = vld [vmem:[%s1623_s4 + $0x58] sm:$0xff]   ;;  %s224_s9 = scalar_lea.vmem %s1624_s5, %s1165_s6 }
  0x10   : > { %1233 = vmatprep.subr.bf16.mxu0 %v1335_v5  ;;  %1201 = vmatprep.subr.bf16.mxu1 %v1335_v5  ;;  %v267_v24 = vld [vmem:[%s1461_s21 + $0x1] sm:$0xff]  ;;  %v268_v27 = vld [vmem:[%s1461_s21 + $0x9] sm:$0xff] }
  0x11   : > { %v583_v26 = vld [vmem:[%s1461_s21 + $0x5] sm:$0xff]  ;;  %v584_v28 = vld [vmem:[%s1461_s21 + $0xd] sm:$0xff]  ;;  %v269_v29 = vmul.f32 %v1467_v25, %v267_v24  ;;  %v270_v31 = vmul.f32 %v1467_v25, %v268_v27 }
  0x12   : > { %v585_v30 = vmul.f32 %v1467_v25, %v583_v26  ;;  %v586_v32 = vmul.f32 %v1467_v25, %v584_v28  ;;  %v671_v39 = vld [vmem:[%s1461_s21 + $0xe] sm:$0xff]  ;;  %v670_v40 = vld [vmem:[%s1461_s21 + $0x6] sm:$0xff] }
  0x13   : > { %257 = vperm.xlu1 %1307, %v249_v9   ;;  %252 = vperm.xlu0 %1306, %v248_v10   ;;  %v271_v34 = vadd.f32 %v1479_v33, %v269_v29  ;;  %v1484_v36 = vadd.f32 %v1479_v33, %v270_v31  ;;  %v229_v43 = vld [vmem:[%s1461_s21 + $0x8] sm:$0xff]  ;;  %v228_v44 = vld [vmem:[%s1461_s21] sm:$0xff]  ;;  %v673_v48 = vmul.f32 %v1467_v25, %v671_v39  ;;  %v758_v7 = vld [vmem:[%s1461_s21 + $0x10] sm:$0xff] }
  0x14   : > { %v587_v35 = vadd.f32 %v1479_v33, %v585_v30  ;;  %v588_v37 = vadd.f32 %v1479_v33, %v586_v32  ;;  %v672_v49 = vmul.f32 %v1467_v25, %v670_v40  ;;  %v237_v51 = vmul.f32 %v1467_v25, %v229_v43  ;;  %v410_v12 = vld [vmem:[%s1461_s21 + $0xa] sm:$0xff]  ;;  %v409_v13 = vld [vmem:[%s1461_s21 + $0x2] sm:$0xff] }
  0x15   : > { %v273_v38 = vmax.f32 %v271_v34, 0.0  ;;  %v274_v46 = vmax.f32 %v1484_v36, 0.0  ;;  %v236_v52 = vmul.f32 %v1467_v25, %v228_v44  ;;  %v675_v58 = vadd.f32 %v1479_v33, %v673_v48  ;;  %v1316_v27 = vld [vmem:[%s1623_s4 + $0x60] sm:$0xff]  }
  0x16   : > { %v589_v45 = vmax.f32 %v587_v35, 0.0  ;;  %v590_v47 = vmax.f32 %v588_v37, 0.0  ;;  %v674_v59 = vadd.f32 %v1479_v33, %v672_v49  ;;  %v1507_v0 = vadd.f32 %v1479_v33, %v237_v51  ;;  %v1317_v28 = vld [vmem:[%s1623_s4 + $0x20] sm:$0xff]   ;;  %v845_v35 = vld [vmem:[%s1461_s21 + $0x11] sm:$0xff]  ;;  %v1318_v37 = vld [vmem:[%s1623_s4 + $0x68] sm:$0xff]  }
  0x17   : > { %775 = vperm.xlu1 %1307, %v1136_v14   ;;  %770 = vperm.xlu0 %1306, %v1135_v15   ;;  %v244_v1 = vadd.f32 %v1479_v33, %v236_v52  ;;  %v677_v4 = vmax.f32 %v675_v58, 0.0 }
  0x18   : > { %v676_v9 = vmax.f32 %v674_v59, 0.0  ;;  %v247_v10 = vmax.f32 %v1507_v0, 0.0 }
  0x19   : > { %v246_v11 = vmax.f32 %v244_v1, 0.0 }
  0x1b   : > { %427 = vperm.xlu1 %1307, %v1100_v16   ;;  %422 = vperm.xlu0 %1306, %v1099_v17   ;;  %v760_v16 = vmul.f32 %v1467_v25, %v758_v7 }
  0x1d   : > { %v762_v24 = vadd.f32 %v1479_v33, %v760_v16 }
  0x1f   : > { %862 = vperm.xlu1 %1307, %v1145_v18   ;;  %857 = vperm.xlu0 %1306, %v1144_v19   ;;  %v412_v18 = vmul.f32 %v1467_v25, %v410_v12  ;;  %v411_v19 = vmul.f32 %v1467_v25, %v409_v13  ;;  %v764_v34 = vmax.f32 %v762_v24, 0.0  ;;  %v1324_v12 = vld [vmem:[%s1623_s4 + $0x80] sm:$0xff]  }
  0x21   : > { %v1541_v31 = vadd.f32 %v1479_v33, %v412_v18  ;;  %v413_v32 = vadd.f32 %v1479_v33, %v411_v19 }
  0x23   : > { %514 = vperm.xlu1 %1307, %v1109_v20   ;;  %509 = vperm.xlu0 %1306, %v1108_v21   ;;  %v416_v39 = vmax.f32 %v1541_v31, 0.0  ;;  %v415_v40 = vmax.f32 %v413_v32, 0.0 }
  0x27   : > { %949 = vperm.xlu1 %1307, %v1154_v22   ;;  %944 = vperm.xlu0 %1306, %v1153_v23  }
  0x86   : > { %v281_v41 = vpop.permute.xlu1 %280  ;;  %v597_v42 = vpop.permute.xlu0 %596 }
  0x87   : > { %v288_v50 = vmul.f32 %v281_v41, %v273_v38  ;;  %v604_v55 = vmul.f32 %v597_v42, %v589_v45  ;;  %v1319_v38 = vld [vmem:[%s1623_s4 + $0x28] sm:$0xff]   ;;  %v847_v45 = vmul.f32 %v1467_v25, %v845_v35 }
  0x88   : > { %v497_v41 = vld [vmem:[%s1461_s21 + $0xc] sm:$0xff]  ;;  %v496_v42 = vld [vmem:[%s1461_s21 + $0x4] sm:$0xff] }
  0x89   : > { %v499_v48 = vmul.f32 %v1467_v25, %v497_v41  ;;  %v498_v49 = vmul.f32 %v1467_v25, %v496_v42 }
  0x8a   : > { %v286_v53 = vpop.permute.xlu1 %285  ;;  %v602_v54 = vpop.permute.xlu0 %601 }
  0x8b   : > { %v289_v56 = vmul.f32 %v286_v53, %v274_v46  ;;  %v605_v57 = vmul.f32 %v602_v54, %v590_v47  ;;  %v849_v54 = vadd.f32 %v1479_v33, %v847_v45 }
  0x8d   : > { %v290_v62 = vpack.c.bf16 %v289_v56, %v288_v50  ;;  %v606_v63 = vpack.c.bf16 %v605_v57, %v604_v55  ;;  %v1320_v56 = vld [vmem:[%s1623_s4 + $0x70] sm:$0xff]   ;;  %v851_v0 = vmax.f32 %v849_v54, 0.0 }
  0x8e   : > { %v689_v2 = vpop.permute.xlu1 %688  ;;  %v684_v3 = vpop.permute.xlu0 %683  ;;  %v1321_v57 = vld [vmem:[%s1623_s4 + $0x30] sm:$0xff]  }
  0x8f   : > { %1198 = vmatmul.mubr.msk.bf16.vlgmr.msra.gmra.mrb[0].mxu1 %vm308_vm1, %v290_v62  ;;  %1230 = vmatmul.mubr.msk.bf16.vlgmr.msra.gmra.mrb[0].mxu0 %vm308_vm1, %v606_v63  ;;  %v692_v17 = vmul.f32 %v689_v2, %v677_v4  ;;  %v691_v20 = vmul.f32 %v684_v3, %v676_v9  ;;  %v1322_v62 = vld [vmem:[%s1623_s4 + $0x78] sm:$0xff]  }
  0x90   : > { %1234 = vmatpush3.bf16.msra.mxu0 %v1312_v60  ;;  %1202 = vmatpush3.bf16.msra.mxu1 %v1313_v61  ;;  %v501_v60 = vadd.f32 %v1479_v33, %v499_v48  ;;  %v500_v61 = vadd.f32 %v1479_v33, %v498_v49  ;;  %v1323_v63 = vld [vmem:[%s1623_s4 + $0x38] sm:$0xff]  }
  0x91   : > { %1235 = vmatprep.subr.bf16.mxu0 %v1335_v5  ;;  %1203 = vmatprep.subr.bf16.mxu1 %v1335_v5  ;;  %v693_v29 = vpack.c.bf16 %v692_v17, %v691_v20  ;;  %v932_v3 = vld [vmem:[%s1461_s21 + $0x12] sm:$0xff] }
  0x92   : > { %v258_v14 = vpop.permute.xlu1 %257  ;;  %v253_v15 = vpop.permute.xlu0 %252  ;;  %1205 = vmatprep.mubr.msk.bf16.mxu1 %vm1336_vm0, %v1335_v5  ;;  %1237 = vmatprep.mubr.msk.bf16.mxu0 %vm1336_vm0, %v1335_v5  ;;  %v503_v1 = vmax.f32 %v501_v60, 0.0  ;;  %v502_v2 = vmax.f32 %v500_v61, 0.0  ;;  %v934_v7 = vmul.f32 %v1467_v25, %v932_v3  ;;  %v1325_v25 = vld [vmem:[%s1623_s4 + $0x88] sm:$0xff]  }
  0x93   : > { %v261_v21 = vmul.f32 %v258_v14, %v247_v10  ;;  %v260_v22 = vmul.f32 %v253_v15, %v246_v11 }
  0x94   : > { %1236 = vmatpush3.bf16.msra.mxu0 %v1314_v6  ;;  %1204 = vmatpush3.bf16.msra.mxu1 %v1315_v8  ;;  %v936_v15 = vadd.f32 %v1479_v33, %v934_v7 }
  0x95   : > { %1241 = vmatprep.subr.bf16.mxu0 %v1335_v5  ;;  %1209 = vmatprep.subr.bf16.mxu1 %v1335_v5  ;;  %v262_v30 = vpack.c.bf16 %v261_v21, %v260_v22 }
  0x96   : > { %v776_v23 = vpop.permute.xlu1 %775  ;;  %v771_v26 = vpop.permute.xlu0 %770  ;;  %v938_v36 = vmax.f32 %v936_v15, 0.0 }
  0x97   : > { %v779_v47 = vmul.f32 %v776_v23, %v764_v34  ;;  %v778_v50 = vmul.f32 %v771_v26, %v247_v10 }
  0x99   : > { %v780_v58 = vpack.c.bf16 %v779_v47, %v778_v50 }
  0x9a   : > { %v428_v43 = vpop.permute.xlu1 %427  ;;  %v423_v44 = vpop.permute.xlu0 %422 }
  0x9b   : > { %1206 = vmatmul.mubr.msk.bf16.vlgmr.msra.gmra.mrb[0].mxu1 %vm308_vm1, %v262_v30  ;;  %1238 = vmatmul.mubr.msk.bf16.vlgmr.msra.gmra.mrb[0].mxu0 %vm308_vm1, %v693_v29  ;;  %v431_v51 = vmul.f32 %v428_v43, %v416_v39  ;;  %v430_v52 = vmul.f32 %v423_v44, %v415_v40 }
  0x9c   : > { %1242 = vmatpush3.bf16.msra.mxu0 %v1316_v27  ;;  %1210 = vmatpush3.bf16.msra.mxu1 %v1317_v28 }
  0x9d   : > { %1243 = vmatprep.subr.bf16.mxu0 %v1335_v5  ;;  %1211 = vmatprep.subr.bf16.mxu1 %v1335_v5  ;;  %v432_v59 = vpack.c.bf16 %v431_v51, %v430_v52 }
  0x9e   : > { %1213 = vmatprep.mubr.msk.bf16.mxu1 %vm1336_vm0, %v1335_v5  ;;  %1245 = vmatprep.mubr.msk.bf16.mxu0 %vm1336_vm0, %v1335_v5  ;;  %v863_v53 = vpop.permute.xlu1 %862  ;;  %v858_v55 = vpop.permute.xlu0 %857 }
  0x9f   : > { %v866_v8 = vmul.f32 %v863_v53, %v851_v0  ;;  %v865_v9 = vmul.f32 %v858_v55, %v274_v46 }
  0xa0   : > { %1244 = vmatpush3.bf16.msra.mxu0 %v1318_v37  ;;  %1212 = vmatpush3.bf16.msra.mxu1 %v1319_v38 }
  0xa1   : > { %1249 = vmatprep.subr.bf16.mxu0 %v1335_v5  ;;  %1217 = vmatprep.subr.bf16.mxu1 %v1335_v5  ;;  %v867_v13 = vpack.c.bf16 %v866_v8, %v865_v9 }
  0xa2   : > { %v515_v4 = vpop.permute.xlu1 %514  ;;  %v510_v6 = vpop.permute.xlu0 %509 }
  0xa3   : > { %v518_v10 = vmul.f32 %v515_v4, %v503_v1  ;;  %v517_v11 = vmul.f32 %v510_v6, %v502_v2 }
  0xa5   : > { %v519_v14 = vpack.c.bf16 %v518_v10, %v517_v11 }
  0xa6   : > { %v950_v46 = vpop.permute.xlu1 %949  ;;  %v945_v16 = vpop.permute.xlu0 %944 }
  0xa7   : > { %1214 = vmatmul.mubr.msk.bf16.vlgmr.msra.gmra.mrb[0].mxu1 %vm308_vm1, %v432_v59  ;;  %1246 = vmatmul.mubr.msk.bf16.vlgmr.msra.gmra.mrb[0].mxu0 %vm308_vm1, %v780_v58  ;;  %v953_v33 = vmul.f32 %v950_v46, %v938_v36  ;;  %v952_v17 = vmul.f32 %v945_v16, %v416_v39 }
  0xa8   : > { %1250 = vmatpush3.bf16.msra.mxu0 %v1320_v56  ;;  %1218 = vmatpush3.bf16.msra.mxu1 %v1321_v57 }
  0xa9   : > { %1251 = vmatprep.subr.bf16.mxu0 %v1335_v5  ;;  %1219 = vmatprep.subr.bf16.mxu1 %v1335_v5  ;;  %v954_v18 = vpack.c.bf16 %v953_v33, %v952_v17 }
  0xaa   : > { %1221 = vmatprep.mubr.msk.bf16.mxu1 %vm1336_vm0, %v1335_v5  ;;  %1253 = vmatprep.mubr.msk.bf16.mxu0 %vm1336_vm0, %v1335_v5 }
  0xac   : > { %1252 = vmatpush3.bf16.msra.mxu0 %v1322_v62  ;;  %1220 = vmatpush3.bf16.msra.mxu1 %v1323_v63 }
  0xad   : > { %1257 = vmatprep.subr.bf16.mxu0 %v1335_v5 }
  0xb3   : > { %1222 = vmatmul.mubr.msk.bf16.vlgmr.msra.gmra.mrb[0].mxu1 %vm308_vm1, %v519_v14  ;;  %1254 = vmatmul.mubr.msk.bf16.vlgmr.msra.gmra.mrb[0].mxu0 %vm308_vm1, %v867_v13 }
  0xb4   : > { %1258 = vmatpush3.bf16.msra.mxu0 %v1324_v12  ;;  %1261 = vmatprep.mubr.msk.bf16.mxu0 %vm1336_vm0, %v1335_v5 }
  0xb5   : > { %1259 = vmatprep.subr.bf16.mxu0 %v1335_v5 }
  0xb8   : > { %1260 = vmatpush3.bf16.msra.mxu0 %v1325_v25 }
  0xbf   : > { %1262 = vmatmul.mubr.msk.bf16.vlgmr.msra.gmra.mrb[0].mxu0 %vm308_vm1, %v954_v18 }
 0x186   : > { %v574_v19 = vpop.f32.mrb[0].mxu1 }
 0x187   : > { %v1223_v20 = vpop.f32.mrb[1].mxu1 }
 0x188   : > { %v577_v21 = vpop.f32.mrb[2].mxu1 }
 0x189   : > { %v1224_v22 = vpop.f32.mrb[3].mxu1 }
 0x192   : > { %v1009_v5 = vpop.f32.mrb[0].mxu0 }
 0x193   : > { %v1265_v23 = vadd.f32 %v1009_v5, %v574_v19  ;;  %v1263_v24 = vpop.f32.mrb[1].mxu0 }
 0x194   : > { %v1012_v26 = vpop.f32.mrb[2].mxu0 }
 0x195   : > { %1019 = vst.msk [vmem:[%s224_s9] sm:$0xff] %vm1018_vm2, %v1265_v23  ;;  %v1266_v27 = vadd.f32 %v1012_v26, %v577_v21  ;;  %v1264_v28 = vpop.f32.mrb[3].mxu0 }
 0x197   : > { %1020 = vst.msk [vmem:[%s224_s9 + $0x8] sm:$0xff] %vm1018_vm2, %v1266_v27 }
 0x198 PF: > { %s15_s18 = sadd.s32 1, %s1332_s18  }
 0x199   : > { %p12_p4 = scmp.ge.s32.totalorder %s15_s18, 4  }
 0x19b   :  { %14 = sbr.rel (!%p12_p4) target bundleno = 1 (0x1), region = 86 }

// kernel: densenet_forward.38
= control target key start
LH: loop header
LB: loop body
LE: loop exit
PB: predicated region body
PF: predicated region fallthrough
CT: control target
= control target key end

     0   :  { %s52_s0 = inlined_call_operand.vmem [shape: f32[4,1,128], index: 0, kind: input, shape index: {}]   ;;  %s53_s1 = inlined_call_operand.vmem [shape: f32[1,128], index: 1, kind: output, shape index: {}]  }
   0x1   :  { %v8_v0 = vld [vmem:[%s52_s0] sm:$0x1]  ;;  %v24_v1 = vld [vmem:[%s52_s0 + $0x1] sm:$0x1]  ;;  %v25_v2 = vld [vmem:[%s52_s0 + $0x2] sm:$0x1] }
   0x2   :  { %v11_v3 = vadd.f32 %v24_v1, %v8_v0  ;;  %v26_v4 = vld [vmem:[%s52_s0 + $0x3] sm:$0x1] }
   0x4   :  { %v14_v5 = vadd.f32 %v25_v2, %v11_v3 }
   0x6   :  { %v17_v6 = vadd.f32 %v26_v4, %v14_v5 }
   0x8   :  { %v18_v7 = vmul.f32 0.25, %v17_v6 }
   0xa   :  { %19 = vst [vmem:[%s53_s1] sm:$0x1] %v18_v7 }

// kernel: densenet_forward.39
= control target key start
LH: loop header
LB: loop body
LE: loop exit
PB: predicated region body
PF: predicated region fallthrough
CT: control target
= control target key end

     0   :  { %9 = vsyncpa [#allocation3], 0  ;;  %s248_s0 = inlined_call_operand.vmem [shape: f32[8,16], index: 0, kind: input, shape index: {}]   ;;  %s249_s1 = inlined_call_operand.hbm [shape: f32[1,16], index: 1, kind: input, shape index: {}]   ;;  %s250_s2 = inlined_call_operand.hbm [shape: f32[1,16], index: 2, kind: input, shape index: {}]   ;;  %s251_s3 = inlined_call_operand.vmem [shape: bf16[16,32], index: 3, kind: input, shape index: {}]   ;;  %s252_s4 = inlined_call_operand.vmem [shape: f32[8,32], index: 4, kind: output, shape index: {}]  }
   0x1   :  { %10 = vsyncpa [#allocation5], 0  ;;  %s186_s15 = smov [#allocation2]   ;;  %s187_s17 = smov [#allocation4]  }
   0x2   :  { %s19_s16 = sshll.u32 %s186_s15, 4  ;;  %s29_s18 = sshll.u32 %s187_s17, 4  ;;  %s20_s16 = int_to_ptr.vmem [resolvable:$true] %s19_s16  ;;  %s30_s18 = int_to_ptr.vmem [resolvable:$true] %s29_s18 }
   0x3   :  { %s138_s21 = scalar_lea.hbm %s249_s1, 16 }
   0x4   :  { %p139_p0 = scmp.ne.s32.totalorder %s249_s1, %s138_s21  ;;  %p142_p1 = scmp.lt.u32.totalorder %s138_s21, %s249_s1 }
   0x6   :  { %p144_p2 = pnand %p142_p1, %p139_p0 }
   0x8   :  { %147 = shalt.err (!%p144_p2)
}
   0x9   :  { %s148_s26 = scalar_lea.vmem %s20_s16, 16  ;;  %s152_s27 = scalar_lea.vmem %s20_s16, 32 }
   0xa   :  { %p149_p3 = scmp.ne.s32.totalorder %s20_s16, %s148_s26  ;;  %p153_p4 = scmp.lt.s32.totalorder %s20_s16, %s20_s16 }
   0xb   :  { %p154_p5 = scmp.lt.s32.totalorder %s152_s27, %s148_s26 }
   0xd   :  { %p155_p6 = por %p154_p5, %p153_p4 }
   0xf   :  { %p156_p7 = pnand %p155_p6, %p149_p3 }
  0x11   :  { %159 = shalt.err (!%p156_p7)
}
  0x12   :  { %22 = dma.hbm_to_vmem [thread:$0]  %s249_s1, 16, %s20_s16, [#allocation3]  }
  0x13   :  { %s160_s6 = scalar_lea.hbm %s250_s2, 16 }
  0x14   :  { %p161_p8 = scmp.ne.s32.totalorder %s250_s2, %s160_s6  ;;  %p164_p9 = scmp.lt.u32.totalorder %s160_s6, %s250_s2 }
  0x16   :  { %p166_p10 = pnand %p164_p9, %p161_p8 }
  0x18   :  { %169 = shalt.err (!%p166_p10)
}
  0x19   :  { %s170_s11 = scalar_lea.vmem %s30_s18, 16  ;;  %s174_s12 = scalar_lea.vmem %s30_s18, 32 }
  0x1a   :  { %p171_p11 = scmp.ne.s32.totalorder %s30_s18, %s170_s11  ;;  %p175_p12 = scmp.lt.s32.totalorder %s30_s18, %s30_s18 }
  0x1b   :  { %p176_p13 = scmp.lt.s32.totalorder %s174_s12, %s170_s11 }
  0x1d   :  { %p177_p0 = por %p176_p13, %p175_p12 }
  0x1f   :  { %p178_p1 = pnand %p177_p0, %p171_p11 }
  0x21   :  { %181 = shalt.err (!%p178_p1)
}
  0x22   :  { %32 = dma.hbm_to_vmem [thread:$0]  %s250_s2, 16, %s30_s18, [#allocation5]  }
  0x23   :  { %182 = dma.done.wait [#allocation3], 16  }
  0x24   :  { %183 = vsyncadd [#allocation3], 4294967280 }
  0x25   :  { %184 = dma.done.wait [#allocation5], 16  }
  0x26   :  { %185 = vsyncadd [#allocation5], 4294967280  ;;  %v188_v0 = vmov 0.0   ;;  %vm189_vm0 = vmmov 0   ;;  %v137_v1 = vld [vmem:[%s251_s3] sm:$0xff]   ;;  %vm69_vm1 = vcmask 130048  }
  0x27   :  { %127 = vmatprep.subr.bf16.mxu0 %v188_v0  ;;  %129 = vmatprep.mubr.msk.bf16.mxu0 %vm189_vm0, %v188_v0  ;;  %v42_v2 = vld [vmem:[%s248_s0] sm:$0xff]  ;;  %vm113_vm2 = vcmask 261120  }
  0x28   :  { %v121_v3 = vld [vmem:[#allocation2] ss:$0 sm:$0xff]  ;;  %v122_v4 = vld [vmem:[#allocation4] ss:$0 sm:$0xff]  ;;  %128 = vmatpush3.bf16.msra.mxu0 %v137_v1 }
  0x29   :  { %v50_v5 = vmul.f32 %v121_v3, %v42_v2 }
  0x2b   :  { %v58_v6 = vadd.f32 %v122_v4, %v50_v5 }
  0x2d   :  { %v59_v7 = vmax.f32 %v58_v6, 0.0 }
  0x2f   :  { %v60_v8 = vpack.c.bf16 %v59_v7, %v59_v7 }
  0x31   :  { %130 = vmatmul.mubr.msk.bf16.vlgmr.msra.gmra.mrb[0].mxu0 %vm69_vm1, %v60_v8 }
 0x104   :  { %v107_v9 = vpop.f32.mrb[0].mxu0 }
 0x105   :  { %114 = vst.msk [vmem:[%s252_s4] sm:$0xff] %vm113_vm2, %v107_v9  ;;  %v131_v10 = vpop.f32.mrb[1].mxu0 }
 0x106   :  { %v110_v11 = vpop.f32.mrb[2].mxu0 }
 0x107   :  { %v132_v12 = vpop.f32.mrb[3].mxu0 }
 0x108   :  { %119 = vsyncpa [#allocation3], 1 }
 0x109   :  { %120 = vsyncpa [#allocation5], 1 }

// kernel: densenet_forward.41
= control target key start
LH: loop header
LB: loop body
LE: loop exit
PB: predicated region body
PF: predicated region fallthrough
CT: control target
= control target key end

     0   :  { %v123_v0 = vmov 0.0   ;;  %vm53_vm0 = vcmask 1043456   ;;  %vm124_vm1 = vmmov 0   ;;  %vm49_vm2 = vcmask 195584   ;;  %s168_s3 = inlined_call_operand.vmem [shape: bf16[24,32], index: 3, kind: input, shape index: {}]   ;;  %s169_s0 = inlined_call_operand.vmem [shape: f32[8,24], index: 0, kind: input, shape index: {}]   ;;  %s170_s1 = inlined_call_operand.vmem [shape: f32[1,24], index: 1, kind: input, shape index: {}]   ;;  %s171_s2 = inlined_call_operand.vmem [shape: f32[1,24], index: 2, kind: input, shape index: {}]   ;;  %s172_s4 = inlined_call_operand.vmem [shape: f32[8,32], index: 4, kind: output, shape index: {}]  }
   0x1   :  { %111 = vmatprep.subr.bf16.mxu0 %v123_v0  ;;  %v121_v1 = vld [vmem:[%s168_s3] sm:$0xff]   ;;  %115 = vmatprep.mubr.msk.bf16.mxu0 %vm124_vm1, %v123_v0  ;;  %v122_v2 = vld [vmem:[%s168_s3 + $0x8] ss:$0 sps:$4 sm:$0xff]   ;;  %vm97_vm3 = vcmask 261120  }
   0x2   :  { %v18_v3 = vld [vmem:[%s169_s0] sm:$0xff]  ;;  %112 = vmatpush3.bf16.msra.mxu0 %v121_v1  ;;  %v55_v6 = vsel %vm53_vm0, %v122_v2, 0 }
   0x3   :  { %v103_v4 = vld [vmem:[%s170_s1] ss:$0 sm:$0xff]  ;;  %113 = vmatprep.subr.bf16.mxu0 %v123_v0 }
   0x4   :  { %v104_v5 = vld [vmem:[%s171_s2] ss:$0 sm:$0xff]  ;;  %v26_v7 = vmul.f32 %v103_v4, %v18_v3 }
   0x6   :  { %v34_v8 = vadd.f32 %v104_v5, %v26_v7  ;;  %114 = vmatpush3.bf16.msra.mxu0 %v55_v6 }
   0x8   :  { %v35_v9 = vmax.f32 %v34_v8, 0.0 }
   0xa   :  { %v36_v10 = vpack.c.bf16 %v35_v9, %v35_v9 }
   0xc   :  { %116 = vmatmul.mubr.msk.bf16.vlgmr.msra.gmra.mrb[0].mxu0 %vm49_vm2, %v36_v10 }
  0xdf   :  { %v91_v11 = vpop.f32.mrb[0].mxu0 }
  0xe0   :  { %98 = vst.msk [vmem:[%s172_s4] sm:$0xff] %vm97_vm3, %v91_v11  ;;  %v117_v12 = vpop.f32.mrb[1].mxu0 }
  0xe1   :  { %v94_v13 = vpop.f32.mrb[2].mxu0 }
  0xe2   :  { %v118_v14 = vpop.f32.mrb[3].mxu0 }

// kernel: densenet_forward.40
= control target key start
LH: loop header
LB: loop body
LE: loop exit
PB: predicated region body
PF: predicated region fallthrough
CT: control target
= control target key end

     0   :  { %s1228_s18 = smov 0   ;;  %s1412_s0 = inlined_call_operand.vmem [shape: f32[2,10,32], index: 0, kind: input, shape index: {}]   ;;  %s1413_s1 = inlined_call_operand.vmem [shape: f32[1,32], index: 1, kind: input, shape index: {}]   ;;  %s1414_s2 = inlined_call_operand.vmem [shape: f32[1,32], index: 2, kind: input, shape index: {}]   ;;  %s1415_s3 = inlined_call_operand.vmem [shape: f32[9,4,1], index: 3, kind: input, shape index: {}]   ;;  %s1416_s4 = inlined_call_operand.vmem [shape: bf16[9,32,8], index: 4, kind: input, shape index: {}]   ;;  %s1417_s5 = inlined_call_operand.vmem [shape: f32[2,4,8], index: 5, kind: output, shape index: {}]  }
   0x1 LB: > { %s948_s19 = sadd.s32 4294967295, %s1193_s18   ;;  %p952_p0 = scmp.ge.s32.totalorder %s1193_s18, 1  ;;  %s1193_s18 = sphi %s1228_s18, %s15_s18  }
   0x2   : > { %p187_p1 = scmp.lt.s32.totalorder %s1193_s18, 3 }
   0x4   : > { %p188_p2 = pnand %p952_p0, %p187_p1 }
   0x5   : > { %v993_v0 = vld [vmem:[%s1415_s3 + $0x14] sm:$0xf] (!%p188_p2)  ;;  %v985_v1 = vld [vmem:[%s1415_s3 + $0x10] sm:$0xf] (!%p188_p2)  ;;  %v1195_v2 = vmov (!%p188_p2), 0   ;;  %v1196_v5 = vmov (!%p188_p2), 0.0  }
   0x6   : > { %191 = sbr.rel (%p188_p2) target bundleno = 402 (0x192), region = 40  ;;  %1168 = vset.pattern.permute.xlu1 (!%p188_p2), %v1195_v2  ;;  %1167 = vset.pattern.permute.xlu0 (!%p188_p2), %v1195_v2  ;;  %v958_v3 = vld [vmem:[%s1415_s3 + $0x4] sm:$0xf] (!%p188_p2)  ;;  %v242_v4 = vld [vmem:[%s1415_s3] sm:$0xf] (!%p188_p2)  ;;  %v1171_v9 = vld [vmem:[%s1416_s4 + $0x10] sm:$0xff] (!%p188_p2)  }
   0x7   : > { %609 = vperm.xlu1 (!%p188_p2), %1168, %v993_v0   ;;  %535 = vperm.xlu0 (!%p188_p2), %1167, %v985_v1   ;;  %v1169_v6 = vld [vmem:[%s1416_s4 + $0x40] sm:$0xff] (!%p188_p2)   ;;  %v1001_v7 = vld [vmem:[%s1415_s3 + $0x18] sm:$0xf] (!%p188_p2)  ;;  %v969_v8 = vld [vmem:[%s1415_s3 + $0x8] sm:$0xf] (!%p188_p2)  ;;  %vm1197_vm0 = vmmov (!%p188_p2), 0  }
   0x8   : > { %1087 = vmatprep.subr.bf16.mxu0 (!%p188_p2), %v1196_v5  ;;  %1055 = vmatprep.subr.bf16.mxu1 (!%p188_p2), %v1196_v5  ;;  %v1170_v10 = vld [vmem:[%s1416_s4 + $0x48] sm:$0xff] (!%p188_p2)   ;;  %v1173_v11 = vld [vmem:[%s1416_s4 + $0x18] sm:$0xff] (!%p188_p2)   ;;  %v1017_v14 = vld [vmem:[%s1415_s3 + $0x20] sm:$0xf] (!%p188_p2)  ;;  %p214_p3 = scmp.lt.s32.totalorder (!%p188_p2), %s948_s19, 1  ;;  %vm284_vm1 = vcmask (!%p188_p2), 261120  }
   0x9   : > { %1088 = vmatpush3.bf16.msra.mxu0 (!%p188_p2), %v1169_v6  ;;  %1091 = vmatprep.mubr.msk.bf16.mxu0 (!%p188_p2), %vm1197_vm0, %v1196_v5  ;;  %v1009_v12 = vld [vmem:[%s1415_s3 + $0x1c] sm:$0xf] (!%p188_p2)  ;;  %v977_v13 = vld [vmem:[%s1415_s3 + $0xc] sm:$0xf] (!%p188_p2)  ;;  %v1300_v15 = vld [vmem:[%s1413_s1] ss:$0 sm:$0xff] (!%p188_p2) }
   0xa   : > { %1089 = vmatprep.subr.bf16.mxu0 (!%p188_p2), %v1196_v5  ;;  %1056 = vmatpush3.bf16.msra.mxu1 (!%p188_p2), %v1171_v9  ;;  %v1307_v18 = vld [vmem:[%s1414_s2] ss:$0 sm:$0xff] (!%p188_p2)  ;;  %v1172_v30 = vld [vmem:[%s1416_s4 + $0x50] sm:$0xff] (!%p188_p2)   ;;  %v1174_v36 = vld [vmem:[%s1416_s4 + $0x58] sm:$0xff] (!%p188_p2)   ;;  %vm893_vm2 = vcmask (!%p188_p2), 60416  }
   0xb   : > { %262 = vperm.xlu0 (!%p188_p2), %1167, %v958_v3   ;;  %245 = vperm.xlu1 (!%p188_p2), %1168, %v242_v4   ;;  %v1175_v37 = vld [vmem:[%s1416_s4] sm:$0xff] (!%p188_p2)   ;;  %v1177_v43 = vld [vmem:[%s1416_s4 + $0x8] sm:$0xff] (!%p188_p2)   ;;  %v1180_v62 = vld [vmem:[%s1416_s4 + $0x70] sm:$0xff] (!%p188_p2)  }
   0xc   : > { %1057 = vmatprep.subr.bf16.mxu1 (!%p188_p2), %v1196_v5  ;;  %1059 = vmatprep.mubr.msk.bf16.mxu1 (!%p188_p2), %vm1197_vm0, %v1196_v5  ;;  %v1176_v48 = vld [vmem:[%s1416_s4 + $0x60] sm:$0xff] (!%p188_p2)   ;;  %v1178_v51 = vld [vmem:[%s1416_s4 + $0x68] sm:$0xff] (!%p188_p2)   ;;  %v1182_v2 = vld [vmem:[%s1416_s4 + $0x78] sm:$0xff] (!%p188_p2)  }
   0xd   : > { %1090 = vmatpush3.bf16.msra.mxu0 %v1170_v10  ;;  %s1419_s19 = smov (!%p214_p3, %s948_s19), 1  ;;  %v1179_v52 = vld [vmem:[%s1416_s4 + $0x20] sm:$0xff]   ;;  %v1181_v57 = vld [vmem:[%s1416_s4 + $0x28] sm:$0xff]   ;;  %v1183_v3 = vld [vmem:[%s1416_s4 + $0x30] sm:$0xff]  }
   0xe   : > { %1095 = vmatprep.subr.bf16.mxu0 %v1196_v5  ;;  %1058 = vmatpush3.bf16.msra.mxu1 %v1173_v11  ;;  %s1027_s23 = sshll.u32 %s1419_s19, 4  ;;  %v1185_v9 = vld [vmem:[%s1416_s4 + $0x38] sm:$0xff]   ;;  %s955_s11 = sshll.u32 %s1419_s19, 2 }
   0xf   : > { %679 = vperm.xlu0 %1167, %v1001_v7   ;;  %391 = vperm.xlu1 %1168, %v969_v8   ;;  %s1295_s26 = scalar_lea.vmem %s1412_s0, %s1027_s23  ;;  %s222_s14 = scalar_lea.vmem %s1417_s5, %s955_s11 }
  0x10   : > { %1063 = vmatprep.subr.bf16.mxu1 %v1196_v5  ;;  %v527_v16 = vld [vmem:[%s1295_s26 + $0x3] sm:$0xf] }
  0x11   : > { %v528_v17 = vmul.f32 %v1300_v15, %v527_v16  ;;  %v254_v19 = vld [vmem:[%s1295_s26 + $0x1] sm:$0xf]  ;;  %v745_v56 = vld [vmem:[%s1295_s26 + $0x5] sm:$0xf] }
  0x12   : > { %v255_v21 = vmul.f32 %v1300_v15, %v254_v19  ;;  %v601_v22 = vld [vmem:[%s1295_s26 + $0x4] sm:$0xf]  ;;  %v226_v27 = vld [vmem:[%s1295_s26] sm:$0xf]  ;;  %v746_v60 = vmul.f32 %v1300_v15, %v745_v56 }
  0x13   : > { %753 = vperm.xlu0 %1167, %v1009_v12   ;;  %461 = vperm.xlu1 %1168, %v977_v13   ;;  %v529_v20 = vadd.f32 %v1307_v18, %v528_v17  ;;  %v602_v25 = vmul.f32 %v1300_v15, %v601_v22  ;;  %v233_v33 = vmul.f32 %v1300_v15, %v226_v27  ;;  %v383_v45 = vld [vmem:[%s1295_s26 + $0x2] sm:$0xf]  ;;  %v819_v8 = vld [vmem:[%s1295_s26 + $0x6] sm:$0xf] }
  0x14   : > { %v256_v24 = vadd.f32 %v1307_v18, %v255_v21  ;;  %v384_v50 = vmul.f32 %v1300_v15, %v383_v45  ;;  %v747_v1 = vadd.f32 %v1307_v18, %v746_v60  ;;  %v820_v11 = vmul.f32 %v1300_v15, %v819_v8  ;;  %v1184_v13 = vld [vmem:[%s1416_s4 + $0x80] sm:$0xff]   ;;  %v1186_v15 = vld [vmem:[%s1416_s4 + $0x88] sm:$0xff]  }
  0x15   : > { %v530_v23 = vmax.f32 %v529_v20, 0.0  ;;  %v603_v31 = vadd.f32 %v1307_v18, %v602_v25  ;;  %v240_v40 = vadd.f32 %v1307_v18, %v233_v33 }
  0x16   : > { %v257_v29 = vmax.f32 %v256_v24, 0.0  ;;  %v385_v54 = vadd.f32 %v1307_v18, %v384_v50  ;;  %v748_v6 = vmax.f32 %v747_v1, 0.0  ;;  %v821_v17 = vadd.f32 %v1307_v18, %v820_v11 }
  0x17   : > { %827 = vperm.xlu0 %1167, %v1017_v14   ;;  %v604_v38 = vmax.f32 %v603_v31, 0.0  ;;  %v241_v44 = vmax.f32 %v240_v40, 0.0 }
  0x18   : > { %v386_v59 = vmax.f32 %v385_v54, 0.0  ;;  %v822_v20 = vmax.f32 %v821_v17, 0.0 }
  0x86   : > { %v536_v26 = vpop.permute.xlu0 %535  ;;  %v610_v41 = vpop.permute.xlu1 %609 }
  0x87   : > { %v538_v28 = vmul.f32 %v536_v26, %v530_v23  ;;  %v612_v42 = vmul.f32 %v610_v41, %v604_v38 }
  0x89   : > { %v539_v32 = vpack.c.bf16 %v538_v28, %v538_v28  ;;  %v613_v46 = vpack.c.bf16 %v612_v42, %v612_v42 }
  0x8a   : > { %v263_v34 = vpop.permute.xlu0 %262  ;;  %v246_v47 = vpop.permute.xlu1 %245 }
  0x8b   : > { %v265_v35 = vmul.f32 %v263_v34, %v257_v29  ;;  %1092 = vmatmul.mubr.msk.bf16.vlgmr.msra.gmra.mrb[0].mxu0 %vm284_vm1, %v539_v32  ;;  %v248_v49 = vmul.f32 %v246_v47, %v241_v44 }
  0x8c   : > { %1096 = vmatpush3.bf16.msra.mxu0 %v1172_v30  ;;  %1099 = vmatprep.mubr.msk.bf16.mxu0 %vm1197_vm0, %v1196_v5 }
  0x8d   : > { %v266_v39 = vpack.c.bf16 %v265_v35, %v265_v35  ;;  %1097 = vmatprep.subr.bf16.mxu0 %v1196_v5  ;;  %v249_v53 = vpack.c.bf16 %v248_v49, %v248_v49 }
  0x8e   : > { %v680_v55 = vpop.permute.xlu0 %679  ;;  %v392_v61 = vpop.permute.xlu1 %391 }
  0x8f   : > { %1060 = vmatmul.mubr.msk.bf16.vlgmr.msra.gmra.mrb[0].mxu1 %vm284_vm1, %v266_v39  ;;  %v682_v58 = vmul.f32 %v680_v55, %v604_v38  ;;  %v394_v0 = vmul.f32 %v392_v61, %v386_v59 }
  0x90   : > { %1098 = vmatpush3.bf16.msra.mxu0 %v1174_v36  ;;  %1064 = vmatpush3.bf16.msra.mxu1 %v1175_v37 }
  0x91   : > { %1103 = vmatprep.subr.bf16.mxu0 %v1196_v5  ;;  %1065 = vmatprep.subr.bf16.mxu1 %v1196_v5  ;;  %v683_v63 = vpack.c.bf16 %v682_v58, %v682_v58  ;;  %v395_v4 = vpack.c.bf16 %v394_v0, %v394_v0 }
  0x92   : > { %1067 = vmatprep.mubr.msk.bf16.mxu1 %vm1197_vm0, %v1196_v5  ;;  %v754_v7 = vpop.permute.xlu0 %753  ;;  %v462_v12 = vpop.permute.xlu1 %461 }
  0x93   : > { %v756_v10 = vmul.f32 %v754_v7, %v748_v6  ;;  %v464_v16 = vmul.f32 %v462_v12, %v386_v59 }
  0x94   : > { %1066 = vmatpush3.bf16.msra.mxu1 %v1177_v43 }
  0x95   : > { %1071 = vmatprep.subr.bf16.mxu1 %v1196_v5  ;;  %v757_v14 = vpack.c.bf16 %v756_v10, %v756_v10  ;;  %v465_v19 = vpack.c.bf16 %v464_v16, %v464_v16 }
  0x96   : > { %v828_v21 = vpop.permute.xlu0 %827 }
  0x97   : > { %1100 = vmatmul.mubr.msk.bf16.vlgmr.msra.gmra.mrb[0].mxu0 %vm284_vm1, %v613_v46  ;;  %v830_v18 = vmul.f32 %v828_v21, %v822_v20 }
  0x98   : > { %1104 = vmatpush3.bf16.msra.mxu0 %v1176_v48  ;;  %1107 = vmatprep.mubr.msk.bf16.mxu0 %vm1197_vm0, %v1196_v5 }
  0x99   : > { %1105 = vmatprep.subr.bf16.mxu0 %v1196_v5  ;;  %v831_v22 = vpack.c.bf16 %v830_v18, %v830_v18 }
  0x9b   : > { %1068 = vmatmul.mubr.msk.bf16.vlgmr.msra.gmra.mrb[0].mxu1 %vm284_vm1, %v249_v53 }
  0x9c   : > { %1106 = vmatpush3.bf16.msra.mxu0 %v1178_v51  ;;  %1072 = vmatpush3.bf16.msra.mxu1 %v1179_v52 }
  0x9d   : > { %1111 = vmatprep.subr.bf16.mxu0 %v1196_v5  ;;  %1073 = vmatprep.subr.bf16.mxu1 %v1196_v5 }
  0x9e   : > { %1075 = vmatprep.mubr.msk.bf16.mxu1 %vm1197_vm0, %v1196_v5 }
  0xa0   : > { %1074 = vmatpush3.bf16.msra.mxu1 %v1181_v57 }
  0xa1   : > { %1079 = vmatprep.subr.bf16.mxu1 %v1196_v5 }
  0xa3   : > { %1108 = vmatmul.mubr.msk.bf16.vlgmr.msra.gmra.mrb[0].mxu0 %vm284_vm1, %v683_v63 }
  0xa4   : > { %1112 = vmatpush3.bf16.msra.mxu0 %v1180_v62  ;;  %1115 = vmatprep.mubr.msk.bf16.mxu0 %vm1197_vm0, %v1196_v5 }
  0xa5   : > { %1113 = vmatprep.subr.bf16.mxu0 %v1196_v5 }
  0xa7   : > { %1076 = vmatmul.mubr.msk.bf16.vlgmr.msra.gmra.mrb[0].mxu1 %vm284_vm1, %v395_v4 }
  0xa8   : > { %1114 = vmatpush3.bf16.msra.mxu0 %v1182_v2  ;;  %1080 = vmatpush3.bf16.msra.mxu1 %v1183_v3 }
  0xa9   : > { %1119 = vmatprep.subr.bf16.mxu0 %v1196_v5  ;;  %1081 = vmatprep.subr.bf16.mxu1 %v1196_v5 }
  0xaa   : > { %1083 = vmatprep.mubr.msk.bf16.mxu1 %vm1197_vm0, %v1196_v5 }
  0xac   : > { %1082 = vmatpush3.bf16.msra.mxu1 %v1185_v9 }
  0xaf   : > { %1116 = vmatmul.mubr.msk.bf16.vlgmr.msra.gmra.mrb[0].mxu0 %vm284_vm1, %v757_v14 }
  0xb0   : > { %1120 = vmatpush3.bf16.msra.mxu0 %v1184_v13  ;;  %1123 = vmatprep.mubr.msk.bf16.mxu0 %vm1197_vm0, %v1196_v5 }
  0xb1   : > { %1121 = vmatprep.subr.bf16.mxu0 %v1196_v5 }
  0xb3   : > { %1084 = vmatmul.mubr.msk.bf16.vlgmr.msra.gmra.mrb[0].mxu1 %vm284_vm1, %v465_v19 }
  0xb4   : > { %1122 = vmatpush3.bf16.msra.mxu0 %v1186_v15 }
  0xbb   : > { %1124 = vmatmul.mubr.msk.bf16.vlgmr.msra.gmra.mrb[0].mxu0 %vm284_vm1, %v831_v22 }
 0x186   : > { %v520_v23 = vpop.f32.mrb[0].mxu1 }
 0x187   : > { %v1085_v24 = vpop.f32.mrb[1].mxu1 }
 0x188   : > { %v523_v25 = vpop.f32.mrb[2].mxu1 }
 0x189   : > { %v1086_v26 = vpop.f32.mrb[3].mxu1 }
 0x18e   : > { %v886_v27 = vpop.f32.mrb[0].mxu0 }
 0x18f   : > { %v1127_v5 = vadd.f32 %v886_v27, %v520_v23  ;;  %v1125_v28 = vpop.f32.mrb[1].mxu0 }
 0x190   : > { %v889_v29 = vpop.f32.mrb[2].mxu0 }
 0x191   : > { %894 = vst.msk [vmem:[%s222_s14] sm:$0xf] %vm893_vm2, %v1127_v5  ;;  %v1126_v30 = vpop.f32.mrb[3].mxu0 }
 0x192 PF: > { %s15_s18 = sadd.s32 1, %s1193_s18  }
 0x193   : > { %p12_p4 = scmp.ge.s32.totalorder %s15_s18, 4  }
 0x195   :  { %14 = sbr.rel (!%p12_p4) target bundleno = 1 (0x1), region = 86 }

// kernel: densenet_forward.43
= control target key start
LH: loop header
LB: loop body
LE: loop exit
PB: predicated region body
PF: predicated region fallthrough
CT: control target
= control target key end

     0   :  { %v123_v0 = vmov 0.0   ;;  %vm124_vm0 = vmmov 0   ;;  %vm53_vm1 = vcmask 261120   ;;  %vm97_vm2 = vcmask 130048   ;;  %s168_s3 = inlined_call_operand.vmem [shape: bf16[32,16], index: 3, kind: input, shape index: {}]   ;;  %s169_s0 = inlined_call_operand.vmem [shape: f32[8,32], index: 0, kind: input, shape index: {}]   ;;  %s170_s1 = inlined_call_operand.vmem [shape: f32[1,32], index: 1, kind: input, shape index: {}]   ;;  %s171_s2 = inlined_call_operand.vmem [shape: f32[1,32], index: 2, kind: input, shape index: {}]   ;;  %s172_s4 = inlined_call_operand.vmem [shape: f32[8,16], index: 4, kind: output, shape index: {}]  }
   0x1   :  { %111 = vmatprep.subr.bf16.mxu0 %v123_v0  ;;  %v121_v1 = vld [vmem:[%s168_s3] sm:$0xff]   ;;  %115 = vmatprep.mubr.msk.bf16.mxu0 %vm124_vm0, %v123_v0  ;;  %v122_v2 = vld [vmem:[%s168_s3 + $0x8] sm:$0xff]  }
   0x2   :  { %112 = vmatpush3.bf16.msra.mxu0 %v121_v1  ;;  %v18_v3 = vld [vmem:[%s169_s0] sm:$0xff] }
   0x3   :  { %v103_v4 = vld [vmem:[%s170_s1] ss:$0 sm:$0xff]  ;;  %113 = vmatprep.subr.bf16.mxu0 %v123_v0 }
   0x4   :  { %v104_v5 = vld [vmem:[%s171_s2] ss:$0 sm:$0xff]  ;;  %v26_v6 = vmul.f32 %v103_v4, %v18_v3 }
   0x6   :  { %v34_v7 = vadd.f32 %v104_v5, %v26_v6  ;;  %114 = vmatpush3.bf16.msra.mxu0 %v122_v2 }
   0x8   :  { %v35_v8 = vmax.f32 %v34_v7, 0.0 }
   0xa   :  { %v36_v9 = vpack.c.bf16 %v35_v8, %v35_v8 }
   0xc   :  { %116 = vmatmul.mubr.msk.bf16.vlgmr.msra.gmra.mrb[0].mxu0 %vm53_vm1, %v36_v9 }
  0xdf   :  { %v91_v10 = vpop.f32.mrb[0].mxu0 }
  0xe0   :  { %98 = vst.msk [vmem:[%s172_s4] sm:$0xff] %vm97_vm2, %v91_v10  ;;  %v117_v11 = vpop.f32.mrb[1].mxu0 }
  0xe1   :  { %v94_v12 = vpop.f32.mrb[2].mxu0 }
  0xe2   :  { %v118_v13 = vpop.f32.mrb[3].mxu0 }

// kernel: densenet_forward.44
= control target key start
LH: loop header
LB: loop body
LE: loop exit
PB: predicated region body
PF: predicated region fallthrough
CT: control target
= control target key end

     0   :  { %vm19_vm0 = vcmask 253952   ;;  %s53_s0 = inlined_call_operand.vmem [shape: f32[4,1,32], index: 0, kind: input, shape index: {}]   ;;  %s54_s1 = inlined_call_operand.vmem [shape: f32[1,32], index: 1, kind: output, shape index: {}]  }
   0x1   :  { %v8_v0 = vld [vmem:[%s53_s0] sm:$0x1]  ;;  %v25_v1 = vld [vmem:[%s53_s0 + $0x1] sm:$0x1]  ;;  %v26_v2 = vld [vmem:[%s53_s0 + $0x2] sm:$0x1] }
   0x2   :  { %v11_v3 = vadd.f32 %v25_v1, %v8_v0  ;;  %v27_v4 = vld [vmem:[%s53_s0 + $0x3] sm:$0x1] }
   0x4   :  { %v14_v5 = vadd.f32 %v26_v2, %v11_v3 }
   0x6   :  { %v17_v6 = vadd.f32 %v27_v4, %v14_v5 }
   0x8   :  { %v18_v7 = vmul.f32 0.25, %v17_v6 }
   0xa   :  { %20 = vst.msk [vmem:[%s54_s1] sm:$0x1] %vm19_vm0, %v18_v7 }

// kernel: densenet_forward.45
= control target key start
LH: loop header
LB: loop body
LE: loop exit
PB: predicated region body
PF: predicated region fallthrough
CT: control target
= control target key end

     0   :  { %v110_v0 = vmov 0.0   ;;  %vm111_vm0 = vmmov 0   ;;  %vm45_vm1 = vcmask 130048   ;;  %vm89_vm2 = vcmask 254976   ;;  %s152_s3 = inlined_call_operand.vmem [shape: bf16[16,32], index: 3, kind: input, shape index: {}]   ;;  %s153_s0 = inlined_call_operand.vmem [shape: f32[2,16], index: 0, kind: input, shape index: {}]   ;;  %s154_s1 = inlined_call_operand.vmem [shape: f32[1,16], index: 1, kind: input, shape index: {}]   ;;  %s155_s2 = inlined_call_operand.vmem [shape: f32[1,16], index: 2, kind: input, shape index: {}]   ;;  %s156_s4 = inlined_call_operand.vmem [shape: f32[2,32], index: 4, kind: output, shape index: {}]  }
   0x1   :  { %101 = vmatprep.subr.bf16.mxu0 %v110_v0  ;;  %v109_v1 = vld [vmem:[%s152_s3] sm:$0xff]   ;;  %103 = vmatprep.mubr.msk.bf16.mxu0 %vm111_vm0, %v110_v0 }
   0x2   :  { %v18_v2 = vld [vmem:[%s153_s0] sm:$0x3]  ;;  %102 = vmatpush3.bf16.msra.mxu0 %v109_v1 }
   0x3   :  { %v95_v3 = vld [vmem:[%s154_s1] ss:$0 sm:$0xff] }
   0x4   :  { %v96_v4 = vld [vmem:[%s155_s2] ss:$0 sm:$0xff]  ;;  %v26_v5 = vmul.f32 %v95_v3, %v18_v2 }
   0x6   :  { %v34_v6 = vadd.f32 %v96_v4, %v26_v5 }
   0x8   :  { %v35_v7 = vmax.f32 %v34_v6, 0.0 }
   0xa   :  { %v36_v8 = vpack.c.bf16 %v35_v7, %v35_v7 }
   0xc   :  { %104 = vmatmul.mubr.msk.bf16.vlgmr.msra.gmra.mrb[0].mxu0 %vm45_vm1, %v36_v8 }
  0xdf   :  { %v83_v9 = vpop.f32.mrb[0].mxu0 }
  0xe0   :  { %90 = vst.msk [vmem:[%s156_s4] sm:$0x3] %vm89_vm2, %v83_v9  ;;  %v105_v10 = vpop.f32.mrb[1].mxu0 }
  0xe1   :  { %v86_v11 = vpop.f32.mrb[2].mxu0 }
  0xe2   :  { %v106_v12 = vpop.f32.mrb[3].mxu0 }

// kernel: densenet_forward.46
= control target key start
LH: loop header
LB: loop body
LE: loop exit
PB: predicated region body
PF: predicated region fallthrough
CT: control target
= control target key end

     0   :  { %s1228_s18 = smov 0   ;;  %s1436_s0 = inlined_call_operand.vmem [shape: f32[2,5,32], index: 0, kind: input, shape index: {}]   ;;  %s1437_s1 = inlined_call_operand.vmem [shape: f32[1,32], index: 1, kind: input, shape index: {}]   ;;  %s1438_s2 = inlined_call_operand.vmem [shape: f32[1,32], index: 2, kind: input, shape index: {}]   ;;  %s1439_s3 = inlined_call_operand.vmem [shape: f32[9,1,1], index: 3, kind: input, shape index: {}]   ;;  %s1440_s4 = inlined_call_operand.vmem [shape: bf16[9,32,8], index: 4, kind: input, shape index: {}]   ;;  %s1441_s5 = inlined_call_operand.vmem [shape: f32[2,1,8], index: 5, kind: output, shape index: {}]  }
   0x1 LB: > { %s953_s19 = sadd.s32 4294967295, %s1193_s18   ;;  %p957_p0 = scmp.ge.s32.totalorder %s1193_s18, 1  ;;  %s1193_s18 = sphi %s1228_s18, %s15_s18  }
   0x2   : > { %p186_p1 = scmp.lt.s32.totalorder %s1193_s18, 3 }
   0x4   : > { %p187_p2 = pnand %p957_p0, %p186_p1 }
   0x5   : > { %v994_v0 = vld [vmem:[%s1439_s3 + $0x5] sm:$0x1] (!%p187_p2)  ;;  %v986_v1 = vld [vmem:[%s1439_s3 + $0x4] sm:$0x1] (!%p187_p2)  ;;  %v1195_v2 = vmov (!%p187_p2), 0   ;;  %v1196_v5 = vmov (!%p187_p2), 0.0   ;;  %v231_v17 = vlaneseq (!%p187_p2) }
   0x6   : > { %190 = sbr.rel (%p187_p2) target bundleno = 404 (0x194), region = 40  ;;  %1168 = vset.pattern.permute.xlu1 (!%p187_p2), %v1195_v2  ;;  %1167 = vset.pattern.permute.xlu0 (!%p187_p2), %v1195_v2  ;;  %v959_v3 = vld [vmem:[%s1439_s3 + $0x1] sm:$0x1] (!%p187_p2)  ;;  %v225_v4 = vld [vmem:[%s1439_s3] sm:$0x1] (!%p187_p2)  ;;  %v1170_v9 = vld [vmem:[%s1440_s4 + $0x48] sm:$0xff] (!%p187_p2)  }
   0x7   : > { %608 = vperm.xlu1 (!%p187_p2), %1168, %v994_v0   ;;  %530 = vperm.xlu0 (!%p187_p2), %1167, %v986_v1   ;;  %v1169_v6 = vld [vmem:[%s1440_s4 + $0x40] sm:$0xff] (!%p187_p2)   ;;  %v1171_v10 = vld [vmem:[%s1440_s4 + $0x10] sm:$0xff] (!%p187_p2)   ;;  %vm1197_vm0 = vmmov (!%p187_p2), 0   ;;  %v1173_v11 = vld [vmem:[%s1440_s4 + $0x18] sm:$0xff] (!%p187_p2)   ;;  %p211_p3 = scmp.lt.s32.totalorder (!%p187_p2), %s953_s19, 1  ;;  %v232_v21 = vshrl.u32 (!%p187_p2), %v231_v17, 7 }
   0x8   : > { %1087 = vmatprep.subr.bf16.mxu0 (!%p187_p2), %v1196_v5  ;;  %1055 = vmatprep.subr.bf16.mxu1 (!%p187_p2), %v1196_v5  ;;  %v1002_v7 = vld [vmem:[%s1439_s3 + $0x6] sm:$0x1] (!%p187_p2)  ;;  %v970_v8 = vld [vmem:[%s1439_s3 + $0x2] sm:$0x1] (!%p187_p2)  ;;  %v1010_v12 = vld [vmem:[%s1439_s3 + $0x7] sm:$0x1] (!%p187_p2) }
   0x9   : > { %1088 = vmatpush3.bf16.msra.mxu0 (!%p187_p2), %v1169_v6  ;;  %1091 = vmatprep.mubr.msk.bf16.mxu0 (!%p187_p2), %vm1197_vm0, %v1196_v5  ;;  %v978_v13 = vld [vmem:[%s1439_s3 + $0x3] sm:$0x1] (!%p187_p2)  ;;  %v1018_v14 = vld [vmem:[%s1439_s3 + $0x8] sm:$0x1] (!%p187_p2)  ;;  %v1300_v15 = vld [vmem:[%s1437_s1] sm:$0x1] (!%p187_p2) }
   0xa   : > { %1089 = vmatprep.subr.bf16.mxu0 (!%p187_p2), %v1196_v5  ;;  %1056 = vmatpush3.bf16.msra.mxu1 (!%p187_p2), %v1171_v10  ;;  %v1307_v19 = vld [vmem:[%s1438_s2] sm:$0x1] (!%p187_p2)  ;;  %v1313_v25 = vsub.s32 (!%p187_p2), 0, %v232_v21  ;;  %vm275_vm1 = vcmask (!%p187_p2), 261120   ;;  %v1172_v36 = vld [vmem:[%s1440_s4 + $0x50] sm:$0xff] (!%p187_p2)   ;;  %v1174_v44 = vld [vmem:[%s1440_s4 + $0x58] sm:$0xff] (!%p187_p2)  }
   0xb   : > { %249 = vperm.xlu0 (!%p187_p2), %1167, %v959_v3   ;;  %228 = vperm.xlu1 (!%p187_p2), %1168, %v225_v4   ;;  %v1175_v45 = vld [vmem:[%s1440_s4] sm:$0xff] (!%p187_p2)   ;;  %v1177_v50 = vld [vmem:[%s1440_s4 + $0x8] sm:$0xff] (!%p187_p2)   ;;  %v1180_v1 = vld [vmem:[%s1440_s4 + $0x70] sm:$0xff] (!%p187_p2)   ;;  %vm904_vm2 = vcmask (!%p187_p2), 57344  }
   0xc   : > { %1059 = vmatprep.mubr.msk.bf16.mxu1 (!%p187_p2), %vm1197_vm0, %v1196_v5  ;;  %1057 = vmatprep.subr.bf16.mxu1 (!%p187_p2), %v1196_v5  ;;  %v1176_v54 = vld [vmem:[%s1440_s4 + $0x60] sm:$0xff] (!%p187_p2)   ;;  %v1178_v57 = vld [vmem:[%s1440_s4 + $0x68] sm:$0xff] (!%p187_p2)   ;;  %v1182_v6 = vld [vmem:[%s1440_s4 + $0x78] sm:$0xff] (!%p187_p2)  }
   0xd   : > { %1090 = vmatpush3.bf16.msra.mxu0 %v1170_v9  ;;  %s1443_s19 = smov (!%p211_p3, %s953_s19), 1  ;;  %v1179_v58 = vld [vmem:[%s1440_s4 + $0x20] sm:$0xff]   ;;  %v1181_v62 = vld [vmem:[%s1440_s4 + $0x28] sm:$0xff]  }
   0xe   : > { %1095 = vmatprep.subr.bf16.mxu0 %v1196_v5  ;;  %1058 = vmatpush3.bf16.msra.mxu1 %v1173_v11  ;;  %s958_s23 = sshll.u32 %s1443_s19, 3  ;;  %v1184_v17 = vld [vmem:[%s1440_s4 + $0x80] sm:$0xff]   ;;  %s217_s13 = scalar_lea.vmem %s1441_s5, %s1443_s19 }
   0xf   : > { %682 = vperm.xlu0 %1167, %v1002_v7   ;;  %382 = vperm.xlu1 %1168, %v970_v8   ;;  %s1295_s26 = scalar_lea.vmem %s1436_s0, %s958_s23  ;;  %v1183_v7 = vld [vmem:[%s1440_s4 + $0x30] sm:$0xff]  }
  0x10   : > { %1063 = vmatprep.subr.bf16.mxu1 %v1196_v5  ;;  %v374_v16 = vld [vmem:[%s1295_s26 + $0x2] sm:$0x1]  ;;  %v241_v20 = vld [vmem:[%s1295_s26 + $0x1] sm:$0x1]  ;;  %v600_v24 = vld [vmem:[%s1295_s26 + $0x3] sm:$0x1] }
  0x11   : > { %v375_v18 = vmul.f32 %v374_v16, %v1300_v15  ;;  %v242_v23 = vmul.f32 %v241_v20, %v1300_v15  ;;  %v601_v26 = vmul.f32 %v600_v24, %v1300_v15  ;;  %v221_v31 = vld [vmem:[%s1295_s26] sm:$0x1]  ;;  %v826_v11 = vld [vmem:[%s1295_s26 + $0x4] sm:$0x1] }
  0x12   : > { %v222_v39 = vmul.f32 %v221_v31, %v1300_v15  ;;  %v827_v16 = vmul.f32 %v826_v11, %v1300_v15  ;;  %v1186_v15 = vld [vmem:[%s1440_s4 + $0x88] sm:$0xff]  }
  0x13   : > { %756 = vperm.xlu0 %1167, %v1010_v12   ;;  %456 = vperm.xlu1 %1168, %v978_v13   ;;  %v376_v22 = vadd.f32 %v375_v18, %v1307_v19  ;;  %v1319_v28 = vadd.f32 %v242_v23, %v1307_v19  ;;  %v1324_v32 = vadd.f32 %v601_v26, %v1307_v19  ;;  %v1185_v12 = vld [vmem:[%s1440_s4 + $0x38] sm:$0xff]  }
  0x14   : > { %v223_v47 = vadd.f32 %v222_v39, %v1307_v19  ;;  %v828_v21 = vadd.f32 %v827_v16, %v1307_v19 }
  0x15   : > { %v1316_v27 = vmax.f32 %v376_v22, 0.0  ;;  %v244_v34 = vmax.f32 %v1319_v28, 0.0  ;;  %v603_v41 = vmax.f32 %v1324_v32, 0.0 }
  0x16   : > { %v224_v51 = vmax.f32 %v223_v47, 0.0  ;;  %v829_v24 = vmax.f32 %v828_v21, 0.0 }
  0x17   : > { %834 = vperm.xlu0 %1167, %v1018_v14  }
  0x86   : > { %v531_v29 = vpop.permute.xlu0 %530  ;;  %v609_v40 = vpop.permute.xlu1 %608 }
  0x87   : > { %v536_v30 = vrot.slane %v531_v29, %v1313_v25  ;;  %v614_v42 = vrot.slane %v609_v40, %v1313_v25 }
  0x89   : > { %v537_v33 = vmul.f32 %v536_v30, %v1316_v27  ;;  %v615_v48 = vmul.f32 %v614_v42, %v603_v41 }
  0x8a   : > { %v250_v35 = vpop.permute.xlu0 %249  ;;  %v229_v49 = vpop.permute.xlu1 %228 }
  0x8b   : > { %v538_v37 = vpack.c.bf16 %v537_v33, %v537_v33  ;;  %v255_v38 = vrot.slane %v250_v35, %v1313_v25  ;;  %v234_v52 = vrot.slane %v229_v49, %v1313_v25  ;;  %v616_v53 = vpack.c.bf16 %v615_v48, %v615_v48 }
  0x8d   : > { %v256_v43 = vmul.f32 %v255_v38, %v244_v34  ;;  %1092 = vmatmul.mubr.msk.bf16.vlgmr.msra.gmra.mrb[0].mxu0 %vm275_vm1, %v538_v37  ;;  %v235_v55 = vmul.f32 %v234_v52, %v224_v51 }
  0x8e   : > { %1096 = vmatpush3.bf16.msra.mxu0 %v1172_v36  ;;  %1099 = vmatprep.mubr.msk.bf16.mxu0 %vm1197_vm0, %v1196_v5  ;;  %v683_v56 = vpop.permute.xlu0 %682  ;;  %v383_v61 = vpop.permute.xlu1 %382 }
  0x8f   : > { %v257_v46 = vpack.c.bf16 %v256_v43, %v256_v43  ;;  %1097 = vmatprep.subr.bf16.mxu0 %v1196_v5  ;;  %v236_v59 = vpack.c.bf16 %v235_v55, %v235_v55  ;;  %v688_v60 = vrot.slane %v683_v56, %v1313_v25  ;;  %v388_v0 = vrot.slane %v383_v61, %v1313_v25 }
  0x91   : > { %1060 = vmatmul.mubr.msk.bf16.vlgmr.msra.gmra.mrb[0].mxu1 %vm275_vm1, %v257_v46  ;;  %v689_v63 = vmul.f32 %v688_v60, %v1316_v27  ;;  %v389_v3 = vmul.f32 %v388_v0, %v1316_v27 }
  0x92   : > { %1098 = vmatpush3.bf16.msra.mxu0 %v1174_v44  ;;  %1064 = vmatpush3.bf16.msra.mxu1 %v1175_v45  ;;  %v757_v4 = vpop.permute.xlu0 %756  ;;  %v457_v10 = vpop.permute.xlu1 %456 }
  0x93   : > { %1103 = vmatprep.subr.bf16.mxu0 %v1196_v5  ;;  %1065 = vmatprep.subr.bf16.mxu1 %v1196_v5  ;;  %v690_v2 = vpack.c.bf16 %v689_v63, %v689_v63  ;;  %v390_v8 = vpack.c.bf16 %v389_v3, %v389_v3  ;;  %v762_v9 = vrot.slane %v757_v4, %v1313_v25 }
  0x94   : > { %1067 = vmatprep.mubr.msk.bf16.mxu1 %vm1197_vm0, %v1196_v5  ;;  %v462_v14 = vrot.slane %v457_v10, %v1313_v25 }
  0x95   : > { %v763_v13 = vmul.f32 %v762_v9, %v603_v41 }
  0x96   : > { %1066 = vmatpush3.bf16.msra.mxu1 %v1177_v50  ;;  %v463_v20 = vmul.f32 %v462_v14, %v244_v34  ;;  %v835_v22 = vpop.permute.xlu0 %834 }
  0x97   : > { %1071 = vmatprep.subr.bf16.mxu1 %v1196_v5  ;;  %v764_v18 = vpack.c.bf16 %v763_v13, %v763_v13  ;;  %v840_v26 = vrot.slane %v835_v22, %v1313_v25 }
  0x98   : > { %v464_v23 = vpack.c.bf16 %v463_v20, %v463_v20 }
  0x99   : > { %1100 = vmatmul.mubr.msk.bf16.vlgmr.msra.gmra.mrb[0].mxu0 %vm275_vm1, %v616_v53  ;;  %v841_v19 = vmul.f32 %v840_v26, %v829_v24 }
  0x9a   : > { %1104 = vmatpush3.bf16.msra.mxu0 %v1176_v54  ;;  %1107 = vmatprep.mubr.msk.bf16.mxu0 %vm1197_vm0, %v1196_v5 }
  0x9b   : > { %1105 = vmatprep.subr.bf16.mxu0 %v1196_v5  ;;  %v842_v27 = vpack.c.bf16 %v841_v19, %v841_v19 }
  0x9d   : > { %1068 = vmatmul.mubr.msk.bf16.vlgmr.msra.gmra.mrb[0].mxu1 %vm275_vm1, %v236_v59 }
  0x9e   : > { %1106 = vmatpush3.bf16.msra.mxu0 %v1178_v57  ;;  %1072 = vmatpush3.bf16.msra.mxu1 %v1179_v58 }
  0x9f   : > { %1111 = vmatprep.subr.bf16.mxu0 %v1196_v5  ;;  %1073 = vmatprep.subr.bf16.mxu1 %v1196_v5 }
  0xa0   : > { %1075 = vmatprep.mubr.msk.bf16.mxu1 %vm1197_vm0, %v1196_v5 }
  0xa2   : > { %1074 = vmatpush3.bf16.msra.mxu1 %v1181_v62 }
  0xa3   : > { %1079 = vmatprep.subr.bf16.mxu1 %v1196_v5 }
  0xa5   : > { %1108 = vmatmul.mubr.msk.bf16.vlgmr.msra.gmra.mrb[0].mxu0 %vm275_vm1, %v690_v2 }
  0xa6   : > { %1112 = vmatpush3.bf16.msra.mxu0 %v1180_v1  ;;  %1115 = vmatprep.mubr.msk.bf16.mxu0 %vm1197_vm0, %v1196_v5 }
  0xa7   : > { %1113 = vmatprep.subr.bf16.mxu0 %v1196_v5 }
  0xa9   : > { %1076 = vmatmul.mubr.msk.bf16.vlgmr.msra.gmra.mrb[0].mxu1 %vm275_vm1, %v390_v8 }
  0xaa   : > { %1114 = vmatpush3.bf16.msra.mxu0 %v1182_v6  ;;  %1080 = vmatpush3.bf16.msra.mxu1 %v1183_v7 }
  0xab   : > { %1119 = vmatprep.subr.bf16.mxu0 %v1196_v5  ;;  %1081 = vmatprep.subr.bf16.mxu1 %v1196_v5 }
  0xac   : > { %1083 = vmatprep.mubr.msk.bf16.mxu1 %vm1197_vm0, %v1196_v5 }
  0xae   : > { %1082 = vmatpush3.bf16.msra.mxu1 %v1185_v12 }
  0xb1   : > { %1116 = vmatmul.mubr.msk.bf16.vlgmr.msra.gmra.mrb[0].mxu0 %vm275_vm1, %v764_v18 }
  0xb2   : > { %1120 = vmatpush3.bf16.msra.mxu0 %v1184_v17  ;;  %1123 = vmatprep.mubr.msk.bf16.mxu0 %vm1197_vm0, %v1196_v5 }
  0xb3   : > { %1121 = vmatprep.subr.bf16.mxu0 %v1196_v5 }
  0xb5   : > { %1084 = vmatmul.mubr.msk.bf16.vlgmr.msra.gmra.mrb[0].mxu1 %vm275_vm1, %v464_v23 }
  0xb6   : > { %1122 = vmatpush3.bf16.msra.mxu0 %v1186_v15 }
  0xbd   : > { %1124 = vmatmul.mubr.msk.bf16.vlgmr.msra.gmra.mrb[0].mxu0 %vm275_vm1, %v842_v27 }
 0x188   : > { %v519_v28 = vpop.f32.mrb[0].mxu1 }
 0x189   : > { %v1085_v29 = vpop.f32.mrb[1].mxu1 }
 0x18a   : > { %v522_v30 = vpop.f32.mrb[2].mxu1 }
 0x18b   : > { %v1086_v31 = vpop.f32.mrb[3].mxu1 }
 0x190   : > { %v897_v32 = vpop.f32.mrb[0].mxu0 }
 0x191   : > { %v1127_v25 = vadd.f32 %v897_v32, %v519_v28  ;;  %v1125_v33 = vpop.f32.mrb[1].mxu0 }
 0x192   : > { %v900_v5 = vpop.f32.mrb[2].mxu0 }
 0x193   : > { %905 = vst.msk [vmem:[%s217_s13] sm:$0x1] %vm904_vm2, %v1127_v25  ;;  %v1126_v34 = vpop.f32.mrb[3].mxu0 }
 0x194 PF: > { %s15_s18 = sadd.s32 1, %s1193_s18  }
 0x195   : > { %p12_p4 = scmp.ge.s32.totalorder %s15_s18, 4  }
 0x197   :  { %14 = sbr.rel (!%p12_p4) target bundleno = 1 (0x1), region = 86 }

// kernel: densenet_forward.47
= control target key start
LH: loop header
LB: loop body
LE: loop exit
PB: predicated region body
PF: predicated region fallthrough
CT: control target
= control target key end

     0   :  { %v123_v0 = vmov 0.0   ;;  %vm53_vm0 = vcmask 1043456   ;;  %vm124_vm1 = vmmov 0   ;;  %vm49_vm2 = vcmask 195584   ;;  %s168_s3 = inlined_call_operand.vmem [shape: bf16[24,32], index: 3, kind: input, shape index: {}]   ;;  %s169_s0 = inlined_call_operand.vmem [shape: f32[2,24], index: 0, kind: input, shape index: {}]   ;;  %s170_s1 = inlined_call_operand.vmem [shape: f32[1,24], index: 1, kind: input, shape index: {}]   ;;  %s171_s2 = inlined_call_operand.vmem [shape: f32[1,24], index: 2, kind: input, shape index: {}]   ;;  %s172_s4 = inlined_call_operand.vmem [shape: f32[2,32], index: 4, kind: output, shape index: {}]  }
   0x1   :  { %111 = vmatprep.subr.bf16.mxu0 %v123_v0  ;;  %v121_v1 = vld [vmem:[%s168_s3] sm:$0xff]   ;;  %115 = vmatprep.mubr.msk.bf16.mxu0 %vm124_vm1, %v123_v0  ;;  %v122_v2 = vld [vmem:[%s168_s3 + $0x8] ss:$0 sps:$4 sm:$0xff]   ;;  %vm97_vm3 = vcmask 254976  }
   0x2   :  { %v18_v3 = vld [vmem:[%s169_s0] sm:$0x3]  ;;  %112 = vmatpush3.bf16.msra.mxu0 %v121_v1  ;;  %v55_v6 = vsel %vm53_vm0, %v122_v2, 0 }
   0x3   :  { %v103_v4 = vld [vmem:[%s170_s1] ss:$0 sm:$0xff]  ;;  %113 = vmatprep.subr.bf16.mxu0 %v123_v0 }
   0x4   :  { %v104_v5 = vld [vmem:[%s171_s2] ss:$0 sm:$0xff]  ;;  %v26_v7 = vmul.f32 %v103_v4, %v18_v3 }
   0x6   :  { %v34_v8 = vadd.f32 %v104_v5, %v26_v7  ;;  %114 = vmatpush3.bf16.msra.mxu0 %v55_v6 }
   0x8   :  { %v35_v9 = vmax.f32 %v34_v8, 0.0 }
   0xa   :  { %v36_v10 = vpack.c.bf16 %v35_v9, %v35_v9 }
   0xc   :  { %116 = vmatmul.mubr.msk.bf16.vlgmr.msra.gmra.mrb[0].mxu0 %vm49_vm2, %v36_v10 }
  0xdf   :  { %v91_v11 = vpop.f32.mrb[0].mxu0 }
  0xe0   :  { %98 = vst.msk [vmem:[%s172_s4] sm:$0x3] %vm97_vm3, %v91_v11  ;;  %v117_v12 = vpop.f32.mrb[1].mxu0 }
  0xe1   :  { %v94_v13 = vpop.f32.mrb[2].mxu0 }
  0xe2   :  { %v118_v14 = vpop.f32.mrb[3].mxu0 }

// kernel: densenet_forward.49
= control target key start
LH: loop header
LB: loop body
LE: loop exit
PB: predicated region body
PF: predicated region fallthrough
CT: control target
= control target key end

     0   :  { %v36_v3 = vlaneseq  ;;  %v189_v4 = vmov 0.0|0.0   ;;  %vm190_vm0 = vmmov 0   ;;  %v191_v7 = vmov 0.0   ;;  %s247_s0 = inlined_call_operand.vmem [shape: f32[2,1,32], index: 0, kind: input, shape index: {}]   ;;  %s248_s1 = inlined_call_operand.vmem [shape: f32[32,10], index: 1, kind: input, shape index: {}]   ;;  %s249_s2 = inlined_call_operand.vmem [shape: f32[1,10], index: 2, kind: input, shape index: {}]   ;;  %s250_s3 = inlined_call_operand.hbm [shape: f32[2,10], index: 3, kind: output, shape index: {}]  }
   0x1   :  { %v19_v0 = vld [vmem:[%s248_s1] sm:$0xff]  ;;  %v20_v1 = vld [vmem:[%s248_s1 + $0x8] sm:$0xff]  ;;  %v21_v2 = vld [vmem:[%s248_s1 + $0x10] sm:$0xff]  ;;  %154 = vmatprep.subr.bf16.mxu0 %v189_v4  ;;  %151 = vmatprep.mubr.msk.f32.mxu0 %vm190_vm0, %v191_v7  ;;  %v192_v11 = vmov 1966171168  }
   0x2   :  { %v155_v5 = vpack.c.bf16 %v20_v1, %v19_v0  ;;  %v22_v6 = vld [vmem:[%s248_s1 + $0x18] sm:$0xff]  ;;  %v15_v8 = vld [vmem:[%s247_s0] sm:$0x1]  ;;  %v16_v9 = vld [vmem:[%s247_s0 + $0x1] sm:$0x1]  ;;  %v34_v12 = vunpack.c.l.s4 %v192_v11  ;;  %v37_v13 = vshrl.u32 %v36_v3, 7 }
   0x3   :  { %v158_v10 = vpack.c.bf16 %v22_v6, %v21_v2 }
   0x4   :  { %156 = vmatpush3.bf16.msra.mxu0 %v155_v5 }
   0x5   :  { %8 = vsyncpa [#allocation3], 0  ;;  %157 = vmatprep.subr.bf16.mxu0 %v189_v4  ;;  %v32_v14 = vcombine.low %v15_v8, %v16_v9  ;;  %v35_v15 = vunpack.c.0.s8 %v34_v12  ;;  %vm47_vm1 = vcmask 261120   ;;  %v136_v19 = vld [vmem:[%s249_s2] ss:$0 sm:$0xff]  ;;  %s193_s0 = smov [#allocation2]  }
   0x6   :  { %s128_s25 = sshll.u32 %s193_s0, 4  ;;  %vm120_vm2 = vcmask 74752   ;;  %s129_s25 = int_to_ptr.vmem [resolvable:$true] %s128_s25 }
   0x7   :  { %v38_v16 = vsub.s32 %v35_v15, %v37_v13  ;;  %s165_s26 = scalar_lea.vmem %s129_s25, 32  ;;  %p170_p1 = scmp.lt.s32.totalorder %s129_s25, %s129_s25 }
   0x8   :  { %159 = vmatpush3.bf16.msra.mxu0 %v158_v10  ;;  %p166_p0 = scmp.ne.s32.totalorder %s129_s25, %s165_s26  ;;  %p171_p2 = scmp.lt.s32.totalorder %s165_s26, %s165_s26 }
   0x9   :  { %v39_v17 = vrot.slane %v32_v14, %v38_v16 }
   0xa   :  { %p172_p3 = por %p171_p2, %p170_p1 }
   0xb   :  { %v46_v18 = vrot.slane %v39_v17, %v38_v16 }
   0xc   :  { %p173_p4 = pnand %p172_p3, %p166_p0 }
   0xd   :  { %152 = vmatmul.mubr.msk.f32.vlgmr.msra.gmra.mrb[0].mxu0 %vm47_vm1, %v46_v18 }
  0xe0   :  { %v116_v20 = vpop.f32.mrb[0].mxu0 }
  0xe1   :  { %v117_v21 = vadd.f32 %v136_v19, %v116_v20  ;;  %v153_v22 = vpop.f32.mrb[1].mxu0 }
  0xe3   :  { %121 = vst.msk [vmem:[#allocation2] sm:$0x3] %vm120_vm2, %v117_v21 }
  0xe4   :  { %176 = shalt.err (!%p173_p4)
}
  0xe5   :  { %s177_s29 = scalar_lea.hbm %s250_s3, 32 }
  0xe6   :  { %p178_p5 = scmp.ne.s32.totalorder %s250_s3, %s177_s29  ;;  %p181_p6 = scmp.lt.u32.totalorder %s177_s29, %s250_s3 }
  0xe8   :  { %p183_p7 = pnand %p181_p6, %p178_p5 }
  0xea   :  { %186 = shalt.err (!%p183_p7)
}
  0xeb   :  { %131 = dma.vmem_to_hbm [thread:$0]  %s129_s25, 32, %s250_s3, [#allocation3]  }
  0xec   :  { %187 = dma.done.wait [#allocation3], 32  }
  0xed   :  { %188 = vsyncadd [#allocation3], 4294967264 }
  0xee   :  { %135 = vsyncpa [#allocation3], 1 }

</bundles_post_ra>
